<compile_context>
chip_gen: v7x
topology: tpu7x:2x2x1
jax: 0.10.0
libtpu: 0.0.40
codegen_flags: <defaults>
</compile_context>

<pallas_src>
import functools
import math

import jax
import jax.numpy as jnp
from jax.experimental import pallas as pl
from jax.experimental.pallas import tpu as pltpu

F32 = jnp.float32


# ----------------------------------------------------------------------------
# small helpers (used inside kernels)
# ----------------------------------------------------------------------------
def _vmem():
    return pl.BlockSpec(memory_space=pltpu.MemorySpace.VMEM)


def _vmem_specs(n):
    return [_vmem() for _ in range(n)]


def _gelu_tanh(x):  # GELU(approximate='tanh')
    return 0.5 * x * (1.0 + jnp.tanh(0.7978845608028654 * (x + 0.044715 * x * x * x)))


def _silu(x):
    return x * (1.0 / (1.0 + jnp.exp(-x)))


def _layernorm(x, g, b, eps=1e-5):
    mu = jnp.mean(x, axis=-1, keepdims=True)
    xc = x - mu
    var = jnp.mean(xc * xc, axis=-1, keepdims=True)
    return xc * jax.lax.rsqrt(var + eps) * g + b


def _softmax_lastdim(s):
    s = s - jnp.max(s, axis=-1, keepdims=True)
    p = jnp.exp(s)
    return p * pl.reciprocal(jnp.sum(p, axis=-1, keepdims=True), approx=True)


def _mha_core(q, k, v, wo, bo, G, N, nh, hd, scale):
    """Multi-head attention over flat tokens (G*N, H), rows g-major; attention is over
    the N axis independently per group g. Output projection is accumulated per head
    (equivalent to concat(heads) @ wo) to avoid in-kernel concatenation."""
    acc = None
    for h in range(nh):
        lo, hi = h * hd, (h + 1) * hd
        qh = q[:, lo:hi].reshape(G, N, hd) * scale
        kh = k[:, lo:hi].reshape(G, N, hd)
        vh = v[:, lo:hi].reshape(G, N, hd)
        s = jnp.einsum('gnd,gmd->gnm', qh, kh, preferred_element_type=F32)
        p = _softmax_lastdim(s)
        oh = jnp.einsum('gnm,gmd->gnd', p, vh, preferred_element_type=F32)
        part = jnp.dot(oh.reshape(G * N, hd), wo[lo:hi, :], preferred_element_type=F32)
        acc = part if acc is None else acc + part
    return acc + bo


# ----------------------------------------------------------------------------
# fused kernels
# ----------------------------------------------------------------------------
def _encoder_layer_kernel(src_ref, pe_ref,
                          wqk_ref, bqk_ref, wv_ref, bv_ref, wo_ref, bo_ref,
                          ln1g_ref, ln1b_ref, w1_ref, b1_ref, w2_ref, b2_ref,
                          ln2g_ref, ln2b_ref,
                          y_ref, ymean_ref, *, B, S, H, nh):
    hd = H // nh
    src = src_ref[...]                                         # (B*S, H), b-major rows
    xqk = src + pe_ref[...]                                    # q = k = src + pos
    qk = jnp.dot(xqk, wqk_ref[...], preferred_element_type=F32) + bqk_ref[...]
    v = jnp.dot(src, wv_ref[...], preferred_element_type=F32) + bv_ref[...]
    attn = _mha_core(qk[:, :H], qk[:, H:], v, wo_ref[...], bo_ref[...],
                     B, S, nh, hd, 1.0 / math.sqrt(hd))
    x = _layernorm(src + attn, ln1g_ref[...], ln1b_ref[...])
    h1 = _gelu_tanh(jnp.dot(x, w1_ref[...], preferred_element_type=F32) + b1_ref[...])
    h2 = jnp.dot(h1, w2_ref[...], preferred_element_type=F32) + b2_ref[...]
    y = _layernorm(x + h2, ln2g_ref[...], ln2b_ref[...])
    y_ref[...] = y
    ymean_ref[...] = jnp.mean(y.reshape(B, S, H), axis=1)      # token mean for adaLN cond


def _decoder_layer_kernel(x_ref, temb_ref, cmean_ref,
                          wqkv_ref, bqkv_ref, wo_ref, bo_ref,
                          ln1g_ref, ln1b_ref, ln2g_ref, ln2b_ref,
                          wmod_ref, bmod_ref, w1_ref, b1_ref, w2_ref, b2_ref,
                          y_ref, *, L, B, H, nh):
    hd = H // nh
    M = L * B

    def rows(vec):  # (B, H) -> (L*B, H), matching l-major token rows
        return jnp.broadcast_to(vec[None], (L, B, H)).reshape(M, H)

    x = x_ref[...]                                             # (L*B, H), l-major rows
    cond = cmean_ref[...] + temb_ref[...]                      # (B, H)
    c = _silu(cond)
    # fused adaLN projections: [am1_sc | am1_sh | am2_sc | mm1_sc | mm1_sh | mm2_sc]
    mods = jnp.dot(c, wmod_ref[...], preferred_element_type=F32) + bmod_ref[...]
    sc1, sh1 = rows(mods[:, 0:H]), rows(mods[:, H:2 * H])
    sc2 = rows(mods[:, 2 * H:3 * H])
    sc3, sh3 = rows(mods[:, 3 * H:4 * H]), rows(mods[:, 4 * H:5 * H])
    sc4 = rows(mods[:, 5 * H:6 * H])

    # --- self-attention branch: reference permutes (1,0,2), so attention runs over the
    #     batch axis B independently per action token l ---
    x2 = _layernorm(x, ln1g_ref[...], ln1b_ref[...]) * sc1 + sh1
    qkv = jnp.dot(x2, wqkv_ref[...], preferred_element_type=F32) + bqkv_ref[...]
    attn = _mha_core(qkv[:, 0:H], qkv[:, H:2 * H], qkv[:, 2 * H:3 * H],
                     wo_ref[...], bo_ref[...], L, B, nh, hd, 1.0 / math.sqrt(hd))
    x = attn * sc2 + x

    # (dead cross-attention / norm3 from the reference skipped here)

    # --- MLP branch ---
    x2 = _layernorm(x, ln2g_ref[...], ln2b_ref[...]) * sc3 + sh3
    h1 = _gelu_tanh(jnp.dot(x2, w1_ref[...], preferred_element_type=F32) + b1_ref[...])
    h2 = jnp.dot(h1, w2_ref[...], preferred_element_type=F32) + b2_ref[...]
    y_ref[...] = x + h2 * sc4


def _final_layer_kernel(x_ref, temb_ref, cmean_ref, adaw_ref, adab_ref,
                        linw_ref, linb_ref, y_ref, *, L, B, H, A):
    M = L * B

    def rows(vec):
        return jnp.broadcast_to(vec[None], (L, B, H)).reshape(M, H)

    cond = cmean_ref[...] + temb_ref[...]
    ada = jnp.dot(_silu(cond), adaw_ref[...], preferred_element_type=F32) + adab_ref[...]
    shift, scale = rows(ada[:, 0:H]), rows(ada[:, H:2 * H])
    x = x_ref[...] * scale + shift
    # NOTE: norm_final exists in the reference module but is not applied in forward.
    y = jnp.dot(x, linw_ref[...], preferred_element_type=F32) + linb_ref[...]
    y_ref[...] = y.reshape(L, B, A)


def _prep_kernel(time_ref, tw_ref, t1w_ref, t1b_ref, t2w_ref, t2b_ref,
                 na_ref, p1w_ref, p1b_ref, p2w_ref, p2b_ref, dpos_ref,
                 temb_ref, dec_ref, *, L, B, H, half):
    # --- sinusoidal time embedding + 2-layer MLP (concat(cos,sin) folded into a
    #     split-row matmul to avoid in-kernel concatenation) ---
    ang = time_ref[...] * tw_ref[...]                          # (B, half)
    t1w = t1w_ref[...]                                         # (2*half, H)
    h = (jnp.dot(jnp.cos(ang), t1w[0:half, :], preferred_element_type=F32)
         + jnp.dot(jnp.sin(ang), t1w[half:2 * half, :], preferred_element_type=F32)
         + t1b_ref[...])
    h = _silu(h)
    temb_ref[...] = jnp.dot(h, t2w_ref[...], preferred_element_type=F32) + t2b_ref[...]

    # --- action projection MLP + decoder positional embedding ---
    a = _gelu_tanh(jnp.dot(na_ref[...], p1w_ref[...], preferred_element_type=F32)
                   + p1b_ref[...])
    a = jnp.dot(a, p2w_ref[...], preferred_element_type=F32) + p2b_ref[...]  # (L*B, H)
    dpos = jnp.broadcast_to(dpos_ref[...][:, None, :], (L, B, H)).reshape(L * B, H)
    dec_ref[...] = a + dpos


# ----------------------------------------------------------------------------
# wrappers (one pallas_call per fused kernel)
# ----------------------------------------------------------------------------
def encoder_layer(src_flat, pe_flat, p, B, S, H, nh):
    kern = functools.partial(_encoder_layer_kernel, B=B, S=S, H=H, nh=nh)
    return pl.pallas_call(
        kern,
        out_shape=(jax.ShapeDtypeStruct((B * S, H), F32),
                   jax.ShapeDtypeStruct((B, H), F32)),
        in_specs=_vmem_specs(16),
        out_specs=(_vmem(), _vmem()),
    )(src_flat, pe_flat, p["wqk"], p["bqk"], p["wv"], p["bv"], p["wo"], p["bo"],
      p["ln1_g"], p["ln1_b"], p["w1"], p["b1"], p["w2"], p["b2"],
      p["ln2_g"], p["ln2_b"])


def decoder_layer(x_flat, temb, cmean, p, L, B, H, nh):
    kern = functools.partial(_decoder_layer_kernel, L=L, B=B, H=H, nh=nh)
    return pl.pallas_call(
        kern,
        out_shape=jax.ShapeDtypeStruct((L * B, H), F32),
        in_specs=_vmem_specs(17),
        out_specs=_vmem(),
    )(x_flat, temb, cmean, p["wqkv"], p["bqkv"], p["wo"], p["bo"],
      p["ln1_g"], p["ln1_b"], p["ln2_g"], p["ln2_b"],
      p["wmod"], p["bmod"], p["w1"], p["b1"], p["w2"], p["b2"])


def final_layer(x_flat, temb, cmean, p, L, B, H, A):
    kern = functools.partial(_final_layer_kernel, L=L, B=B, H=H, A=A)
    return pl.pallas_call(
        kern,
        out_shape=jax.ShapeDtypeStruct((L, B, A), F32),
        in_specs=_vmem_specs(7),
        out_specs=_vmem(),
    )(x_flat, temb, cmean, p["ada_w"], p["ada_b"], p["lin_w"], p["lin_b"])


def prep(params, time, na_flat, L, B, H, half):
    kern = functools.partial(_prep_kernel, L=L, B=B, H=H, half=half)
    return pl.pallas_call(
        kern,
        out_shape=(jax.ShapeDtypeStruct((B, H), F32),
                   jax.ShapeDtypeStruct((L * B, H), F32)),
        in_specs=_vmem_specs(12),
        out_specs=(_vmem(), _vmem()),
    )(time.reshape(B, 1), params["time_w"], params["t1_w"], params["t1_b"],
      params["t2_w"], params["t2_b"],
      na_flat, params["p1_w"], params["p1_b"], params["p2_w"], params["p2_b"],
      params["dec_pos"])


# ----------------------------------------------------------------------------
# model forward (glue reshapes/transposes in plain JAX on tiny tensors)
# ----------------------------------------------------------------------------
def make_pos_encoding(S, H):
    pos = jnp.arange(S, dtype=F32)[:, None]
    div = jnp.exp(jnp.arange(0, H, 2, dtype=F32) * (-math.log(10000.0) / H))
    pe = jnp.zeros((S, H), F32)
    pe = pe.at[:, 0::2].set(jnp.sin(pos * div))
    pe = pe.at[:, 1::2].set(jnp.cos(pos * div))
    return pe


def dit_forward(params, noise_actions, time, obs_enc, cfg):
    H, nh = cfg["hidden"], cfg["nhead"]
    B, S, _ = obs_enc.shape
    _, L, A = noise_actions.shape
    half = cfg["time_dim"] // 2

    # ---- encoder (forward_enc): internal layout (B*S, H), b-major rows ----
    pe_flat = jnp.tile(make_pos_encoding(S, H), (B, 1))        # (B*S, H)
    x = obs_enc.reshape(B * S, H)
    enc_flat, enc_means = [], []
    for lp in params["enc_layers"]:
        x, m = encoder_layer(x, pe_flat, lp, B, S, H, nh)
        enc_flat.append(x)
        enc_means.append(m)

    # ---- fused time-embedding + action-projection preamble ----
    na_flat = jnp.transpose(noise_actions, (1, 0, 2)).reshape(L * B, A)  # l-major rows
    temb, dec_x = prep(params, time, na_flat, L, B, H, half)

    # ---- decoder (one fused kernel per layer; cond mean comes from encoder kernels) ----
    for lp, cm in zip(params["dec_layers"], enc_means):
        dec_x = decoder_layer(dec_x, temb, cm, lp, L, B, H, nh)

    # ---- final layer (reuses the last encoder token-mean, no re-reduction) ----
    y = final_layer(dec_x, temb, enc_means[-1], params["final"], L, B, H, A)  # (L, B, A)
    out = jnp.transpose(y, (1, 0, 2))                                          # (B, L, A)

    # enc_cache returned in the reference (seq-first) layout (S, B, H)
    enc_cache = [jnp.transpose(e.reshape(B, S, H), (1, 0, 2)) for e in enc_flat]
    return enc_cache, out


# ----------------------------------------------------------------------------
# parameter init (deterministic, synthetic; the reference's zero-inits are replaced
# by small random values so the kernels are actually exercised)
# ----------------------------------------------------------------------------
def init_params(key, cfg):
    H, FF, A, T, L, nb = (cfg["hidden"], cfg["ff"], cfg["ac_dim"],
                          cfg["time_dim"], cfg["ac_chunk"], cfg["num_blocks"])
    keys = iter(jax.random.split(key, 256))

    def w(shape, s=0.02):
        return s * jax.random.normal(next(keys), shape, dtype=F32)

    def enc_layer():
        return dict(
            wqk=w((H, 2 * H)), bqk=w((1, 2 * H)), wv=w((H, H)), bv=w((1, H)),
            wo=w((H, H)), bo=w((1, H)),
            ln1_g=jnp.ones((1, H), F32), ln1_b=jnp.zeros((1, H), F32),
            ln2_g=jnp.ones((1, H), F32), ln2_b=jnp.zeros((1, H), F32),
            w1=w((H, FF)), b1=w((1, FF)), w2=w((FF, H)), b2=w((1, H)))

    def dec_layer():
        return dict(
            wqkv=w((H, 3 * H)), bqkv=w((1, 3 * H)), wo=w((H, H)), bo=w((1, H)),
            ln1_g=jnp.ones((1, H), F32), ln1_b=jnp.zeros((1, H), F32),
            ln2_g=jnp.ones((1, H), F32), ln2_b=jnp.zeros((1, H), F32),
            # fused adaLN: [am1_sc | am1_sh | am2_sc | mm1_sc | mm1_sh | mm2_sc]
            wmod=w((H, 6 * H)), bmod=w((1, 6 * H)),
            w1=w((H, FF)), b1=w((1, FF)), w2=w((FF, H)), b2=w((1, H)))

    half = T // 2
    return dict(
        enc_layers=[enc_layer() for _ in range(nb)],
        dec_layers=[dec_layer() for _ in range(nb)],
        final=dict(ada_w=w((H, 2 * H)), ada_b=w((1, 2 * H)),
                   lin_w=w((H, A)), lin_b=w((1, A))),
        time_w=jnp.exp(jnp.arange(half, dtype=F32)
                       * (-math.log(10000.0) / (half - 1)))[None],   # (1, half)
        t1_w=w((T, H)), t1_b=w((1, H)), t2_w=w((H, H)), t2_b=w((1, H)),
        p1_w=w((A, A)), p1_b=w((1, A)), p2_w=w((A, H)), p2_b=w((1, H)),
        dec_pos=w((L, H)),
    )


# ----------------------------------------------------------------------------
if __name__ == "__main__":
    cfg = dict(ac_dim=8, ac_chunk=8, time_dim=32, hidden=128,
               num_blocks=2, ff=256, nhead=4)
    B, S_OBS = 2, 8

    root = jax.random.PRNGKey(0)
    kp, k1, k2, k3 = jax.random.split(root, 4)
    params = init_params(kp, cfg)

    noise_actions = jax.random.normal(k1, (B, cfg["ac_chunk"], cfg["ac_dim"]), F32)
    time = jax.random.uniform(k2, (B,), F32, 0.0, 100.0)
    obs_enc = jax.random.normal(k3, (B, S_OBS, cfg["hidden"]), F32)

    fwd = jax.jit(functools.partial(dit_forward, cfg=cfg))
    enc_cache, eps = fwd(params, noise_actions, time, obs_enc)
    eps = jax.block_until_ready(eps)
    enc_cache = jax.block_until_ready(enc_cache)

    assert eps.shape == (B, cfg["ac_chunk"], cfg["ac_dim"]), eps.shape
    assert len(enc_cache) == cfg["num_blocks"]
    assert enc_cache[0].shape == (S_OBS, B, cfg["hidden"])
    assert bool(jnp.all(jnp.isfinite(eps)))
    print("KERNEL_OK")
</pallas_src>

<mosaic_0001>
module attributes {stable_mosaic.version = 11 : i64} {
  func.func @_encoder_layer_kernel(%arg0: memref<16x128xf32, #tpu.memory_space<vmem>>, %arg1: memref<16x128xf32, #tpu.memory_space<vmem>>, %arg2: memref<128x256xf32, #tpu.memory_space<vmem>>, %arg3: memref<1x256xf32, #tpu.memory_space<vmem>>, %arg4: memref<128x128xf32, #tpu.memory_space<vmem>>, %arg5: memref<1x128xf32, #tpu.memory_space<vmem>>, %arg6: memref<128x128xf32, #tpu.memory_space<vmem>>, %arg7: memref<1x128xf32, #tpu.memory_space<vmem>>, %arg8: memref<1x128xf32, #tpu.memory_space<vmem>>, %arg9: memref<1x128xf32, #tpu.memory_space<vmem>>, %arg10: memref<128x256xf32, #tpu.memory_space<vmem>>, %arg11: memref<1x256xf32, #tpu.memory_space<vmem>>, %arg12: memref<256x128xf32, #tpu.memory_space<vmem>>, %arg13: memref<1x128xf32, #tpu.memory_space<vmem>>, %arg14: memref<1x128xf32, #tpu.memory_space<vmem>>, %arg15: memref<1x128xf32, #tpu.memory_space<vmem>>, %arg16: memref<16x128xf32, #tpu.memory_space<vmem>>, %arg17: memref<2x128xf32, #tpu.memory_space<vmem>>) attributes {dimension_semantics = [], scalar_prefetch = 0 : i64, scratch_operands = 0 : i64, tpu.core_type = #tpu.core_type<tc>} {
    %c0 = arith.constant 0 : index
    %c0_0 = arith.constant 0 : index
    %0 = vector.load %arg0[%c0, %c0_0] : memref<16x128xf32, #tpu.memory_space<vmem>>, vector<16x128xf32>
    %c0_1 = arith.constant 0 : index
    %c0_2 = arith.constant 0 : index
    %1 = vector.load %arg1[%c0_1, %c0_2] : memref<16x128xf32, #tpu.memory_space<vmem>>, vector<16x128xf32>
    %2 = arith.addf %0, %1 : vector<16x128xf32>
    %c0_3 = arith.constant 0 : index
    %c0_4 = arith.constant 0 : index
    %3 = vector.load %arg2[%c0_3, %c0_4] : memref<128x256xf32, #tpu.memory_space<vmem>>, vector<128x256xf32>
    %cst = arith.constant dense<0.000000e+00> : vector<16x256xf32>
    %4 = tpu.matmul %2, %3, %cst {dimension_numbers = #tpu.dot_dimension_numbers<[1], [0], [0], [1], [0, 0, 1, 1], [], []>} : vector<16x128xf32>, vector<128x256xf32>, vector<16x256xf32> -> vector<16x256xf32>
    %c0_5 = arith.constant 0 : index
    %c0_6 = arith.constant 0 : index
    %5 = vector.load %arg3[%c0_5, %c0_6] : memref<1x256xf32, #tpu.memory_space<vmem>>, vector<1x256xf32>
    %6 = vector.broadcast %5 : vector<1x256xf32> to vector<16x256xf32>
    %7 = arith.addf %4, %6 : vector<16x256xf32>
    %c0_7 = arith.constant 0 : index
    %c0_8 = arith.constant 0 : index
    %8 = vector.load %arg4[%c0_7, %c0_8] : memref<128x128xf32, #tpu.memory_space<vmem>>, vector<128x128xf32>
    %cst_9 = arith.constant dense<0.000000e+00> : vector<16x128xf32>
    %9 = tpu.matmul %0, %8, %cst_9 {dimension_numbers = #tpu.dot_dimension_numbers<[1], [0], [0], [1], [0, 0, 1, 1], [], []>} : vector<16x128xf32>, vector<128x128xf32>, vector<16x128xf32> -> vector<16x128xf32>
    %c0_10 = arith.constant 0 : index
    %c0_11 = arith.constant 0 : index
    %10 = vector.load %arg5[%c0_10, %c0_11] : memref<1x128xf32, #tpu.memory_space<vmem>>, vector<1x128xf32>
    %11 = vector.broadcast %10 : vector<1x128xf32> to vector<16x128xf32>
    %12 = arith.addf %9, %11 : vector<16x128xf32>
    %13 = vector.extract_strided_slice %7 {offsets = [0, 0], sizes = [16, 128], strides = [1, 1]} : vector<16x256xf32> to vector<16x128xf32>
    %14 = vector.extract_strided_slice %7 {offsets = [0, 128], sizes = [16, 128], strides = [1, 1]} : vector<16x256xf32> to vector<16x128xf32>
    %c0_12 = arith.constant 0 : index
    %c0_13 = arith.constant 0 : index
    %15 = vector.load %arg6[%c0_12, %c0_13] : memref<128x128xf32, #tpu.memory_space<vmem>>, vector<128x128xf32>
    %c0_14 = arith.constant 0 : index
    %c0_15 = arith.constant 0 : index
    %16 = vector.load %arg7[%c0_14, %c0_15] : memref<1x128xf32, #tpu.memory_space<vmem>>, vector<1x128xf32>
    %17 = vector.extract_strided_slice %13 {offsets = [0, 0], sizes = [16, 32], strides = [1, 1]} : vector<16x128xf32> to vector<16x32xf32>
    %18 = vector.shape_cast %17 : vector<16x32xf32> to vector<2x8x32xf32>
    %cst_16 = arith.constant 0.176776692 : f32
    %19 = vector.broadcast %cst_16 : f32 to vector<2x8x32xf32>
    %20 = arith.mulf %18, %19 : vector<2x8x32xf32>
    %21 = vector.extract_strided_slice %14 {offsets = [0, 0], sizes = [16, 32], strides = [1, 1]} : vector<16x128xf32> to vector<16x32xf32>
    %22 = vector.shape_cast %21 : vector<16x32xf32> to vector<2x8x32xf32>
    %23 = vector.extract_strided_slice %12 {offsets = [0, 0], sizes = [16, 32], strides = [1, 1]} : vector<16x128xf32> to vector<16x32xf32>
    %24 = vector.shape_cast %23 : vector<16x32xf32> to vector<2x8x32xf32>
    "tpu.trace_start"() <{level = 10 : i32, message = "gnd,gmd->gnm"}> : () -> ()
    %cst_17 = arith.constant dense<0.000000e+00> : vector<2x8x8xf32>
    %25 = tpu.matmul %20, %22, %cst_17 {dimension_numbers = #tpu.dot_dimension_numbers<[2], [2], [1], [1], [0, 0, 0, 1, 1, 1], [0], [0]>} : vector<2x8x32xf32>, vector<2x8x32xf32>, vector<2x8x8xf32> -> vector<2x8x8xf32>
    "tpu.trace_stop"() : () -> ()
    %cst_18 = arith.constant dense<0xFF800000> : vector<2x8xf32>
    %26 = vector.multi_reduction <maximumf>, %25, %cst_18 [2] : vector<2x8x8xf32> to vector<2x8xf32>
    %27 = vector.shape_cast %26 : vector<2x8xf32> to vector<2x8x1xf32>
    %28 = vector.broadcast %27 : vector<2x8x1xf32> to vector<2x8x8xf32>
    %29 = arith.subf %25, %28 : vector<2x8x8xf32>
    %30 = math.exp %29 : vector<2x8x8xf32>
    %cst_19 = arith.constant dense<0.000000e+00> : vector<2x8xf32>
    %31 = vector.multi_reduction <add>, %30, %cst_19 [2] : vector<2x8x8xf32> to vector<2x8xf32>
    %32 = vector.shape_cast %31 : vector<2x8xf32> to vector<2x8x1xf32>
    %33 = tpu.reciprocal %32 {approx = true} : vector<2x8x1xf32> -> vector<2x8x1xf32>
    %34 = vector.broadcast %33 : vector<2x8x1xf32> to vector<2x8x8xf32>
    %35 = arith.mulf %30, %34 : vector<2x8x8xf32>
    "tpu.trace_start"() <{level = 10 : i32, message = "gnm,gmd->gnd"}> : () -> ()
    %cst_20 = arith.constant dense<0.000000e+00> : vector<2x8x32xf32>
    %36 = tpu.matmul %35, %24, %cst_20 {dimension_numbers = #tpu.dot_dimension_numbers<[2], [1], [1], [2], [0, 0, 0, 1, 1, 2], [0], [0]>} : vector<2x8x8xf32>, vector<2x8x32xf32>, vector<2x8x32xf32> -> vector<2x8x32xf32>
    "tpu.trace_stop"() : () -> ()
    %37 = vector.shape_cast %36 : vector<2x8x32xf32> to vector<16x32xf32>
    %38 = vector.extract_strided_slice %15 {offsets = [0, 0], sizes = [32, 128], strides = [1, 1]} : vector<128x128xf32> to vector<32x128xf32>
    %cst_21 = arith.constant dense<0.000000e+00> : vector<16x128xf32>
    %39 = tpu.matmul %37, %38, %cst_21 {dimension_numbers = #tpu.dot_dimension_numbers<[1], [0], [0], [1], [0, 0, 1, 1], [], []>} : vector<16x32xf32>, vector<32x128xf32>, vector<16x128xf32> -> vector<16x128xf32>
    %40 = vector.extract_strided_slice %13 {offsets = [0, 32], sizes = [16, 32], strides = [1, 1]} : vector<16x128xf32> to vector<16x32xf32>
    %41 = vector.shape_cast %40 : vector<16x32xf32> to vector<2x8x32xf32>
    %cst_22 = arith.constant 0.176776692 : f32
    %42 = vector.broadcast %cst_22 : f32 to vector<2x8x32xf32>
    %43 = arith.mulf %41, %42 : vector<2x8x32xf32>
    %44 = vector.extract_strided_slice %14 {offsets = [0, 32], sizes = [16, 32], strides = [1, 1]} : vector<16x128xf32> to vector<16x32xf32>
    %45 = vector.shape_cast %44 : vector<16x32xf32> to vector<2x8x32xf32>
    %46 = vector.extract_strided_slice %12 {offsets = [0, 32], sizes = [16, 32], strides = [1, 1]} : vector<16x128xf32> to vector<16x32xf32>
    %47 = vector.shape_cast %46 : vector<16x32xf32> to vector<2x8x32xf32>
    "tpu.trace_start"() <{level = 10 : i32, message = "gnd,gmd->gnm"}> : () -> ()
    %cst_23 = arith.constant dense<0.000000e+00> : vector<2x8x8xf32>
    %48 = tpu.matmul %43, %45, %cst_23 {dimension_numbers = #tpu.dot_dimension_numbers<[2], [2], [1], [1], [0, 0, 0, 1, 1, 1], [0], [0]>} : vector<2x8x32xf32>, vector<2x8x32xf32>, vector<2x8x8xf32> -> vector<2x8x8xf32>
    "tpu.trace_stop"() : () -> ()
    %cst_24 = arith.constant dense<0xFF800000> : vector<2x8xf32>
    %49 = vector.multi_reduction <maximumf>, %48, %cst_24 [2] : vector<2x8x8xf32> to vector<2x8xf32>
    %50 = vector.shape_cast %49 : vector<2x8xf32> to vector<2x8x1xf32>
    %51 = vector.broadcast %50 : vector<2x8x1xf32> to vector<2x8x8xf32>
    %52 = arith.subf %48, %51 : vector<2x8x8xf32>
    %53 = math.exp %52 : vector<2x8x8xf32>
    %cst_25 = arith.constant dense<0.000000e+00> : vector<2x8xf32>
    %54 = vector.multi_reduction <add>, %53, %cst_25 [2] : vector<2x8x8xf32> to vector<2x8xf32>
    %55 = vector.shape_cast %54 : vector<2x8xf32> to vector<2x8x1xf32>
    %56 = tpu.reciprocal %55 {approx = true} : vector<2x8x1xf32> -> vector<2x8x1xf32>
    %57 = vector.broadcast %56 : vector<2x8x1xf32> to vector<2x8x8xf32>
    %58 = arith.mulf %53, %57 : vector<2x8x8xf32>
    "tpu.trace_start"() <{level = 10 : i32, message = "gnm,gmd->gnd"}> : () -> ()
    %cst_26 = arith.constant dense<0.000000e+00> : vector<2x8x32xf32>
    %59 = tpu.matmul %58, %47, %cst_26 {dimension_numbers = #tpu.dot_dimension_numbers<[2], [1], [1], [2], [0, 0, 0, 1, 1, 2], [0], [0]>} : vector<2x8x8xf32>, vector<2x8x32xf32>, vector<2x8x32xf32> -> vector<2x8x32xf32>
    "tpu.trace_stop"() : () -> ()
    %60 = vector.shape_cast %59 : vector<2x8x32xf32> to vector<16x32xf32>
    %61 = vector.extract_strided_slice %15 {offsets = [32, 0], sizes = [32, 128], strides = [1, 1]} : vector<128x128xf32> to vector<32x128xf32>
    %cst_27 = arith.constant dense<0.000000e+00> : vector<16x128xf32>
    %62 = tpu.matmul %60, %61, %cst_27 {dimension_numbers = #tpu.dot_dimension_numbers<[1], [0], [0], [1], [0, 0, 1, 1], [], []>} : vector<16x32xf32>, vector<32x128xf32>, vector<16x128xf32> -> vector<16x128xf32>
    %63 = arith.addf %39, %62 : vector<16x128xf32>
    %64 = vector.extract_strided_slice %13 {offsets = [0, 64], sizes = [16, 32], strides = [1, 1]} : vector<16x128xf32> to vector<16x32xf32>
    %65 = vector.shape_cast %64 : vector<16x32xf32> to vector<2x8x32xf32>
    %cst_28 = arith.constant 0.176776692 : f32
    %66 = vector.broadcast %cst_28 : f32 to vector<2x8x32xf32>
    %67 = arith.mulf %65, %66 : vector<2x8x32xf32>
    %68 = vector.extract_strided_slice %14 {offsets = [0, 64], sizes = [16, 32], strides = [1, 1]} : vector<16x128xf32> to vector<16x32xf32>
    %69 = vector.shape_cast %68 : vector<16x32xf32> to vector<2x8x32xf32>
    %70 = vector.extract_strided_slice %12 {offsets = [0, 64], sizes = [16, 32], strides = [1, 1]} : vector<16x128xf32> to vector<16x32xf32>
    %71 = vector.shape_cast %70 : vector<16x32xf32> to vector<2x8x32xf32>
    "tpu.trace_start"() <{level = 10 : i32, message = "gnd,gmd->gnm"}> : () -> ()
    %cst_29 = arith.constant dense<0.000000e+00> : vector<2x8x8xf32>
    %72 = tpu.matmul %67, %69, %cst_29 {dimension_numbers = #tpu.dot_dimension_numbers<[2], [2], [1], [1], [0, 0, 0, 1, 1, 1], [0], [0]>} : vector<2x8x32xf32>, vector<2x8x32xf32>, vector<2x8x8xf32> -> vector<2x8x8xf32>
    "tpu.trace_stop"() : () -> ()
    %cst_30 = arith.constant dense<0xFF800000> : vector<2x8xf32>
    %73 = vector.multi_reduction <maximumf>, %72, %cst_30 [2] : vector<2x8x8xf32> to vector<2x8xf32>
    %74 = vector.shape_cast %73 : vector<2x8xf32> to vector<2x8x1xf32>
    %75 = vector.broadcast %74 : vector<2x8x1xf32> to vector<2x8x8xf32>
    %76 = arith.subf %72, %75 : vector<2x8x8xf32>
    %77 = math.exp %76 : vector<2x8x8xf32>
    %cst_31 = arith.constant dense<0.000000e+00> : vector<2x8xf32>
    %78 = vector.multi_reduction <add>, %77, %cst_31 [2] : vector<2x8x8xf32> to vector<2x8xf32>
    %79 = vector.shape_cast %78 : vector<2x8xf32> to vector<2x8x1xf32>
    %80 = tpu.reciprocal %79 {approx = true} : vector<2x8x1xf32> -> vector<2x8x1xf32>
    %81 = vector.broadcast %80 : vector<2x8x1xf32> to vector<2x8x8xf32>
    %82 = arith.mulf %77, %81 : vector<2x8x8xf32>
    "tpu.trace_start"() <{level = 10 : i32, message = "gnm,gmd->gnd"}> : () -> ()
    %cst_32 = arith.constant dense<0.000000e+00> : vector<2x8x32xf32>
    %83 = tpu.matmul %82, %71, %cst_32 {dimension_numbers = #tpu.dot_dimension_numbers<[2], [1], [1], [2], [0, 0, 0, 1, 1, 2], [0], [0]>} : vector<2x8x8xf32>, vector<2x8x32xf32>, vector<2x8x32xf32> -> vector<2x8x32xf32>
    "tpu.trace_stop"() : () -> ()
    %84 = vector.shape_cast %83 : vector<2x8x32xf32> to vector<16x32xf32>
    %85 = vector.extract_strided_slice %15 {offsets = [64, 0], sizes = [32, 128], strides = [1, 1]} : vector<128x128xf32> to vector<32x128xf32>
    %cst_33 = arith.constant dense<0.000000e+00> : vector<16x128xf32>
    %86 = tpu.matmul %84, %85, %cst_33 {dimension_numbers = #tpu.dot_dimension_numbers<[1], [0], [0], [1], [0, 0, 1, 1], [], []>} : vector<16x32xf32>, vector<32x128xf32>, vector<16x128xf32> -> vector<16x128xf32>
    %87 = arith.addf %63, %86 : vector<16x128xf32>
    %88 = vector.extract_strided_slice %13 {offsets = [0, 96], sizes = [16, 32], strides = [1, 1]} : vector<16x128xf32> to vector<16x32xf32>
    %89 = vector.shape_cast %88 : vector<16x32xf32> to vector<2x8x32xf32>
    %cst_34 = arith.constant 0.176776692 : f32
    %90 = vector.broadcast %cst_34 : f32 to vector<2x8x32xf32>
    %91 = arith.mulf %89, %90 : vector<2x8x32xf32>
    %92 = vector.extract_strided_slice %14 {offsets = [0, 96], sizes = [16, 32], strides = [1, 1]} : vector<16x128xf32> to vector<16x32xf32>
    %93 = vector.shape_cast %92 : vector<16x32xf32> to vector<2x8x32xf32>
    %94 = vector.extract_strided_slice %12 {offsets = [0, 96], sizes = [16, 32], strides = [1, 1]} : vector<16x128xf32> to vector<16x32xf32>
    %95 = vector.shape_cast %94 : vector<16x32xf32> to vector<2x8x32xf32>
    "tpu.trace_start"() <{level = 10 : i32, message = "gnd,gmd->gnm"}> : () -> ()
    %cst_35 = arith.constant dense<0.000000e+00> : vector<2x8x8xf32>
    %96 = tpu.matmul %91, %93, %cst_35 {dimension_numbers = #tpu.dot_dimension_numbers<[2], [2], [1], [1], [0, 0, 0, 1, 1, 1], [0], [0]>} : vector<2x8x32xf32>, vector<2x8x32xf32>, vector<2x8x8xf32> -> vector<2x8x8xf32>
    "tpu.trace_stop"() : () -> ()
    %cst_36 = arith.constant dense<0xFF800000> : vector<2x8xf32>
    %97 = vector.multi_reduction <maximumf>, %96, %cst_36 [2] : vector<2x8x8xf32> to vector<2x8xf32>
    %98 = vector.shape_cast %97 : vector<2x8xf32> to vector<2x8x1xf32>
    %99 = vector.broadcast %98 : vector<2x8x1xf32> to vector<2x8x8xf32>
    %100 = arith.subf %96, %99 : vector<2x8x8xf32>
    %101 = math.exp %100 : vector<2x8x8xf32>
    %cst_37 = arith.constant dense<0.000000e+00> : vector<2x8xf32>
    %102 = vector.multi_reduction <add>, %101, %cst_37 [2] : vector<2x8x8xf32> to vector<2x8xf32>
    %103 = vector.shape_cast %102 : vector<2x8xf32> to vector<2x8x1xf32>
    %104 = tpu.reciprocal %103 {approx = true} : vector<2x8x1xf32> -> vector<2x8x1xf32>
    %105 = vector.broadcast %104 : vector<2x8x1xf32> to vector<2x8x8xf32>
    %106 = arith.mulf %101, %105 : vector<2x8x8xf32>
    "tpu.trace_start"() <{level = 10 : i32, message = "gnm,gmd->gnd"}> : () -> ()
    %cst_38 = arith.constant dense<0.000000e+00> : vector<2x8x32xf32>
    %107 = tpu.matmul %106, %95, %cst_38 {dimension_numbers = #tpu.dot_dimension_numbers<[2], [1], [1], [2], [0, 0, 0, 1, 1, 2], [0], [0]>} : vector<2x8x8xf32>, vector<2x8x32xf32>, vector<2x8x32xf32> -> vector<2x8x32xf32>
    "tpu.trace_stop"() : () -> ()
    %108 = vector.shape_cast %107 : vector<2x8x32xf32> to vector<16x32xf32>
    %109 = vector.extract_strided_slice %15 {offsets = [96, 0], sizes = [32, 128], strides = [1, 1]} : vector<128x128xf32> to vector<32x128xf32>
    %cst_39 = arith.constant dense<0.000000e+00> : vector<16x128xf32>
    %110 = tpu.matmul %108, %109, %cst_39 {dimension_numbers = #tpu.dot_dimension_numbers<[1], [0], [0], [1], [0, 0, 1, 1], [], []>} : vector<16x32xf32>, vector<32x128xf32>, vector<16x128xf32> -> vector<16x128xf32>
    %111 = arith.addf %87, %110 : vector<16x128xf32>
    %112 = vector.broadcast %16 : vector<1x128xf32> to vector<16x128xf32>
    %113 = arith.addf %111, %112 : vector<16x128xf32>
    %114 = arith.addf %0, %113 : vector<16x128xf32>
    %c0_40 = arith.constant 0 : index
    %c0_41 = arith.constant 0 : index
    %115 = vector.load %arg8[%c0_40, %c0_41] : memref<1x128xf32, #tpu.memory_space<vmem>>, vector<1x128xf32>
    %c0_42 = arith.constant 0 : index
    %c0_43 = arith.constant 0 : index
    %116 = vector.load %arg9[%c0_42, %c0_43] : memref<1x128xf32, #tpu.memory_space<vmem>>, vector<1x128xf32>
    %cst_44 = arith.constant dense<0.000000e+00> : vector<16xf32>
    %117 = vector.multi_reduction <add>, %114, %cst_44 [1] : vector<16x128xf32> to vector<16xf32>
    %118 = vector.shape_cast %117 : vector<16xf32> to vector<16x1xf32>
    %cst_45 = arith.constant 1.280000e+02 : f32
    %119 = vector.broadcast %cst_45 : f32 to vector<16x1xf32>
    %120 = arith.divf %118, %119 : vector<16x1xf32>
    %121 = vector.broadcast %120 : vector<16x1xf32> to vector<16x128xf32>
    %122 = arith.subf %114, %121 : vector<16x128xf32>
    %123 = arith.mulf %122, %122 : vector<16x128xf32>
    %cst_46 = arith.constant dense<0.000000e+00> : vector<16xf32>
    %124 = vector.multi_reduction <add>, %123, %cst_46 [1] : vector<16x128xf32> to vector<16xf32>
    %125 = vector.shape_cast %124 : vector<16xf32> to vector<16x1xf32>
    %cst_47 = arith.constant 1.280000e+02 : f32
    %126 = vector.broadcast %cst_47 : f32 to vector<16x1xf32>
    %127 = arith.divf %125, %126 : vector<16x1xf32>
    %cst_48 = arith.constant 9.99999974E-6 : f32
    %128 = vector.broadcast %cst_48 : f32 to vector<16x1xf32>
    %129 = arith.addf %127, %128 : vector<16x1xf32>
    %130 = math.rsqrt %129 : vector<16x1xf32>
    %131 = vector.broadcast %130 : vector<16x1xf32> to vector<16x128xf32>
    %132 = arith.mulf %122, %131 : vector<16x128xf32>
    %133 = vector.broadcast %115 : vector<1x128xf32> to vector<16x128xf32>
    %134 = arith.mulf %132, %133 : vector<16x128xf32>
    %135 = vector.broadcast %116 : vector<1x128xf32> to vector<16x128xf32>
    %136 = arith.addf %134, %135 : vector<16x128xf32>
    %c0_49 = arith.constant 0 : index
    %c0_50 = arith.constant 0 : index
    %137 = vector.load %arg10[%c0_49, %c0_50] : memref<128x256xf32, #tpu.memory_space<vmem>>, vector<128x256xf32>
    %cst_51 = arith.constant dense<0.000000e+00> : vector<16x256xf32>
    %138 = tpu.matmul %136, %137, %cst_51 {dimension_numbers = #tpu.dot_dimension_numbers<[1], [0], [0], [1], [0, 0, 1, 1], [], []>} : vector<16x128xf32>, vector<128x256xf32>, vector<16x256xf32> -> vector<16x256xf32>
    %c0_52 = arith.constant 0 : index
    %c0_53 = arith.constant 0 : index
    %139 = vector.load %arg11[%c0_52, %c0_53] : memref<1x256xf32, #tpu.memory_space<vmem>>, vector<1x256xf32>
    %140 = vector.broadcast %139 : vector<1x256xf32> to vector<16x256xf32>
    %141 = arith.addf %138, %140 : vector<16x256xf32>
    %cst_54 = arith.constant 5.000000e-01 : f32
    %142 = vector.broadcast %cst_54 : f32 to vector<16x256xf32>
    %143 = arith.mulf %142, %141 : vector<16x256xf32>
    %cst_55 = arith.constant 4.471500e-02 : f32
    %144 = vector.broadcast %cst_55 : f32 to vector<16x256xf32>
    %145 = arith.mulf %144, %141 : vector<16x256xf32>
    %146 = arith.mulf %145, %141 : vector<16x256xf32>
    %147 = arith.mulf %146, %141 : vector<16x256xf32>
    %148 = arith.addf %141, %147 : vector<16x256xf32>
    %cst_56 = arith.constant 0.797884583 : f32
    %149 = vector.broadcast %cst_56 : f32 to vector<16x256xf32>
    %150 = arith.mulf %149, %148 : vector<16x256xf32>
    %151 = math.tanh %150 : vector<16x256xf32>
    %cst_57 = arith.constant 1.000000e+00 : f32
    %152 = vector.broadcast %cst_57 : f32 to vector<16x256xf32>
    %153 = arith.addf %152, %151 : vector<16x256xf32>
    %154 = arith.mulf %143, %153 : vector<16x256xf32>
    %c0_58 = arith.constant 0 : index
    %c0_59 = arith.constant 0 : index
    %155 = vector.load %arg12[%c0_58, %c0_59] : memref<256x128xf32, #tpu.memory_space<vmem>>, vector<256x128xf32>
    %cst_60 = arith.constant dense<0.000000e+00> : vector<16x128xf32>
    %156 = tpu.matmul %154, %155, %cst_60 {dimension_numbers = #tpu.dot_dimension_numbers<[1], [0], [0], [1], [0, 0, 1, 1], [], []>} : vector<16x256xf32>, vector<256x128xf32>, vector<16x128xf32> -> vector<16x128xf32>
    %c0_61 = arith.constant 0 : index
    %c0_62 = arith.constant 0 : index
    %157 = vector.load %arg13[%c0_61, %c0_62] : memref<1x128xf32, #tpu.memory_space<vmem>>, vector<1x128xf32>
    %158 = vector.broadcast %157 : vector<1x128xf32> to vector<16x128xf32>
    %159 = arith.addf %156, %158 : vector<16x128xf32>
    %160 = arith.addf %136, %159 : vector<16x128xf32>
    %c0_63 = arith.constant 0 : index
    %c0_64 = arith.constant 0 : index
    %161 = vector.load %arg14[%c0_63, %c0_64] : memref<1x128xf32, #tpu.memory_space<vmem>>, vector<1x128xf32>
    %c0_65 = arith.constant 0 : index
    %c0_66 = arith.constant 0 : index
    %162 = vector.load %arg15[%c0_65, %c0_66] : memref<1x128xf32, #tpu.memory_space<vmem>>, vector<1x128xf32>
    %cst_67 = arith.constant dense<0.000000e+00> : vector<16xf32>
    %163 = vector.multi_reduction <add>, %160, %cst_67 [1] : vector<16x128xf32> to vector<16xf32>
    %164 = vector.shape_cast %163 : vector<16xf32> to vector<16x1xf32>
    %cst_68 = arith.constant 1.280000e+02 : f32
    %165 = vector.broadcast %cst_68 : f32 to vector<16x1xf32>
    %166 = arith.divf %164, %165 : vector<16x1xf32>
    %167 = vector.broadcast %166 : vector<16x1xf32> to vector<16x128xf32>
    %168 = arith.subf %160, %167 : vector<16x128xf32>
    %169 = arith.mulf %168, %168 : vector<16x128xf32>
    %cst_69 = arith.constant dense<0.000000e+00> : vector<16xf32>
    %170 = vector.multi_reduction <add>, %169, %cst_69 [1] : vector<16x128xf32> to vector<16xf32>
    %171 = vector.shape_cast %170 : vector<16xf32> to vector<16x1xf32>
    %cst_70 = arith.constant 1.280000e+02 : f32
    %172 = vector.broadcast %cst_70 : f32 to vector<16x1xf32>
    %173 = arith.divf %171, %172 : vector<16x1xf32>
    %cst_71 = arith.constant 9.99999974E-6 : f32
    %174 = vector.broadcast %cst_71 : f32 to vector<16x1xf32>
    %175 = arith.addf %173, %174 : vector<16x1xf32>
    %176 = math.rsqrt %175 : vector<16x1xf32>
    %177 = vector.broadcast %176 : vector<16x1xf32> to vector<16x128xf32>
    %178 = arith.mulf %168, %177 : vector<16x128xf32>
    %179 = vector.broadcast %161 : vector<1x128xf32> to vector<16x128xf32>
    %180 = arith.mulf %178, %179 : vector<16x128xf32>
    %181 = vector.broadcast %162 : vector<1x128xf32> to vector<16x128xf32>
    %182 = arith.addf %180, %181 : vector<16x128xf32>
    %c0_72 = arith.constant 0 : index
    %c0_73 = arith.constant 0 : index
    %183 = vector.load %arg16[%c0_72, %c0_73] : memref<16x128xf32, #tpu.memory_space<vmem>>, vector<16x128xf32>
    tpu.vector_store %arg16[%c0_72, %c0_73], %182 {strides = array<i32>} : memref<16x128xf32, #tpu.memory_space<vmem>>, vector<16x128xf32>,
    %184 = vector.shape_cast %182 : vector<16x128xf32> to vector<2x8x128xf32>
    %cst_74 = arith.constant dense<0.000000e+00> : vector<2x128xf32>
    %185 = vector.multi_reduction <add>, %184, %cst_74 [1] : vector<2x8x128xf32> to vector<2x128xf32>
    %cst_75 = arith.constant 8.000000e+00 : f32
    %186 = vector.broadcast %cst_75 : f32 to vector<2x128xf32>
    %187 = arith.divf %185, %186 : vector<2x128xf32>
    %c0_76 = arith.constant 0 : index
    %c0_77 = arith.constant 0 : index
    %188 = vector.load %arg17[%c0_76, %c0_77] : memref<2x128xf32, #tpu.memory_space<vmem>>, vector<2x128xf32>
    tpu.vector_store %arg17[%c0_76, %c0_77], %187 {strides = array<i32>} : memref<2x128xf32, #tpu.memory_space<vmem>>, vector<2x128xf32>,
    return
  }
}

module attributes {stable_mosaic.version = 11 : i64} {
  func.func @_encoder_layer_kernel(%arg0: memref<16x128xf32, #tpu.memory_space<vmem>>, %arg1: memref<16x128xf32, #tpu.memory_space<vmem>>, %arg2: memref<128x256xf32, #tpu.memory_space<vmem>>, %arg3: memref<1x256xf32, #tpu.memory_space<vmem>>, %arg4: memref<128x128xf32, #tpu.memory_space<vmem>>, %arg5: memref<1x128xf32, #tpu.memory_space<vmem>>, %arg6: memref<128x128xf32, #tpu.memory_space<vmem>>, %arg7: memref<1x128xf32, #tpu.memory_space<vmem>>, %arg8: memref<1x128xf32, #tpu.memory_space<vmem>>, %arg9: memref<1x128xf32, #tpu.memory_space<vmem>>, %arg10: memref<128x256xf32, #tpu.memory_space<vmem>>, %arg11: memref<1x256xf32, #tpu.memory_space<vmem>>, %arg12: memref<256x128xf32, #tpu.memory_space<vmem>>, %arg13: memref<1x128xf32, #tpu.memory_space<vmem>>, %arg14: memref<1x128xf32, #tpu.memory_space<vmem>>, %arg15: memref<1x128xf32, #tpu.memory_space<vmem>>, %arg16: memref<16x128xf32, #tpu.memory_space<vmem>>, %arg17: memref<2x128xf32, #tpu.memory_space<vmem>>) attributes {dimension_semantics = [], scalar_prefetch = 0 : i64, scratch_operands = 0 : i64, tpu.core_type = #tpu.core_type<tc>} {
    %c0 = arith.constant 0 : index
    %c0_0 = arith.constant 0 : index
    %0 = vector.load %arg0[%c0, %c0_0] : memref<16x128xf32, #tpu.memory_space<vmem>>, vector<16x128xf32>
    %c0_1 = arith.constant 0 : index
    %c0_2 = arith.constant 0 : index
    %1 = vector.load %arg1[%c0_1, %c0_2] : memref<16x128xf32, #tpu.memory_space<vmem>>, vector<16x128xf32>
    %2 = arith.addf %0, %1 : vector<16x128xf32>
    %c0_3 = arith.constant 0 : index
    %c0_4 = arith.constant 0 : index
    %3 = vector.load %arg2[%c0_3, %c0_4] : memref<128x256xf32, #tpu.memory_space<vmem>>, vector<128x256xf32>
    %cst = arith.constant dense<0.000000e+00> : vector<16x256xf32>
    %4 = tpu.matmul %2, %3, %cst {dimension_numbers = #tpu.dot_dimension_numbers<[1], [0], [0], [1], [0, 0, 1, 1], [], []>} : vector<16x128xf32>, vector<128x256xf32>, vector<16x256xf32> -> vector<16x256xf32>
    %c0_5 = arith.constant 0 : index
    %c0_6 = arith.constant 0 : index
    %5 = vector.load %arg3[%c0_5, %c0_6] : memref<1x256xf32, #tpu.memory_space<vmem>>, vector<1x256xf32>
    %6 = vector.broadcast %5 : vector<1x256xf32> to vector<16x256xf32>
    %7 = arith.addf %4, %6 : vector<16x256xf32>
    %c0_7 = arith.constant 0 : index
    %c0_8 = arith.constant 0 : index
    %8 = vector.load %arg4[%c0_7, %c0_8] : memref<128x128xf32, #tpu.memory_space<vmem>>, vector<128x128xf32>
    %cst_9 = arith.constant dense<0.000000e+00> : vector<16x128xf32>
    %9 = tpu.matmul %0, %8, %cst_9 {dimension_numbers = #tpu.dot_dimension_numbers<[1], [0], [0], [1], [0, 0, 1, 1], [], []>} : vector<16x128xf32>, vector<128x128xf32>, vector<16x128xf32> -> vector<16x128xf32>
    %c0_10 = arith.constant 0 : index
    %c0_11 = arith.constant 0 : index
    %10 = vector.load %arg5[%c0_10, %c0_11] : memref<1x128xf32, #tpu.memory_space<vmem>>, vector<1x128xf32>
    %11 = vector.broadcast %10 : vector<1x128xf32> to vector<16x128xf32>
    %12 = arith.addf %9, %11 : vector<16x128xf32>
    %13 = vector.extract_strided_slice %7 {offsets = [0, 0], sizes = [16, 128], strides = [1, 1]} : vector<16x256xf32> to vector<16x128xf32>
    %14 = vector.extract_strided_slice %7 {offsets = [0, 128], sizes = [16, 128], strides = [1, 1]} : vector<16x256xf32> to vector<16x128xf32>
    %c0_12 = arith.constant 0 : index
    %c0_13 = arith.constant 0 : index
    %15 = vector.load %arg6[%c0_12, %c0_13] : memref<128x128xf32, #tpu.memory_space<vmem>>, vector<128x128xf32>
    %c0_14 = arith.constant 0 : index
    %c0_15 = arith.constant 0 : index
    %16 = vector.load %arg7[%c0_14, %c0_15] : memref<1x128xf32, #tpu.memory_space<vmem>>, vector<1x128xf32>
    %17 = vector.extract_strided_slice %13 {offsets = [0, 0], sizes = [16, 32], strides = [1, 1]} : vector<16x128xf32> to vector<16x32xf32>
    %18 = vector.shape_cast %17 : vector<16x32xf32> to vector<2x8x32xf32>
    %cst_16 = arith.constant 0.176776692 : f32
    %19 = vector.broadcast %cst_16 : f32 to vector<2x8x32xf32>
    %20 = arith.mulf %18, %19 : vector<2x8x32xf32>
    %21 = vector.extract_strided_slice %14 {offsets = [0, 0], sizes = [16, 32], strides = [1, 1]} : vector<16x128xf32> to vector<16x32xf32>
    %22 = vector.shape_cast %21 : vector<16x32xf32> to vector<2x8x32xf32>
    %23 = vector.extract_strided_slice %12 {offsets = [0, 0], sizes = [16, 32], strides = [1, 1]} : vector<16x128xf32> to vector<16x32xf32>
    %24 = vector.shape_cast %23 : vector<16x32xf32> to vector<2x8x32xf32>
    "tpu.trace_start"() <{level = 10 : i32, message = "gnd,gmd->gnm"}> : () -> ()
    %cst_17 = arith.constant dense<0.000000e+00> : vector<2x8x8xf32>
    %25 = tpu.matmul %20, %22, %cst_17 {dimension_numbers = #tpu.dot_dimension_numbers<[2], [2], [1], [1], [0, 0, 0, 1, 1, 1], [0], [0]>} : vector<2x8x32xf32>, vector<2x8x32xf32>, vector<2x8x8xf32> -> vector<2x8x8xf32>
    "tpu.trace_stop"() : () -> ()
    %cst_18 = arith.constant dense<0xFF800000> : vector<2x8xf32>
    %26 = vector.multi_reduction <maximumf>, %25, %cst_18 [2] : vector<2x8x8xf32> to vector<2x8xf32>
    %27 = vector.shape_cast %26 : vector<2x8xf32> to vector<2x8x1xf32>
    %28 = vector.broadcast %27 : vector<2x8x1xf32> to vector<2x8x8xf32>
    %29 = arith.subf %25, %28 : vector<2x8x8xf32>
    %30 = math.exp %29 : vector<2x8x8xf32>
    %cst_19 = arith.constant dense<0.000000e+00> : vector<2x8xf32>
    %31 = vector.multi_reduction <add>, %30, %cst_19 [2] : vector<2x8x8xf32> to vector<2x8xf32>
    %32 = vector.shape_cast %31 : vector<2x8xf32> to vector<2x8x1xf32>
    %33 = tpu.reciprocal %32 {approx = true} : vector<2x8x1xf32> -> vector<2x8x1xf32>
    %34 = vector.broadcast %33 : vector<2x8x1xf32> to vector<2x8x8xf32>
    %35 = arith.mulf %30, %34 : vector<2x8x8xf32>
    "tpu.trace_start"() <{level = 10 : i32, message = "gnm,gmd->gnd"}> : () -> ()
    %cst_20 = arith.constant dense<0.000000e+00> : vector<2x8x32xf32>
    %36 = tpu.matmul %35, %24, %cst_20 {dimension_numbers = #tpu.dot_dimension_numbers<[2], [1], [1], [2], [0, 0, 0, 1, 1, 2], [0], [0]>} : vector<2x8x8xf32>, vector<2x8x32xf32>, vector<2x8x32xf32> -> vector<2x8x32xf32>
    "tpu.trace_stop"() : () -> ()
    %37 = vector.shape_cast %36 : vector<2x8x32xf32> to vector<16x32xf32>
    %38 = vector.extract_strided_slice %15 {offsets = [0, 0], sizes = [32, 128], strides = [1, 1]} : vector<128x128xf32> to vector<32x128xf32>
    %cst_21 = arith.constant dense<0.000000e+00> : vector<16x128xf32>
    %39 = tpu.matmul %37, %38, %cst_21 {dimension_numbers = #tpu.dot_dimension_numbers<[1], [0], [0], [1], [0, 0, 1, 1], [], []>} : vector<16x32xf32>, vector<32x128xf32>, vector<16x128xf32> -> vector<16x128xf32>
    %40 = vector.extract_strided_slice %13 {offsets = [0, 32], sizes = [16, 32], strides = [1, 1]} : vector<16x128xf32> to vector<16x32xf32>
    %41 = vector.shape_cast %40 : vector<16x32xf32> to vector<2x8x32xf32>
    %cst_22 = arith.constant 0.176776692 : f32
    %42 = vector.broadcast %cst_22 : f32 to vector<2x8x32xf32>
    %43 = arith.mulf %41, %42 : vector<2x8x32xf32>
    %44 = vector.extract_strided_slice %14 {offsets = [0, 32], sizes = [16, 32], strides = [1, 1]} : vector<16x128xf32> to vector<16x32xf32>
    %45 = vector.shape_cast %44 : vector<16x32xf32> to vector<2x8x32xf32>
    %46 = vector.extract_strided_slice %12 {offsets = [0, 32], sizes = [16, 32], strides = [1, 1]} : vector<16x128xf32> to vector<16x32xf32>
    %47 = vector.shape_cast %46 : vector<16x32xf32> to vector<2x8x32xf32>
    "tpu.trace_start"() <{level = 10 : i32, message = "gnd,gmd->gnm"}> : () -> ()
    %cst_23 = arith.constant dense<0.000000e+00> : vector<2x8x8xf32>
    %48 = tpu.matmul %43, %45, %cst_23 {dimension_numbers = #tpu.dot_dimension_numbers<[2], [2], [1], [1], [0, 0, 0, 1, 1, 1], [0], [0]>} : vector<2x8x32xf32>, vector<2x8x32xf32>, vector<2x8x8xf32> -> vector<2x8x8xf32>
    "tpu.trace_stop"() : () -> ()
    %cst_24 = arith.constant dense<0xFF800000> : vector<2x8xf32>
    %49 = vector.multi_reduction <maximumf>, %48, %cst_24 [2] : vector<2x8x8xf32> to vector<2x8xf32>
    %50 = vector.shape_cast %49 : vector<2x8xf32> to vector<2x8x1xf32>
    %51 = vector.broadcast %50 : vector<2x8x1xf32> to vector<2x8x8xf32>
    %52 = arith.subf %48, %51 : vector<2x8x8xf32>
    %53 = math.exp %52 : vector<2x8x8xf32>
    %cst_25 = arith.constant dense<0.000000e+00> : vector<2x8xf32>
    %54 = vector.multi_reduction <add>, %53, %cst_25 [2] : vector<2x8x8xf32> to vector<2x8xf32>
    %55 = vector.shape_cast %54 : vector<2x8xf32> to vector<2x8x1xf32>
    %56 = tpu.reciprocal %55 {approx = true} : vector<2x8x1xf32> -> vector<2x8x1xf32>
    %57 = vector.broadcast %56 : vector<2x8x1xf32> to vector<2x8x8xf32>
    %58 = arith.mulf %53, %57 : vector<2x8x8xf32>
    "tpu.trace_start"() <{level = 10 : i32, message = "gnm,gmd->gnd"}> : () -> ()
    %cst_26 = arith.constant dense<0.000000e+00> : vector<2x8x32xf32>
    %59 = tpu.matmul %58, %47, %cst_26 {dimension_numbers = #tpu.dot_dimension_numbers<[2], [1], [1], [2], [0, 0, 0, 1, 1, 2], [0], [0]>} : vector<2x8x8xf32>, vector<2x8x32xf32>, vector<2x8x32xf32> -> vector<2x8x32xf32>
    "tpu.trace_stop"() : () -> ()
    %60 = vector.shape_cast %59 : vector<2x8x32xf32> to vector<16x32xf32>
    %61 = vector.extract_strided_slice %15 {offsets = [32, 0], sizes = [32, 128], strides = [1, 1]} : vector<128x128xf32> to vector<32x128xf32>
    %cst_27 = arith.constant dense<0.000000e+00> : vector<16x128xf32>
    %62 = tpu.matmul %60, %61, %cst_27 {dimension_numbers = #tpu.dot_dimension_numbers<[1], [0], [0], [1], [0, 0, 1, 1], [], []>} : vector<16x32xf32>, vector<32x128xf32>, vector<16x128xf32> -> vector<16x128xf32>
    %63 = arith.addf %39, %62 : vector<16x128xf32>
    %64 = vector.extract_strided_slice %13 {offsets = [0, 64], sizes = [16, 32], strides = [1, 1]} : vector<16x128xf32> to vector<16x32xf32>
    %65 = vector.shape_cast %64 : vector<16x32xf32> to vector<2x8x32xf32>
    %cst_28 = arith.constant 0.176776692 : f32
    %66 = vector.broadcast %cst_28 : f32 to vector<2x8x32xf32>
    %67 = arith.mulf %65, %66 : vector<2x8x32xf32>
    %68 = vector.extract_strided_slice %14 {offsets = [0, 64], sizes = [16, 32], strides = [1, 1]} : vector<16x128xf32> to vector<16x32xf32>
    %69 = vector.shape_cast %68 : vector<16x32xf32> to vector<2x8x32xf32>
    %70 = vector.extract_strided_slice %12 {offsets = [0, 64], sizes = [16, 32], strides = [1, 1]} : vector<16x128xf32> to vector<16x32xf32>
    %71 = vector.shape_cast %70 : vector<16x32xf32> to vector<2x8x32xf32>
    "tpu.trace_start"() <{level = 10 : i32, message = "gnd,gmd->gnm"}> : () -> ()
    %cst_29 = arith.constant dense<0.000000e+00> : vector<2x8x8xf32>
    %72 = tpu.matmul %67, %69, %cst_29 {dimension_numbers = #tpu.dot_dimension_numbers<[2], [2], [1], [1], [0, 0, 0, 1, 1, 1], [0], [0]>} : vector<2x8x32xf32>, vector<2x8x32xf32>, vector<2x8x8xf32> -> vector<2x8x8xf32>
    "tpu.trace_stop"() : () -> ()
    %cst_30 = arith.constant dense<0xFF800000> : vector<2x8xf32>
    %73 = vector.multi_reduction <maximumf>, %72, %cst_30 [2] : vector<2x8x8xf32> to vector<2x8xf32>
    %74 = vector.shape_cast %73 : vector<2x8xf32> to vector<2x8x1xf32>
    %75 = vector.broadcast %74 : vector<2x8x1xf32> to vector<2x8x8xf32>
    %76 = arith.subf %72, %75 : vector<2x8x8xf32>
    %77 = math.exp %76 : vector<2x8x8xf32>
    %cst_31 = arith.constant dense<0.000000e+00> : vector<2x8xf32>
    %78 = vector.multi_reduction <add>, %77, %cst_31 [2] : vector<2x8x8xf32> to vector<2x8xf32>
    %79 = vector.shape_cast %78 : vector<2x8xf32> to vector<2x8x1xf32>
    %80 = tpu.reciprocal %79 {approx = true} : vector<2x8x1xf32> -> vector<2x8x1xf32>
    %81 = vector.broadcast %80 : vector<2x8x1xf32> to vector<2x8x8xf32>
    %82 = arith.mulf %77, %81 : vector<2x8x8xf32>
    "tpu.trace_start"() <{level = 10 : i32, message = "gnm,gmd->gnd"}> : () -> ()
    %cst_32 = arith.constant dense<0.000000e+00> : vector<2x8x32xf32>
    %83 = tpu.matmul %82, %71, %cst_32 {dimension_numbers = #tpu.dot_dimension_numbers<[2], [1], [1], [2], [0, 0, 0, 1, 1, 2], [0], [0]>} : vector<2x8x8xf32>, vector<2x8x32xf32>, vector<2x8x32xf32> -> vector<2x8x32xf32>
    "tpu.trace_stop"() : () -> ()
    %84 = vector.shape_cast %83 : vector<2x8x32xf32> to vector<16x32xf32>
    %85 = vector.extract_strided_slice %15 {offsets = [64, 0], sizes = [32, 128], strides = [1, 1]} : vector<128x128xf32> to vector<32x128xf32>
    %cst_33 = arith.constant dense<0.000000e+00> : vector<16x128xf32>
    %86 = tpu.matmul %84, %85, %cst_33 {dimension_numbers = #tpu.dot_dimension_numbers<[1], [0], [0], [1], [0, 0, 1, 1], [], []>} : vector<16x32xf32>, vector<32x128xf32>, vector<16x128xf32> -> vector<16x128xf32>
    %87 = arith.addf %63, %86 : vector<16x128xf32>
    %88 = vector.extract_strided_slice %13 {offsets = [0, 96], sizes = [16, 32], strides = [1, 1]} : vector<16x128xf32> to vector<16x32xf32>
    %89 = vector.shape_cast %88 : vector<16x32xf32> to vector<2x8x32xf32>
    %cst_34 = arith.constant 0.176776692 : f32
    %90 = vector.broadcast %cst_34 : f32 to vector<2x8x32xf32>
    %91 = arith.mulf %89, %90 : vector<2x8x32xf32>
    %92 = vector.extract_strided_slice %14 {offsets = [0, 96], sizes = [16, 32], strides = [1, 1]} : vector<16x128xf32> to vector<16x32xf32>
    %93 = vector.shape_cast %92 : vector<16x32xf32> to vector<2x8x32xf32>
    %94 = vector.extract_strided_slice %12 {offsets = [0, 96], sizes = [16, 32], strides = [1, 1]} : vector<16x128xf32> to vector<16x32xf32>
    %95 = vector.shape_cast %94 : vector<16x32xf32> to vector<2x8x32xf32>
    "tpu.trace_start"() <{level = 10 : i32, message = "gnd,gmd->gnm"}> : () -> ()
    %cst_35 = arith.constant dense<0.000000e+00> : vector<2x8x8xf32>
    %96 = tpu.matmul %91, %93, %cst_35 {dimension_numbers = #tpu.dot_dimension_numbers<[2], [2], [1], [1], [0, 0, 0, 1, 1, 1], [0], [0]>} : vector<2x8x32xf32>, vector<2x8x32xf32>, vector<2x8x8xf32> -> vector<2x8x8xf32>
    "tpu.trace_stop"() : () -> ()
    %cst_36 = arith.constant dense<0xFF800000> : vector<2x8xf32>
    %97 = vector.multi_reduction <maximumf>, %96, %cst_36 [2] : vector<2x8x8xf32> to vector<2x8xf32>
    %98 = vector.shape_cast %97 : vector<2x8xf32> to vector<2x8x1xf32>
    %99 = vector.broadcast %98 : vector<2x8x1xf32> to vector<2x8x8xf32>
    %100 = arith.subf %96, %99 : vector<2x8x8xf32>
    %101 = math.exp %100 : vector<2x8x8xf32>
    %cst_37 = arith.constant dense<0.000000e+00> : vector<2x8xf32>
    %102 = vector.multi_reduction <add>, %101, %cst_37 [2] : vector<2x8x8xf32> to vector<2x8xf32>
    %103 = vector.shape_cast %102 : vector<2x8xf32> to vector<2x8x1xf32>
    %104 = tpu.reciprocal %103 {approx = true} : vector<2x8x1xf32> -> vector<2x8x1xf32>
    %105 = vector.broadcast %104 : vector<2x8x1xf32> to vector<2x8x8xf32>
    %106 = arith.mulf %101, %105 : vector<2x8x8xf32>
    "tpu.trace_start"() <{level = 10 : i32, message = "gnm,gmd->gnd"}> : () -> ()
    %cst_38 = arith.constant dense<0.000000e+00> : vector<2x8x32xf32>
    %107 = tpu.matmul %106, %95, %cst_38 {dimension_numbers = #tpu.dot_dimension_numbers<[2], [1], [1], [2], [0, 0, 0, 1, 1, 2], [0], [0]>} : vector<2x8x8xf32>, vector<2x8x32xf32>, vector<2x8x32xf32> -> vector<2x8x32xf32>
    "tpu.trace_stop"() : () -> ()
    %108 = vector.shape_cast %107 : vector<2x8x32xf32> to vector<16x32xf32>
    %109 = vector.extract_strided_slice %15 {offsets = [96, 0], sizes = [32, 128], strides = [1, 1]} : vector<128x128xf32> to vector<32x128xf32>
    %cst_39 = arith.constant dense<0.000000e+00> : vector<16x128xf32>
    %110 = tpu.matmul %108, %109, %cst_39 {dimension_numbers = #tpu.dot_dimension_numbers<[1], [0], [0], [1], [0, 0, 1, 1], [], []>} : vector<16x32xf32>, vector<32x128xf32>, vector<16x128xf32> -> vector<16x128xf32>
    %111 = arith.addf %87, %110 : vector<16x128xf32>
    %112 = vector.broadcast %16 : vector<1x128xf32> to vector<16x128xf32>
    %113 = arith.addf %111, %112 : vector<16x128xf32>
    %114 = arith.addf %0, %113 : vector<16x128xf32>
    %c0_40 = arith.constant 0 : index
    %c0_41 = arith.constant 0 : index
    %115 = vector.load %arg8[%c0_40, %c0_41] : memref<1x128xf32, #tpu.memory_space<vmem>>, vector<1x128xf32>
    %c0_42 = arith.constant 0 : index
    %c0_43 = arith.constant 0 : index
    %116 = vector.load %arg9[%c0_42, %c0_43] : memref<1x128xf32, #tpu.memory_space<vmem>>, vector<1x128xf32>
    %cst_44 = arith.constant dense<0.000000e+00> : vector<16xf32>
    %117 = vector.multi_reduction <add>, %114, %cst_44 [1] : vector<16x128xf32> to vector<16xf32>
    %118 = vector.shape_cast %117 : vector<16xf32> to vector<16x1xf32>
    %cst_45 = arith.constant 1.280000e+02 : f32
    %119 = vector.broadcast %cst_45 : f32 to vector<16x1xf32>
    %120 = arith.divf %118, %119 : vector<16x1xf32>
    %121 = vector.broadcast %120 : vector<16x1xf32> to vector<16x128xf32>
    %122 = arith.subf %114, %121 : vector<16x128xf32>
    %123 = arith.mulf %122, %122 : vector<16x128xf32>
    %cst_46 = arith.constant dense<0.000000e+00> : vector<16xf32>
    %124 = vector.multi_reduction <add>, %123, %cst_46 [1] : vector<16x128xf32> to vector<16xf32>
    %125 = vector.shape_cast %124 : vector<16xf32> to vector<16x1xf32>
    %cst_47 = arith.constant 1.280000e+02 : f32
    %126 = vector.broadcast %cst_47 : f32 to vector<16x1xf32>
    %127 = arith.divf %125, %126 : vector<16x1xf32>
    %cst_48 = arith.constant 9.99999974E-6 : f32
    %128 = vector.broadcast %cst_48 : f32 to vector<16x1xf32>
    %129 = arith.addf %127, %128 : vector<16x1xf32>
    %130 = math.rsqrt %129 : vector<16x1xf32>
    %131 = vector.broadcast %130 : vector<16x1xf32> to vector<16x128xf32>
    %132 = arith.mulf %122, %131 : vector<16x128xf32>
    %133 = vector.broadcast %115 : vector<1x128xf32> to vector<16x128xf32>
    %134 = arith.mulf %132, %133 : vector<16x128xf32>
    %135 = vector.broadcast %116 : vector<1x128xf32> to vector<16x128xf32>
    %136 = arith.addf %134, %135 : vector<16x128xf32>
    %c0_49 = arith.constant 0 : index
    %c0_50 = arith.constant 0 : index
    %137 = vector.load %arg10[%c0_49, %c0_50] : memref<128x256xf32, #tpu.memory_space<vmem>>, vector<128x256xf32>
    %cst_51 = arith.constant dense<0.000000e+00> : vector<16x256xf32>
    %138 = tpu.matmul %136, %137, %cst_51 {dimension_numbers = #tpu.dot_dimension_numbers<[1], [0], [0], [1], [0, 0, 1, 1], [], []>} : vector<16x128xf32>, vector<128x256xf32>, vector<16x256xf32> -> vector<16x256xf32>
    %c0_52 = arith.constant 0 : index
    %c0_53 = arith.constant 0 : index
    %139 = vector.load %arg11[%c0_52, %c0_53] : memref<1x256xf32, #tpu.memory_space<vmem>>, vector<1x256xf32>
    %140 = vector.broadcast %139 : vector<1x256xf32> to vector<16x256xf32>
    %141 = arith.addf %138, %140 : vector<16x256xf32>
    %cst_54 = arith.constant 5.000000e-01 : f32
    %142 = vector.broadcast %cst_54 : f32 to vector<16x256xf32>
    %143 = arith.mulf %142, %141 : vector<16x256xf32>
    %cst_55 = arith.constant 4.471500e-02 : f32
    %144 = vector.broadcast %cst_55 : f32 to vector<16x256xf32>
    %145 = arith.mulf %144, %141 : vector<16x256xf32>
    %146 = arith.mulf %145, %141 : vector<16x256xf32>
    %147 = arith.mulf %146, %141 : vector<16x256xf32>
    %148 = arith.addf %141, %147 : vector<16x256xf32>
    %cst_56 = arith.constant 0.797884583 : f32
    %149 = vector.broadcast %cst_56 : f32 to vector<16x256xf32>
    %150 = arith.mulf %149, %148 : vector<16x256xf32>
    %151 = math.tanh %150 : vector<16x256xf32>
    %cst_57 = arith.constant 1.000000e+00 : f32
    %152 = vector.broadcast %cst_57 : f32 to vector<16x256xf32>
    %153 = arith.addf %152, %151 : vector<16x256xf32>
    %154 = arith.mulf %143, %153 : vector<16x256xf32>
    %c0_58 = arith.constant 0 : index
    %c0_59 = arith.constant 0 : index
    %155 = vector.load %arg12[%c0_58, %c0_59] : memref<256x128xf32, #tpu.memory_space<vmem>>, vector<256x128xf32>
    %cst_60 = arith.constant dense<0.000000e+00> : vector<16x128xf32>
    %156 = tpu.matmul %154, %155, %cst_60 {dimension_numbers = #tpu.dot_dimension_numbers<[1], [0], [0], [1], [0, 0, 1, 1], [], []>} : vector<16x256xf32>, vector<256x128xf32>, vector<16x128xf32> -> vector<16x128xf32>
    %c0_61 = arith.constant 0 : index
    %c0_62 = arith.constant 0 : index
    %157 = vector.load %arg13[%c0_61, %c0_62] : memref<1x128xf32, #tpu.memory_space<vmem>>, vector<1x128xf32>
    %158 = vector.broadcast %157 : vector<1x128xf32> to vector<16x128xf32>
    %159 = arith.addf %156, %158 : vector<16x128xf32>
    %160 = arith.addf %136, %159 : vector<16x128xf32>
    %c0_63 = arith.constant 0 : index
    %c0_64 = arith.constant 0 : index
    %161 = vector.load %arg14[%c0_63, %c0_64] : memref<1x128xf32, #tpu.memory_space<vmem>>, vector<1x128xf32>
    %c0_65 = arith.constant 0 : index
    %c0_66 = arith.constant 0 : index
    %162 = vector.load %arg15[%c0_65, %c0_66] : memref<1x128xf32, #tpu.memory_space<vmem>>, vector<1x128xf32>
    %cst_67 = arith.constant dense<0.000000e+00> : vector<16xf32>
    %163 = vector.multi_reduction <add>, %160, %cst_67 [1] : vector<16x128xf32> to vector<16xf32>
    %164 = vector.shape_cast %163 : vector<16xf32> to vector<16x1xf32>
    %cst_68 = arith.constant 1.280000e+02 : f32
    %165 = vector.broadcast %cst_68 : f32 to vector<16x1xf32>
    %166 = arith.divf %164, %165 : vector<16x1xf32>
    %167 = vector.broadcast %166 : vector<16x1xf32> to vector<16x128xf32>
    %168 = arith.subf %160, %167 : vector<16x128xf32>
    %169 = arith.mulf %168, %168 : vector<16x128xf32>
    %cst_69 = arith.constant dense<0.000000e+00> : vector<16xf32>
    %170 = vector.multi_reduction <add>, %169, %cst_69 [1] : vector<16x128xf32> to vector<16xf32>
    %171 = vector.shape_cast %170 : vector<16xf32> to vector<16x1xf32>
    %cst_70 = arith.constant 1.280000e+02 : f32
    %172 = vector.broadcast %cst_70 : f32 to vector<16x1xf32>
    %173 = arith.divf %171, %172 : vector<16x1xf32>
    %cst_71 = arith.constant 9.99999974E-6 : f32
    %174 = vector.broadcast %cst_71 : f32 to vector<16x1xf32>
    %175 = arith.addf %173, %174 : vector<16x1xf32>
    %176 = math.rsqrt %175 : vector<16x1xf32>
    %177 = vector.broadcast %176 : vector<16x1xf32> to vector<16x128xf32>
    %178 = arith.mulf %168, %177 : vector<16x128xf32>
    %179 = vector.broadcast %161 : vector<1x128xf32> to vector<16x128xf32>
    %180 = arith.mulf %178, %179 : vector<16x128xf32>
    %181 = vector.broadcast %162 : vector<1x128xf32> to vector<16x128xf32>
    %182 = arith.addf %180, %181 : vector<16x128xf32>
    %c0_72 = arith.constant 0 : index
    %c0_73 = arith.constant 0 : index
    %183 = vector.load %arg16[%c0_72, %c0_73] : memref<16x128xf32, #tpu.memory_space<vmem>>, vector<16x128xf32>
    tpu.vector_store %arg16[%c0_72, %c0_73], %182 {strides = array<i32>} : memref<16x128xf32, #tpu.memory_space<vmem>>, vector<16x128xf32>,
    %184 = vector.shape_cast %182 : vector<16x128xf32> to vector<2x8x128xf32>
    %cst_74 = arith.constant dense<0.000000e+00> : vector<2x128xf32>
    %185 = vector.multi_reduction <add>, %184, %cst_74 [1] : vector<2x8x128xf32> to vector<2x128xf32>
    %cst_75 = arith.constant 8.000000e+00 : f32
    %186 = vector.broadcast %cst_75 : f32 to vector<2x128xf32>
    %187 = arith.divf %185, %186 : vector<2x128xf32>
    %c0_76 = arith.constant 0 : index
    %c0_77 = arith.constant 0 : index
    %188 = vector.load %arg17[%c0_76, %c0_77] : memref<2x128xf32, #tpu.memory_space<vmem>>, vector<2x128xf32>
    tpu.vector_store %arg17[%c0_76, %c0_77], %187 {strides = array<i32>} : memref<2x128xf32, #tpu.memory_space<vmem>>, vector<2x128xf32>,
    return
  }
}

module attributes {stable_mosaic.version = 11 : i64} {
  func.func @_prep_kernel(%arg0: memref<2x1xf32, #tpu.memory_space<vmem>>, %arg1: memref<1x16xf32, #tpu.memory_space<vmem>>, %arg2: memref<32x128xf32, #tpu.memory_space<vmem>>, %arg3: memref<1x128xf32, #tpu.memory_space<vmem>>, %arg4: memref<128x128xf32, #tpu.memory_space<vmem>>, %arg5: memref<1x128xf32, #tpu.memory_space<vmem>>, %arg6: memref<16x8xf32, #tpu.memory_space<vmem>>, %arg7: memref<8x8xf32, #tpu.memory_space<vmem>>, %arg8: memref<1x8xf32, #tpu.memory_space<vmem>>, %arg9: memref<8x128xf32, #tpu.memory_space<vmem>>, %arg10: memref<1x128xf32, #tpu.memory_space<vmem>>, %arg11: memref<8x128xf32, #tpu.memory_space<vmem>>, %arg12: memref<2x128xf32, #tpu.memory_space<vmem>>, %arg13: memref<16x128xf32, #tpu.memory_space<vmem>>) attributes {dimension_semantics = [], scalar_prefetch = 0 : i64, scratch_operands = 0 : i64, tpu.core_type = #tpu.core_type<tc>} {
    %c0 = arith.constant 0 : index
    %c0_0 = arith.constant 0 : index
    %0 = vector.load %arg0[%c0, %c0_0] : memref<2x1xf32, #tpu.memory_space<vmem>>, vector<2x1xf32>
    %c0_1 = arith.constant 0 : index
    %c0_2 = arith.constant 0 : index
    %1 = vector.load %arg1[%c0_1, %c0_2] : memref<1x16xf32, #tpu.memory_space<vmem>>, vector<1x16xf32>
    %2 = vector.broadcast %0 : vector<2x1xf32> to vector<2x16xf32>
    %3 = vector.broadcast %1 : vector<1x16xf32> to vector<2x16xf32>
    %4 = arith.mulf %2, %3 : vector<2x16xf32>
    %c0_3 = arith.constant 0 : index
    %c0_4 = arith.constant 0 : index
    %5 = vector.load %arg2[%c0_3, %c0_4] : memref<32x128xf32, #tpu.memory_space<vmem>>, vector<32x128xf32>
    %6 = math.cos %4 : vector<2x16xf32>
    %7 = vector.extract_strided_slice %5 {offsets = [0, 0], sizes = [16, 128], strides = [1, 1]} : vector<32x128xf32> to vector<16x128xf32>
    %cst = arith.constant dense<0.000000e+00> : vector<2x128xf32>
    %8 = tpu.matmul %6, %7, %cst {dimension_numbers = #tpu.dot_dimension_numbers<[1], [0], [0], [1], [0, 0, 1, 1], [], []>} : vector<2x16xf32>, vector<16x128xf32>, vector<2x128xf32> -> vector<2x128xf32>
    %9 = math.sin %4 : vector<2x16xf32>
    %10 = vector.extract_strided_slice %5 {offsets = [16, 0], sizes = [16, 128], strides = [1, 1]} : vector<32x128xf32> to vector<16x128xf32>
    %cst_5 = arith.constant dense<0.000000e+00> : vector<2x128xf32>
    %11 = tpu.matmul %9, %10, %cst_5 {dimension_numbers = #tpu.dot_dimension_numbers<[1], [0], [0], [1], [0, 0, 1, 1], [], []>} : vector<2x16xf32>, vector<16x128xf32>, vector<2x128xf32> -> vector<2x128xf32>
    %12 = arith.addf %8, %11 : vector<2x128xf32>
    %c0_6 = arith.constant 0 : index
    %c0_7 = arith.constant 0 : index
    %13 = vector.load %arg3[%c0_6, %c0_7] : memref<1x128xf32, #tpu.memory_space<vmem>>, vector<1x128xf32>
    %14 = vector.broadcast %13 : vector<1x128xf32> to vector<2x128xf32>
    %15 = arith.addf %12, %14 : vector<2x128xf32>
    %cst_8 = arith.constant 0.000000e+00 : f32
    %16 = vector.broadcast %cst_8 : f32 to vector<2x128xf32>
    %17 = arith.subf %16, %15 : vector<2x128xf32>
    %18 = math.exp %17 : vector<2x128xf32>
    %cst_9 = arith.constant 1.000000e+00 : f32
    %19 = vector.broadcast %cst_9 : f32 to vector<2x128xf32>
    %20 = arith.addf %19, %18 : vector<2x128xf32>
    %cst_10 = arith.constant 1.000000e+00 : f32
    %21 = vector.broadcast %cst_10 : f32 to vector<2x128xf32>
    %22 = arith.divf %21, %20 : vector<2x128xf32>
    %23 = arith.mulf %15, %22 : vector<2x128xf32>
    %c0_11 = arith.constant 0 : index
    %c0_12 = arith.constant 0 : index
    %24 = vector.load %arg4[%c0_11, %c0_12] : memref<128x128xf32, #tpu.memory_space<vmem>>, vector<128x128xf32>
    %cst_13 = arith.constant dense<0.000000e+00> : vector<2x128xf32>
    %25 = tpu.matmul %23, %24, %cst_13 {dimension_numbers = #tpu.dot_dimension_numbers<[1], [0], [0], [1], [0, 0, 1, 1], [], []>} : vector<2x128xf32>, vector<128x128xf32>, vector<2x128xf32> -> vector<2x128xf32>
    %c0_14 = arith.constant 0 : index
    %c0_15 = arith.constant 0 : index
    %26 = vector.load %arg5[%c0_14, %c0_15] : memref<1x128xf32, #tpu.memory_space<vmem>>, vector<1x128xf32>
    %27 = vector.broadcast %26 : vector<1x128xf32> to vector<2x128xf32>
    %28 = arith.addf %25, %27 : vector<2x128xf32>
    %c0_16 = arith.constant 0 : index
    %c0_17 = arith.constant 0 : index
    %29 = vector.load %arg12[%c0_16, %c0_17] : memref<2x128xf32, #tpu.memory_space<vmem>>, vector<2x128xf32>
    tpu.vector_store %arg12[%c0_16, %c0_17], %28 {strides = array<i32>} : memref<2x128xf32, #tpu.memory_space<vmem>>, vector<2x128xf32>,
    %c0_18 = arith.constant 0 : index
    %c0_19 = arith.constant 0 : index
    %30 = vector.load %arg6[%c0_18, %c0_19] : memref<16x8xf32, #tpu.memory_space<vmem>>, vector<16x8xf32>
    %c0_20 = arith.constant 0 : index
    %c0_21 = arith.constant 0 : index
    %31 = vector.load %arg7[%c0_20, %c0_21] : memref<8x8xf32, #tpu.memory_space<vmem>>, vector<8x8xf32>
    %cst_22 = arith.constant dense<0.000000e+00> : vector<16x8xf32>
    %32 = tpu.matmul %30, %31, %cst_22 {dimension_numbers = #tpu.dot_dimension_numbers<[1], [0], [0], [1], [0, 0, 1, 1], [], []>} : vector<16x8xf32>, vector<8x8xf32>, vector<16x8xf32> -> vector<16x8xf32>
    %c0_23 = arith.constant 0 : index
    %c0_24 = arith.constant 0 : index
    %33 = vector.load %arg8[%c0_23, %c0_24] : memref<1x8xf32, #tpu.memory_space<vmem>>, vector<1x8xf32>
    %34 = vector.broadcast %33 : vector<1x8xf32> to vector<16x8xf32>
    %35 = arith.addf %32, %34 : vector<16x8xf32>
    %cst_25 = arith.constant 5.000000e-01 : f32
    %36 = vector.broadcast %cst_25 : f32 to vector<16x8xf32>
    %37 = arith.mulf %36, %35 : vector<16x8xf32>
    %cst_26 = arith.constant 4.471500e-02 : f32
    %38 = vector.broadcast %cst_26 : f32 to vector<16x8xf32>
    %39 = arith.mulf %38, %35 : vector<16x8xf32>
    %40 = arith.mulf %39, %35 : vector<16x8xf32>
    %41 = arith.mulf %40, %35 : vector<16x8xf32>
    %42 = arith.addf %35, %41 : vector<16x8xf32>
    %cst_27 = arith.constant 0.797884583 : f32
    %43 = vector.broadcast %cst_27 : f32 to vector<16x8xf32>
    %44 = arith.mulf %43, %42 : vector<16x8xf32>
    %45 = math.tanh %44 : vector<16x8xf32>
    %cst_28 = arith.constant 1.000000e+00 : f32
    %46 = vector.broadcast %cst_28 : f32 to vector<16x8xf32>
    %47 = arith.addf %46, %45 : vector<16x8xf32>
    %48 = arith.mulf %37, %47 : vector<16x8xf32>
    %c0_29 = arith.constant 0 : index
    %c0_30 = arith.constant 0 : index
    %49 = vector.load %arg9[%c0_29, %c0_30] : memref<8x128xf32, #tpu.memory_space<vmem>>, vector<8x128xf32>
    %cst_31 = arith.constant dense<0.000000e+00> : vector<16x128xf32>
    %50 = tpu.matmul %48, %49, %cst_31 {dimension_numbers = #tpu.dot_dimension_numbers<[1], [0], [0], [1], [0, 0, 1, 1], [], []>} : vector<16x8xf32>, vector<8x128xf32>, vector<16x128xf32> -> vector<16x128xf32>
    %c0_32 = arith.constant 0 : index
    %c0_33 = arith.constant 0 : index
    %51 = vector.load %arg10[%c0_32, %c0_33] : memref<1x128xf32, #tpu.memory_space<vmem>>, vector<1x128xf32>
    %52 = vector.broadcast %51 : vector<1x128xf32> to vector<16x128xf32>
    %53 = arith.addf %50, %52 : vector<16x128xf32>
    %c0_34 = arith.constant 0 : index
    %c0_35 = arith.constant 0 : index
    %54 = vector.load %arg11[%c0_34, %c0_35] : memref<8x128xf32, #tpu.memory_space<vmem>>, vector<8x128xf32>
    %55 = vector.shape_cast %54 : vector<8x128xf32> to vector<8x1x128xf32>
    %56 = vector.shape_cast %55 : vector<8x1x128xf32> to vector<8x1x128xf32>
    %57 = vector.broadcast %56 : vector<8x1x128xf32> to vector<8x2x128xf32>
    %58 = vector.shape_cast %57 : vector<8x2x128xf32> to vector<16x128xf32>
    %59 = arith.addf %53, %58 : vector<16x128xf32>
    %c0_36 = arith.constant 0 : index
    %c0_37 = arith.constant 0 : index
    %60 = vector.load %arg13[%c0_36, %c0_37] : memref<16x128xf32, #tpu.memory_space<vmem>>, vector<16x128xf32>
    tpu.vector_store %arg13[%c0_36, %c0_37], %59 {strides = array<i32>} : memref<16x128xf32, #tpu.memory_space<vmem>>, vector<16x128xf32>,
    return
  }
}

module attributes {stable_mosaic.version = 11 : i64} {
  func.func @_decoder_layer_kernel(%arg0: memref<16x128xf32, #tpu.memory_space<vmem>>, %arg1: memref<2x128xf32, #tpu.memory_space<vmem>>, %arg2: memref<2x128xf32, #tpu.memory_space<vmem>>, %arg3: memref<128x384xf32, #tpu.memory_space<vmem>>, %arg4: memref<1x384xf32, #tpu.memory_space<vmem>>, %arg5: memref<128x128xf32, #tpu.memory_space<vmem>>, %arg6: memref<1x128xf32, #tpu.memory_space<vmem>>, %arg7: memref<1x128xf32, #tpu.memory_space<vmem>>, %arg8: memref<1x128xf32, #tpu.memory_space<vmem>>, %arg9: memref<1x128xf32, #tpu.memory_space<vmem>>, %arg10: memref<1x128xf32, #tpu.memory_space<vmem>>, %arg11: memref<128x768xf32, #tpu.memory_space<vmem>>, %arg12: memref<1x768xf32, #tpu.memory_space<vmem>>, %arg13: memref<128x256xf32, #tpu.memory_space<vmem>>, %arg14: memref<1x256xf32, #tpu.memory_space<vmem>>, %arg15: memref<256x128xf32, #tpu.memory_space<vmem>>, %arg16: memref<1x128xf32, #tpu.memory_space<vmem>>, %arg17: memref<16x128xf32, #tpu.memory_space<vmem>>) attributes {dimension_semantics = [], scalar_prefetch = 0 : i64, scratch_operands = 0 : i64, tpu.core_type = #tpu.core_type<tc>} {
    %c0 = arith.constant 0 : index
    %c0_0 = arith.constant 0 : index
    %0 = vector.load %arg0[%c0, %c0_0] : memref<16x128xf32, #tpu.memory_space<vmem>>, vector<16x128xf32>
    %c0_1 = arith.constant 0 : index
    %c0_2 = arith.constant 0 : index
    %1 = vector.load %arg2[%c0_1, %c0_2] : memref<2x128xf32, #tpu.memory_space<vmem>>, vector<2x128xf32>
    %c0_3 = arith.constant 0 : index
    %c0_4 = arith.constant 0 : index
    %2 = vector.load %arg1[%c0_3, %c0_4] : memref<2x128xf32, #tpu.memory_space<vmem>>, vector<2x128xf32>
    %3 = arith.addf %1, %2 : vector<2x128xf32>
    %cst = arith.constant 0.000000e+00 : f32
    %4 = vector.broadcast %cst : f32 to vector<2x128xf32>
    %5 = arith.subf %4, %3 : vector<2x128xf32>
    %6 = math.exp %5 : vector<2x128xf32>
    %cst_5 = arith.constant 1.000000e+00 : f32
    %7 = vector.broadcast %cst_5 : f32 to vector<2x128xf32>
    %8 = arith.addf %7, %6 : vector<2x128xf32>
    %cst_6 = arith.constant 1.000000e+00 : f32
    %9 = vector.broadcast %cst_6 : f32 to vector<2x128xf32>
    %10 = arith.divf %9, %8 : vector<2x128xf32>
    %11 = arith.mulf %3, %10 : vector<2x128xf32>
    %c0_7 = arith.constant 0 : index
    %c0_8 = arith.constant 0 : index
    %12 = vector.load %arg11[%c0_7, %c0_8] : memref<128x768xf32, #tpu.memory_space<vmem>>, vector<128x768xf32>
    %cst_9 = arith.constant dense<0.000000e+00> : vector<2x768xf32>
    %13 = tpu.matmul %11, %12, %cst_9 {dimension_numbers = #tpu.dot_dimension_numbers<[1], [0], [0], [1], [0, 0, 1, 1], [], []>} : vector<2x128xf32>, vector<128x768xf32>, vector<2x768xf32> -> vector<2x768xf32>
    %c0_10 = arith.constant 0 : index
    %c0_11 = arith.constant 0 : index
    %14 = vector.load %arg12[%c0_10, %c0_11] : memref<1x768xf32, #tpu.memory_space<vmem>>, vector<1x768xf32>
    %15 = vector.broadcast %14 : vector<1x768xf32> to vector<2x768xf32>
    %16 = arith.addf %13, %15 : vector<2x768xf32>
    %17 = vector.extract_strided_slice %16 {offsets = [0, 0], sizes = [2, 128], strides = [1, 1]} : vector<2x768xf32> to vector<2x128xf32>
    %18 = vector.shape_cast %17 : vector<2x128xf32> to vector<1x2x128xf32>
    %19 = vector.shape_cast %18 : vector<1x2x128xf32> to vector<1x2x128xf32>
    %20 = vector.broadcast %19 : vector<1x2x128xf32> to vector<8x2x128xf32>
    %21 = vector.shape_cast %20 : vector<8x2x128xf32> to vector<16x128xf32>
    %22 = vector.extract_strided_slice %16 {offsets = [0, 128], sizes = [2, 128], strides = [1, 1]} : vector<2x768xf32> to vector<2x128xf32>
    %23 = vector.shape_cast %22 : vector<2x128xf32> to vector<1x2x128xf32>
    %24 = vector.shape_cast %23 : vector<1x2x128xf32> to vector<1x2x128xf32>
    %25 = vector.broadcast %24 : vector<1x2x128xf32> to vector<8x2x128xf32>
    %26 = vector.shape_cast %25 : vector<8x2x128xf32> to vector<16x128xf32>
    %27 = vector.extract_strided_slice %16 {offsets = [0, 256], sizes = [2, 128], strides = [1, 1]} : vector<2x768xf32> to vector<2x128xf32>
    %28 = vector.shape_cast %27 : vector<2x128xf32> to vector<1x2x128xf32>
    %29 = vector.shape_cast %28 : vector<1x2x128xf32> to vector<1x2x128xf32>
    %30 = vector.broadcast %29 : vector<1x2x128xf32> to vector<8x2x128xf32>
    %31 = vector.shape_cast %30 : vector<8x2x128xf32> to vector<16x128xf32>
    %32 = vector.extract_strided_slice %16 {offsets = [0, 384], sizes = [2, 128], strides = [1, 1]} : vector<2x768xf32> to vector<2x128xf32>
    %33 = vector.shape_cast %32 : vector<2x128xf32> to vector<1x2x128xf32>
    %34 = vector.shape_cast %33 : vector<1x2x128xf32> to vector<1x2x128xf32>
    %35 = vector.broadcast %34 : vector<1x2x128xf32> to vector<8x2x128xf32>
    %36 = vector.shape_cast %35 : vector<8x2x128xf32> to vector<16x128xf32>
    %37 = vector.extract_strided_slice %16 {offsets = [0, 512], sizes = [2, 128], strides = [1, 1]} : vector<2x768xf32> to vector<2x128xf32>
    %38 = vector.shape_cast %37 : vector<2x128xf32> to vector<1x2x128xf32>
    %39 = vector.shape_cast %38 : vector<1x2x128xf32> to vector<1x2x128xf32>
    %40 = vector.broadcast %39 : vector<1x2x128xf32> to vector<8x2x128xf32>
    %41 = vector.shape_cast %40 : vector<8x2x128xf32> to vector<16x128xf32>
    %42 = vector.extract_strided_slice %16 {offsets = [0, 640], sizes = [2, 128], strides = [1, 1]} : vector<2x768xf32> to vector<2x128xf32>
    %43 = vector.shape_cast %42 : vector<2x128xf32> to vector<1x2x128xf32>
    %44 = vector.shape_cast %43 : vector<1x2x128xf32> to vector<1x2x128xf32>
    %45 = vector.broadcast %44 : vector<1x2x128xf32> to vector<8x2x128xf32>
    %46 = vector.shape_cast %45 : vector<8x2x128xf32> to vector<16x128xf32>
    %c0_12 = arith.constant 0 : index
    %c0_13 = arith.constant 0 : index
    %47 = vector.load %arg7[%c0_12, %c0_13] : memref<1x128xf32, #tpu.memory_space<vmem>>, vector<1x128xf32>
    %c0_14 = arith.constant 0 : index
    %c0_15 = arith.constant 0 : index
    %48 = vector.load %arg8[%c0_14, %c0_15] : memref<1x128xf32, #tpu.memory_space<vmem>>, vector<1x128xf32>
    %cst_16 = arith.constant dense<0.000000e+00> : vector<16xf32>
    %49 = vector.multi_reduction <add>, %0, %cst_16 [1] : vector<16x128xf32> to vector<16xf32>
    %50 = vector.shape_cast %49 : vector<16xf32> to vector<16x1xf32>
    %cst_17 = arith.constant 1.280000e+02 : f32
    %51 = vector.broadcast %cst_17 : f32 to vector<16x1xf32>
    %52 = arith.divf %50, %51 : vector<16x1xf32>
    %53 = vector.broadcast %52 : vector<16x1xf32> to vector<16x128xf32>
    %54 = arith.subf %0, %53 : vector<16x128xf32>
    %55 = arith.mulf %54, %54 : vector<16x128xf32>
    %cst_18 = arith.constant dense<0.000000e+00> : vector<16xf32>
    %56 = vector.multi_reduction <add>, %55, %cst_18 [1] : vector<16x128xf32> to vector<16xf32>
    %57 = vector.shape_cast %56 : vector<16xf32> to vector<16x1xf32>
    %cst_19 = arith.constant 1.280000e+02 : f32
    %58 = vector.broadcast %cst_19 : f32 to vector<16x1xf32>
    %59 = arith.divf %57, %58 : vector<16x1xf32>
    %cst_20 = arith.constant 9.99999974E-6 : f32
    %60 = vector.broadcast %cst_20 : f32 to vector<16x1xf32>
    %61 = arith.addf %59, %60 : vector<16x1xf32>
    %62 = math.rsqrt %61 : vector<16x1xf32>
    %63 = vector.broadcast %62 : vector<16x1xf32> to vector<16x128xf32>
    %64 = arith.mulf %54, %63 : vector<16x128xf32>
    %65 = vector.broadcast %47 : vector<1x128xf32> to vector<16x128xf32>
    %66 = arith.mulf %64, %65 : vector<16x128xf32>
    %67 = vector.broadcast %48 : vector<1x128xf32> to vector<16x128xf32>
    %68 = arith.addf %66, %67 : vector<16x128xf32>
    %69 = arith.mulf %68, %21 : vector<16x128xf32>
    %70 = arith.addf %69, %26 : vector<16x128xf32>
    %c0_21 = arith.constant 0 : index
    %c0_22 = arith.constant 0 : index
    %71 = vector.load %arg3[%c0_21, %c0_22] : memref<128x384xf32, #tpu.memory_space<vmem>>, vector<128x384xf32>
    %cst_23 = arith.constant dense<0.000000e+00> : vector<16x384xf32>
    %72 = tpu.matmul %70, %71, %cst_23 {dimension_numbers = #tpu.dot_dimension_numbers<[1], [0], [0], [1], [0, 0, 1, 1], [], []>} : vector<16x128xf32>, vector<128x384xf32>, vector<16x384xf32> -> vector<16x384xf32>
    %c0_24 = arith.constant 0 : index
    %c0_25 = arith.constant 0 : index
    %73 = vector.load %arg4[%c0_24, %c0_25] : memref<1x384xf32, #tpu.memory_space<vmem>>, vector<1x384xf32>
    %74 = vector.broadcast %73 : vector<1x384xf32> to vector<16x384xf32>
    %75 = arith.addf %72, %74 : vector<16x384xf32>
    %76 = vector.extract_strided_slice %75 {offsets = [0, 0], sizes = [16, 128], strides = [1, 1]} : vector<16x384xf32> to vector<16x128xf32>
    %77 = vector.extract_strided_slice %75 {offsets = [0, 128], sizes = [16, 128], strides = [1, 1]} : vector<16x384xf32> to vector<16x128xf32>
    %78 = vector.extract_strided_slice %75 {offsets = [0, 256], sizes = [16, 128], strides = [1, 1]} : vector<16x384xf32> to vector<16x128xf32>
    %c0_26 = arith.constant 0 : index
    %c0_27 = arith.constant 0 : index
    %79 = vector.load %arg5[%c0_26, %c0_27] : memref<128x128xf32, #tpu.memory_space<vmem>>, vector<128x128xf32>
    %c0_28 = arith.constant 0 : index
    %c0_29 = arith.constant 0 : index
    %80 = vector.load %arg6[%c0_28, %c0_29] : memref<1x128xf32, #tpu.memory_space<vmem>>, vector<1x128xf32>
    %81 = vector.extract_strided_slice %76 {offsets = [0, 0], sizes = [16, 32], strides = [1, 1]} : vector<16x128xf32> to vector<16x32xf32>
    %82 = vector.shape_cast %81 : vector<16x32xf32> to vector<8x2x32xf32>
    %cst_30 = arith.constant 0.176776692 : f32
    %83 = vector.broadcast %cst_30 : f32 to vector<8x2x32xf32>
    %84 = arith.mulf %82, %83 : vector<8x2x32xf32>
    %85 = vector.extract_strided_slice %77 {offsets = [0, 0], sizes = [16, 32], strides = [1, 1]} : vector<16x128xf32> to vector<16x32xf32>
    %86 = vector.shape_cast %85 : vector<16x32xf32> to vector<8x2x32xf32>
    %87 = vector.extract_strided_slice %78 {offsets = [0, 0], sizes = [16, 32], strides = [1, 1]} : vector<16x128xf32> to vector<16x32xf32>
    %88 = vector.shape_cast %87 : vector<16x32xf32> to vector<8x2x32xf32>
    "tpu.trace_start"() <{level = 10 : i32, message = "gnd,gmd->gnm"}> : () -> ()
    %cst_31 = arith.constant dense<0.000000e+00> : vector<8x2x2xf32>
    %89 = tpu.matmul %84, %86, %cst_31 {dimension_numbers = #tpu.dot_dimension_numbers<[2], [2], [1], [1], [0, 0, 0, 1, 1, 1], [0], [0]>} : vector<8x2x32xf32>, vector<8x2x32xf32>, vector<8x2x2xf32> -> vector<8x2x2xf32>
    "tpu.trace_stop"() : () -> ()
    %cst_32 = arith.constant dense<0xFF800000> : vector<8x2xf32>
    %90 = vector.multi_reduction <maximumf>, %89, %cst_32 [2] : vector<8x2x2xf32> to vector<8x2xf32>
    %91 = vector.shape_cast %90 : vector<8x2xf32> to vector<8x2x1xf32>
    %92 = vector.broadcast %91 : vector<8x2x1xf32> to vector<8x2x2xf32>
    %93 = arith.subf %89, %92 : vector<8x2x2xf32>
    %94 = math.exp %93 : vector<8x2x2xf32>
    %cst_33 = arith.constant dense<0.000000e+00> : vector<8x2xf32>
    %95 = vector.multi_reduction <add>, %94, %cst_33 [2] : vector<8x2x2xf32> to vector<8x2xf32>
    %96 = vector.shape_cast %95 : vector<8x2xf32> to vector<8x2x1xf32>
    %97 = tpu.reciprocal %96 {approx = true} : vector<8x2x1xf32> -> vector<8x2x1xf32>
    %98 = vector.broadcast %97 : vector<8x2x1xf32> to vector<8x2x2xf32>
    %99 = arith.mulf %94, %98 : vector<8x2x2xf32>
    "tpu.trace_start"() <{level = 10 : i32, message = "gnm,gmd->gnd"}> : () -> ()
    %cst_34 = arith.constant dense<0.000000e+00> : vector<8x2x32xf32>
    %100 = tpu.matmul %99, %88, %cst_34 {dimension_numbers = #tpu.dot_dimension_numbers<[2], [1], [1], [2], [0, 0, 0, 1, 1, 2], [0], [0]>} : vector<8x2x2xf32>, vector<8x2x32xf32>, vector<8x2x32xf32> -> vector<8x2x32xf32>
    "tpu.trace_stop"() : () -> ()
    %101 = vector.shape_cast %100 : vector<8x2x32xf32> to vector<16x32xf32>
    %102 = vector.extract_strided_slice %79 {offsets = [0, 0], sizes = [32, 128], strides = [1, 1]} : vector<128x128xf32> to vector<32x128xf32>
    %cst_35 = arith.constant dense<0.000000e+00> : vector<16x128xf32>
    %103 = tpu.matmul %101, %102, %cst_35 {dimension_numbers = #tpu.dot_dimension_numbers<[1], [0], [0], [1], [0, 0, 1, 1], [], []>} : vector<16x32xf32>, vector<32x128xf32>, vector<16x128xf32> -> vector<16x128xf32>
    %104 = vector.extract_strided_slice %76 {offsets = [0, 32], sizes = [16, 32], strides = [1, 1]} : vector<16x128xf32> to vector<16x32xf32>
    %105 = vector.shape_cast %104 : vector<16x32xf32> to vector<8x2x32xf32>
    %cst_36 = arith.constant 0.176776692 : f32
    %106 = vector.broadcast %cst_36 : f32 to vector<8x2x32xf32>
    %107 = arith.mulf %105, %106 : vector<8x2x32xf32>
    %108 = vector.extract_strided_slice %77 {offsets = [0, 32], sizes = [16, 32], strides = [1, 1]} : vector<16x128xf32> to vector<16x32xf32>
    %109 = vector.shape_cast %108 : vector<16x32xf32> to vector<8x2x32xf32>
    %110 = vector.extract_strided_slice %78 {offsets = [0, 32], sizes = [16, 32], strides = [1, 1]} : vector<16x128xf32> to vector<16x32xf32>
    %111 = vector.shape_cast %110 : vector<16x32xf32> to vector<8x2x32xf32>
    "tpu.trace_start"() <{level = 10 : i32, message = "gnd,gmd->gnm"}> : () -> ()
    %cst_37 = arith.constant dense<0.000000e+00> : vector<8x2x2xf32>
    %112 = tpu.matmul %107, %109, %cst_37 {dimension_numbers = #tpu.dot_dimension_numbers<[2], [2], [1], [1], [0, 0, 0, 1, 1, 1], [0], [0]>} : vector<8x2x32xf32>, vector<8x2x32xf32>, vector<8x2x2xf32> -> vector<8x2x2xf32>
    "tpu.trace_stop"() : () -> ()
    %cst_38 = arith.constant dense<0xFF800000> : vector<8x2xf32>
    %113 = vector.multi_reduction <maximumf>, %112, %cst_38 [2] : vector<8x2x2xf32> to vector<8x2xf32>
    %114 = vector.shape_cast %113 : vector<8x2xf32> to vector<8x2x1xf32>
    %115 = vector.broadcast %114 : vector<8x2x1xf32> to vector<8x2x2xf32>
    %116 = arith.subf %112, %115 : vector<8x2x2xf32>
    %117 = math.exp %116 : vector<8x2x2xf32>
    %cst_39 = arith.constant dense<0.000000e+00> : vector<8x2xf32>
    %118 = vector.multi_reduction <add>, %117, %cst_39 [2] : vector<8x2x2xf32> to vector<8x2xf32>
    %119 = vector.shape_cast %118 : vector<8x2xf32> to vector<8x2x1xf32>
    %120 = tpu.reciprocal %119 {approx = true} : vector<8x2x1xf32> -> vector<8x2x1xf32>
    %121 = vector.broadcast %120 : vector<8x2x1xf32> to vector<8x2x2xf32>
    %122 = arith.mulf %117, %121 : vector<8x2x2xf32>
    "tpu.trace_start"() <{level = 10 : i32, message = "gnm,gmd->gnd"}> : () -> ()
    %cst_40 = arith.constant dense<0.000000e+00> : vector<8x2x32xf32>
    %123 = tpu.matmul %122, %111, %cst_40 {dimension_numbers = #tpu.dot_dimension_numbers<[2], [1], [1], [2], [0, 0, 0, 1, 1, 2], [0], [0]>} : vector<8x2x2xf32>, vector<8x2x32xf32>, vector<8x2x32xf32> -> vector<8x2x32xf32>
    "tpu.trace_stop"() : () -> ()
    %124 = vector.shape_cast %123 : vector<8x2x32xf32> to vector<16x32xf32>
    %125 = vector.extract_strided_slice %79 {offsets = [32, 0], sizes = [32, 128], strides = [1, 1]} : vector<128x128xf32> to vector<32x128xf32>
    %cst_41 = arith.constant dense<0.000000e+00> : vector<16x128xf32>
    %126 = tpu.matmul %124, %125, %cst_41 {dimension_numbers = #tpu.dot_dimension_numbers<[1], [0], [0], [1], [0, 0, 1, 1], [], []>} : vector<16x32xf32>, vector<32x128xf32>, vector<16x128xf32> -> vector<16x128xf32>
    %127 = arith.addf %103, %126 : vector<16x128xf32>
    %128 = vector.extract_strided_slice %76 {offsets = [0, 64], sizes = [16, 32], strides = [1, 1]} : vector<16x128xf32> to vector<16x32xf32>
    %129 = vector.shape_cast %128 : vector<16x32xf32> to vector<8x2x32xf32>
    %cst_42 = arith.constant 0.176776692 : f32
    %130 = vector.broadcast %cst_42 : f32 to vector<8x2x32xf32>
    %131 = arith.mulf %129, %130 : vector<8x2x32xf32>
    %132 = vector.extract_strided_slice %77 {offsets = [0, 64], sizes = [16, 32], strides = [1, 1]} : vector<16x128xf32> to vector<16x32xf32>
    %133 = vector.shape_cast %132 : vector<16x32xf32> to vector<8x2x32xf32>
    %134 = vector.extract_strided_slice %78 {offsets = [0, 64], sizes = [16, 32], strides = [1, 1]} : vector<16x128xf32> to vector<16x32xf32>
    %135 = vector.shape_cast %134 : vector<16x32xf32> to vector<8x2x32xf32>
    "tpu.trace_start"() <{level = 10 : i32, message = "gnd,gmd->gnm"}> : () -> ()
    %cst_43 = arith.constant dense<0.000000e+00> : vector<8x2x2xf32>
    %136 = tpu.matmul %131, %133, %cst_43 {dimension_numbers = #tpu.dot_dimension_numbers<[2], [2], [1], [1], [0, 0, 0, 1, 1, 1], [0], [0]>} : vector<8x2x32xf32>, vector<8x2x32xf32>, vector<8x2x2xf32> -> vector<8x2x2xf32>
    "tpu.trace_stop"() : () -> ()
    %cst_44 = arith.constant dense<0xFF800000> : vector<8x2xf32>
    %137 = vector.multi_reduction <maximumf>, %136, %cst_44 [2] : vector<8x2x2xf32> to vector<8x2xf32>
    %138 = vector.shape_cast %137 : vector<8x2xf32> to vector<8x2x1xf32>
    %139 = vector.broadcast %138 : vector<8x2x1xf32> to vector<8x2x2xf32>
    %140 = arith.subf %136, %139 : vector<8x2x2xf32>
    %141 = math.exp %140 : vector<8x2x2xf32>
    %cst_45 = arith.constant dense<0.000000e+00> : vector<8x2xf32>
    %142 = vector.multi_reduction <add>, %141, %cst_45 [2] : vector<8x2x2xf32> to vector<8x2xf32>
    %143 = vector.shape_cast %142 : vector<8x2xf32> to vector<8x2x1xf32>
    %144 = tpu.reciprocal %143 {approx = true} : vector<8x2x1xf32> -> vector<8x2x1xf32>
    %145 = vector.broadcast %144 : vector<8x2x1xf32> to vector<8x2x2xf32>
    %146 = arith.mulf %141, %145 : vector<8x2x2xf32>
    "tpu.trace_start"() <{level = 10 : i32, message = "gnm,gmd->gnd"}> : () -> ()
    %cst_46 = arith.constant dense<0.000000e+00> : vector<8x2x32xf32>
    %147 = tpu.matmul %146, %135, %cst_46 {dimension_numbers = #tpu.dot_dimension_numbers<[2], [1], [1], [2], [0, 0, 0, 1, 1, 2], [0], [0]>} : vector<8x2x2xf32>, vector<8x2x32xf32>, vector<8x2x32xf32> -> vector<8x2x32xf32>
    "tpu.trace_stop"() : () -> ()
    %148 = vector.shape_cast %147 : vector<8x2x32xf32> to vector<16x32xf32>
    %149 = vector.extract_strided_slice %79 {offsets = [64, 0], sizes = [32, 128], strides = [1, 1]} : vector<128x128xf32> to vector<32x128xf32>
    %cst_47 = arith.constant dense<0.000000e+00> : vector<16x128xf32>
    %150 = tpu.matmul %148, %149, %cst_47 {dimension_numbers = #tpu.dot_dimension_numbers<[1], [0], [0], [1], [0, 0, 1, 1], [], []>} : vector<16x32xf32>, vector<32x128xf32>, vector<16x128xf32> -> vector<16x128xf32>
    %151 = arith.addf %127, %150 : vector<16x128xf32>
    %152 = vector.extract_strided_slice %76 {offsets = [0, 96], sizes = [16, 32], strides = [1, 1]} : vector<16x128xf32> to vector<16x32xf32>
    %153 = vector.shape_cast %152 : vector<16x32xf32> to vector<8x2x32xf32>
    %cst_48 = arith.constant 0.176776692 : f32
    %154 = vector.broadcast %cst_48 : f32 to vector<8x2x32xf32>
    %155 = arith.mulf %153, %154 : vector<8x2x32xf32>
    %156 = vector.extract_strided_slice %77 {offsets = [0, 96], sizes = [16, 32], strides = [1, 1]} : vector<16x128xf32> to vector<16x32xf32>
    %157 = vector.shape_cast %156 : vector<16x32xf32> to vector<8x2x32xf32>
    %158 = vector.extract_strided_slice %78 {offsets = [0, 96], sizes = [16, 32], strides = [1, 1]} : vector<16x128xf32> to vector<16x32xf32>
    %159 = vector.shape_cast %158 : vector<16x32xf32> to vector<8x2x32xf32>
    "tpu.trace_start"() <{level = 10 : i32, message = "gnd,gmd->gnm"}> : () -> ()
    %cst_49 = arith.constant dense<0.000000e+00> : vector<8x2x2xf32>
    %160 = tpu.matmul %155, %157, %cst_49 {dimension_numbers = #tpu.dot_dimension_numbers<[2], [2], [1], [1], [0, 0, 0, 1, 1, 1], [0], [0]>} : vector<8x2x32xf32>, vector<8x2x32xf32>, vector<8x2x2xf32> -> vector<8x2x2xf32>
    "tpu.trace_stop"() : () -> ()
    %cst_50 = arith.constant dense<0xFF800000> : vector<8x2xf32>
    %161 = vector.multi_reduction <maximumf>, %160, %cst_50 [2] : vector<8x2x2xf32> to vector<8x2xf32>
    %162 = vector.shape_cast %161 : vector<8x2xf32> to vector<8x2x1xf32>
    %163 = vector.broadcast %162 : vector<8x2x1xf32> to vector<8x2x2xf32>
    %164 = arith.subf %160, %163 : vector<8x2x2xf32>
    %165 = math.exp %164 : vector<8x2x2xf32>
    %cst_51 = arith.constant dense<0.000000e+00> : vector<8x2xf32>
    %166 = vector.multi_reduction <add>, %165, %cst_51 [2] : vector<8x2x2xf32> to vector<8x2xf32>
    %167 = vector.shape_cast %166 : vector<8x2xf32> to vector<8x2x1xf32>
    %168 = tpu.reciprocal %167 {approx = true} : vector<8x2x1xf32> -> vector<8x2x1xf32>
    %169 = vector.broadcast %168 : vector<8x2x1xf32> to vector<8x2x2xf32>
    %170 = arith.mulf %165, %169 : vector<8x2x2xf32>
    "tpu.trace_start"() <{level = 10 : i32, message = "gnm,gmd->gnd"}> : () -> ()
    %cst_52 = arith.constant dense<0.000000e+00> : vector<8x2x32xf32>
    %171 = tpu.matmul %170, %159, %cst_52 {dimension_numbers = #tpu.dot_dimension_numbers<[2], [1], [1], [2], [0, 0, 0, 1, 1, 2], [0], [0]>} : vector<8x2x2xf32>, vector<8x2x32xf32>, vector<8x2x32xf32> -> vector<8x2x32xf32>
    "tpu.trace_stop"() : () -> ()
    %172 = vector.shape_cast %171 : vector<8x2x32xf32> to vector<16x32xf32>
    %173 = vector.extract_strided_slice %79 {offsets = [96, 0], sizes = [32, 128], strides = [1, 1]} : vector<128x128xf32> to vector<32x128xf32>
    %cst_53 = arith.constant dense<0.000000e+00> : vector<16x128xf32>
    %174 = tpu.matmul %172, %173, %cst_53 {dimension_numbers = #tpu.dot_dimension_numbers<[1], [0], [0], [1], [0, 0, 1, 1], [], []>} : vector<16x32xf32>, vector<32x128xf32>, vector<16x128xf32> -> vector<16x128xf32>
    %175 = arith.addf %151, %174 : vector<16x128xf32>
    %176 = vector.broadcast %80 : vector<1x128xf32> to vector<16x128xf32>
    %177 = arith.addf %175, %176 : vector<16x128xf32>
    %178 = arith.mulf %177, %31 : vector<16x128xf32>
    %179 = arith.addf %178, %0 : vector<16x128xf32>
    %c0_54 = arith.constant 0 : index
    %c0_55 = arith.constant 0 : index
    %180 = vector.load %arg9[%c0_54, %c0_55] : memref<1x128xf32, #tpu.memory_space<vmem>>, vector<1x128xf32>
    %c0_56 = arith.constant 0 : index
    %c0_57 = arith.constant 0 : index
    %181 = vector.load %arg10[%c0_56, %c0_57] : memref<1x128xf32, #tpu.memory_space<vmem>>, vector<1x128xf32>
    %cst_58 = arith.constant dense<0.000000e+00> : vector<16xf32>
    %182 = vector.multi_reduction <add>, %179, %cst_58 [1] : vector<16x128xf32> to vector<16xf32>
    %183 = vector.shape_cast %182 : vector<16xf32> to vector<16x1xf32>
    %cst_59 = arith.constant 1.280000e+02 : f32
    %184 = vector.broadcast %cst_59 : f32 to vector<16x1xf32>
    %185 = arith.divf %183, %184 : vector<16x1xf32>
    %186 = vector.broadcast %185 : vector<16x1xf32> to vector<16x128xf32>
    %187 = arith.subf %179, %186 : vector<16x128xf32>
    %188 = arith.mulf %187, %187 : vector<16x128xf32>
    %cst_60 = arith.constant dense<0.000000e+00> : vector<16xf32>
    %189 = vector.multi_reduction <add>, %188, %cst_60 [1] : vector<16x128xf32> to vector<16xf32>
    %190 = vector.shape_cast %189 : vector<16xf32> to vector<16x1xf32>
    %cst_61 = arith.constant 1.280000e+02 : f32
    %191 = vector.broadcast %cst_61 : f32 to vector<16x1xf32>
    %192 = arith.divf %190, %191 : vector<16x1xf32>
    %cst_62 = arith.constant 9.99999974E-6 : f32
    %193 = vector.broadcast %cst_62 : f32 to vector<16x1xf32>
    %194 = arith.addf %192, %193 : vector<16x1xf32>
    %195 = math.rsqrt %194 : vector<16x1xf32>
    %196 = vector.broadcast %195 : vector<16x1xf32> to vector<16x128xf32>
    %197 = arith.mulf %187, %196 : vector<16x128xf32>
    %198 = vector.broadcast %180 : vector<1x128xf32> to vector<16x128xf32>
    %199 = arith.mulf %197, %198 : vector<16x128xf32>
    %200 = vector.broadcast %181 : vector<1x128xf32> to vector<16x128xf32>
    %201 = arith.addf %199, %200 : vector<16x128xf32>
    %202 = arith.mulf %201, %36 : vector<16x128xf32>
    %203 = arith.addf %202, %41 : vector<16x128xf32>
    %c0_63 = arith.constant 0 : index
    %c0_64 = arith.constant 0 : index
    %204 = vector.load %arg13[%c0_63, %c0_64] : memref<128x256xf32, #tpu.memory_space<vmem>>, vector<128x256xf32>
    %cst_65 = arith.constant dense<0.000000e+00> : vector<16x256xf32>
    %205 = tpu.matmul %203, %204, %cst_65 {dimension_numbers = #tpu.dot_dimension_numbers<[1], [0], [0], [1], [0, 0, 1, 1], [], []>} : vector<16x128xf32>, vector<128x256xf32>, vector<16x256xf32> -> vector<16x256xf32>
    %c0_66 = arith.constant 0 : index
    %c0_67 = arith.constant 0 : index
    %206 = vector.load %arg14[%c0_66, %c0_67] : memref<1x256xf32, #tpu.memory_space<vmem>>, vector<1x256xf32>
    %207 = vector.broadcast %206 : vector<1x256xf32> to vector<16x256xf32>
    %208 = arith.addf %205, %207 : vector<16x256xf32>
    %cst_68 = arith.constant 5.000000e-01 : f32
    %209 = vector.broadcast %cst_68 : f32 to vector<16x256xf32>
    %210 = arith.mulf %209, %208 : vector<16x256xf32>
    %cst_69 = arith.constant 4.471500e-02 : f32
    %211 = vector.broadcast %cst_69 : f32 to vector<16x256xf32>
    %212 = arith.mulf %211, %208 : vector<16x256xf32>
    %213 = arith.mulf %212, %208 : vector<16x256xf32>
    %214 = arith.mulf %213, %208 : vector<16x256xf32>
    %215 = arith.addf %208, %214 : vector<16x256xf32>
    %cst_70 = arith.constant 0.797884583 : f32
    %216 = vector.broadcast %cst_70 : f32 to vector<16x256xf32>
    %217 = arith.mulf %216, %215 : vector<16x256xf32>
    %218 = math.tanh %217 : vector<16x256xf32>
    %cst_71 = arith.constant 1.000000e+00 : f32
    %219 = vector.broadcast %cst_71 : f32 to vector<16x256xf32>
    %220 = arith.addf %219, %218 : vector<16x256xf32>
    %221 = arith.mulf %210, %220 : vector<16x256xf32>
    %c0_72 = arith.constant 0 : index
    %c0_73 = arith.constant 0 : index
    %222 = vector.load %arg15[%c0_72, %c0_73] : memref<256x128xf32, #tpu.memory_space<vmem>>, vector<256x128xf32>
    %cst_74 = arith.constant dense<0.000000e+00> : vector<16x128xf32>
    %223 = tpu.matmul %221, %222, %cst_74 {dimension_numbers = #tpu.dot_dimension_numbers<[1], [0], [0], [1], [0, 0, 1, 1], [], []>} : vector<16x256xf32>, vector<256x128xf32>, vector<16x128xf32> -> vector<16x128xf32>
    %c0_75 = arith.constant 0 : index
    %c0_76 = arith.constant 0 : index
    %224 = vector.load %arg16[%c0_75, %c0_76] : memref<1x128xf32, #tpu.memory_space<vmem>>, vector<1x128xf32>
    %225 = vector.broadcast %224 : vector<1x128xf32> to vector<16x128xf32>
    %226 = arith.addf %223, %225 : vector<16x128xf32>
    %227 = arith.mulf %226, %46 : vector<16x128xf32>
    %228 = arith.addf %179, %227 : vector<16x128xf32>
    %c0_77 = arith.constant 0 : index
    %c0_78 = arith.constant 0 : index
    %229 = vector.load %arg17[%c0_77, %c0_78] : memref<16x128xf32, #tpu.memory_space<vmem>>, vector<16x128xf32>
    tpu.vector_store %arg17[%c0_77, %c0_78], %228 {strides = array<i32>} : memref<16x128xf32, #tpu.memory_space<vmem>>, vector<16x128xf32>,
    return
  }
}

module attributes {stable_mosaic.version = 11 : i64} {
  func.func @_decoder_layer_kernel(%arg0: memref<16x128xf32, #tpu.memory_space<vmem>>, %arg1: memref<2x128xf32, #tpu.memory_space<vmem>>, %arg2: memref<2x128xf32, #tpu.memory_space<vmem>>, %arg3: memref<128x384xf32, #tpu.memory_space<vmem>>, %arg4: memref<1x384xf32, #tpu.memory_space<vmem>>, %arg5: memref<128x128xf32, #tpu.memory_space<vmem>>, %arg6: memref<1x128xf32, #tpu.memory_space<vmem>>, %arg7: memref<1x128xf32, #tpu.memory_space<vmem>>, %arg8: memref<1x128xf32, #tpu.memory_space<vmem>>, %arg9: memref<1x128xf32, #tpu.memory_space<vmem>>, %arg10: memref<1x128xf32, #tpu.memory_space<vmem>>, %arg11: memref<128x768xf32, #tpu.memory_space<vmem>>, %arg12: memref<1x768xf32, #tpu.memory_space<vmem>>, %arg13: memref<128x256xf32, #tpu.memory_space<vmem>>, %arg14: memref<1x256xf32, #tpu.memory_space<vmem>>, %arg15: memref<256x128xf32, #tpu.memory_space<vmem>>, %arg16: memref<1x128xf32, #tpu.memory_space<vmem>>, %arg17: memref<16x128xf32, #tpu.memory_space<vmem>>) attributes {dimension_semantics = [], scalar_prefetch = 0 : i64, scratch_operands = 0 : i64, tpu.core_type = #tpu.core_type<tc>} {
    %c0 = arith.constant 0 : index
    %c0_0 = arith.constant 0 : index
    %0 = vector.load %arg0[%c0, %c0_0] : memref<16x128xf32, #tpu.memory_space<vmem>>, vector<16x128xf32>
    %c0_1 = arith.constant 0 : index
    %c0_2 = arith.constant 0 : index
    %1 = vector.load %arg2[%c0_1, %c0_2] : memref<2x128xf32, #tpu.memory_space<vmem>>, vector<2x128xf32>
    %c0_3 = arith.constant 0 : index
    %c0_4 = arith.constant 0 : index
    %2 = vector.load %arg1[%c0_3, %c0_4] : memref<2x128xf32, #tpu.memory_space<vmem>>, vector<2x128xf32>
    %3 = arith.addf %1, %2 : vector<2x128xf32>
    %cst = arith.constant 0.000000e+00 : f32
    %4 = vector.broadcast %cst : f32 to vector<2x128xf32>
    %5 = arith.subf %4, %3 : vector<2x128xf32>
    %6 = math.exp %5 : vector<2x128xf32>
    %cst_5 = arith.constant 1.000000e+00 : f32
    %7 = vector.broadcast %cst_5 : f32 to vector<2x128xf32>
    %8 = arith.addf %7, %6 : vector<2x128xf32>
    %cst_6 = arith.constant 1.000000e+00 : f32
    %9 = vector.broadcast %cst_6 : f32 to vector<2x128xf32>
    %10 = arith.divf %9, %8 : vector<2x128xf32>
    %11 = arith.mulf %3, %10 : vector<2x128xf32>
    %c0_7 = arith.constant 0 : index
    %c0_8 = arith.constant 0 : index
    %12 = vector.load %arg11[%c0_7, %c0_8] : memref<128x768xf32, #tpu.memory_space<vmem>>, vector<128x768xf32>
    %cst_9 = arith.constant dense<0.000000e+00> : vector<2x768xf32>
    %13 = tpu.matmul %11, %12, %cst_9 {dimension_numbers = #tpu.dot_dimension_numbers<[1], [0], [0], [1], [0, 0, 1, 1], [], []>} : vector<2x128xf32>, vector<128x768xf32>, vector<2x768xf32> -> vector<2x768xf32>
    %c0_10 = arith.constant 0 : index
    %c0_11 = arith.constant 0 : index
    %14 = vector.load %arg12[%c0_10, %c0_11] : memref<1x768xf32, #tpu.memory_space<vmem>>, vector<1x768xf32>
    %15 = vector.broadcast %14 : vector<1x768xf32> to vector<2x768xf32>
    %16 = arith.addf %13, %15 : vector<2x768xf32>
    %17 = vector.extract_strided_slice %16 {offsets = [0, 0], sizes = [2, 128], strides = [1, 1]} : vector<2x768xf32> to vector<2x128xf32>
    %18 = vector.shape_cast %17 : vector<2x128xf32> to vector<1x2x128xf32>
    %19 = vector.shape_cast %18 : vector<1x2x128xf32> to vector<1x2x128xf32>
    %20 = vector.broadcast %19 : vector<1x2x128xf32> to vector<8x2x128xf32>
    %21 = vector.shape_cast %20 : vector<8x2x128xf32> to vector<16x128xf32>
    %22 = vector.extract_strided_slice %16 {offsets = [0, 128], sizes = [2, 128], strides = [1, 1]} : vector<2x768xf32> to vector<2x128xf32>
    %23 = vector.shape_cast %22 : vector<2x128xf32> to vector<1x2x128xf32>
    %24 = vector.shape_cast %23 : vector<1x2x128xf32> to vector<1x2x128xf32>
    %25 = vector.broadcast %24 : vector<1x2x128xf32> to vector<8x2x128xf32>
    %26 = vector.shape_cast %25 : vector<8x2x128xf32> to vector<16x128xf32>
    %27 = vector.extract_strided_slice %16 {offsets = [0, 256], sizes = [2, 128], strides = [1, 1]} : vector<2x768xf32> to vector<2x128xf32>
    %28 = vector.shape_cast %27 : vector<2x128xf32> to vector<1x2x128xf32>
    %29 = vector.shape_cast %28 : vector<1x2x128xf32> to vector<1x2x128xf32>
    %30 = vector.broadcast %29 : vector<1x2x128xf32> to vector<8x2x128xf32>
    %31 = vector.shape_cast %30 : vector<8x2x128xf32> to vector<16x128xf32>
    %32 = vector.extract_strided_slice %16 {offsets = [0, 384], sizes = [2, 128], strides = [1, 1]} : vector<2x768xf32> to vector<2x128xf32>
    %33 = vector.shape_cast %32 : vector<2x128xf32> to vector<1x2x128xf32>
    %34 = vector.shape_cast %33 : vector<1x2x128xf32> to vector<1x2x128xf32>
    %35 = vector.broadcast %34 : vector<1x2x128xf32> to vector<8x2x128xf32>
    %36 = vector.shape_cast %35 : vector<8x2x128xf32> to vector<16x128xf32>
    %37 = vector.extract_strided_slice %16 {offsets = [0, 512], sizes = [2, 128], strides = [1, 1]} : vector<2x768xf32> to vector<2x128xf32>
    %38 = vector.shape_cast %37 : vector<2x128xf32> to vector<1x2x128xf32>
    %39 = vector.shape_cast %38 : vector<1x2x128xf32> to vector<1x2x128xf32>
    %40 = vector.broadcast %39 : vector<1x2x128xf32> to vector<8x2x128xf32>
    %41 = vector.shape_cast %40 : vector<8x2x128xf32> to vector<16x128xf32>
    %42 = vector.extract_strided_slice %16 {offsets = [0, 640], sizes = [2, 128], strides = [1, 1]} : vector<2x768xf32> to vector<2x128xf32>
    %43 = vector.shape_cast %42 : vector<2x128xf32> to vector<1x2x128xf32>
    %44 = vector.shape_cast %43 : vector<1x2x128xf32> to vector<1x2x128xf32>
    %45 = vector.broadcast %44 : vector<1x2x128xf32> to vector<8x2x128xf32>
    %46 = vector.shape_cast %45 : vector<8x2x128xf32> to vector<16x128xf32>
    %c0_12 = arith.constant 0 : index
    %c0_13 = arith.constant 0 : index
    %47 = vector.load %arg7[%c0_12, %c0_13] : memref<1x128xf32, #tpu.memory_space<vmem>>, vector<1x128xf32>
    %c0_14 = arith.constant 0 : index
    %c0_15 = arith.constant 0 : index
    %48 = vector.load %arg8[%c0_14, %c0_15] : memref<1x128xf32, #tpu.memory_space<vmem>>, vector<1x128xf32>
    %cst_16 = arith.constant dense<0.000000e+00> : vector<16xf32>
    %49 = vector.multi_reduction <add>, %0, %cst_16 [1] : vector<16x128xf32> to vector<16xf32>
    %50 = vector.shape_cast %49 : vector<16xf32> to vector<16x1xf32>
    %cst_17 = arith.constant 1.280000e+02 : f32
    %51 = vector.broadcast %cst_17 : f32 to vector<16x1xf32>
    %52 = arith.divf %50, %51 : vector<16x1xf32>
    %53 = vector.broadcast %52 : vector<16x1xf32> to vector<16x128xf32>
    %54 = arith.subf %0, %53 : vector<16x128xf32>
    %55 = arith.mulf %54, %54 : vector<16x128xf32>
    %cst_18 = arith.constant dense<0.000000e+00> : vector<16xf32>
    %56 = vector.multi_reduction <add>, %55, %cst_18 [1] : vector<16x128xf32> to vector<16xf32>
    %57 = vector.shape_cast %56 : vector<16xf32> to vector<16x1xf32>
    %cst_19 = arith.constant 1.280000e+02 : f32
    %58 = vector.broadcast %cst_19 : f32 to vector<16x1xf32>
    %59 = arith.divf %57, %58 : vector<16x1xf32>
    %cst_20 = arith.constant 9.99999974E-6 : f32
    %60 = vector.broadcast %cst_20 : f32 to vector<16x1xf32>
    %61 = arith.addf %59, %60 : vector<16x1xf32>
    %62 = math.rsqrt %61 : vector<16x1xf32>
    %63 = vector.broadcast %62 : vector<16x1xf32> to vector<16x128xf32>
    %64 = arith.mulf %54, %63 : vector<16x128xf32>
    %65 = vector.broadcast %47 : vector<1x128xf32> to vector<16x128xf32>
    %66 = arith.mulf %64, %65 : vector<16x128xf32>
    %67 = vector.broadcast %48 : vector<1x128xf32> to vector<16x128xf32>
    %68 = arith.addf %66, %67 : vector<16x128xf32>
    %69 = arith.mulf %68, %21 : vector<16x128xf32>
    %70 = arith.addf %69, %26 : vector<16x128xf32>
    %c0_21 = arith.constant 0 : index
    %c0_22 = arith.constant 0 : index
    %71 = vector.load %arg3[%c0_21, %c0_22] : memref<128x384xf32, #tpu.memory_space<vmem>>, vector<128x384xf32>
    %cst_23 = arith.constant dense<0.000000e+00> : vector<16x384xf32>
    %72 = tpu.matmul %70, %71, %cst_23 {dimension_numbers = #tpu.dot_dimension_numbers<[1], [0], [0], [1], [0, 0, 1, 1], [], []>} : vector<16x128xf32>, vector<128x384xf32>, vector<16x384xf32> -> vector<16x384xf32>
    %c0_24 = arith.constant 0 : index
    %c0_25 = arith.constant 0 : index
    %73 = vector.load %arg4[%c0_24, %c0_25] : memref<1x384xf32, #tpu.memory_space<vmem>>, vector<1x384xf32>
    %74 = vector.broadcast %73 : vector<1x384xf32> to vector<16x384xf32>
    %75 = arith.addf %72, %74 : vector<16x384xf32>
    %76 = vector.extract_strided_slice %75 {offsets = [0, 0], sizes = [16, 128], strides = [1, 1]} : vector<16x384xf32> to vector<16x128xf32>
    %77 = vector.extract_strided_slice %75 {offsets = [0, 128], sizes = [16, 128], strides = [1, 1]} : vector<16x384xf32> to vector<16x128xf32>
    %78 = vector.extract_strided_slice %75 {offsets = [0, 256], sizes = [16, 128], strides = [1, 1]} : vector<16x384xf32> to vector<16x128xf32>
    %c0_26 = arith.constant 0 : index
    %c0_27 = arith.constant 0 : index
    %79 = vector.load %arg5[%c0_26, %c0_27] : memref<128x128xf32, #tpu.memory_space<vmem>>, vector<128x128xf32>
    %c0_28 = arith.constant 0 : index
    %c0_29 = arith.constant 0 : index
    %80 = vector.load %arg6[%c0_28, %c0_29] : memref<1x128xf32, #tpu.memory_space<vmem>>, vector<1x128xf32>
    %81 = vector.extract_strided_slice %76 {offsets = [0, 0], sizes = [16, 32], strides = [1, 1]} : vector<16x128xf32> to vector<16x32xf32>
    %82 = vector.shape_cast %81 : vector<16x32xf32> to vector<8x2x32xf32>
    %cst_30 = arith.constant 0.176776692 : f32
    %83 = vector.broadcast %cst_30 : f32 to vector<8x2x32xf32>
    %84 = arith.mulf %82, %83 : vector<8x2x32xf32>
    %85 = vector.extract_strided_slice %77 {offsets = [0, 0], sizes = [16, 32], strides = [1, 1]} : vector<16x128xf32> to vector<16x32xf32>
    %86 = vector.shape_cast %85 : vector<16x32xf32> to vector<8x2x32xf32>
    %87 = vector.extract_strided_slice %78 {offsets = [0, 0], sizes = [16, 32], strides = [1, 1]} : vector<16x128xf32> to vector<16x32xf32>
    %88 = vector.shape_cast %87 : vector<16x32xf32> to vector<8x2x32xf32>
    "tpu.trace_start"() <{level = 10 : i32, message = "gnd,gmd->gnm"}> : () -> ()
    %cst_31 = arith.constant dense<0.000000e+00> : vector<8x2x2xf32>
    %89 = tpu.matmul %84, %86, %cst_31 {dimension_numbers = #tpu.dot_dimension_numbers<[2], [2], [1], [1], [0, 0, 0, 1, 1, 1], [0], [0]>} : vector<8x2x32xf32>, vector<8x2x32xf32>, vector<8x2x2xf32> -> vector<8x2x2xf32>
    "tpu.trace_stop"() : () -> ()
    %cst_32 = arith.constant dense<0xFF800000> : vector<8x2xf32>
    %90 = vector.multi_reduction <maximumf>, %89, %cst_32 [2] : vector<8x2x2xf32> to vector<8x2xf32>
    %91 = vector.shape_cast %90 : vector<8x2xf32> to vector<8x2x1xf32>
    %92 = vector.broadcast %91 : vector<8x2x1xf32> to vector<8x2x2xf32>
    %93 = arith.subf %89, %92 : vector<8x2x2xf32>
    %94 = math.exp %93 : vector<8x2x2xf32>
    %cst_33 = arith.constant dense<0.000000e+00> : vector<8x2xf32>
    %95 = vector.multi_reduction <add>, %94, %cst_33 [2] : vector<8x2x2xf32> to vector<8x2xf32>
    %96 = vector.shape_cast %95 : vector<8x2xf32> to vector<8x2x1xf32>
    %97 = tpu.reciprocal %96 {approx = true} : vector<8x2x1xf32> -> vector<8x2x1xf32>
    %98 = vector.broadcast %97 : vector<8x2x1xf32> to vector<8x2x2xf32>
    %99 = arith.mulf %94, %98 : vector<8x2x2xf32>
    "tpu.trace_start"() <{level = 10 : i32, message = "gnm,gmd->gnd"}> : () -> ()
    %cst_34 = arith.constant dense<0.000000e+00> : vector<8x2x32xf32>
    %100 = tpu.matmul %99, %88, %cst_34 {dimension_numbers = #tpu.dot_dimension_numbers<[2], [1], [1], [2], [0, 0, 0, 1, 1, 2], [0], [0]>} : vector<8x2x2xf32>, vector<8x2x32xf32>, vector<8x2x32xf32> -> vector<8x2x32xf32>
    "tpu.trace_stop"() : () -> ()
    %101 = vector.shape_cast %100 : vector<8x2x32xf32> to vector<16x32xf32>
    %102 = vector.extract_strided_slice %79 {offsets = [0, 0], sizes = [32, 128], strides = [1, 1]} : vector<128x128xf32> to vector<32x128xf32>
    %cst_35 = arith.constant dense<0.000000e+00> : vector<16x128xf32>
    %103 = tpu.matmul %101, %102, %cst_35 {dimension_numbers = #tpu.dot_dimension_numbers<[1], [0], [0], [1], [0, 0, 1, 1], [], []>} : vector<16x32xf32>, vector<32x128xf32>, vector<16x128xf32> -> vector<16x128xf32>
    %104 = vector.extract_strided_slice %76 {offsets = [0, 32], sizes = [16, 32], strides = [1, 1]} : vector<16x128xf32> to vector<16x32xf32>
    %105 = vector.shape_cast %104 : vector<16x32xf32> to vector<8x2x32xf32>
    %cst_36 = arith.constant 0.176776692 : f32
    %106 = vector.broadcast %cst_36 : f32 to vector<8x2x32xf32>
    %107 = arith.mulf %105, %106 : vector<8x2x32xf32>
    %108 = vector.extract_strided_slice %77 {offsets = [0, 32], sizes = [16, 32], strides = [1, 1]} : vector<16x128xf32> to vector<16x32xf32>
    %109 = vector.shape_cast %108 : vector<16x32xf32> to vector<8x2x32xf32>
    %110 = vector.extract_strided_slice %78 {offsets = [0, 32], sizes = [16, 32], strides = [1, 1]} : vector<16x128xf32> to vector<16x32xf32>
    %111 = vector.shape_cast %110 : vector<16x32xf32> to vector<8x2x32xf32>
    "tpu.trace_start"() <{level = 10 : i32, message = "gnd,gmd->gnm"}> : () -> ()
    %cst_37 = arith.constant dense<0.000000e+00> : vector<8x2x2xf32>
    %112 = tpu.matmul %107, %109, %cst_37 {dimension_numbers = #tpu.dot_dimension_numbers<[2], [2], [1], [1], [0, 0, 0, 1, 1, 1], [0], [0]>} : vector<8x2x32xf32>, vector<8x2x32xf32>, vector<8x2x2xf32> -> vector<8x2x2xf32>
    "tpu.trace_stop"() : () -> ()
    %cst_38 = arith.constant dense<0xFF800000> : vector<8x2xf32>
    %113 = vector.multi_reduction <maximumf>, %112, %cst_38 [2] : vector<8x2x2xf32> to vector<8x2xf32>
    %114 = vector.shape_cast %113 : vector<8x2xf32> to vector<8x2x1xf32>
    %115 = vector.broadcast %114 : vector<8x2x1xf32> to vector<8x2x2xf32>
    %116 = arith.subf %112, %115 : vector<8x2x2xf32>
    %117 = math.exp %116 : vector<8x2x2xf32>
    %cst_39 = arith.constant dense<0.000000e+00> : vector<8x2xf32>
    %118 = vector.multi_reduction <add>, %117, %cst_39 [2] : vector<8x2x2xf32> to vector<8x2xf32>
    %119 = vector.shape_cast %118 : vector<8x2xf32> to vector<8x2x1xf32>
    %120 = tpu.reciprocal %119 {approx = true} : vector<8x2x1xf32> -> vector<8x2x1xf32>
    %121 = vector.broadcast %120 : vector<8x2x1xf32> to vector<8x2x2xf32>
    %122 = arith.mulf %117, %121 : vector<8x2x2xf32>
    "tpu.trace_start"() <{level = 10 : i32, message = "gnm,gmd->gnd"}> : () -> ()
    %cst_40 = arith.constant dense<0.000000e+00> : vector<8x2x32xf32>
    %123 = tpu.matmul %122, %111, %cst_40 {dimension_numbers = #tpu.dot_dimension_numbers<[2], [1], [1], [2], [0, 0, 0, 1, 1, 2], [0], [0]>} : vector<8x2x2xf32>, vector<8x2x32xf32>, vector<8x2x32xf32> -> vector<8x2x32xf32>
    "tpu.trace_stop"() : () -> ()
    %124 = vector.shape_cast %123 : vector<8x2x32xf32> to vector<16x32xf32>
    %125 = vector.extract_strided_slice %79 {offsets = [32, 0], sizes = [32, 128], strides = [1, 1]} : vector<128x128xf32> to vector<32x128xf32>
    %cst_41 = arith.constant dense<0.000000e+00> : vector<16x128xf32>
    %126 = tpu.matmul %124, %125, %cst_41 {dimension_numbers = #tpu.dot_dimension_numbers<[1], [0], [0], [1], [0, 0, 1, 1], [], []>} : vector<16x32xf32>, vector<32x128xf32>, vector<16x128xf32> -> vector<16x128xf32>
    %127 = arith.addf %103, %126 : vector<16x128xf32>
    %128 = vector.extract_strided_slice %76 {offsets = [0, 64], sizes = [16, 32], strides = [1, 1]} : vector<16x128xf32> to vector<16x32xf32>
    %129 = vector.shape_cast %128 : vector<16x32xf32> to vector<8x2x32xf32>
    %cst_42 = arith.constant 0.176776692 : f32
    %130 = vector.broadcast %cst_42 : f32 to vector<8x2x32xf32>
    %131 = arith.mulf %129, %130 : vector<8x2x32xf32>
    %132 = vector.extract_strided_slice %77 {offsets = [0, 64], sizes = [16, 32], strides = [1, 1]} : vector<16x128xf32> to vector<16x32xf32>
    %133 = vector.shape_cast %132 : vector<16x32xf32> to vector<8x2x32xf32>
    %134 = vector.extract_strided_slice %78 {offsets = [0, 64], sizes = [16, 32], strides = [1, 1]} : vector<16x128xf32> to vector<16x32xf32>
    %135 = vector.shape_cast %134 : vector<16x32xf32> to vector<8x2x32xf32>
    "tpu.trace_start"() <{level = 10 : i32, message = "gnd,gmd->gnm"}> : () -> ()
    %cst_43 = arith.constant dense<0.000000e+00> : vector<8x2x2xf32>
    %136 = tpu.matmul %131, %133, %cst_43 {dimension_numbers = #tpu.dot_dimension_numbers<[2], [2], [1], [1], [0, 0, 0, 1, 1, 1], [0], [0]>} : vector<8x2x32xf32>, vector<8x2x32xf32>, vector<8x2x2xf32> -> vector<8x2x2xf32>
    "tpu.trace_stop"() : () -> ()
    %cst_44 = arith.constant dense<0xFF800000> : vector<8x2xf32>
    %137 = vector.multi_reduction <maximumf>, %136, %cst_44 [2] : vector<8x2x2xf32> to vector<8x2xf32>
    %138 = vector.shape_cast %137 : vector<8x2xf32> to vector<8x2x1xf32>
    %139 = vector.broadcast %138 : vector<8x2x1xf32> to vector<8x2x2xf32>
    %140 = arith.subf %136, %139 : vector<8x2x2xf32>
    %141 = math.exp %140 : vector<8x2x2xf32>
    %cst_45 = arith.constant dense<0.000000e+00> : vector<8x2xf32>
    %142 = vector.multi_reduction <add>, %141, %cst_45 [2] : vector<8x2x2xf32> to vector<8x2xf32>
    %143 = vector.shape_cast %142 : vector<8x2xf32> to vector<8x2x1xf32>
    %144 = tpu.reciprocal %143 {approx = true} : vector<8x2x1xf32> -> vector<8x2x1xf32>
    %145 = vector.broadcast %144 : vector<8x2x1xf32> to vector<8x2x2xf32>
    %146 = arith.mulf %141, %145 : vector<8x2x2xf32>
    "tpu.trace_start"() <{level = 10 : i32, message = "gnm,gmd->gnd"}> : () -> ()
    %cst_46 = arith.constant dense<0.000000e+00> : vector<8x2x32xf32>
    %147 = tpu.matmul %146, %135, %cst_46 {dimension_numbers = #tpu.dot_dimension_numbers<[2], [1], [1], [2], [0, 0, 0, 1, 1, 2], [0], [0]>} : vector<8x2x2xf32>, vector<8x2x32xf32>, vector<8x2x32xf32> -> vector<8x2x32xf32>
    "tpu.trace_stop"() : () -> ()
    %148 = vector.shape_cast %147 : vector<8x2x32xf32> to vector<16x32xf32>
    %149 = vector.extract_strided_slice %79 {offsets = [64, 0], sizes = [32, 128], strides = [1, 1]} : vector<128x128xf32> to vector<32x128xf32>
    %cst_47 = arith.constant dense<0.000000e+00> : vector<16x128xf32>
    %150 = tpu.matmul %148, %149, %cst_47 {dimension_numbers = #tpu.dot_dimension_numbers<[1], [0], [0], [1], [0, 0, 1, 1], [], []>} : vector<16x32xf32>, vector<32x128xf32>, vector<16x128xf32> -> vector<16x128xf32>
    %151 = arith.addf %127, %150 : vector<16x128xf32>
    %152 = vector.extract_strided_slice %76 {offsets = [0, 96], sizes = [16, 32], strides = [1, 1]} : vector<16x128xf32> to vector<16x32xf32>
    %153 = vector.shape_cast %152 : vector<16x32xf32> to vector<8x2x32xf32>
    %cst_48 = arith.constant 0.176776692 : f32
    %154 = vector.broadcast %cst_48 : f32 to vector<8x2x32xf32>
    %155 = arith.mulf %153, %154 : vector<8x2x32xf32>
    %156 = vector.extract_strided_slice %77 {offsets = [0, 96], sizes = [16, 32], strides = [1, 1]} : vector<16x128xf32> to vector<16x32xf32>
    %157 = vector.shape_cast %156 : vector<16x32xf32> to vector<8x2x32xf32>
    %158 = vector.extract_strided_slice %78 {offsets = [0, 96], sizes = [16, 32], strides = [1, 1]} : vector<16x128xf32> to vector<16x32xf32>
    %159 = vector.shape_cast %158 : vector<16x32xf32> to vector<8x2x32xf32>
    "tpu.trace_start"() <{level = 10 : i32, message = "gnd,gmd->gnm"}> : () -> ()
    %cst_49 = arith.constant dense<0.000000e+00> : vector<8x2x2xf32>
    %160 = tpu.matmul %155, %157, %cst_49 {dimension_numbers = #tpu.dot_dimension_numbers<[2], [2], [1], [1], [0, 0, 0, 1, 1, 1], [0], [0]>} : vector<8x2x32xf32>, vector<8x2x32xf32>, vector<8x2x2xf32> -> vector<8x2x2xf32>
    "tpu.trace_stop"() : () -> ()
    %cst_50 = arith.constant dense<0xFF800000> : vector<8x2xf32>
    %161 = vector.multi_reduction <maximumf>, %160, %cst_50 [2] : vector<8x2x2xf32> to vector<8x2xf32>
    %162 = vector.shape_cast %161 : vector<8x2xf32> to vector<8x2x1xf32>
    %163 = vector.broadcast %162 : vector<8x2x1xf32> to vector<8x2x2xf32>
    %164 = arith.subf %160, %163 : vector<8x2x2xf32>
    %165 = math.exp %164 : vector<8x2x2xf32>
    %cst_51 = arith.constant dense<0.000000e+00> : vector<8x2xf32>
    %166 = vector.multi_reduction <add>, %165, %cst_51 [2] : vector<8x2x2xf32> to vector<8x2xf32>
    %167 = vector.shape_cast %166 : vector<8x2xf32> to vector<8x2x1xf32>
    %168 = tpu.reciprocal %167 {approx = true} : vector<8x2x1xf32> -> vector<8x2x1xf32>
    %169 = vector.broadcast %168 : vector<8x2x1xf32> to vector<8x2x2xf32>
    %170 = arith.mulf %165, %169 : vector<8x2x2xf32>
    "tpu.trace_start"() <{level = 10 : i32, message = "gnm,gmd->gnd"}> : () -> ()
    %cst_52 = arith.constant dense<0.000000e+00> : vector<8x2x32xf32>
    %171 = tpu.matmul %170, %159, %cst_52 {dimension_numbers = #tpu.dot_dimension_numbers<[2], [1], [1], [2], [0, 0, 0, 1, 1, 2], [0], [0]>} : vector<8x2x2xf32>, vector<8x2x32xf32>, vector<8x2x32xf32> -> vector<8x2x32xf32>
    "tpu.trace_stop"() : () -> ()
    %172 = vector.shape_cast %171 : vector<8x2x32xf32> to vector<16x32xf32>
    %173 = vector.extract_strided_slice %79 {offsets = [96, 0], sizes = [32, 128], strides = [1, 1]} : vector<128x128xf32> to vector<32x128xf32>
    %cst_53 = arith.constant dense<0.000000e+00> : vector<16x128xf32>
    %174 = tpu.matmul %172, %173, %cst_53 {dimension_numbers = #tpu.dot_dimension_numbers<[1], [0], [0], [1], [0, 0, 1, 1], [], []>} : vector<16x32xf32>, vector<32x128xf32>, vector<16x128xf32> -> vector<16x128xf32>
    %175 = arith.addf %151, %174 : vector<16x128xf32>
    %176 = vector.broadcast %80 : vector<1x128xf32> to vector<16x128xf32>
    %177 = arith.addf %175, %176 : vector<16x128xf32>
    %178 = arith.mulf %177, %31 : vector<16x128xf32>
    %179 = arith.addf %178, %0 : vector<16x128xf32>
    %c0_54 = arith.constant 0 : index
    %c0_55 = arith.constant 0 : index
    %180 = vector.load %arg9[%c0_54, %c0_55] : memref<1x128xf32, #tpu.memory_space<vmem>>, vector<1x128xf32>
    %c0_56 = arith.constant 0 : index
    %c0_57 = arith.constant 0 : index
    %181 = vector.load %arg10[%c0_56, %c0_57] : memref<1x128xf32, #tpu.memory_space<vmem>>, vector<1x128xf32>
    %cst_58 = arith.constant dense<0.000000e+00> : vector<16xf32>
    %182 = vector.multi_reduction <add>, %179, %cst_58 [1] : vector<16x128xf32> to vector<16xf32>
    %183 = vector.shape_cast %182 : vector<16xf32> to vector<16x1xf32>
    %cst_59 = arith.constant 1.280000e+02 : f32
    %184 = vector.broadcast %cst_59 : f32 to vector<16x1xf32>
    %185 = arith.divf %183, %184 : vector<16x1xf32>
    %186 = vector.broadcast %185 : vector<16x1xf32> to vector<16x128xf32>
    %187 = arith.subf %179, %186 : vector<16x128xf32>
    %188 = arith.mulf %187, %187 : vector<16x128xf32>
    %cst_60 = arith.constant dense<0.000000e+00> : vector<16xf32>
    %189 = vector.multi_reduction <add>, %188, %cst_60 [1] : vector<16x128xf32> to vector<16xf32>
    %190 = vector.shape_cast %189 : vector<16xf32> to vector<16x1xf32>
    %cst_61 = arith.constant 1.280000e+02 : f32
    %191 = vector.broadcast %cst_61 : f32 to vector<16x1xf32>
    %192 = arith.divf %190, %191 : vector<16x1xf32>
    %cst_62 = arith.constant 9.99999974E-6 : f32
    %193 = vector.broadcast %cst_62 : f32 to vector<16x1xf32>
    %194 = arith.addf %192, %193 : vector<16x1xf32>
    %195 = math.rsqrt %194 : vector<16x1xf32>
    %196 = vector.broadcast %195 : vector<16x1xf32> to vector<16x128xf32>
    %197 = arith.mulf %187, %196 : vector<16x128xf32>
    %198 = vector.broadcast %180 : vector<1x128xf32> to vector<16x128xf32>
    %199 = arith.mulf %197, %198 : vector<16x128xf32>
    %200 = vector.broadcast %181 : vector<1x128xf32> to vector<16x128xf32>
    %201 = arith.addf %199, %200 : vector<16x128xf32>
    %202 = arith.mulf %201, %36 : vector<16x128xf32>
    %203 = arith.addf %202, %41 : vector<16x128xf32>
    %c0_63 = arith.constant 0 : index
    %c0_64 = arith.constant 0 : index
    %204 = vector.load %arg13[%c0_63, %c0_64] : memref<128x256xf32, #tpu.memory_space<vmem>>, vector<128x256xf32>
    %cst_65 = arith.constant dense<0.000000e+00> : vector<16x256xf32>
    %205 = tpu.matmul %203, %204, %cst_65 {dimension_numbers = #tpu.dot_dimension_numbers<[1], [0], [0], [1], [0, 0, 1, 1], [], []>} : vector<16x128xf32>, vector<128x256xf32>, vector<16x256xf32> -> vector<16x256xf32>
    %c0_66 = arith.constant 0 : index
    %c0_67 = arith.constant 0 : index
    %206 = vector.load %arg14[%c0_66, %c0_67] : memref<1x256xf32, #tpu.memory_space<vmem>>, vector<1x256xf32>
    %207 = vector.broadcast %206 : vector<1x256xf32> to vector<16x256xf32>
    %208 = arith.addf %205, %207 : vector<16x256xf32>
    %cst_68 = arith.constant 5.000000e-01 : f32
    %209 = vector.broadcast %cst_68 : f32 to vector<16x256xf32>
    %210 = arith.mulf %209, %208 : vector<16x256xf32>
    %cst_69 = arith.constant 4.471500e-02 : f32
    %211 = vector.broadcast %cst_69 : f32 to vector<16x256xf32>
    %212 = arith.mulf %211, %208 : vector<16x256xf32>
    %213 = arith.mulf %212, %208 : vector<16x256xf32>
    %214 = arith.mulf %213, %208 : vector<16x256xf32>
    %215 = arith.addf %208, %214 : vector<16x256xf32>
    %cst_70 = arith.constant 0.797884583 : f32
    %216 = vector.broadcast %cst_70 : f32 to vector<16x256xf32>
    %217 = arith.mulf %216, %215 : vector<16x256xf32>
    %218 = math.tanh %217 : vector<16x256xf32>
    %cst_71 = arith.constant 1.000000e+00 : f32
    %219 = vector.broadcast %cst_71 : f32 to vector<16x256xf32>
    %220 = arith.addf %219, %218 : vector<16x256xf32>
    %221 = arith.mulf %210, %220 : vector<16x256xf32>
    %c0_72 = arith.constant 0 : index
    %c0_73 = arith.constant 0 : index
    %222 = vector.load %arg15[%c0_72, %c0_73] : memref<256x128xf32, #tpu.memory_space<vmem>>, vector<256x128xf32>
    %cst_74 = arith.constant dense<0.000000e+00> : vector<16x128xf32>
    %223 = tpu.matmul %221, %222, %cst_74 {dimension_numbers = #tpu.dot_dimension_numbers<[1], [0], [0], [1], [0, 0, 1, 1], [], []>} : vector<16x256xf32>, vector<256x128xf32>, vector<16x128xf32> -> vector<16x128xf32>
    %c0_75 = arith.constant 0 : index
    %c0_76 = arith.constant 0 : index
    %224 = vector.load %arg16[%c0_75, %c0_76] : memref<1x128xf32, #tpu.memory_space<vmem>>, vector<1x128xf32>
    %225 = vector.broadcast %224 : vector<1x128xf32> to vector<16x128xf32>
    %226 = arith.addf %223, %225 : vector<16x128xf32>
    %227 = arith.mulf %226, %46 : vector<16x128xf32>
    %228 = arith.addf %179, %227 : vector<16x128xf32>
    %c0_77 = arith.constant 0 : index
    %c0_78 = arith.constant 0 : index
    %229 = vector.load %arg17[%c0_77, %c0_78] : memref<16x128xf32, #tpu.memory_space<vmem>>, vector<16x128xf32>
    tpu.vector_store %arg17[%c0_77, %c0_78], %228 {strides = array<i32>} : memref<16x128xf32, #tpu.memory_space<vmem>>, vector<16x128xf32>,
    return
  }
}

module attributes {stable_mosaic.version = 11 : i64} {
  func.func @_final_layer_kernel(%arg0: memref<16x128xf32, #tpu.memory_space<vmem>>, %arg1: memref<2x128xf32, #tpu.memory_space<vmem>>, %arg2: memref<2x128xf32, #tpu.memory_space<vmem>>, %arg3: memref<128x256xf32, #tpu.memory_space<vmem>>, %arg4: memref<1x256xf32, #tpu.memory_space<vmem>>, %arg5: memref<128x8xf32, #tpu.memory_space<vmem>>, %arg6: memref<1x8xf32, #tpu.memory_space<vmem>>, %arg7: memref<8x2x8xf32, #tpu.memory_space<vmem>>) attributes {dimension_semantics = [], scalar_prefetch = 0 : i64, scratch_operands = 0 : i64, tpu.core_type = #tpu.core_type<tc>} {
    %c0 = arith.constant 0 : index
    %c0_0 = arith.constant 0 : index
    %0 = vector.load %arg2[%c0, %c0_0] : memref<2x128xf32, #tpu.memory_space<vmem>>, vector<2x128xf32>
    %c0_1 = arith.constant 0 : index
    %c0_2 = arith.constant 0 : index
    %1 = vector.load %arg1[%c0_1, %c0_2] : memref<2x128xf32, #tpu.memory_space<vmem>>, vector<2x128xf32>
    %2 = arith.addf %0, %1 : vector<2x128xf32>
    %cst = arith.constant 0.000000e+00 : f32
    %3 = vector.broadcast %cst : f32 to vector<2x128xf32>
    %4 = arith.subf %3, %2 : vector<2x128xf32>
    %5 = math.exp %4 : vector<2x128xf32>
    %cst_3 = arith.constant 1.000000e+00 : f32
    %6 = vector.broadcast %cst_3 : f32 to vector<2x128xf32>
    %7 = arith.addf %6, %5 : vector<2x128xf32>
    %cst_4 = arith.constant 1.000000e+00 : f32
    %8 = vector.broadcast %cst_4 : f32 to vector<2x128xf32>
    %9 = arith.divf %8, %7 : vector<2x128xf32>
    %10 = arith.mulf %2, %9 : vector<2x128xf32>
    %c0_5 = arith.constant 0 : index
    %c0_6 = arith.constant 0 : index
    %11 = vector.load %arg3[%c0_5, %c0_6] : memref<128x256xf32, #tpu.memory_space<vmem>>, vector<128x256xf32>
    %cst_7 = arith.constant dense<0.000000e+00> : vector<2x256xf32>
    %12 = tpu.matmul %10, %11, %cst_7 {dimension_numbers = #tpu.dot_dimension_numbers<[1], [0], [0], [1], [0, 0, 1, 1], [], []>} : vector<2x128xf32>, vector<128x256xf32>, vector<2x256xf32> -> vector<2x256xf32>
    %c0_8 = arith.constant 0 : index
    %c0_9 = arith.constant 0 : index
    %13 = vector.load %arg4[%c0_8, %c0_9] : memref<1x256xf32, #tpu.memory_space<vmem>>, vector<1x256xf32>
    %14 = vector.broadcast %13 : vector<1x256xf32> to vector<2x256xf32>
    %15 = arith.addf %12, %14 : vector<2x256xf32>
    %16 = vector.extract_strided_slice %15 {offsets = [0, 0], sizes = [2, 128], strides = [1, 1]} : vector<2x256xf32> to vector<2x128xf32>
    %17 = vector.shape_cast %16 : vector<2x128xf32> to vector<1x2x128xf32>
    %18 = vector.shape_cast %17 : vector<1x2x128xf32> to vector<1x2x128xf32>
    %19 = vector.broadcast %18 : vector<1x2x128xf32> to vector<8x2x128xf32>
    %20 = vector.shape_cast %19 : vector<8x2x128xf32> to vector<16x128xf32>
    %21 = vector.extract_strided_slice %15 {offsets = [0, 128], sizes = [2, 128], strides = [1, 1]} : vector<2x256xf32> to vector<2x128xf32>
    %22 = vector.shape_cast %21 : vector<2x128xf32> to vector<1x2x128xf32>
    %23 = vector.shape_cast %22 : vector<1x2x128xf32> to vector<1x2x128xf32>
    %24 = vector.broadcast %23 : vector<1x2x128xf32> to vector<8x2x128xf32>
    %25 = vector.shape_cast %24 : vector<8x2x128xf32> to vector<16x128xf32>
    %c0_10 = arith.constant 0 : index
    %c0_11 = arith.constant 0 : index
    %26 = vector.load %arg0[%c0_10, %c0_11] : memref<16x128xf32, #tpu.memory_space<vmem>>, vector<16x128xf32>
    %27 = arith.mulf %26, %25 : vector<16x128xf32>
    %28 = arith.addf %27, %20 : vector<16x128xf32>
    %c0_12 = arith.constant 0 : index
    %c0_13 = arith.constant 0 : index
    %29 = vector.load %arg5[%c0_12, %c0_13] : memref<128x8xf32, #tpu.memory_space<vmem>>, vector<128x8xf32>
    %cst_14 = arith.constant dense<0.000000e+00> : vector<16x8xf32>
    %30 = tpu.matmul %28, %29, %cst_14 {dimension_numbers = #tpu.dot_dimension_numbers<[1], [0], [0], [1], [0, 0, 1, 1], [], []>} : vector<16x128xf32>, vector<128x8xf32>, vector<16x8xf32> -> vector<16x8xf32>
    %c0_15 = arith.constant 0 : index
    %c0_16 = arith.constant 0 : index
    %31 = vector.load %arg6[%c0_15, %c0_16] : memref<1x8xf32, #tpu.memory_space<vmem>>, vector<1x8xf32>
    %32 = vector.broadcast %31 : vector<1x8xf32> to vector<16x8xf32>
    %33 = arith.addf %30, %32 : vector<16x8xf32>
    %34 = vector.shape_cast %33 : vector<16x8xf32> to vector<8x2x8xf32>
    %c0_17 = arith.constant 0 : index
    %c0_18 = arith.constant 0 : index
    %c0_19 = arith.constant 0 : index
    %35 = vector.load %arg7[%c0_17, %c0_18, %c0_19] : memref<8x2x8xf32, #tpu.memory_space<vmem>>, vector<8x2x8xf32>
    tpu.vector_store %arg7[%c0_17, %c0_18, %c0_19], %34 {strides = array<i32>} : memref<8x2x8xf32, #tpu.memory_space<vmem>>, vector<8x2x8xf32>,
    return
  }
}

</mosaic_0001>

<bundles_post_ra>
// kernel: dit_forward.8
= control target key start
LH: loop header
LB: loop body
LE: loop exit
PB: predicated region body
PF: predicated region fallthrough
CT: control target
= control target key end

     0   :  { %19 = vsyncpa [#allocation3], 0  ;;  %s1305_s0 = inlined_call_operand.vmem [shape: f32[2,1], index: 0, kind: input, shape index: {}]   ;;  %s1306_s1 = inlined_call_operand.vmem [shape: f32[1,16], index: 1, kind: input, shape index: {}]   ;;  %s1307_s2 = inlined_call_operand.vmem [shape: f32[32,128], index: 2, kind: input, shape index: {}]   ;;  %s1308_s3 = inlined_call_operand.vmem [shape: f32[1,128], index: 3, kind: input, shape index: {}]   ;;  %s1309_s4 = inlined_call_operand.hbm [shape: f32[128,128], index: 4, kind: input, shape index: {}]   ;;  %s1310_s5 = inlined_call_operand.vmem [shape: f32[1,128], index: 5, kind: input, shape index: {}]   ;;  %s1311_s6 = inlined_call_operand.vmem [shape: f32[16,8], index: 6, kind: input, shape index: {}]   ;;  %s1312_s7 = inlined_call_operand.vmem [shape: f32[8,8], index: 7, kind: input, shape index: {}]   ;;  %s1313_s8 = inlined_call_operand.vmem [shape: f32[1,8], index: 8, kind: input, shape index: {}]   ;;  %s1314_s9 = inlined_call_operand.vmem [shape: f32[8,128], index: 9, kind: input, shape index: {}]   ;;  %s1315_s10 = inlined_call_operand.hbm [shape: f32[1,128], index: 10, kind: input, shape index: {}]   ;;  %s1316_s11 = inlined_call_operand.vmem [shape: f32[8,128], index: 11, kind: input, shape index: {}]   ;;  %s1317_s12 = inlined_call_operand.vmem [shape: f32[2,128], index: 12, kind: output, shape index: {0}]   ;;  %s1318_s13 = inlined_call_operand.vmem [shape: f32[16,128], index: 13, kind: output, shape index: {1}]  }
   0x1   :  { %20 = vsyncpa [#allocation5], 0  ;;  %s1101_s25 = smov [#allocation2]   ;;  %s1053_s29 = scalar_lea.hbm %s1309_s4, 2048 }
   0x2   :  { %s34_s26 = sshll.u32 %s1101_s25, 4  ;;  %p1054_p0 = scmp.ne.s32.totalorder %s1309_s4, %s1053_s29  ;;  %s35_s26 = int_to_ptr.vmem [resolvable:$true] %s34_s26 }
   0x3   :  { %p1057_p1 = scmp.lt.u32.totalorder %s1053_s29, %s1309_s4 }
   0x5   :  { %p1059_p2 = pnand %p1057_p1, %p1054_p0 }
   0x7   :  { %1062 = shalt.err (!%p1059_p2)
}
   0x8   :  { %s1063_s17 = scalar_lea.vmem %s35_s26, 2048  ;;  %p1068_p4 = scmp.lt.s32.totalorder %s35_s26, %s35_s26 }
   0x9   :  { %p1064_p3 = scmp.ne.s32.totalorder %s35_s26, %s1063_s17  ;;  %p1069_p5 = scmp.lt.s32.totalorder %s1063_s17, %s1063_s17 }
   0xb   :  { %p1070_p6 = por %p1069_p5, %p1068_p4 }
   0xd   :  { %p1071_p7 = pnand %p1070_p6, %p1064_p3 }
   0xf   :  { %1074 = shalt.err (!%p1071_p7)
}
  0x10   :  { %s1102_s18 = smov 128   ;;  %s1103_s19 = smov 8  }
  0x11   :  { %40 = dma.hbm_to_vmem [thread:$0]  %s1309_s4, 2048, %s35_s26, [#allocation3], %s1102_s18, %s1102_s18, %s1103_s19  }
  0x12   :  { %s1104_s22 = smov [#allocation4]   ;;  %s1075_s27 = scalar_lea.hbm %s1315_s10, 16 }
  0x13   :  { %s57_s23 = sshll.u32 %s1104_s22, 4  ;;  %p1076_p8 = scmp.ne.s32.totalorder %s1315_s10, %s1075_s27  ;;  %s58_s23 = int_to_ptr.vmem [resolvable:$true] %s57_s23 }
  0x14   :  { %p1079_p9 = scmp.lt.u32.totalorder %s1075_s27, %s1315_s10 }
  0x16   :  { %p1081_p10 = pnand %p1079_p9, %p1076_p8 }
  0x18   :  { %1084 = shalt.err (!%p1081_p10)
}
  0x19   :  { %s1085_s15 = scalar_lea.vmem %s58_s23, 16  ;;  %s1089_s4 = scalar_lea.vmem %s58_s23, 32 }
  0x1a   :  { %p1086_p11 = scmp.ne.s32.totalorder %s58_s23, %s1085_s15  ;;  %p1090_p12 = scmp.lt.s32.totalorder %s58_s23, %s58_s23 }
  0x1b   :  { %p1091_p13 = scmp.lt.s32.totalorder %s1089_s4, %s1085_s15 }
  0x1d   :  { %p1092_p0 = por %p1091_p13, %p1090_p12 }
  0x1f   :  { %p1093_p1 = pnand %p1092_p0, %p1086_p11 }
  0x21   :  { %1096 = shalt.err (!%p1093_p1)
}
  0x22   :  { %60 = dma.hbm_to_vmem [thread:$0]  %s1315_s10, 16, %s58_s23, [#allocation5]  }
  0x23   :  { %1097 = dma.done.wait [#allocation3], 2048  }
  0x24   :  { %1098 = vsyncadd [#allocation3], 4294965248 }
  0x25   :  { %1099 = dma.done.wait [#allocation5], 16  }
  0x26   :  { %1100 = vsyncadd [#allocation5], 4294967280  ;;  %v1105_v0 = vmov 0   ;;  %v69_v1 = vld [vmem:[%s1305_s0] sm:$0x3]  ;;  %v85_v2 = vld [vmem:[%s1307_s2 + $0x10] sm:$0xff] }
  0x27   :  { %1039 = vset.pattern.permute.xlu0 %v1105_v0  ;;  %v86_v3 = vld [vmem:[%s1307_s2 + $0x18] sm:$0xff]  ;;  %v1106_v4 = vmov 0.0|0.0   ;;  %vm1107_vm0 = vmmov 0   ;;  %v1108_v6 = vmov 0.0   ;;  %v882_v7 = vld [vmem:[%s1306_s1] ss:$0 sm:$0xff] }
  0x28   :  { %73 = vperm.xlu0 %1039, %v69_v1   ;;  %989 = vmatprep.subr.bf16.mxu1 %v1106_v4  ;;  %v990_v5 = vpack.c.bf16 %v86_v3, %v85_v2  ;;  %v1109_v20 = vmov 683565275   ;;  %v1110_v22 = vmov 2475754826   ;;  %v1111_v25 = vmov 2131351028  }
  0x29   :  { %934 = vmatprep.mubr.msk.f32.mxu1 %vm1107_vm0, %v1108_v6  ;;  %995 = vmatprep.subr.bf16.mxu0 %v1106_v4  ;;  %v1112_v28 = vmov 2102212464   ;;  %v1113_v31 = vmov 920167782   ;;  %v1114_v34 = vmov 1326507024  }
  0x2a   :  { %976 = vmatprep.mubr.msk.f32.mxu0 %vm1107_vm0, %v1108_v6  ;;  %991 = vmatpush3.bf16.msra.mxu1 %v990_v5  ;;  %vm294_vm11 = vcmask 130048  }
  0x2b   :  { %992 = vmatprep.subr.bf16.mxu1 %v1106_v4 }
  0xa7   :  { %v74_v8 = vpop.permute.xlu0 %73 }
  0xa8   :  { %v1230_v9 = vmul.f32 %v882_v7, %v74_v8 }
  0xaa   :  { %v90_v10 = vand.u32 2139095040, %v1230_v9  ;;  %v87_v14 = vand.u32 2147483647, %v1230_v9  ;;  %vm89_vm8 = vcmp.lt.s32.totalorder %v1230_v9, 0 }
  0xac   :  { %v91_v11 = vshrl.u32 %v90_v10, 23  ;;  %v94_v17 = vand.u32 8388607, %v87_v14  ;;  %vm88_vm9 = vcmp.le.f32.partialorder %v87_v14, 0.7853982 }
  0xae   :  { %v883_v12 = vadd.s32 4294967169, %v91_v11  ;;  %v95_v36 = vor.u32 8388608, %v94_v17 }
  0xb0   :  { %v97_v13 = vadd.s32 1, %v883_v12  ;;  %v135_v50 = vshll.u32 %v95_v36, 8 }
  0xb2   :  { %vm98_vm1 = vcmp.gt.s32.totalorder %v97_v13, 0 }
  0xb3   :  { %v99_v15 = vsel %vm98_vm1, %v97_v13, 0  ;;  %vm179_vm1 = vweird.f32 %v1230_v9 }
  0xb4   :  { %v101_v16 = vand.u32 31, %v99_v15  ;;  %v100_v19 = vshrl.u32 %v99_v15, 5 }
  0xb6   :  { %v102_v18 = vsub.s32 32, %v101_v16  ;;  %v104_v21 = vshll.u32 %v1109_v20, %v101_v16  ;;  %v107_v23 = vshll.u32 %v1110_v22, %v101_v16  ;;  %v110_v27 = vshll.u32 %v1111_v25, %v101_v16 }
  0xb7   :  { %v113_v30 = vshll.u32 %v1112_v28, %v101_v16  ;;  %v116_v33 = vshll.u32 %v1113_v31, %v101_v16  ;;  %vm119_vm2 = vcmp.lt.s32.totalorder %v100_v19, 1  ;;  %vm122_vm3 = vcmp.lt.s32.totalorder %v100_v19, 4 }
  0xb8   :  { %v105_v24 = vshrl.u32 %v1110_v22, %v102_v18  ;;  %v108_v26 = vshrl.u32 %v1111_v25, %v102_v18  ;;  %v111_v29 = vshrl.u32 %v1112_v28, %v102_v18  ;;  %v114_v32 = vshrl.u32 %v1113_v31, %v102_v18 }
  0xb9   :  { %v117_v35 = vshrl.u32 %v1114_v34, %v102_v18  ;;  %v103_v45 = vshrl.u32 %v1109_v20, %v102_v18  ;;  %vm121_vm4 = vcmp.lt.s32.totalorder %v100_v19, 3  ;;  %vm120_vm5 = vcmp.lt.s32.totalorder %v100_v19, 2  ;;  %v83_v34 = vld [vmem:[%s1307_s2] sm:$0xff] }
  0xba   :  { %v106_v37 = vor.u32 %v105_v24, %v104_v21  ;;  %v109_v38 = vor.u32 %v108_v26, %v107_v23  ;;  %v112_v39 = vor.u32 %v111_v29, %v110_v27  ;;  %v115_v40 = vor.u32 %v114_v32, %v113_v30 }
  0xbb   :  { %v118_v41 = vor.u32 %v117_v35, %v116_v33  ;;  %v84_v35 = vld [vmem:[%s1307_s2 + $0x8] sm:$0xff] }
  0xbc   :  { %v124_v42 = vsel %vm122_vm3, %v112_v39, 2102212464  ;;  %v127_v43 = vsel %vm119_vm2, %v106_v37, %v109_v38  ;;  %v131_v44 = vsel %vm119_vm2, %v109_v38, %v112_v39  ;;  %v128_v46 = vsel %vm122_vm3, %v115_v40, 920167782 }
  0xbd   :  { %v132_v47 = vsel %vm122_vm3, %v118_v41, 1326507024  ;;  %v129_v48 = vsel %vm121_vm4, %v112_v39, %v128_v46  ;;  %v123_v51 = vsel %vm119_vm2, %v103_v45, %v106_v37  ;;  %v125_v52 = vsel %vm121_vm4, %v109_v38, %v124_v42  ;;  %v552_v46 = vld [vmem:[%s1312_s7] sm:$0xff] }
  0xbe   :  { %v133_v49 = vsel %vm121_vm4, %v115_v40, %v132_v47  ;;  %v130_v53 = vsel %vm120_vm5, %v127_v43, %v129_v48  ;;  %v126_v59 = vsel %vm120_vm5, %v123_v51, %v125_v52  ;;  %v993_v39 = vpack.c.bf16 %v84_v35, %v83_v34  ;;  %v550_v48 = vld [vmem:[%s1311_s6] sm:$0xff]  ;;  %v458_v52 = vld [vmem:[#allocation2 + $0x10] sm:$0xff] }
  0xbf   :  { %v134_v54 = vsel %vm120_vm5, %v131_v44, %v133_v49  ;;  %v1239_v57 = vmul.u32.u64.low %v135_v50, %v130_v53  ;;  %v1240_v58 = vmul.u32.u64.high %v135_v50, %v130_v53, %v1239_v57  ;;  %v142_v61 = vmul.u32 %v135_v50, %v126_v59  ;;  %v551_v49 = vld [vmem:[%s1311_s6 + $0x8] sm:$0xff]  ;;  %v459_v53 = vld [vmem:[#allocation2 + $0x18] sm:$0xff] }
  0xc0   :  { %v1236_v55 = vmul.u32.u64.low %v135_v50, %v134_v54  ;;  %v1237_v56 = vmul.u32.u64.high %v135_v50, %v134_v54, %v1236_v55  ;;  %vm560_vm3 = vcmask 64512   ;;  %v456_v50 = vld [vmem:[#allocation2] sm:$0xff]  ;;  %v999_v54 = vpack.c.bf16 %v459_v53, %v458_v52  ;;  %v463_v59 = vld [vmem:[#allocation2 + $0x38] sm:$0xff] }
  0xc1   :  { %v145_v60 = vadd.s32 1, %v1240_v58  ;;  %v460_v55 = vld [vmem:[#allocation2 + $0x20] sm:$0xff] }
  0xc2   :  { %vm144_vm6 = vc.u32 %v1237_v56, %v1239_v57  ;;  %v143_v12 = vadd.s32 %v1239_v57, %v1237_v56  ;;  %v461_v56 = vld [vmem:[#allocation2 + $0x28] sm:$0xff] }
  0xc3   :  { %v146_v62 = vsel %vm144_vm6, %v145_v60, %v1240_v58  ;;  %v1002_v57 = vpack.c.bf16 %v461_v56, %v460_v55  ;;  %v462_v58 = vld [vmem:[#allocation2 + $0x30] sm:$0xff] }
  0xc4   :  { %v147_v63 = vadd.s32 %v146_v62, %v142_v61  ;;  %v1005_v60 = vpack.c.bf16 %v463_v59, %v462_v58  ;;  %v464_v61 = vld [vmem:[#allocation2 + $0x40] sm:$0xff]  ;;  %v465_v62 = vld [vmem:[#allocation2 + $0x48] sm:$0xff] }
  0xc6   :  { %v148_v0 = vadd.s32 536870912, %v147_v63 }
  0xc8   :  { %v149_v1 = vshrl.u32 %v148_v0, 30  ;;  %v466_v0 = vld [vmem:[#allocation2 + $0x50] sm:$0xff] }
  0xca   :  { %v150_v2 = vshll.u32 %v149_v1, 30  ;;  %v173_v25 = vsub.s32 4, %v149_v1 }
  0xcc   :  { %v151_v3 = vsub.s32 %v147_v63, %v150_v2  ;;  %v174_v28 = vsel %vm89_vm8, %v173_v25, %v149_v1  ;;  %v1008_v63 = vpack.c.bf16 %v465_v62, %v464_v61  ;;  %v467_v1 = vld [vmem:[#allocation2 + $0x58] sm:$0xff]  ;;  %v468_v2 = vld [vmem:[#allocation2 + $0x60] sm:$0xff] }
  0xcd   :  { %v176_v30 = vsel %vm88_vm9, 0, %v174_v28 }
  0xce   :  { %v153_v5 = vsub.s32 0, %v151_v3  ;;  %v283_v31 = vadd.s32 3, %v176_v30  ;;  %v180_v33 = vand.u32 3, %v176_v30 }
  0xd0   :  { %v884_v7 = vmin.u32 %v153_v5, %v151_v3  ;;  %v284_v32 = vand.u32 3, %v283_v31  ;;  %vm182_vm12 = vcmp.eq.s32.totalorder %v180_v33, 0  ;;  %vm185_vm13 = vcmp.eq.s32.totalorder %v180_v33, 2  ;;  %v469_v5 = vld [vmem:[#allocation2 + $0x68] sm:$0xff] }
  0xd1   :  { %vm181_vm2 = vcmp.lt.s32.totalorder %v180_v33, 2 }
  0xd2   :  { %v155_v8 = vclz %v884_v7  ;;  %vm289_vm10 = vcmp.eq.s32.totalorder %v284_v32, 2  ;;  %vm286_vm14 = vcmp.eq.s32.totalorder %v284_v32, 0  ;;  %vm285_vm15 = vcmp.lt.s32.totalorder %v284_v32, 2  ;;  %v660_v7 = vld [vmem:[%s1314_s9] sm:$0xff] }
  0xd4   :  { %v885_v10 = vadd.s32 4294967294, %v155_v8  ;;  %v1014_v8 = vpack.c.bf16 %v469_v5, %v468_v2 }
  0xd6   :  { %vm886_vm7 = vcmp.lt.s32.totalorder %v885_v10, 0 }
  0xd7   :  { %v158_v11 = vsel %vm886_vm7, 0, %v885_v10  ;;  %v470_v10 = vld [vmem:[#allocation2 + $0x70] sm:$0xff] }
  0xd8   :  { %v159_v13 = vsub.s32 32, %v158_v11  ;;  %v163_v15 = vsub.s32 4294967266, %v158_v11  ;;  %v160_v16 = vshll.u32 %v151_v3, %v158_v11  ;;  %v1011_v3 = vpack.c.bf16 %v467_v1, %v466_v0  ;;  %v471_v11 = vld [vmem:[#allocation2 + $0x78] sm:$0xff] }
  0xd9   :  { %v1116_v1 = vmov 1983009808  }
  0xda   :  { %v161_v17 = vshrl.u32 %v143_v12, %v159_v13  ;;  %v164_v18 = vadd.s32 127, %v163_v15  ;;  %v1017_v12 = vpack.c.bf16 %v471_v11, %v470_v10  ;;  %v835_v2 = vunpack.c.l.s4 %v1116_v1 }
  0xdc   :  { %v162_v19 = vor.u32 %v161_v17, %v160_v16  ;;  %v165_v20 = vshll.u32 %v164_v18, 23  ;;  %v893_v17 = vld [vmem:[%s1308_s3] ss:$0 sm:$0xff] }
  0xde   :  { %v166_v21 = vor.u32 4788187, %v165_v20  ;;  %v169_v23 = vcvt.s32.f32 %v162_v19  ;;  %v895_v20 = vld [vmem:[%s1313_s8] ss:$0 sm:$0xff] }
  0xe0   :  { %v167_v22 = vand.u32 2147483647, %v166_v21 }
  0xe2   :  { %v170_v24 = vmul.f32 %v169_v23, %v167_v22 }
  0xe4   :  { %v171_v26 = vxor.u32 2147483648, %v170_v24 }
  0xe6   :  { %v172_v27 = vsel %vm89_vm8, %v171_v26, %v170_v24 }
  0xe7   :  { %v175_v29 = vsel %vm88_vm9, %v1230_v9, %v172_v27 }
  0xe8   :  { %1041 = vcosq.f32 %v175_v29 }
  0xe9   :  { %1043 = vsinq.f32 %v175_v29 }
  0xf2   :  { %v1042_v36 = vpop.eup %1041 }
  0xf3   :  { %v1044_v14 = vpop.eup %1043  ;;  %v186_v37 = vxor.u32 2147483648, %v1042_v36 }
  0xf4   :  { %v183_v38 = vxor.u32 2147483648, %v1044_v14 }
  0xf5   :  { %v291_v40 = vsel %vm289_vm10, %v186_v37, %v1044_v14  ;;  %v187_v42 = vsel %vm185_vm13, %v186_v37, %v1044_v14 }
  0xf6   :  { %v184_v41 = vsel %vm182_vm12, %v1042_v36, %v183_v38  ;;  %v288_v43 = vsel %vm286_vm14, %v1042_v36, %v183_v38 }
  0xf7   :  { %v292_v44 = vsel %vm285_vm15, %v288_v43, %v291_v40  ;;  %v188_v47 = vsel %vm181_vm2, %v184_v41, %v187_v42 }
  0xf8   :  { %v293_v45 = vsel %vm179_vm1, nan, %v292_v44  ;;  %v189_v9 = vsel %vm179_vm1, nan, %v188_v47 }
  0xf9   :  { %935 = vmatmul.mubr.msk.f32.vlgmr.msra.gmra.mrb[0].mxu1 %vm294_vm11, %v293_v45 }
  0xfa   :  { %994 = vmatpush3.bf16.msra.mxu1 %v993_v39  ;;  %941 = vmatprep.mubr.msk.f32.mxu1 %vm1107_vm0, %v1108_v6  ;;  %v457_v6 = vld [vmem:[#allocation2 + $0x8] sm:$0xff] }
  0xfb   :  { %979 = vmatprep.subr.mxu1 %v552_v46  ;;  %v996_v51 = vpack.c.bf16 %v457_v6, %v456_v50 }
  0xfd   :  { %942 = vmatmul.mubr.msk.f32.vlgmr.msra.gmra.mrb[2].mxu1 %vm294_vm11, %v189_v9  ;;  %997 = vmatpush3.bf16.msra.mxu0 %v996_v51  ;;  %v749_v51 = vld [vmem:[%s1316_s11] sm:$0xff] }
  0xfe   :  { %980 = vmatpush3.msra.mxu1 %v552_v46  ;;  %981 = vmatprep.mubr.msk.f32.mxu1 %vm560_vm3, %v550_v48  ;;  %v1115_v48 = vmov 1966171168   ;;  %v751_v52 = vcombine.high %v749_v51, %v749_v51 }
  0xff   :  { %998 = vmatprep.subr.bf16.mxu0 %v1106_v4  ;;  %984 = vmatprep.subr.mxu1 %v660_v7  ;;  %v753_v9 = vunpack.c.l.s4 %v1115_v48 }
 0x101   :  { %982 = vmatmul.mubr.msk.f32.vlgmr.msra.gmra.mrb[4].mxu1 %vm560_vm3, %v551_v49  ;;  %1000 = vmatpush3.bf16.msra.mxu0 %v999_v54  ;;  %v755_v49 = vlaneseq  ;;  %v754_v50 = vunpack.c.0.s8 %v753_v9 }
 0x102   :  { %1001 = vmatprep.subr.bf16.mxu0 %v1106_v4  ;;  %985 = vmatpush3.msra.mxu1 %v660_v7 }
 0x103   :  { %v756_v6 = vshrl.u32 %v755_v49, 7 }
 0x105   :  { %1003 = vmatpush3.bf16.msra.mxu0 %v1002_v57  ;;  %v757_v53 = vsub.s32 %v754_v50, %v756_v6  ;;  %v802_v62 = vsub.s32 0, %v756_v6 }
 0x106   :  { %1004 = vmatprep.subr.bf16.mxu0 %v1106_v4 }
 0x107   :  { %v765_v54 = vrot.slane %v751_v52, %v757_v53  ;;  %v758_v55 = vrot.slane %v749_v51, %v757_v53 }
 0x109   :  { %1006 = vmatpush3.bf16.msra.mxu0 %v1005_v60  ;;  %v767_v56 = vcombine.high %v765_v54, %v765_v54  ;;  %v766_v57 = vcombine.high %v758_v55, %v758_v55  ;;  %v781_v58 = vrot.slane %v765_v54, %v757_v53  ;;  %v774_v60 = vrot.slane %v758_v55, %v757_v53 }
 0x10a   :  { %1007 = vmatprep.subr.bf16.mxu0 %v1106_v4 }
 0x10b   :  { %v795_v59 = vrot.slane %v767_v56, %v757_v53  ;;  %v788_v61 = vrot.slane %v766_v57, %v757_v53  ;;  %v819_v7 = vrot.slane %v781_v58, %v802_v62 }
 0x10d   :  { %1009 = vmatpush3.bf16.msra.mxu0 %v1008_v63  ;;  %v797_v63 = vcombine.high %v781_v58, %v781_v58  ;;  %v799_v0 = vcombine.high %v795_v59, %v795_v59  ;;  %v798_v5 = vcombine.high %v788_v61, %v788_v61 }
 0x10e   :  { %1010 = vmatprep.subr.bf16.mxu0 %v1106_v4 }
 0x10f   :  { %v827_v10 = vrot.slane %v797_v63, %v802_v62  ;;  %v831_v11 = vrot.slane %v799_v0, %v802_v62 }
 0x111   :  { %1012 = vmatpush3.bf16.msra.mxu0 %v1011_v3  ;;  %v796_v3 = vcombine.high %v774_v60, %v774_v60 }
 0x112   :  { %1013 = vmatprep.subr.bf16.mxu0 %v1106_v4 }
 0x115   :  { %1015 = vmatpush3.bf16.msra.mxu0 %v1014_v8  ;;  %v823_v8 = vrot.slane %v795_v59, %v802_v62 }
 0x116   :  { %1016 = vmatprep.subr.bf16.mxu0 %v1106_v4 }
 0x119   :  { %1018 = vmatpush3.bf16.msra.mxu0 %v1017_v12  ;;  %v836_v12 = vunpack.c.0.s8 %v835_v2 }
 0x1cc   :  { %v364_v13 = vpop.f32.mrb[0].mxu1 }
 0x1cd   :  { %v936_v15 = vpop.f32.mrb[1].mxu1 }
 0x1ce   :  { %v807_v15 = vrot.slane %v788_v61, %v802_v62 }
 0x1d0   :  { %v437_v16 = vpop.f32.mrb[2].mxu1 }
 0x1d1   :  { %v438_v18 = vadd.f32 %v437_v16, %v364_v13  ;;  %v943_v19 = vpop.f32.mrb[3].mxu1  ;;  %v803_v13 = vrot.slane %v774_v60, %v802_v62  ;;  %v811_v16 = vrot.slane %v796_v3, %v802_v62 }
 0x1d2   :  { %v849_v19 = vcombine.low %v819_v7, %v823_v8 }
 0x1d3   :  { %v448_v21 = vadd.f32 %v893_v17, %v438_v18  ;;  %v815_v17 = vrot.slane %v798_v5, %v802_v62  ;;  %v839_v18 = vsub.s32 %v836_v12, %v756_v6 }
 0x1d4   :  { %v983_v22 = vpop.f32.mrb[4].mxu1 }
 0x1d5   :  { %v449_v23 = vsub.f32 0.0, %v448_v21  ;;  %v639_v24 = vadd.f32 %v983_v22, %v895_v20  ;;  %v633_v25 = vpop.f32.mrb[5].mxu1  ;;  %v833_v22 = vcombine.low %v811_v16, %v815_v17 }
 0x1d6   :  { %v634_v4 = vadd.f32 %v895_v20, %v633_v25  ;;  %v850_v20 = vcombine.low %v827_v10, %v831_v11 }
 0x1d7   :  { %v450_v26 = vmul.f32 1.442695, %v449_v23  ;;  %v645_v27 = vmul.f32 0.044715, %v639_v24  ;;  %v643_v43 = vmul.f32 0.5, %v639_v24  ;;  %v857_v23 = vrot.slane %v849_v19, %v839_v18 }
 0x1d8   :  { %v644_v28 = vmul.f32 0.044715, %v634_v4  ;;  %v642_v41 = vmul.f32 0.5, %v634_v4 }
 0x1d9   :  { %1045 = vpow2.f32 %v450_v26  ;;  %v647_v29 = vmul.f32 %v645_v27, %v639_v24  ;;  %v898_v26 = vld [vmem:[#allocation4] ss:$0 sm:$0xff] }
 0x1da   :  { %v646_v30 = vmul.f32 %v644_v28, %v634_v4  ;;  %v894_v28 = vld [vmem:[%s1310_s5] ss:$0 sm:$0xff] }
 0x1db   :  { %v649_v31 = vmul.f32 %v647_v29, %v639_v24 }
 0x1dc   :  { %v648_v32 = vmul.f32 %v646_v30, %v634_v4 }
 0x1dd   :  { %v651_v33 = vadd.f32 %v649_v31, %v639_v24  ;;  %v864_v24 = vrot.slane %v850_v20, %v839_v18 }
 0x1de   :  { %v650_v34 = vadd.f32 %v648_v32, %v634_v4  ;;  %v847_v4 = vrot.slane %v833_v22, %v839_v18 }
 0x1df   :  { %v653_v35 = vmul.f32 0.7978846, %v651_v33  ;;  %v865_v27 = vcombine.low %v857_v23, %v864_v24 }
 0x1e0   :  { %v652_v36 = vmul.f32 0.7978846, %v650_v34 }
 0x1e1   :  { %1047 = vtanh.f32 %v653_v35 }
 0x1e2   :  { %1049 = vtanh.f32 %v652_v36 }
 0x1e3   :  { %v1046_v14 = vpop.eup %1045 }
 0x1e4   :  { %v452_v37 = vadd.f32 1.0, %v1046_v14 }
 0x1e6   :  { %1051 = vrcp.f32 %v452_v37 }
 0x1eb   :  { %v1048_v38 = vpop.eup %1047 }
 0x1ec   :  { %v1050_v39 = vpop.eup %1049  ;;  %v657_v40 = vadd.f32 1.0, %v1048_v38 }
 0x1ed   :  { %v656_v42 = vadd.f32 1.0, %v1050_v39 }
 0x1ee   :  { %v659_v46 = vmul.f32 %v657_v40, %v643_v43 }
 0x1ef   :  { %v658_v44 = vmul.f32 %v656_v42, %v642_v41 }
 0x1f0   :  { %v1052_v45 = vpop.eup %1051 }
 0x1f1   :  { %986 = vmatprep.mubr.msk.f32.mxu1 %vm560_vm3, %v658_v44  ;;  %v455_v47 = vmul.f32 %v1052_v45, %v448_v21  ;;  %v832_v21 = vcombine.low %v803_v13, %v807_v15 }
 0x1f2   :  { %987 = vmatmul.mubr.msk.f32.vlgmr.msra.gmra.mrb[6].mxu1 %vm560_vm3, %v659_v46 }
 0x1f3   :  { %977 = vmatmul.mubr.f32.vlgmr.msra.gmra.mrb[0].mxu0 %v455_v47  ;;  %v840_v25 = vrot.slane %v832_v21, %v839_v18 }
 0x1f5   :  { %v848_v30 = vcombine.low %v840_v25, %v847_v4 }
 0x2c5   :  { %v988_v29 = vpop.f32.mrb[6].mxu1 }
 0x2c6   :  { %v746_v31 = vadd.f32 %v988_v29, %v898_v26  ;;  %v545_v32 = vpop.f32.mrb[0].mxu0  ;;  %v740_v33 = vpop.f32.mrb[7].mxu1 }
 0x2c7   :  { %v546_v34 = vadd.f32 %v894_v28, %v545_v32  ;;  %v741_v35 = vadd.f32 %v898_v26, %v740_v33  ;;  %v978_v36 = vpop.f32.mrb[1].mxu0 }
 0x2c8   :  { %v869_v14 = vadd.f32 %v865_v27, %v746_v31 }
 0x2c9   :  { %549 = vst [vmem:[%s1317_s12] sm:$0x3] %v546_v34  ;;  %v868_v37 = vadd.f32 %v848_v30, %v741_v35 }
 0x2ca   :  { %871 = vst [vmem:[%s1318_s13 + $0x8] sm:$0xff] %v869_v14 }
 0x2cb   :  { %870 = vst [vmem:[%s1318_s13] sm:$0xff] %v868_v37 }
 0x2cc   :  { %880 = vsyncpa [#allocation3], 1 }
 0x2cd   :  { %881 = vsyncpa [#allocation5], 1 }

// kernel: dit_forward.7
= control target key start
LH: loop header
LB: loop body
LE: loop exit
PB: predicated region body
PF: predicated region fallthrough
CT: control target
= control target key end

     0   :  { %s3604_s0 = inlined_call_operand.vmem [shape: f32[16,128], index: 0, kind: input, shape index: {}]   ;;  %s3605_s1 = inlined_call_operand.vmem [shape: f32[16,128], index: 1, kind: input, shape index: {}]   ;;  %s3606_s2 = inlined_call_operand.vmem [shape: f32[128,256], index: 2, kind: input, shape index: {}]   ;;  %s3607_s3 = inlined_call_operand.vmem [shape: f32[1,256], index: 3, kind: input, shape index: {}]   ;;  %s3608_s4 = inlined_call_operand.vmem [shape: f32[128,128], index: 4, kind: input, shape index: {}]   ;;  %s3609_s5 = inlined_call_operand.vmem [shape: f32[1,128], index: 5, kind: input, shape index: {}]   ;;  %s3610_s6 = inlined_call_operand.hbm [shape: f32[128,128], index: 6, kind: input, shape index: {}]   ;;  %s3611_s7 = inlined_call_operand.vmem [shape: f32[1,128], index: 7, kind: input, shape index: {}]   ;;  %s3612_s8 = inlined_call_operand.vmem [shape: f32[1,128], index: 8, kind: input, shape index: {}]   ;;  %s3613_s9 = inlined_call_operand.vmem [shape: f32[1,128], index: 9, kind: input, shape index: {}]   ;;  %s3614_s10 = inlined_call_operand.vmem [shape: f32[128,256], index: 10, kind: input, shape index: {}]   ;;  %s3615_s11 = inlined_call_operand.vmem [shape: f32[1,256], index: 11, kind: input, shape index: {}]   ;;  %s3616_s12 = inlined_call_operand.vmem [shape: f32[256,128], index: 12, kind: input, shape index: {}]   ;;  %s3617_s13 = inlined_call_operand.vmem [shape: f32[1,128], index: 13, kind: input, shape index: {}]   ;;  %s3618_s14 = inlined_call_operand.vmem [shape: f32[1,128], index: 14, kind: input, shape index: {}]   ;;  %s3619_s15 = inlined_call_operand.vmem [shape: f32[1,128], index: 15, kind: input, shape index: {}]   ;;  %s3620_s16 = inlined_call_operand.vmem [shape: f32[16,128], index: 16, kind: output, shape index: {0}]   ;;  %s3621_s17 = inlined_call_operand.vmem [shape: f32[2,128], index: 17, kind: output, shape index: {1}]  }
   0x1   :  { %3624 = sst [smem:[#allocation5_spill]] %s3604_s0 }
   0x2   :  { %3625 = sst [smem:[#allocation6_spill]] %s3605_s1 }
   0x3   :  { %23 = vsyncpa [#allocation3], 0  ;;  %s2907_s24 = smov [#allocation2]   ;;  %s2883_s28 = scalar_lea.hbm %s3610_s6, 2048 }
   0x4   :  { %s41_s25 = sshll.u32 %s2907_s24, 4  ;;  %p2884_p0 = scmp.ne.s32.totalorder %s3610_s6, %s2883_s28  ;;  %s42_s25 = int_to_ptr.vmem [resolvable:$true] %s41_s25 }
   0x5   :  { %p2887_p1 = scmp.lt.u32.totalorder %s2883_s28, %s3610_s6 }
   0x7   :  { %p2889_p2 = pnand %p2887_p1, %p2884_p0 }
   0x9   :  { %2892 = shalt.err (!%p2889_p2)
}
   0xa   :  { %s2893_s19 = scalar_lea.vmem %s42_s25, 2048  ;;  %p2898_p4 = scmp.lt.s32.totalorder %s42_s25, %s42_s25 }
   0xb   :  { %p2894_p3 = scmp.ne.s32.totalorder %s42_s25, %s2893_s19  ;;  %p2899_p5 = scmp.lt.s32.totalorder %s2893_s19, %s2893_s19 }
   0xd   :  { %p2900_p6 = por %p2899_p5, %p2898_p4 }
   0xf   :  { %p2901_p7 = pnand %p2900_p6, %p2894_p3 }
  0x11   :  { %2904 = shalt.err (!%p2901_p7)
}
  0x12   :  { %s2908_s1 = smov 128   ;;  %s2909_s20 = smov 8  }
  0x13   :  { %47 = dma.hbm_to_vmem [thread:$0]  %s3610_s6, 2048, %s42_s25, [#allocation3], %s2908_s1, %s2908_s1, %s2909_s20  }
  0x14   :  { %2905 = dma.done.wait [#allocation3], 2048  }
  0x15   :  { %2906 = vsyncadd [#allocation3], 4294965248  ;;  %v2910_v0 = vmov 0.0   ;;  %v76_v1 = vld [vmem:[%s3606_s2 + $0x8] sm:$0xff]  ;;  %v78_v2 = vld [vmem:[%s3606_s2 + $0x18] sm:$0xff]  ;;  %s3626_s0 = sld [smem:[#allocation5_spill]] }
  0x16   :  { %183 = vmatprep.mubr.f32.mxu0 %v2910_v0  ;;  %v75_v3 = vld [vmem:[%s3606_s2] sm:$0xff]  ;;  %v2661_v4 = vpack.c.bf16 %v78_v2, %v76_v1  ;;  %v77_v5 = vld [vmem:[%s3606_s2 + $0x10] sm:$0xff]  ;;  %v80_v6 = vld [vmem:[%s3606_s2 + $0x28] sm:$0xff]  ;;  %s3627_s23 = sld [smem:[#allocation6_spill]]  ;;  %vm2911_vm0 = vmmov 0   ;;  %vm313_vm1 = vcmask 261120  }
  0x17   :  { %v82_v7 = vld [vmem:[%s3606_s2 + $0x38] sm:$0xff]  ;;  %v2663_v8 = vpack.c.bf16 %v77_v5, %v75_v3  ;;  %v79_v10 = vld [vmem:[%s3606_s2 + $0x20] sm:$0xff]  ;;  %v81_v11 = vld [vmem:[%s3606_s2 + $0x30] sm:$0xff]  ;;  %vm466_vm2 = vcmask 64512   ;;  %s2914_s22 = smov 32   ;;  %vm2338_vm3 = vcmask 1041409  }
  0x18   :  { %v2665_v9 = vpack.c.bf16 %v82_v7, %v80_v6  ;;  %v84_v12 = vld [vmem:[%s3606_s2 + $0x48] sm:$0xff]  ;;  %2662 = vmatprep.subr.bf16.mxu0 %v2661_v4  ;;  %v86_v13 = vld [vmem:[%s3606_s2 + $0x58] sm:$0xff]  ;;  %v2667_v14 = vpack.c.bf16 %v81_v11, %v79_v10  ;;  %v83_v16 = vld [vmem:[%s3606_s2 + $0x40] sm:$0xff] }
  0x19   :  { %2664 = vmatpush1.bf16.msra.mxu0 %v2663_v8  ;;  %v2669_v15 = vpack.c.bf16 %v86_v13, %v84_v12  ;;  %v85_v17 = vld [vmem:[%s3606_s2 + $0x50] sm:$0xff]  ;;  %v88_v18 = vld [vmem:[%s3606_s2 + $0x68] sm:$0xff]  ;;  %v90_v19 = vld [vmem:[%s3606_s2 + $0x78] sm:$0xff] }
  0x1a   :  { %2666 = vmatprep.subr.bf16.mxu0 %v2665_v9  ;;  %v2671_v20 = vpack.c.bf16 %v85_v17, %v83_v16  ;;  %v2673_v21 = vpack.c.bf16 %v90_v19, %v88_v18  ;;  %v87_v22 = vld [vmem:[%s3606_s2 + $0x60] sm:$0xff]  ;;  %v89_v23 = vld [vmem:[%s3606_s2 + $0x70] sm:$0xff]  ;;  %v92_v24 = vld [vmem:[%s3606_s2 + $0x88] sm:$0xff]  ;;  %v109_v16 = vlaneseq }
  0x1b   :  { %v94_v25 = vld [vmem:[%s3606_s2 + $0x98] sm:$0xff]  ;;  %v3075_v26 = vld [vmem:[%s3626_s0] sm:$0xff]  ;;  %v2675_v28 = vpack.c.bf16 %v89_v23, %v87_v22  ;;  %v197_v30 = vld [vmem:[%s3608_s4 + $0x8] sm:$0xff] }
  0x1c   :  { %v91_v27 = vld [vmem:[%s3606_s2 + $0x80] sm:$0xff]  ;;  %2534 = vmatprep.mubr.f32.mxu1 %v3075_v26  ;;  %v198_v31 = vld [vmem:[%s3608_s4 + $0x10] sm:$0xff]  ;;  %v2677_v32 = vpack.c.bf16 %v94_v25, %v92_v24  ;;  %v96_v34 = vld [vmem:[%s3606_s2 + $0xa8] sm:$0xff]  ;;  %v3189_v17 = vshrl.u32 %v109_v16, 7 }
  0x1d   :  { %2668 = vmatpush1.bf16.msra.mxu0 %v2667_v14  ;;  %v196_v29 = vld [vmem:[%s3608_s4] sm:$0xff]  ;;  %v93_v33 = vld [vmem:[%s3606_s2 + $0x90] sm:$0xff]  ;;  %v199_v36 = vld [vmem:[%s3608_s4 + $0x18] sm:$0xff] }
  0x1e   :  { %2670 = vmatprep.subr.bf16.mxu0 %v2669_v15  ;;  %v2693_v35 = vpack.c.bf16 %v197_v30, %v196_v29  ;;  %v98_v37 = vld [vmem:[%s3606_s2 + $0xb8] sm:$0xff]  ;;  %v2697_v38 = vpack.c.bf16 %v199_v36, %v198_v31  ;;  %v200_v39 = vld [vmem:[%s3608_s4 + $0x20] sm:$0xff]  ;;  %v201_v40 = vld [vmem:[%s3608_s4 + $0x28] sm:$0xff]  ;;  %v2679_v41 = vpack.c.bf16 %v93_v33, %v91_v27  ;;  %v111_v18 = vsub.s32 0, %v3189_v17 }
  0x1f   :  { %v2681_v42 = vpack.c.bf16 %v98_v37, %v96_v34  ;;  %v95_v43 = vld [vmem:[%s3606_s2 + $0xa0] sm:$0xff]  ;;  %v97_v44 = vld [vmem:[%s3606_s2 + $0xb0] sm:$0xff]  ;;  %v100_v45 = vld [vmem:[%s3606_s2 + $0xc8] sm:$0xff]  ;;  %v2701_v46 = vpack.c.bf16 %v201_v40, %v200_v39 }
  0x20   :  { %2694 = vmatprep.subr.bf16.mxu1 %v2693_v35  ;;  %v102_v47 = vld [vmem:[%s3606_s2 + $0xd8] sm:$0xff]  ;;  %v202_v48 = vld [vmem:[%s3608_s4 + $0x30] sm:$0xff]  ;;  %v2683_v50 = vpack.c.bf16 %v97_v44, %v95_v43  ;;  %v99_v52 = vld [vmem:[%s3606_s2 + $0xc0] sm:$0xff] }
  0x21   :  { %2672 = vmatpush1.bf16.msra.mxu0 %v2671_v20  ;;  %2696 = vmatpush3.bf16.msra.mxu1 %v2693_v35  ;;  %v203_v49 = vld [vmem:[%s3608_s4 + $0x38] sm:$0xff]  ;;  %v2685_v51 = vpack.c.bf16 %v102_v47, %v100_v45  ;;  %v101_v53 = vld [vmem:[%s3606_s2 + $0xd0] sm:$0xff]  ;;  %v104_v54 = vld [vmem:[%s3606_s2 + $0xe8] sm:$0xff]  ;;  %v115_v20 = vsub.s32 1, %v3189_v17 }
  0x22   :  { %2674 = vmatprep.subr.bf16.mxu0 %v2673_v21  ;;  %2698 = vmatprep.subr.bf16.mxu1 %v2697_v38  ;;  %v2705_v55 = vpack.c.bf16 %v203_v49, %v202_v48  ;;  %v106_v56 = vld [vmem:[%s3606_s2 + $0xf8] sm:$0xff]  ;;  %v204_v57 = vld [vmem:[%s3608_s4 + $0x40] sm:$0xff]  ;;  %v205_v58 = vld [vmem:[%s3608_s4 + $0x48] sm:$0xff]  ;;  %v2687_v59 = vpack.c.bf16 %v101_v53, %v99_v52 }
  0x23   :  { %v2689_v60 = vpack.c.bf16 %v106_v56, %v104_v54  ;;  %v103_v61 = vld [vmem:[%s3606_s2 + $0xe0] sm:$0xff]  ;;  %v105_v62 = vld [vmem:[%s3606_s2 + $0xf0] sm:$0xff]  ;;  %v2709_v63 = vpack.c.bf16 %v205_v58, %v204_v57  ;;  %v207_v2 = vld [vmem:[%s3608_s4 + $0x58] sm:$0xff] }
  0x24   :  { %v206_v1 = vld [vmem:[%s3608_s4 + $0x50] sm:$0xff]  ;;  %v2691_v3 = vpack.c.bf16 %v105_v62, %v103_v61  ;;  %v71_v4 = vld [vmem:[%s3627_s23] sm:$0xff]  ;;  %v209_v7 = vld [vmem:[%s3608_s4 + $0x68] sm:$0xff] }
  0x25   :  { %2676 = vmatpush1.bf16.msra.mxu0 %v2675_v28  ;;  %2700 = vmatpush3.bf16.msra.mxu1 %v2697_v38  ;;  %v2713_v5 = vpack.c.bf16 %v207_v2, %v206_v1  ;;  %v208_v6 = vld [vmem:[%s3608_s4 + $0x60] sm:$0xff]  ;;  %v73_v8 = vadd.f32 %v71_v4, %v3075_v26  ;;  %v3169_v9 = vld [vmem:[%s3626_s0 + $0x8] sm:$0xff]  ;;  %v210_v12 = vld [vmem:[%s3608_s4 + $0x70] sm:$0xff] }
  0x26   :  { %2678 = vmatprep.subr.bf16.mxu0 %v2677_v32  ;;  %2702 = vmatprep.subr.bf16.mxu1 %v2701_v46  ;;  %v72_v10 = vld [vmem:[%s3627_s23 + $0x8] sm:$0xff]  ;;  %v2717_v11 = vpack.c.bf16 %v209_v7, %v208_v6  ;;  %v211_v13 = vld [vmem:[%s3608_s4 + $0x78] sm:$0xff]  ;;  %v107_v19 = vld [vmem:[%s3607_s3] sm:$0x3]  ;;  %s2912_s3 = smov 96  }
  0x27   :  { %v74_v14 = vadd.f32 %v72_v10, %v3169_v9  ;;  %v2721_v15 = vpack.c.bf16 %v211_v13, %v210_v12  ;;  %v112_v21 = vrot.slane %v107_v19, %v111_v18  ;;  %v116_v22 = vrot.slane %v107_v19, %v115_v20  ;;  %v2351_v34 = vld [vmem:[%s3609_s5] ss:$0 sm:$0xff]  ;;  %s2913_s5 = smov 64  }
  0x29   :  { %2680 = vmatpush1.bf16.msra.mxu0 %v2679_v41  ;;  %2704 = vmatpush3.bf16.msra.mxu1 %v2701_v46 }
  0x2a   :  { %2682 = vmatprep.subr.bf16.mxu0 %v2681_v42  ;;  %2706 = vmatprep.subr.bf16.mxu1 %v2705_v55 }
  0x2d   :  { %2684 = vmatpush1.bf16.msra.mxu0 %v2683_v50  ;;  %2708 = vmatpush3.bf16.msra.mxu1 %v2705_v55 }
  0x2e   :  { %2686 = vmatprep.subr.bf16.mxu0 %v2685_v51  ;;  %2710 = vmatprep.subr.bf16.mxu1 %v2709_v63 }
  0x31   :  { %2688 = vmatpush1.bf16.msra.mxu0 %v2687_v59  ;;  %2712 = vmatpush3.bf16.msra.mxu1 %v2709_v63 }
  0x32   :  { %2690 = vmatprep.subr.bf16.mxu0 %v2689_v60  ;;  %2714 = vmatprep.subr.bf16.mxu1 %v2713_v5 }
  0x35   :  { %2692 = vmatpush1.bf16.msra.mxu0 %v2691_v3  ;;  %2716 = vmatpush3.bf16.msra.mxu1 %v2713_v5 }
  0x36   :  { %2542 = vmatprep.subr.mxu0 %v2910_v0  ;;  %2718 = vmatprep.subr.bf16.mxu1 %v2717_v11 }
  0x38   :  { %184 = vmatmul.mubr.f32.vlgmr.msra.gmra.mrb[0].mxu0 %v73_v8 }
  0x39   :  { %189 = vmatprep.mubr.f32.mxu0 %v2910_v0  ;;  %2720 = vmatpush3.bf16.msra.mxu1 %v2717_v11 }
  0x3a   :  { %2722 = vmatprep.subr.bf16.mxu1 %v2721_v15 }
  0x3c   :  { %190 = vmatmul.mubr.f32.gmra.mrb[2].mxu0 %v74_v14 }
  0x3d   :  { %2724 = vmatpush3.bf16.msra.mxu1 %v2721_v15  ;;  %2544 = vmatprep.mubr.msk.f32.mxu0 %vm2911_vm0, %v2910_v0 }
  0x3e   :  { %2537 = vmatprep.subr.mxu1 %v2910_v0 }
  0x40   :  { %2535 = vmatmul.mubr.f32.vlgmr.msra.gmra.mrb[0].mxu1 %v3169_v9 }
  0x41   :  { %2539 = vmatprep.mubr.msk.f32.mxu1 %vm2911_vm0, %v2910_v0 }
 0x10b   :  { %v185_v23 = vpop.f32.mrb[0].mxu0 }
 0x10c   :  { %v186_v24 = vadd.f32 %v185_v23, %v112_v21  ;;  %v187_v25 = vpop.f32.mrb[1].mxu0 }
 0x10d   :  { %v3200_v27 = vadd.f32 %v187_v25, %v116_v22 }
 0x10e   :  { %v3204_v29 = vmul.f32 0.17677669, %v186_v24 }
 0x10f   :  { %v191_v28 = vpop.f32.mrb[2].mxu0  ;;  %2538 = vmatpush3.xpose.msk.msra.mxu1 %vm313_vm1, %v3200_v27 }
 0x110   :  { %v192_v30 = vadd.f32 %v191_v28, %v112_v21  ;;  %v193_v31 = vpop.f32.mrb[3].mxu0  ;;  %2547 = vmatprep.subr.mxu1 %v2910_v0 }
 0x111   :  { %v3207_v32 = vadd.f32 %v193_v31, %v116_v22 }
 0x112   :  { %2540 = vmatmul.mubr.msk.f32.vlgmr.msra.gmra.mrb[2].mxu1 %vm313_vm1, %v3204_v29  ;;  %v3215_v33 = vmul.f32 0.17677669, %v192_v30 }
 0x113   :  { %715 = vrot.lane.b32.xlu1 %v3207_v32, %s2912_s3  ;;  %2543 = vmatpush3.xpose.msk.msra.mxu0 %vm313_vm1, %v3207_v32  ;;  %v2536_v35 = vpop.f32.mrb[0].mxu1 }
 0x114   :  { %2552 = vmatprep.subr.mxu0 %v2910_v0  ;;  %2549 = vmatprep.mubr.msk.f32.mxu1 %vm2911_vm0, %v2910_v0  ;;  %v3229_v36 = vadd.f32 %v2536_v35, %v2351_v34  ;;  %v285_v37 = vpop.f32.mrb[1].mxu1 }
 0x115   :  { %v3231_v38 = vadd.f32 %v2351_v34, %v285_v37 }
 0x116   :  { %2545 = vmatmul.mubr.msk.f32.vlgmr.msra.gmra.mrb[4].mxu0 %vm313_vm1, %v3215_v33 }
 0x117   :  { %713 = vrot.lane.b32.xlu1 %v3215_v33, %s2912_s3  ;;  %2554 = vmatprep.mubr.msk.f32.mxu0 %vm2911_vm0, %v2910_v0 }
 0x118   :  { %2553 = vmatpush3.msra.mxu0 %v3229_v36  ;;  %2548 = vmatpush3.msra.mxu1 %v3231_v38 }
 0x119   :  { %2562 = vmatprep.subr.mxu0 %v2910_v0  ;;  %2557 = vmatprep.subr.mxu1 %v2910_v0 }
 0x185   :  { %v716_v51 = vpop.permute.xlu1 %715 }
 0x189   :  { %v714_v53 = vpop.permute.xlu1 %713 }
 0x1e5   :  { %v386_v39 = vpop.f32.mrb[2].mxu1 }
 0x1e6   :  { %v2541_v40 = vpop.f32.mrb[3].mxu1  ;;  %v467_v59 = vsel %vm466_vm2, %v386_v39, -inf }
 0x1e9   :  { %v462_v41 = vpop.f32.mrb[4].mxu0 }
 0x1ea   :  { %v2546_v42 = vpop.f32.mrb[5].mxu0  ;;  %v470_v43 = vsel %vm466_vm2, %v462_v41, -inf }
 0x1eb   :  { %471 = vmax.xlane.f32.xlu0 %v470_v43 }
 0x278   :  { %v472_v44 = vpop.xlane.xlu0 %471 }
 0x279   :  { %v474_v45 = vsub.f32 %v462_v41, %v472_v44 }
 0x27b   :  { %v477_v46 = vmul.f32 1.442695, %v474_v45 }
 0x27d   :  { %2835 = vpow2.f32 %v477_v46 }
 0x287   :  { %v2836_v47 = vpop.eup %2835 }
 0x288   :  { %v482_v48 = vsel %vm466_vm2, %v2836_v47, 0.0 }
 0x289   :  { %483 = vadd.xlane.f32.xlu0 %v482_v48 }
 0x316   :  { %v484_v49 = vpop.xlane.xlu0 %483 }
 0x317   :  { %2837 = vrcp.f32 %v484_v49 }
 0x321   :  { %v2838_v50 = vpop.eup %2837 }
 0x322   :  { %v488_v52 = vmul.f32 %v2838_v50, %v2836_v47 }
 0x324   :  { %2555 = vmatmul.mubr.msk.f32.vlgmr.msra.gmra.mrb[6].mxu0 %vm466_vm2, %v488_v52 }
 0x325   :  { %2563 = vmatpush3.xpose.msk.msra.mxu0 %vm313_vm1, %v716_v51  ;;  %2564 = vmatprep.mubr.msk.f32.mxu0 %vm2911_vm0, %v2910_v0 }
 0x326   :  { %2572 = vmatprep.subr.mxu0 %v2910_v0 }
 0x328   :  { %2565 = vmatmul.mubr.msk.f32.vlgmr.msra.gmra.mrb[8].mxu0 %vm313_vm1, %v714_v53 }
 0x329   :  { %2574 = vmatprep.mubr.msk.f32.mxu0 %vm2911_vm0, %v2910_v0 }
 0x3f7   :  { %v3247_v54 = vpop.f32.mrb[6].mxu0 }
 0x3f8   :  { %v2556_v55 = vpop.f32.mrb[7].mxu0 }
 0x3fb   :  { %v787_v56 = vpop.f32.mrb[8].mxu0 }
 0x3fc   :  { %v2566_v57 = vpop.f32.mrb[9].mxu0  ;;  %v794_v58 = vsel %vm466_vm2, %v787_v56, -inf }
 0x3fd   :  { %795 = vmax.xlane.f32.xlu0 %v794_v58 }
 0x413   :  { %891 = vrot.lane.b32.xlu0 %v3229_v36, %s2912_s3 }
 0x417   :  { %1131 = vrot.lane.b32.xlu0 %v3200_v27, %s2913_s5 }
 0x41b   :  { %1129 = vrot.lane.b32.xlu0 %v3204_v29, %s2913_s5 }
 0x41f   :  { %1209 = vrot.lane.b32.xlu0 %v3207_v32, %s2913_s5 }
 0x43e   :  { %468 = vmax.xlane.f32.xlu0 %v467_v59 }
 0x454   :  { %637 = vrot.lane.b32.xlu0 %v3200_v27, %s2912_s3 }
 0x48a   :  { %v796_v60 = vpop.xlane.xlu0 %795 }
 0x48b   :  { %v798_v61 = vsub.f32 %v787_v56, %v796_v60 }
 0x48d   :  { %v801_v62 = vmul.f32 1.442695, %v798_v61 }
 0x48e   :  { %v892_v63 = vpop.permute.xlu0 %891 }
 0x48f   :  { %2839 = vpow2.f32 %v801_v62  ;;  %2573 = vmatpush3.msra.mxu0 %v892_v63 }
 0x490   :  { %2599 = vmatprep.subr.mxu0 %v2910_v0 }
 0x492   :  { %v1132_v3 = vpop.permute.xlu0 %1131 }
 0x496   :  { %v1130_v4 = vpop.permute.xlu0 %1129 }
 0x499   :  { %v2840_v1 = vpop.eup %2839 }
 0x49a   :  { %v806_v2 = vsel %vm466_vm2, %v2840_v1, 0.0  ;;  %v1210_v5 = vpop.permute.xlu0 %1209 }
 0x49b   :  { %807 = vadd.xlane.f32.xlu1 %v806_v2 }
 0x4ac   :  { %1207 = vrot.lane.b32.xlu1 %v3215_v33, %s2913_s5 }
 0x4cb   :  { %v469_v6 = vpop.xlane.xlu0 %468 }
 0x4cc   :  { %v473_v7 = vsub.f32 %v386_v39, %v469_v6 }
 0x4ce   :  { %v475_v8 = vmul.f32 1.442695, %v473_v7 }
 0x4cf   :  { %v638_v22 = vpop.permute.xlu0 %637 }
 0x4d0   :  { %2841 = vpow2.f32 %v475_v8 }
 0x4da   :  { %v2842_v10 = vpop.eup %2841 }
 0x4db   :  { %v479_v11 = vsel %vm466_vm2, %v2842_v10, 0.0 }
 0x4dc   :  { %480 = vadd.xlane.f32.xlu1 %v479_v11  ;;  %v299_v11 = vld [vmem:[#allocation2 + $0x28] sm:$0xff] }
 0x4ed   :  { %635 = vrot.lane.b32.xlu1 %v3204_v29, %s2912_s3 }
 0x528   :  { %v808_v12 = vpop.xlane.xlu1 %807 }
 0x529   :  { %2843 = vrcp.f32 %v808_v12  ;;  %v300_v12 = vld [vmem:[#allocation2 + $0x30] sm:$0xff] }
 0x52c   :  { %v1208_v15 = vpop.permute.xlu1 %1207 }
 0x533   :  { %v2844_v13 = vpop.eup %2843 }
 0x534   :  { %v812_v14 = vmul.f32 %v2844_v13, %v2840_v1 }
 0x536   :  { %2575 = vmatmul.mubr.msk.f32.vlgmr.msra.gmra.mrb[10].mxu0 %vm466_vm2, %v812_v14  ;;  %v301_v14 = vld [vmem:[#allocation2 + $0x38] sm:$0xff] }
 0x537   :  { %2600 = vmatpush3.xpose.msk.msra.mxu0 %vm313_vm1, %v1132_v3  ;;  %2601 = vmatprep.mubr.msk.f32.mxu0 %vm2911_vm0, %v2910_v0 }
 0x538   :  { %2604 = vmatprep.subr.mxu0 %v2910_v0 }
 0x53a   :  { %2602 = vmatmul.mubr.msk.f32.vlgmr.msra.gmra.mrb[12].mxu0 %vm313_vm1, %v1130_v4 }
 0x53b   :  { %2605 = vmatpush3.xpose.msk.msra.mxu0 %vm313_vm1, %v1210_v5  ;;  %2606 = vmatprep.mubr.msk.f32.mxu0 %vm2911_vm0, %v2910_v0 }
 0x53c   :  { %2609 = vmatprep.subr.mxu0 %v2910_v0 }
 0x53e   :  { %2607 = vmatmul.mubr.msk.f32.vlgmr.msra.gmra.mrb[14].mxu0 %vm313_vm1, %v1208_v15  ;;  %v2729_v15 = vpack.c.bf16 %v301_v14, %v300_v12 }
 0x53f   :  { %2611 = vmatprep.mubr.msk.f32.mxu0 %vm2911_vm0, %v2910_v0 }
 0x569   :  { %v481_v16 = vpop.xlane.xlu1 %480 }
 0x56a   :  { %2845 = vrcp.f32 %v481_v16  ;;  %v294_v16 = vld [vmem:[#allocation2] sm:$0xff] }
 0x56d   :  { %v636_v23 = vpop.permute.xlu1 %635 }
 0x574   :  { %v2846_v19 = vpop.eup %2845 }
 0x575   :  { %v487_v21 = vmul.f32 %v2846_v19, %v2842_v10  ;;  %v298_v10 = vld [vmem:[#allocation2 + $0x20] sm:$0xff]  ;;  %v295_v19 = vld [vmem:[#allocation2 + $0x8] sm:$0xff] }
 0x576   :  { %v2725_v13 = vpack.c.bf16 %v299_v11, %v298_v10 }
 0x577   :  { %2550 = vmatmul.mubr.msk.f32.vlgmr.msra.gmra.mrb[4].mxu1 %vm466_vm2, %v487_v21  ;;  %v2733_v21 = vpack.c.bf16 %v295_v19, %v294_v16  ;;  %v2007_v16 = vld [vmem:[%s3614_s10 + $0x8] sm:$0xff]  ;;  %v2009_v19 = vld [vmem:[%s3614_s10 + $0x18] sm:$0xff] }
 0x578   :  { %2558 = vmatpush3.xpose.msk.msra.mxu1 %vm313_vm1, %v638_v22  ;;  %2559 = vmatprep.mubr.msk.f32.mxu1 %vm2911_vm0, %v2910_v0 }
 0x579   :  { %2567 = vmatprep.subr.mxu1 %v2910_v0 }
 0x57b   :  { %2560 = vmatmul.mubr.msk.f32.vlgmr.msra.gmra.mrb[6].mxu1 %vm313_vm1, %v636_v23 }
 0x57c   :  { %2569 = vmatprep.mubr.msk.f32.mxu1 %vm2911_vm0, %v2910_v0 }
 0x609   :  { %v3289_v24 = vpop.f32.mrb[10].mxu0 }
 0x60a   :  { %v2576_v25 = vpop.f32.mrb[11].mxu0 }
 0x60d   :  { %v1203_v28 = vpop.f32.mrb[12].mxu0 }
 0x60e   :  { %v2603_v30 = vpop.f32.mrb[13].mxu0  ;;  %v1285_v31 = vsel %vm466_vm2, %v1203_v28, -inf }
 0x60f   :  { %1286 = vmax.xlane.f32.xlu0 %v1285_v31 }
 0x611   :  { %v1281_v34 = vpop.f32.mrb[14].mxu0 }
 0x612   :  { %v2608_v35 = vpop.f32.mrb[15].mxu0  ;;  %v1288_v37 = vsel %vm466_vm2, %v1281_v34, -inf }
 0x613   :  { %1289 = vmax.xlane.f32.xlu1 %v1288_v37 }
 0x624   :  { %1383 = vrot.lane.b32.xlu1 %v3229_v36, %s2913_s5 }
 0x625   :  { %1307 = vrot.lane.b32.xlu0 %v3231_v38, %s2913_s5 }
 0x628   :  { %1622 = vrot.lane.b32.xlu1 %v3207_v32, %s2914_s22 }
 0x64a   :  { %v3299_v39 = vpop.f32.mrb[4].mxu1 }
 0x64b   :  { %v2551_v40 = vpop.f32.mrb[5].mxu1 }
 0x64e   :  { %v709_v41 = vpop.f32.mrb[6].mxu1 }
 0x64f   :  { %v2561_v42 = vpop.f32.mrb[7].mxu1  ;;  %v791_v43 = vsel %vm466_vm2, %v709_v41, -inf }
 0x650   :  { %792 = vmax.xlane.f32.xlu1 %v791_v43  ;;  %v297_v42 = vld [vmem:[#allocation2 + $0x18] sm:$0xff] }
 0x69c   :  { %v1287_v44 = vpop.xlane.xlu0 %1286 }
 0x69d   :  { %v1291_v45 = vsub.f32 %v1203_v28, %v1287_v44 }
 0x69f   :  { %v1293_v46 = vmul.f32 1.442695, %v1291_v45 }
 0x6a0   :  { %v1308_v47 = vpop.permute.xlu0 %1307  ;;  %v1290_v32 = vpop.xlane.xlu1 %1289 }
 0x6a1   :  { %2847 = vpow2.f32 %v1293_v46  ;;  %2610 = vmatpush3.msra.mxu0 %v1308_v47  ;;  %v1292_v50 = vsub.f32 %v1281_v34, %v1290_v32  ;;  %v302_v46 = vld [vmem:[#allocation2 + $0x40] sm:$0xff]  ;;  %v303_v47 = vld [vmem:[#allocation2 + $0x48] sm:$0xff]  ;;  %v305_v32 = vld [vmem:[#allocation2 + $0x58] sm:$0xff] }
 0x6a2   :  { %2614 = vmatprep.subr.mxu0 %v2910_v0 }
 0x6a3   :  { %v1295_v51 = vmul.f32 1.442695, %v1292_v50 }
 0x6a4   :  { %v1384_v55 = vpop.permute.xlu1 %1383 }
 0x6a5   :  { %2849 = vpow2.f32 %v1295_v51 }
 0x6a8   :  { %v1623_v56 = vpop.permute.xlu1 %1622 }
 0x6ab   :  { %v2848_v48 = vpop.eup %2847 }
 0x6ac   :  { %v1297_v49 = vsel %vm466_vm2, %v2848_v48, 0.0 }
 0x6ad   :  { %1298 = vadd.xlane.f32.xlu0 %v1297_v49  ;;  %v304_v49 = vld [vmem:[#allocation2 + $0x50] sm:$0xff] }
 0x6ae   :  { %v2745_v50 = vpack.c.bf16 %v305_v32, %v304_v49 }
 0x6af   :  { %v2850_v52 = vpop.eup %2849 }
 0x6b0   :  { %v1300_v53 = vsel %vm466_vm2, %v2850_v52, 0.0 }
 0x6c3   :  { %1544 = vrot.lane.b32.xlu0 %v3200_v27, %s2914_s22 }
 0x6dd   :  { %v793_v57 = vpop.xlane.xlu1 %792 }
 0x6de   :  { %v797_v58 = vsub.f32 %v709_v41, %v793_v57  ;;  %v296_v41 = vld [vmem:[#allocation2 + $0x10] sm:$0xff] }
 0x6df   :  { %v2737_v44 = vpack.c.bf16 %v297_v42, %v296_v41  ;;  %v2014_v41 = vld [vmem:[%s3614_s10 + $0x40] sm:$0xff]  ;;  %v2016_v42 = vld [vmem:[%s3614_s10 + $0x50] sm:$0xff] }
 0x6e0   :  { %v799_v59 = vmul.f32 1.442695, %v797_v58 }
 0x6e2   :  { %1301 = vadd.xlane.f32.xlu0 %v1300_v53  ;;  %2851 = vpow2.f32 %v799_v59 }
 0x6ec   :  { %v2852_v27 = vpop.eup %2851 }
 0x6ed   :  { %v803_v60 = vsel %vm466_vm2, %v2852_v27, 0.0 }
 0x6f8   :  { %1542 = vrot.lane.b32.xlu0 %v3204_v29, %s2914_s22 }
 0x6fc   :  { %1620 = vrot.lane.b32.xlu0 %v3215_v33, %s2914_s22 }
 0x71b   :  { %804 = vadd.xlane.f32.xlu0 %v803_v60  ;;  %v307_v60 = vld [vmem:[#allocation2 + $0x68] sm:$0xff] }
 0x731   :  { %814 = vrot.lane.b32.xlu0 %v3231_v38, %s2912_s3 }
 0x735   :  { %1796 = vrot.lane.b32.xlu0 %v3229_v36, %s2914_s22 }
 0x73a   :  { %v1299_v61 = vpop.xlane.xlu0 %1298 }
 0x73b   :  { %2853 = vrcp.f32 %v1299_v61 }
 0x73e   :  { %v1545_v33 = vpop.permute.xlu0 %1544 }
 0x745   :  { %v2854_v29 = vpop.eup %2853 }
 0x746   :  { %v1305_v62 = vmul.f32 %v2854_v29, %v2848_v48  ;;  %v2741_v48 = vpack.c.bf16 %v303_v47, %v302_v46 }
 0x748   :  { %2612 = vmatmul.mubr.msk.f32.vlgmr.msra.gmra.mrb[16].mxu0 %vm466_vm2, %v1305_v62 }
 0x749   :  { %2615 = vmatpush3.msra.mxu0 %v1384_v55  ;;  %2616 = vmatprep.mubr.msk.f32.mxu0 %vm2911_vm0, %v2910_v0 }
 0x74a   :  { %2630 = vmatprep.subr.mxu0 %v2910_v0 }
 0x76f   :  { %v1302_v63 = vpop.xlane.xlu0 %1301 }
 0x770   :  { %2855 = vrcp.f32 %v1302_v63 }
 0x773   :  { %v1543_v36 = vpop.permute.xlu0 %1542 }
 0x777   :  { %v1621_v3 = vpop.permute.xlu0 %1620 }
 0x77a   :  { %v2856_v1 = vpop.eup %2855 }
 0x77b   :  { %v1306_v2 = vmul.f32 %v2856_v1, %v2850_v52 }
 0x77d   :  { %2617 = vmatmul.mubr.msk.f32.vlgmr.msra.gmra.mrb[18].mxu0 %vm466_vm2, %v1306_v2 }
 0x77e   :  { %2631 = vmatpush3.xpose.msk.msra.mxu0 %vm313_vm1, %v1545_v33  ;;  %2632 = vmatprep.mubr.msk.f32.mxu0 %vm2911_vm0, %v2910_v0 }
 0x77f   :  { %2635 = vmatprep.subr.mxu0 %v2910_v0 }
 0x781   :  { %2633 = vmatmul.mubr.msk.f32.vlgmr.msra.gmra.mrb[20].mxu0 %vm313_vm1, %v1543_v36  ;;  %v309_v36 = vld [vmem:[#allocation2 + $0x78] sm:$0xff] }
 0x782   :  { %2636 = vmatpush3.xpose.msk.msra.mxu0 %vm313_vm1, %v1623_v56  ;;  %2637 = vmatprep.mubr.msk.f32.mxu0 %vm2911_vm0, %v2910_v0 }
 0x783   :  { %2645 = vmatprep.subr.mxu0 %v2910_v0 }
 0x785   :  { %2638 = vmatmul.mubr.msk.f32.vlgmr.msra.gmra.mrb[22].mxu0 %vm313_vm1, %v1621_v3 }
 0x786   :  { %2647 = vmatprep.mubr.msk.f32.mxu0 %vm2911_vm0, %v2910_v0 }
 0x7a8   :  { %v805_v4 = vpop.xlane.xlu0 %804 }
 0x7a9   :  { %2857 = vrcp.f32 %v805_v4 }
 0x7ac   :  { %v815_v5 = vpop.permute.xlu0 %814 }
 0x7ad   :  { %2568 = vmatpush3.msra.mxu1 %v815_v5 }
 0x7ae   :  { %2726 = vmatprep.subr.bf16.mxu1 %v2725_v13 }
 0x7b0   :  { %v1797_v6 = vpop.permute.xlu0 %1796 }
 0x7b1   :  { %2646 = vmatpush3.msra.mxu0 %v1797_v6 }
 0x7b3   :  { %v2858_v7 = vpop.eup %2857 }
 0x7b4   :  { %v811_v8 = vmul.f32 %v2858_v7, %v2852_v27  ;;  %v306_v27 = vld [vmem:[#allocation2 + $0x60] sm:$0xff] }
 0x7b5   :  { %v2749_v29 = vpack.c.bf16 %v307_v60, %v306_v27  ;;  %v2027_v60 = vld [vmem:[%s3614_s10 + $0xa8] sm:$0xff] }
 0x7b6   :  { %2570 = vmatmul.mubr.msk.f32.vlgmr.msra.gmra.mrb[8].mxu1 %vm466_vm2, %v811_v8  ;;  %v2384_v8 = vld [vmem:[%s3611_s7] ss:$0 sm:$0xff] }
 0x7b7   :  { %2728 = vmatpush3.bf16.msra.mxu1 %v2725_v13 }
 0x7b8   :  { %2730 = vmatprep.subr.bf16.mxu1 %v2729_v15 }
 0x7bb   :  { %2732 = vmatpush3.bf16.msra.mxu1 %v2729_v15 }
 0x7bc   :  { %2734 = vmatprep.subr.bf16.mxu1 %v2733_v21 }
 0x81b   :  { %v1379_v22 = vpop.f32.mrb[16].mxu0 }
 0x81c   :  { %v2613_v23 = vpop.f32.mrb[17].mxu0 }
 0x81d   :  { %v2013_v23 = vld [vmem:[%s3614_s10 + $0x38] sm:$0xff] }
 0x850   :  { %v1455_v25 = vpop.f32.mrb[18].mxu0 }
 0x851   :  { %v2618_v28 = vpop.f32.mrb[19].mxu0 }
 0x854   :  { %v1616_v30 = vpop.f32.mrb[20].mxu0 }
 0x855   :  { %v2634_v31 = vpop.f32.mrb[21].mxu0  ;;  %v1698_v34 = vsel %vm466_vm2, %v1616_v30, -inf }
 0x856   :  { %1699 = vmax.xlane.f32.xlu1 %v1698_v34  ;;  %v2012_v31 = vld [vmem:[%s3614_s10 + $0x30] sm:$0xff]  ;;  %v2015_v34 = vld [vmem:[%s3614_s10 + $0x48] sm:$0xff] }
 0x858   :  { %v1694_v35 = vpop.f32.mrb[22].mxu0 }
 0x859   :  { %v2639_v37 = vpop.f32.mrb[23].mxu0  ;;  %v1701_v40 = vsel %vm466_vm2, %v1694_v35, -inf }
 0x85a   :  { %1702 = vmax.xlane.f32.xlu1 %v1701_v40 }
 0x889   :  { %v886_v43 = vpop.f32.mrb[8].mxu1 }
 0x88a   :  { %v2571_v45 = vpop.f32.mrb[9].mxu1  ;;  %2585 = vmatprep.mubr.msk.f32.mxu1 %vm313_vm1, %v886_v43  ;;  %v2767_v43 = vpack.c.bf16 %v2016_v42, %v2014_v41 }
 0x88b   :  { %2586 = vmatmul.mubr.msk.f32.vlgmr.msra.gmra.mrb[10].mxu1 %vm313_vm1, %v3289_v24 }
 0x88c   :  { %2736 = vmatpush3.bf16.msra.mxu1 %v2733_v21  ;;  %2596 = vmatprep.mubr.msk.f32.mxu1 %vm313_vm1, %v3299_v39  ;;  %v2006_v21 = vld [vmem:[%s3614_s10] sm:$0xff] }
 0x88d   :  { %2738 = vmatprep.subr.bf16.mxu1 %v2737_v44 }
 0x890   :  { %2740 = vmatpush3.bf16.msra.mxu1 %v2737_v44 }
 0x891   :  { %2742 = vmatprep.subr.bf16.mxu1 %v2741_v48 }
 0x893   :  { %2597 = vmatmul.mubr.msk.f32.vlgmr.msra.gmra.mrb[10].mxu1 %vm313_vm1, %v3247_v54 }
 0x894   :  { %2744 = vmatpush3.bf16.msra.mxu1 %v2741_v48  ;;  %2627 = vmatprep.mubr.msk.f32.mxu1 %vm313_vm1, %v1379_v22  ;;  %v2757_v22 = vpack.c.bf16 %v2009_v19, %v2007_v16  ;;  %v2164_v16 = vld [vmem:[%s3616_s12 + $0x8] sm:$0xff] }
 0x895   :  { %2746 = vmatprep.subr.bf16.mxu1 %v2745_v50 }
 0x896   :  { %2758 = vmatprep.subr.bf16.mxu0 %v2757_v22 }
 0x898   :  { %2748 = vmatpush3.bf16.msra.mxu1 %v2745_v50 }
 0x899   :  { %2640 = vmatprep.subr.mxu1 %v2910_v0 }
 0x89b   :  { %2628 = vmatmul.mubr.msk.f32.vlgmr.msra.gmra.mrb[10].mxu1 %vm313_vm1, %v1455_v25 }
 0x89c   :  { %2642 = vmatprep.mubr.msk.f32.mxu1 %vm2911_vm0, %v2910_v0 }
 0x8e3   :  { %v1700_v24 = vpop.xlane.xlu1 %1699 }
 0x8e4   :  { %v1704_v39 = vsub.f32 %v1616_v30, %v1700_v24  ;;  %v2010_v30 = vld [vmem:[%s3614_s10 + $0x20] sm:$0xff]  ;;  %v2019_v24 = vld [vmem:[%s3614_s10 + $0x68] sm:$0xff] }
 0x8e5   :  { %v2763_v37 = vpack.c.bf16 %v2012_v31, %v2010_v30  ;;  %v2385_v30 = vld [vmem:[%s3612_s8] ss:$0 sm:$0xff] }
 0x8e6   :  { %v1706_v51 = vmul.f32 1.442695, %v1704_v39  ;;  %v2021_v39 = vld [vmem:[%s3614_s10 + $0x78] sm:$0xff] }
 0x8e7   :  { %v1703_v52 = vpop.xlane.xlu1 %1702 }
 0x8e8   :  { %2859 = vpow2.f32 %v1706_v51  ;;  %v1705_v53 = vsub.f32 %v1694_v35, %v1703_v52  ;;  %v2017_v35 = vld [vmem:[%s3614_s10 + $0x58] sm:$0xff]  ;;  %v2769_v51 = vpack.c.bf16 %v2021_v39, %v2019_v24  ;;  %v2018_v52 = vld [vmem:[%s3614_s10 + $0x60] sm:$0xff]  ;;  %v2168_v39 = vld [vmem:[%s3616_s12 + $0x28] sm:$0xff] }
 0x8e9   :  { %v2765_v40 = vpack.c.bf16 %v2017_v35, %v2015_v34  ;;  %v2386_v34 = vld [vmem:[%s3613_s9] ss:$0 sm:$0xff] }
 0x8ea   :  { %v1708_v55 = vmul.f32 1.442695, %v1705_v53  ;;  %v2020_v53 = vld [vmem:[%s3614_s10 + $0x70] sm:$0xff]  ;;  %v2167_v24 = vld [vmem:[%s3616_s12 + $0x20] sm:$0xff] }
 0x8ec   :  { %2861 = vpow2.f32 %v1708_v55  ;;  %v2771_v55 = vpack.c.bf16 %v2020_v53, %v2018_v52  ;;  %v2185_v52 = vld [vmem:[%s3616_s12 + $0xb0] sm:$0xff]  ;;  %v2186_v53 = vld [vmem:[%s3616_s12 + $0xb8] sm:$0xff] }
 0x8f2   :  { %v2860_v54 = vpop.eup %2859 }
 0x8f3   :  { %v1710_v56 = vsel %vm466_vm2, %v2860_v54, 0.0 }
 0x8f4   :  { %1711 = vadd.xlane.f32.xlu1 %v1710_v56  ;;  %v2025_v56 = vld [vmem:[%s3614_s10 + $0x98] sm:$0xff] }
 0x8f6   :  { %v2862_v57 = vpop.eup %2861 }
 0x8f7   :  { %v1713_v58 = vsel %vm466_vm2, %v2862_v57, 0.0 }
 0x8f8   :  { %1714 = vadd.xlane.f32.xlu1 %v1713_v58  ;;  %v2022_v58 = vld [vmem:[%s3614_s10 + $0x80] sm:$0xff] }
 0x909   :  { %1720 = vrot.lane.b32.xlu1 %v3231_v38, %s2914_s22  ;;  %v308_v38 = vld [vmem:[#allocation2 + $0x70] sm:$0xff] }
 0x90a   :  { %v2753_v3 = vpack.c.bf16 %v309_v36, %v308_v38  ;;  %v2030_v38 = vld [vmem:[%s3614_s10 + $0xc0] sm:$0xff]  ;;  %v2032_v36 = vld [vmem:[%s3614_s10 + $0xd0] sm:$0xff] }
 0x981   :  { %v1712_v59 = vpop.xlane.xlu1 %1711 }
 0x982   :  { %2863 = vrcp.f32 %v1712_v59  ;;  %v2024_v59 = vld [vmem:[%s3614_s10 + $0x90] sm:$0xff] }
 0x983   :  { %v2775_v27 = vpack.c.bf16 %v2024_v59, %v2022_v58  ;;  %v2187_v58 = vld [vmem:[%s3616_s12 + $0xc0] sm:$0xff]  ;;  %v2188_v59 = vld [vmem:[%s3616_s12 + $0xc8] sm:$0xff] }
 0x985   :  { %v1715_v61 = vpop.xlane.xlu1 %1714 }
 0x986   :  { %2865 = vrcp.f32 %v1715_v61  ;;  %v2029_v61 = vld [vmem:[%s3614_s10 + $0xb8] sm:$0xff] }
 0x989   :  { %v1721_v62 = vpop.permute.xlu1 %1720 }
 0x98a   :  { %2641 = vmatpush3.msra.mxu1 %v1721_v62  ;;  %v2026_v62 = vld [vmem:[%s3614_s10 + $0xa0] sm:$0xff] }
 0x98b   :  { %2750 = vmatprep.subr.bf16.mxu1 %v2749_v29 }
 0x98c   :  { %v2864_v33 = vpop.eup %2863 }
 0x98d   :  { %v1718_v63 = vmul.f32 %v2864_v33, %v2860_v54  ;;  %v2023_v54 = vld [vmem:[%s3614_s10 + $0x88] sm:$0xff]  ;;  %v2028_v33 = vld [vmem:[%s3614_s10 + $0xb0] sm:$0xff] }
 0x98f   :  { %2643 = vmatmul.mubr.msk.f32.vlgmr.msra.gmra.mrb[12].mxu1 %vm466_vm2, %v1718_v63  ;;  %v2031_v63 = vld [vmem:[%s3614_s10 + $0xc8] sm:$0xff] }
 0x990   :  { %v2866_v1 = vpop.eup %2865  ;;  %2752 = vmatpush3.bf16.msra.mxu1 %v2749_v29  ;;  %v2777_v29 = vpack.c.bf16 %v2029_v61, %v2027_v60  ;;  %v2805_v60 = vpack.c.bf16 %v2188_v59, %v2187_v58  ;;  %v2172_v61 = vld [vmem:[%s3616_s12 + $0x48] sm:$0xff] }
 0x991   :  { %v1719_v2 = vmul.f32 %v2866_v1, %v2862_v57  ;;  %2754 = vmatprep.subr.bf16.mxu1 %v2753_v3  ;;  %v2773_v57 = vpack.c.bf16 %v2025_v56, %v2023_v54  ;;  %v2779_v1 = vpack.c.bf16 %v2028_v33, %v2026_v62  ;;  %v2169_v54 = vld [vmem:[%s3616_s12 + $0x30] sm:$0xff]  ;;  %v2170_v56 = vld [vmem:[%s3616_s12 + $0x38] sm:$0xff] }
 0x992   :  { %v2190_v62 = vld [vmem:[%s3616_s12 + $0xd8] sm:$0xff] }
 0x993   :  { %2648 = vmatmul.mubr.msk.f32.vlgmr.msra.gmra.mrb[24].mxu0 %vm466_vm2, %v1719_v2  ;;  %v2033_v2 = vld [vmem:[%s3614_s10 + $0xd8] sm:$0xff] }
 0x994   :  { %2114 = vmatprep.mubr.f32.mxu0 %v2910_v0  ;;  %2756 = vmatpush3.bf16.msra.mxu1 %v2753_v3  ;;  %v2781_v3 = vpack.c.bf16 %v2033_v2, %v2031_v63  ;;  %v2174_v2 = vld [vmem:[%s3616_s12 + $0x58] sm:$0xff] }
 0xa62   :  { %v1792_v4 = vpop.f32.mrb[12].mxu1 }
 0xa63   :  { %v2644_v5 = vpop.f32.mrb[13].mxu1  ;;  %2658 = vmatprep.mubr.msk.f32.mxu1 %vm313_vm1, %v1792_v4  ;;  %v2035_v4 = vld [vmem:[%s3614_s10 + $0xe8] sm:$0xff] }
 0xa64   :  { %v2037_v5 = vld [vmem:[%s3614_s10 + $0xf8] sm:$0xff] }
 0xa66   :  { %v1868_v6 = vpop.f32.mrb[24].mxu0 }
 0xa67   :  { %v2649_v7 = vpop.f32.mrb[25].mxu0  ;;  %2659 = vmatmul.mubr.msk.f32.vlgmr.msra.gmra.mrb[10].mxu1 %vm313_vm1, %v1868_v6  ;;  %v2783_v6 = vpack.c.bf16 %v2032_v36, %v2030_v38  ;;  %v2191_v38 = vld [vmem:[%s3616_s12 + $0xe0] sm:$0xff]  ;;  %v2192_v36 = vld [vmem:[%s3616_s12 + $0xe8] sm:$0xff] }
 0xa68   :  { %v2785_v7 = vpack.c.bf16 %v2037_v5, %v2035_v4  ;;  %v2813_v4 = vpack.c.bf16 %v2192_v36, %v2191_v38  ;;  %v2175_v5 = vld [vmem:[%s3616_s12 + $0x60] sm:$0xff] }
 0xb3a   :  { %v2660_v10 = vpop.f32.mrb[10].mxu1 }
 0xb3b   :  { %v1962_v11 = vadd.f32 %v2660_v10, %v2384_v8  ;;  %v1944_v12 = vpop.f32.mrb[11].mxu1  ;;  %v2036_v10 = vld [vmem:[%s3614_s10 + $0xf0] sm:$0xff] }
 0xb3c   :  { %v1961_v13 = vadd.f32 %v2384_v8, %v1944_v12  ;;  %v2034_v8 = vld [vmem:[%s3614_s10 + $0xe0] sm:$0xff] }
 0xb3d   :  { %v1964_v14 = vadd.f32 %v1962_v11, %v3169_v9  ;;  %v2008_v9 = vld [vmem:[%s3614_s10 + $0x10] sm:$0xff]  ;;  %v2787_v11 = vpack.c.bf16 %v2036_v10, %v2034_v8  ;;  %v2179_v12 = vld [vmem:[%s3616_s12 + $0x80] sm:$0xff]  ;;  %v2194_v8 = vld [vmem:[%s3616_s12 + $0xf8] sm:$0xff] }
 0xb3e   :  { %v1963_v15 = vadd.f32 %v1961_v13, %v3075_v26  ;;  %v2011_v26 = vld [vmem:[%s3614_s10 + $0x28] sm:$0xff]  ;;  %v2759_v25 = vpack.c.bf16 %v2008_v9, %v2006_v21 }
 0xb3f   :  { %1969 = vadd.xlane.f32.xlu1 %v1964_v14  ;;  %v2761_v28 = vpack.c.bf16 %v2013_v23, %v2011_v26  ;;  %v2180_v13 = vld [vmem:[%s3616_s12 + $0x88] sm:$0xff] }
 0xb40   :  { %1967 = vadd.xlane.f32.xlu0 %v1963_v15  ;;  %2760 = vmatpush1.bf16.msra.mxu0 %v2759_v25 }
 0xb41   :  { %2762 = vmatprep.subr.bf16.mxu0 %v2761_v28 }
 0xb44   :  { %2764 = vmatpush1.bf16.msra.mxu0 %v2763_v37 }
 0xb45   :  { %2766 = vmatprep.subr.bf16.mxu0 %v2765_v40 }
 0xb48   :  { %2768 = vmatpush1.bf16.msra.mxu0 %v2767_v43 }
 0xb49   :  { %2770 = vmatprep.subr.bf16.mxu0 %v2769_v51  ;;  %v2799_v51 = vpack.c.bf16 %v2168_v39, %v2167_v24 }
 0xb4c   :  { %2772 = vmatpush1.bf16.msra.mxu0 %v2771_v55  ;;  %v2801_v55 = vpack.c.bf16 %v2186_v53, %v2185_v52 }
 0xb4d   :  { %2774 = vmatprep.subr.bf16.mxu0 %v2773_v57  ;;  %v2803_v57 = vpack.c.bf16 %v2170_v56, %v2169_v54 }
 0xb50   :  { %2776 = vmatpush1.bf16.msra.mxu0 %v2775_v27  ;;  %v2171_v27 = vld [vmem:[%s3616_s12 + $0x40] sm:$0xff] }
 0xb51   :  { %2778 = vmatprep.subr.bf16.mxu0 %v2777_v29  ;;  %v2189_v29 = vld [vmem:[%s3616_s12 + $0xd0] sm:$0xff]  ;;  %v2807_v33 = vpack.c.bf16 %v2172_v61, %v2171_v27 }
 0xb52   :  { %v2809_v63 = vpack.c.bf16 %v2190_v62, %v2189_v29 }
 0xb54   :  { %2780 = vmatpush1.bf16.msra.mxu0 %v2779_v1  ;;  %v2173_v1 = vld [vmem:[%s3616_s12 + $0x50] sm:$0xff] }
 0xb55   :  { %2782 = vmatprep.subr.bf16.mxu0 %v2781_v3  ;;  %v2811_v3 = vpack.c.bf16 %v2174_v2, %v2173_v1  ;;  %v2387_v2 = vld [vmem:[%s3617_s13] ss:$0 sm:$0xff] }
 0xb58   :  { %2784 = vmatpush1.bf16.msra.mxu0 %v2783_v6  ;;  %v2176_v6 = vld [vmem:[%s3616_s12 + $0x68] sm:$0xff] }
 0xb59   :  { %2786 = vmatprep.subr.bf16.mxu0 %v2785_v7  ;;  %v2193_v7 = vld [vmem:[%s3616_s12 + $0xf0] sm:$0xff]  ;;  %v2815_v10 = vpack.c.bf16 %v2176_v6, %v2175_v5 }
 0xb5c   :  { %2788 = vmatpush1.bf16.msra.mxu0 %v2787_v11  ;;  %v2817_v11 = vpack.c.bf16 %v2194_v8, %v2193_v7 }
 0xbcc   :  { %v1970_v44 = vpop.xlane.xlu1 %1969 }
 0xbcd   :  { %v1968_v45 = vpop.xlane.xlu0 %1967  ;;  %v1973_v46 = vmul.f32 0.0078125, %v1970_v44  ;;  %v2181_v44 = vld [vmem:[%s3616_s12 + $0x90] sm:$0xff] }
 0xbce   :  { %v1972_v47 = vmul.f32 0.0078125, %v1968_v45  ;;  %v2182_v45 = vld [vmem:[%s3616_s12 + $0x98] sm:$0xff] }
 0xbcf   :  { %v3400_v49 = vsub.f32 %v1964_v14, %v1973_v46  ;;  %v2163_v14 = vld [vmem:[%s3616_s12] sm:$0xff]  ;;  %v2793_v46 = vpack.c.bf16 %v2182_v45, %v2181_v44 }
 0xbd0   :  { %v3398_v48 = vsub.f32 %v1963_v15, %v1972_v47  ;;  %v2789_v15 = vpack.c.bf16 %v2180_v13, %v2179_v12  ;;  %v2791_v19 = vpack.c.bf16 %v2164_v16, %v2163_v14  ;;  %v2165_v47 = vld [vmem:[%s3616_s12 + $0x10] sm:$0xff]  ;;  %v2178_v13 = vld [vmem:[%s3616_s12 + $0x78] sm:$0xff] }
 0xbd1   :  { %v1977_v50 = vmul.f32 %v3400_v49, %v3400_v49  ;;  %v2177_v12 = vld [vmem:[%s3616_s12 + $0x70] sm:$0xff] }
 0xbd2   :  { %v1976_v32 = vmul.f32 %v3398_v48, %v3398_v48  ;;  %2790 = vmatprep.subr.bf16.mxu1 %v2789_v15  ;;  %v2819_v14 = vpack.c.bf16 %v2178_v13, %v2177_v12  ;;  %v2038_v15 = vld [vmem:[%s3615_s11] sm:$0x3] }
 0xbd3   :  { %2792 = vmatpush3.bf16.msra.mxu1 %v2791_v19  ;;  %v2043_v16 = vrot.slane %v2038_v15, %v111_v18  ;;  %v2047_v19 = vrot.slane %v2038_v15, %v115_v20 }
 0xbd4   :  { %1978 = vadd.xlane.f32.xlu0 %v1976_v32  ;;  %2794 = vmatprep.subr.bf16.mxu1 %v2793_v46  ;;  %v2184_v32 = vld [vmem:[%s3616_s12 + $0xa8] sm:$0xff] }
 0xbd8   :  { %1980 = vadd.xlane.f32.xlu0 %v1977_v50 }
 0xc61   :  { %v1979_v21 = vpop.xlane.xlu0 %1978 }
 0xc62   :  { %v1982_v22 = vmul.f32 0.0078125, %v1979_v21 }
 0xc64   :  { %v1984_v9 = vadd.f32 1e-05, %v1982_v22 }
 0xc65   :  { %v1981_v26 = vpop.xlane.xlu0 %1980 }
 0xc66   :  { %2867 = vrsqrt.f32 %v1984_v9  ;;  %v1983_v23 = vmul.f32 0.0078125, %v1981_v26 }
 0xc68   :  { %v1985_v25 = vadd.f32 1e-05, %v1983_v23 }
 0xc6a   :  { %2869 = vrsqrt.f32 %v1985_v25 }
 0xc70   :  { %v2868_v28 = vpop.eup %2867 }
 0xc71   :  { %v1988_v31 = vmul.f32 %v2868_v28, %v3398_v48 }
 0xc73   :  { %v1996_v35 = vmul.f32 %v2385_v30, %v1988_v31 }
 0xc74   :  { %v2870_v37 = vpop.eup %2869 }
 0xc75   :  { %v3485_v40 = vadd.f32 %v2386_v34, %v1996_v35  ;;  %v1989_v41 = vmul.f32 %v2870_v37, %v3400_v49  ;;  %v2183_v49 = vld [vmem:[%s3616_s12 + $0xa0] sm:$0xff] }
 0xc76   :  { %v2797_v50 = vpack.c.bf16 %v2184_v32, %v2183_v49 }
 0xc77   :  { %2115 = vmatmul.mubr.f32.vlgmr.msra.gmra.mrb[26].mxu0 %v3485_v40  ;;  %v1997_v42 = vmul.f32 %v2385_v30, %v1989_v41 }
 0xc78   :  { %2120 = vmatprep.mubr.f32.mxu0 %v2910_v0  ;;  %v2166_v0 = vld [vmem:[%s3616_s12 + $0x18] sm:$0xff] }
 0xc79   :  { %v3490_v43 = vadd.f32 %v2386_v34, %v1997_v42  ;;  %v2795_v48 = vpack.c.bf16 %v2166_v0, %v2165_v47 }
 0xc7b   :  { %2121 = vmatmul.mubr.f32.gmra.mrb[28].mxu0 %v3490_v43  ;;  %2796 = vmatpush3.bf16.msra.mxu1 %v2795_v48 }
 0xc7c   :  { %2798 = vmatprep.subr.bf16.mxu1 %v2797_v50 }
 0xc7f   :  { %2800 = vmatpush3.bf16.msra.mxu1 %v2799_v51 }
 0xc80   :  { %2802 = vmatprep.subr.bf16.mxu1 %v2801_v55 }
 0xc83   :  { %2804 = vmatpush3.bf16.msra.mxu1 %v2803_v57 }
 0xc84   :  { %2806 = vmatprep.subr.bf16.mxu1 %v2805_v60 }
 0xc87   :  { %2808 = vmatpush3.bf16.msra.mxu1 %v2807_v33 }
 0xc88   :  { %2810 = vmatprep.subr.bf16.mxu1 %v2809_v63 }
 0xc8b   :  { %2812 = vmatpush3.bf16.msra.mxu1 %v2811_v3 }
 0xc8c   :  { %2814 = vmatprep.subr.bf16.mxu1 %v2813_v4 }
 0xc8f   :  { %2816 = vmatpush3.bf16.msra.mxu1 %v2815_v10 }
 0xc90   :  { %2818 = vmatprep.subr.bf16.mxu1 %v2817_v11 }
 0xc93   :  { %2820 = vmatpush3.bf16.msra.mxu1 %v2819_v14 }
 0xd4a   :  { %v2116_v21 = vpop.f32.mrb[26].mxu0 }
 0xd4b   :  { %v2117_v22 = vadd.f32 %v2116_v21, %v2043_v16  ;;  %v2118_v9 = vpop.f32.mrb[27].mxu0 }
 0xd4c   :  { %v2119_v26 = vadd.f32 %v2118_v9, %v2047_v19 }
 0xd4d   :  { %v2131_v23 = vmul.f32 0.044715, %v2117_v22  ;;  %v2127_v56 = vmul.f32 0.5, %v2117_v22 }
 0xd4e   :  { %v2132_v25 = vmul.f32 0.044715, %v2119_v26  ;;  %v2122_v28 = vpop.f32.mrb[28].mxu0  ;;  %v2128_v55 = vmul.f32 0.5, %v2119_v26 }
 0xd4f   :  { %v2135_v30 = vmul.f32 %v2131_v23, %v2117_v22  ;;  %v2123_v31 = vadd.f32 %v2122_v28, %v2043_v16  ;;  %v2124_v34 = vpop.f32.mrb[29].mxu0  ;;  %v2388_v28 = vld [vmem:[%s3618_s14] ss:$0 sm:$0xff] }
 0xd50   :  { %v2136_v35 = vmul.f32 %v2132_v25, %v2119_v26  ;;  %v2125_v37 = vadd.f32 %v2124_v34, %v2047_v19 }
 0xd51   :  { %v2139_v41 = vmul.f32 %v2135_v30, %v2117_v22  ;;  %v2133_v42 = vmul.f32 0.044715, %v2123_v31  ;;  %v2129_v62 = vmul.f32 0.5, %v2123_v31 }
 0xd52   :  { %v2134_v44 = vmul.f32 0.044715, %v2125_v37  ;;  %v2140_v45 = vmul.f32 %v2136_v35, %v2119_v26  ;;  %v2130_v61 = vmul.f32 0.5, %v2125_v37 }
 0xd53   :  { %v2143_v18 = vadd.f32 %v2139_v41, %v2117_v22  ;;  %v2137_v46 = vmul.f32 %v2133_v42, %v2123_v31 }
 0xd54   :  { %v2138_v17 = vmul.f32 %v2134_v44, %v2125_v37  ;;  %v2144_v20 = vadd.f32 %v2140_v45, %v2119_v26 }
 0xd55   :  { %v2147_v47 = vmul.f32 0.7978846, %v2143_v18  ;;  %v2141_v0 = vmul.f32 %v2137_v46, %v2123_v31 }
 0xd56   :  { %v2148_v48 = vmul.f32 0.7978846, %v2144_v20  ;;  %v2142_v49 = vmul.f32 %v2138_v17, %v2125_v37 }
 0xd57   :  { %2871 = vtanh.f32 %v2147_v47  ;;  %v2145_v32 = vadd.f32 %v2141_v0, %v2123_v31  ;;  %v2389_v31 = vld [vmem:[%s3619_s15] ss:$0 sm:$0xff] }
 0xd58   :  { %2873 = vtanh.f32 %v2148_v48  ;;  %v2146_v50 = vadd.f32 %v2142_v49, %v2125_v37 }
 0xd59   :  { %v2149_v24 = vmul.f32 0.7978846, %v2145_v32 }
 0xd5a   :  { %v2150_v39 = vmul.f32 0.7978846, %v2146_v50 }
 0xd5b   :  { %2875 = vtanh.f32 %v2149_v24 }
 0xd5c   :  { %2877 = vtanh.f32 %v2150_v39 }
 0xd61   :  { %v2872_v51 = vpop.eup %2871 }
 0xd62   :  { %v2874_v52 = vpop.eup %2873  ;;  %v2155_v53 = vadd.f32 1.0, %v2872_v51 }
 0xd63   :  { %v2156_v54 = vadd.f32 1.0, %v2874_v52 }
 0xd64   :  { %v2159_v27 = vmul.f32 %v2155_v53, %v2127_v56 }
 0xd65   :  { %v2876_v57 = vpop.eup %2875  ;;  %v2160_v58 = vmul.f32 %v2156_v54, %v2128_v55 }
 0xd66   :  { %v2878_v59 = vpop.eup %2877  ;;  %v2157_v60 = vadd.f32 1.0, %v2876_v57 }
 0xd67   :  { %2266 = vmatprep.mubr.f32.mxu1 %v2160_v58  ;;  %v2158_v29 = vadd.f32 1.0, %v2878_v59 }
 0xd68   :  { %2267 = vmatmul.mubr.f32.vlgmr.msra.gmra.mrb[14].mxu1 %v2159_v27  ;;  %v2161_v63 = vmul.f32 %v2157_v60, %v2129_v62 }
 0xd69   :  { %v2162_v33 = vmul.f32 %v2158_v29, %v2130_v61 }
 0xd6b   :  { %2271 = vmatprep.mubr.f32.mxu1 %v2162_v33 }
 0xd6c   :  { %2272 = vmatmul.mubr.f32.gmra.mrb[16].mxu1 %v2161_v63 }
 0xe3b   :  { %v2496_v1 = vpop.f32.mrb[14].mxu1 }
 0xe3c   :  { %v2497_v38 = vpop.f32.mrb[15].mxu1 }
 0xe3d   :  { %v2498_v36 = vadd.f32 %v2497_v38, %v2496_v1 }
 0xe3f   :  { %v2269_v3 = vadd.f32 %v2498_v36, %v2387_v2  ;;  %v2499_v4 = vpop.f32.mrb[16].mxu1 }
 0xe40   :  { %v2500_v5 = vpop.f32.mrb[17].mxu1 }
 0xe41   :  { %v2501_v6 = vadd.f32 %v2500_v5, %v2499_v4  ;;  %v2277_v7 = vadd.f32 %v2269_v3, %v3485_v40 }
 0xe43   :  { %v2274_v8 = vadd.f32 %v2501_v6, %v2387_v2  ;;  %2281 = vadd.xlane.f32.xlu0 %v2277_v7 }
 0xe45   :  { %v2278_v10 = vadd.f32 %v2274_v8, %v3490_v43 }
 0xe47   :  { %2283 = vadd.xlane.f32.xlu0 %v2278_v10 }
 0xed0   :  { %v2282_v11 = vpop.xlane.xlu0 %2281 }
 0xed1   :  { %v2285_v12 = vmul.f32 0.0078125, %v2282_v11 }
 0xed3   :  { %v2287_v13 = vsub.f32 %v2277_v7, %v2285_v12 }
 0xed4   :  { %v2284_v14 = vpop.xlane.xlu0 %2283 }
 0xed5   :  { %v2286_v15 = vmul.f32 0.0078125, %v2284_v14  ;;  %v2289_v16 = vmul.f32 %v2287_v13, %v2287_v13 }
 0xed7   :  { %v2288_v19 = vsub.f32 %v2278_v10, %v2286_v15  ;;  %2291 = vadd.xlane.f32.xlu0 %v2289_v16 }
 0xed9   :  { %v2290_v21 = vmul.f32 %v2288_v19, %v2288_v19 }
 0xedb   :  { %2293 = vadd.xlane.f32.xlu1 %v2290_v21 }
 0xf64   :  { %v2292_v22 = vpop.xlane.xlu0 %2291 }
 0xf65   :  { %v2295_v9 = vmul.f32 0.0078125, %v2292_v22 }
 0xf67   :  { %v2297_v26 = vadd.f32 1e-05, %v2295_v9 }
 0xf68   :  { %v2294_v23 = vpop.xlane.xlu1 %2293 }
 0xf69   :  { %2879 = vrsqrt.f32 %v2297_v26  ;;  %v2296_v40 = vmul.f32 0.0078125, %v2294_v23 }
 0xf6b   :  { %v2298_v25 = vadd.f32 1e-05, %v2296_v40 }
 0xf6d   :  { %2881 = vrsqrt.f32 %v2298_v25 }
 0xf73   :  { %v2880_v43 = vpop.eup %2879 }
 0xf74   :  { %v2301_v30 = vmul.f32 %v2880_v43, %v2287_v13 }
 0xf76   :  { %v2309_v34 = vmul.f32 %v2388_v28, %v2301_v30 }
 0xf77   :  { %v2882_v35 = vpop.eup %2881 }
 0xf78   :  { %v2317_v37 = vadd.f32 %v2389_v31, %v2309_v34  ;;  %v2302_v41 = vmul.f32 %v2882_v35, %v2288_v19 }
 0xf7a   :  { %2319 = vst [vmem:[%s3620_s16] sm:$0xff] %v2317_v37  ;;  %v2321_v42 = vrot.slane %v2317_v37, 4  ;;  %v2310_v44 = vmul.f32 %v2388_v28, %v2302_v41 }
 0xf7c   :  { %v2322_v45 = vadd.f32 %v2321_v42, %v2317_v37  ;;  %v2318_v18 = vadd.f32 %v2389_v31, %v2310_v44 }
 0xf7e   :  { %v2323_v46 = vrot.slane %v2322_v45, 2  ;;  %2320 = vst [vmem:[%s3620_s16 + $0x8] sm:$0xff] %v2318_v18  ;;  %v2327_v17 = vrot.slane %v2318_v18, 4 }
 0xf80   :  { %v2324_v20 = vadd.f32 %v2323_v46, %v2322_v45  ;;  %v2328_v47 = vadd.f32 %v2327_v17, %v2318_v18 }
 0xf82   :  { %v2325_v0 = vrot.slane %v2324_v20, 1  ;;  %v2329_v48 = vrot.slane %v2328_v47, 2 }
 0xf84   :  { %v2330_v49 = vadd.f32 %v2329_v48, %v2328_v47  ;;  %v2326_v32 = vadd.f32 %v2325_v0, %v2324_v20 }
 0xf86   :  { %v2331_v50 = vrot.slane %v2330_v49, 1  ;;  %v2334_v39 = vmul.f32 0.125, %v2326_v32 }
 0xf88   :  { %v2332_v24 = vadd.f32 %v2331_v50, %v2330_v49 }
 0xf8a   :  { %v2335_v51 = vmul.f32 0.125, %v2332_v24 }
 0xf8c   :  { %v2339_v52 = vsel %vm2338_vm3, %v2335_v51, %v2334_v39 }
 0xf8d   :  { %2341 = vst [vmem:[%s3621_s17] sm:$0x3] %v2339_v52 }
 0xf8e   :  { %2350 = vsyncpa [#allocation3], 1 }

// kernel: dit_forward.6
= control target key start
LH: loop header
LB: loop body
LE: loop exit
PB: predicated region body
PF: predicated region fallthrough
CT: control target
= control target key end

     0   :  { %s3561_s0 = inlined_call_operand.vmem [shape: f32[16,128], index: 0, kind: input, shape index: {}]   ;;  %s3562_s1 = inlined_call_operand.vmem [shape: f32[16,128], index: 1, kind: input, shape index: {}]   ;;  %s3563_s2 = inlined_call_operand.vmem [shape: f32[128,256], index: 2, kind: input, shape index: {}]   ;;  %s3564_s3 = inlined_call_operand.vmem [shape: f32[1,256], index: 3, kind: input, shape index: {}]   ;;  %s3565_s4 = inlined_call_operand.vmem [shape: f32[128,128], index: 4, kind: input, shape index: {}]   ;;  %s3566_s5 = inlined_call_operand.vmem [shape: f32[1,128], index: 5, kind: input, shape index: {}]   ;;  %s3567_s6 = inlined_call_operand.hbm [shape: f32[128,128], index: 6, kind: input, shape index: {}]   ;;  %s3568_s7 = inlined_call_operand.vmem [shape: f32[1,128], index: 7, kind: input, shape index: {}]   ;;  %s3569_s8 = inlined_call_operand.vmem [shape: f32[1,128], index: 8, kind: input, shape index: {}]   ;;  %s3570_s9 = inlined_call_operand.vmem [shape: f32[1,128], index: 9, kind: input, shape index: {}]   ;;  %s3571_s10 = inlined_call_operand.vmem [shape: f32[128,256], index: 10, kind: input, shape index: {}]   ;;  %s3572_s11 = inlined_call_operand.vmem [shape: f32[1,256], index: 11, kind: input, shape index: {}]   ;;  %s3573_s12 = inlined_call_operand.hbm [shape: f32[256,128], index: 12, kind: input, shape index: {}]   ;;  %s3574_s13 = inlined_call_operand.vmem [shape: f32[1,128], index: 13, kind: input, shape index: {}]   ;;  %s3575_s14 = inlined_call_operand.vmem [shape: f32[1,128], index: 14, kind: input, shape index: {}]   ;;  %s3576_s15 = inlined_call_operand.vmem [shape: f32[1,128], index: 15, kind: input, shape index: {}]   ;;  %s3577_s16 = inlined_call_operand.vmem [shape: f32[16,128], index: 16, kind: output, shape index: {0}]   ;;  %s3578_s17 = inlined_call_operand.vmem [shape: f32[2,128], index: 17, kind: output, shape index: {1}]  }
   0x1   :  { %3581 = sst [smem:[#allocation8_spill]] %s3561_s0 }
   0x2   :  { %3582 = sst [smem:[#allocation9_spill]] %s3562_s1 }
   0x3   :  { %23 = vsyncpa [#allocation3], 0 }
   0x4   :  { %24 = vsyncpa [#allocation5], 0  ;;  %s2947_s24 = smov [#allocation2]   ;;  %s2899_s28 = scalar_lea.hbm %s3567_s6, 2048 }
   0x5   :  { %s42_s25 = sshll.u32 %s2947_s24, 4  ;;  %p2900_p0 = scmp.ne.s32.totalorder %s3567_s6, %s2899_s28  ;;  %s43_s25 = int_to_ptr.vmem [resolvable:$true] %s42_s25 }
   0x6   :  { %p2903_p1 = scmp.lt.u32.totalorder %s2899_s28, %s3567_s6 }
   0x8   :  { %p2905_p2 = pnand %p2903_p1, %p2900_p0 }
   0xa   :  { %2908 = shalt.err (!%p2905_p2)
}
   0xb   :  { %s2909_s19 = scalar_lea.vmem %s43_s25, 2048  ;;  %p2914_p4 = scmp.lt.s32.totalorder %s43_s25, %s43_s25 }
   0xc   :  { %p2910_p3 = scmp.ne.s32.totalorder %s43_s25, %s2909_s19  ;;  %p2915_p5 = scmp.lt.s32.totalorder %s2909_s19, %s2909_s19 }
   0xe   :  { %p2916_p6 = por %p2915_p5, %p2914_p4 }
  0x10   :  { %p2917_p7 = pnand %p2916_p6, %p2910_p3 }
  0x12   :  { %2920 = shalt.err (!%p2917_p7)
}
  0x13   :  { %s2948_s1 = smov 128   ;;  %s2949_s20 = smov 8  }
  0x14   :  { %48 = dma.hbm_to_vmem [thread:$0]  %s3567_s6, 2048, %s43_s25, [#allocation3], %s2948_s1, %s2948_s1, %s2949_s20  }
  0x15   :  { %s2950_s23 = smov [#allocation4]   ;;  %s2921_s28 = scalar_lea.hbm %s3573_s12, 4096 }
  0x16   :  { %s64_s24 = sshll.u32 %s2950_s23, 4  ;;  %p2922_p8 = scmp.ne.s32.totalorder %s3573_s12, %s2921_s28  ;;  %s65_s24 = int_to_ptr.vmem [resolvable:$true] %s64_s24 }
  0x17   :  { %p2925_p9 = scmp.lt.u32.totalorder %s2921_s28, %s3573_s12 }
  0x19   :  { %p2927_p10 = pnand %p2925_p9, %p2922_p8 }
  0x1b   :  { %2930 = shalt.err (!%p2927_p10)
}
  0x1c   :  { %s2931_s19 = scalar_lea.vmem %s65_s24, 4096  ;;  %p2936_p12 = scmp.lt.s32.totalorder %s65_s24, %s65_s24 }
  0x1d   :  { %p2932_p11 = scmp.ne.s32.totalorder %s65_s24, %s2931_s19  ;;  %p2937_p13 = scmp.lt.s32.totalorder %s2931_s19, %s2931_s19 }
  0x1f   :  { %p2938_p0 = por %p2937_p13, %p2936_p12 }
  0x21   :  { %p2939_p1 = pnand %p2938_p0, %p2932_p11 }
  0x23   :  { %2942 = shalt.err (!%p2939_p1)
}
  0x24   :  { %70 = dma.hbm_to_vmem [thread:$0]  %s3573_s12, 4096, %s65_s24, [#allocation5], %s2948_s1, %s2948_s1, %s2949_s20  }
  0x25   :  { %2943 = dma.done.wait [#allocation3], 2048  }
  0x26   :  { %2944 = vsyncadd [#allocation3], 4294965248 }
  0x27   :  { %2945 = dma.done.wait [#allocation5], 4096  }
  0x28   :  { %2946 = vsyncadd [#allocation5], 4294963200  ;;  %v2951_v0 = vmov 0.0   ;;  %v90_v1 = vld [vmem:[%s3563_s2 + $0x8] sm:$0xff]  ;;  %v92_v2 = vld [vmem:[%s3563_s2 + $0x18] sm:$0xff]  ;;  %s3583_s27 = sld [smem:[#allocation8_spill]] }
  0x29   :  { %197 = vmatprep.mubr.f32.mxu0 %v2951_v0  ;;  %v89_v3 = vld [vmem:[%s3563_s2] sm:$0xff]  ;;  %v2676_v4 = vpack.c.bf16 %v92_v2, %v90_v1  ;;  %v91_v5 = vld [vmem:[%s3563_s2 + $0x10] sm:$0xff]  ;;  %v94_v6 = vld [vmem:[%s3563_s2 + $0x28] sm:$0xff]  ;;  %s3584_s0 = sld [smem:[#allocation9_spill]]  ;;  %vm2952_vm0 = vmmov 0   ;;  %vm327_vm1 = vcmask 261120  }
  0x2a   :  { %v96_v7 = vld [vmem:[%s3563_s2 + $0x38] sm:$0xff]  ;;  %v2678_v8 = vpack.c.bf16 %v91_v5, %v89_v3  ;;  %v93_v10 = vld [vmem:[%s3563_s2 + $0x20] sm:$0xff]  ;;  %v95_v11 = vld [vmem:[%s3563_s2 + $0x30] sm:$0xff]  ;;  %vm480_vm2 = vcmask 64512   ;;  %s2955_s24 = smov 32   ;;  %vm2352_vm3 = vcmask 1041409  }
  0x2b   :  { %v2680_v9 = vpack.c.bf16 %v96_v7, %v94_v6  ;;  %v98_v12 = vld [vmem:[%s3563_s2 + $0x48] sm:$0xff]  ;;  %2677 = vmatprep.subr.bf16.mxu0 %v2676_v4  ;;  %v100_v13 = vld [vmem:[%s3563_s2 + $0x58] sm:$0xff]  ;;  %v2682_v14 = vpack.c.bf16 %v95_v11, %v93_v10  ;;  %v97_v16 = vld [vmem:[%s3563_s2 + $0x40] sm:$0xff] }
  0x2c   :  { %2679 = vmatpush1.bf16.msra.mxu0 %v2678_v8  ;;  %v2684_v15 = vpack.c.bf16 %v100_v13, %v98_v12  ;;  %v99_v17 = vld [vmem:[%s3563_s2 + $0x50] sm:$0xff]  ;;  %v102_v18 = vld [vmem:[%s3563_s2 + $0x68] sm:$0xff]  ;;  %v104_v19 = vld [vmem:[%s3563_s2 + $0x78] sm:$0xff] }
  0x2d   :  { %2681 = vmatprep.subr.bf16.mxu0 %v2680_v9  ;;  %v2686_v20 = vpack.c.bf16 %v99_v17, %v97_v16  ;;  %v2688_v21 = vpack.c.bf16 %v104_v19, %v102_v18  ;;  %v101_v22 = vld [vmem:[%s3563_s2 + $0x60] sm:$0xff]  ;;  %v103_v23 = vld [vmem:[%s3563_s2 + $0x70] sm:$0xff]  ;;  %v106_v24 = vld [vmem:[%s3563_s2 + $0x88] sm:$0xff]  ;;  %v123_v16 = vlaneseq }
  0x2e   :  { %v108_v25 = vld [vmem:[%s3563_s2 + $0x98] sm:$0xff]  ;;  %v3128_v26 = vld [vmem:[%s3583_s27] sm:$0xff]  ;;  %v2690_v28 = vpack.c.bf16 %v103_v23, %v101_v22  ;;  %v211_v30 = vld [vmem:[%s3565_s4 + $0x8] sm:$0xff] }
  0x2f   :  { %v105_v27 = vld [vmem:[%s3563_s2 + $0x80] sm:$0xff]  ;;  %2549 = vmatprep.mubr.f32.mxu1 %v3128_v26  ;;  %v212_v31 = vld [vmem:[%s3565_s4 + $0x10] sm:$0xff]  ;;  %v2692_v32 = vpack.c.bf16 %v108_v25, %v106_v24  ;;  %v110_v34 = vld [vmem:[%s3563_s2 + $0xa8] sm:$0xff]  ;;  %v3242_v17 = vshrl.u32 %v123_v16, 7 }
  0x30   :  { %2683 = vmatpush1.bf16.msra.mxu0 %v2682_v14  ;;  %v210_v29 = vld [vmem:[%s3565_s4] sm:$0xff]  ;;  %v107_v33 = vld [vmem:[%s3563_s2 + $0x90] sm:$0xff]  ;;  %v213_v36 = vld [vmem:[%s3565_s4 + $0x18] sm:$0xff] }
  0x31   :  { %2685 = vmatprep.subr.bf16.mxu0 %v2684_v15  ;;  %v2708_v35 = vpack.c.bf16 %v211_v30, %v210_v29  ;;  %v112_v37 = vld [vmem:[%s3563_s2 + $0xb8] sm:$0xff]  ;;  %v2712_v38 = vpack.c.bf16 %v213_v36, %v212_v31  ;;  %v214_v39 = vld [vmem:[%s3565_s4 + $0x20] sm:$0xff]  ;;  %v215_v40 = vld [vmem:[%s3565_s4 + $0x28] sm:$0xff]  ;;  %v2694_v41 = vpack.c.bf16 %v107_v33, %v105_v27  ;;  %v125_v18 = vsub.s32 0, %v3242_v17 }
  0x32   :  { %v2696_v42 = vpack.c.bf16 %v112_v37, %v110_v34  ;;  %v109_v43 = vld [vmem:[%s3563_s2 + $0xa0] sm:$0xff]  ;;  %v111_v44 = vld [vmem:[%s3563_s2 + $0xb0] sm:$0xff]  ;;  %v114_v45 = vld [vmem:[%s3563_s2 + $0xc8] sm:$0xff]  ;;  %v2716_v46 = vpack.c.bf16 %v215_v40, %v214_v39 }
  0x33   :  { %2709 = vmatprep.subr.bf16.mxu1 %v2708_v35  ;;  %v116_v47 = vld [vmem:[%s3563_s2 + $0xd8] sm:$0xff]  ;;  %v216_v48 = vld [vmem:[%s3565_s4 + $0x30] sm:$0xff]  ;;  %v2698_v50 = vpack.c.bf16 %v111_v44, %v109_v43  ;;  %v113_v52 = vld [vmem:[%s3563_s2 + $0xc0] sm:$0xff] }
  0x34   :  { %2687 = vmatpush1.bf16.msra.mxu0 %v2686_v20  ;;  %2711 = vmatpush3.bf16.msra.mxu1 %v2708_v35  ;;  %v217_v49 = vld [vmem:[%s3565_s4 + $0x38] sm:$0xff]  ;;  %v2700_v51 = vpack.c.bf16 %v116_v47, %v114_v45  ;;  %v115_v53 = vld [vmem:[%s3563_s2 + $0xd0] sm:$0xff]  ;;  %v118_v54 = vld [vmem:[%s3563_s2 + $0xe8] sm:$0xff]  ;;  %v129_v20 = vsub.s32 1, %v3242_v17 }
  0x35   :  { %2689 = vmatprep.subr.bf16.mxu0 %v2688_v21  ;;  %2713 = vmatprep.subr.bf16.mxu1 %v2712_v38  ;;  %v2720_v55 = vpack.c.bf16 %v217_v49, %v216_v48  ;;  %v120_v56 = vld [vmem:[%s3563_s2 + $0xf8] sm:$0xff]  ;;  %v218_v57 = vld [vmem:[%s3565_s4 + $0x40] sm:$0xff]  ;;  %v219_v58 = vld [vmem:[%s3565_s4 + $0x48] sm:$0xff]  ;;  %v2702_v59 = vpack.c.bf16 %v115_v53, %v113_v52 }
  0x36   :  { %v2704_v60 = vpack.c.bf16 %v120_v56, %v118_v54  ;;  %v117_v61 = vld [vmem:[%s3563_s2 + $0xe0] sm:$0xff]  ;;  %v119_v62 = vld [vmem:[%s3563_s2 + $0xf0] sm:$0xff]  ;;  %v2724_v63 = vpack.c.bf16 %v219_v58, %v218_v57  ;;  %v221_v2 = vld [vmem:[%s3565_s4 + $0x58] sm:$0xff] }
  0x37   :  { %v220_v1 = vld [vmem:[%s3565_s4 + $0x50] sm:$0xff]  ;;  %v2706_v3 = vpack.c.bf16 %v119_v62, %v117_v61  ;;  %v85_v4 = vld [vmem:[%s3584_s0] sm:$0xff]  ;;  %v223_v7 = vld [vmem:[%s3565_s4 + $0x68] sm:$0xff] }
  0x38   :  { %2691 = vmatpush1.bf16.msra.mxu0 %v2690_v28  ;;  %2715 = vmatpush3.bf16.msra.mxu1 %v2712_v38  ;;  %v2728_v5 = vpack.c.bf16 %v221_v2, %v220_v1  ;;  %v222_v6 = vld [vmem:[%s3565_s4 + $0x60] sm:$0xff]  ;;  %v87_v8 = vadd.f32 %v85_v4, %v3128_v26  ;;  %v3222_v9 = vld [vmem:[%s3583_s27 + $0x8] sm:$0xff]  ;;  %v224_v12 = vld [vmem:[%s3565_s4 + $0x70] sm:$0xff] }
  0x39   :  { %2693 = vmatprep.subr.bf16.mxu0 %v2692_v32  ;;  %2717 = vmatprep.subr.bf16.mxu1 %v2716_v46  ;;  %v86_v10 = vld [vmem:[%s3584_s0 + $0x8] sm:$0xff]  ;;  %v2732_v11 = vpack.c.bf16 %v223_v7, %v222_v6  ;;  %v225_v13 = vld [vmem:[%s3565_s4 + $0x78] sm:$0xff]  ;;  %v121_v19 = vld [vmem:[%s3564_s3] sm:$0x3]  ;;  %s2953_s3 = smov 96  }
  0x3a   :  { %v88_v14 = vadd.f32 %v86_v10, %v3222_v9  ;;  %v2736_v15 = vpack.c.bf16 %v225_v13, %v224_v12  ;;  %v126_v21 = vrot.slane %v121_v19, %v125_v18  ;;  %v130_v22 = vrot.slane %v121_v19, %v129_v20  ;;  %v2366_v34 = vld [vmem:[%s3566_s5] ss:$0 sm:$0xff]  ;;  %s2954_s5 = smov 64  }
  0x3c   :  { %2695 = vmatpush1.bf16.msra.mxu0 %v2694_v41  ;;  %2719 = vmatpush3.bf16.msra.mxu1 %v2716_v46 }
  0x3d   :  { %2697 = vmatprep.subr.bf16.mxu0 %v2696_v42  ;;  %2721 = vmatprep.subr.bf16.mxu1 %v2720_v55 }
  0x40   :  { %2699 = vmatpush1.bf16.msra.mxu0 %v2698_v50  ;;  %2723 = vmatpush3.bf16.msra.mxu1 %v2720_v55 }
  0x41   :  { %2701 = vmatprep.subr.bf16.mxu0 %v2700_v51  ;;  %2725 = vmatprep.subr.bf16.mxu1 %v2724_v63 }
  0x44   :  { %2703 = vmatpush1.bf16.msra.mxu0 %v2702_v59  ;;  %2727 = vmatpush3.bf16.msra.mxu1 %v2724_v63 }
  0x45   :  { %2705 = vmatprep.subr.bf16.mxu0 %v2704_v60  ;;  %2729 = vmatprep.subr.bf16.mxu1 %v2728_v5 }
  0x48   :  { %2707 = vmatpush1.bf16.msra.mxu0 %v2706_v3  ;;  %2731 = vmatpush3.bf16.msra.mxu1 %v2728_v5 }
  0x49   :  { %2557 = vmatprep.subr.mxu0 %v2951_v0  ;;  %2733 = vmatprep.subr.bf16.mxu1 %v2732_v11 }
  0x4b   :  { %198 = vmatmul.mubr.f32.vlgmr.msra.gmra.mrb[0].mxu0 %v87_v8 }
  0x4c   :  { %203 = vmatprep.mubr.f32.mxu0 %v2951_v0  ;;  %2735 = vmatpush3.bf16.msra.mxu1 %v2732_v11 }
  0x4d   :  { %2737 = vmatprep.subr.bf16.mxu1 %v2736_v15 }
  0x4f   :  { %204 = vmatmul.mubr.f32.gmra.mrb[2].mxu0 %v88_v14 }
  0x50   :  { %2739 = vmatpush3.bf16.msra.mxu1 %v2736_v15  ;;  %2559 = vmatprep.mubr.msk.f32.mxu0 %vm2952_vm0, %v2951_v0 }
  0x51   :  { %2552 = vmatprep.subr.mxu1 %v2951_v0 }
  0x53   :  { %2550 = vmatmul.mubr.f32.vlgmr.msra.gmra.mrb[0].mxu1 %v3222_v9 }
  0x54   :  { %2554 = vmatprep.mubr.msk.f32.mxu1 %vm2952_vm0, %v2951_v0 }
 0x11e   :  { %v199_v23 = vpop.f32.mrb[0].mxu0 }
 0x11f   :  { %v200_v24 = vadd.f32 %v199_v23, %v126_v21  ;;  %v201_v25 = vpop.f32.mrb[1].mxu0 }
 0x120   :  { %v3253_v27 = vadd.f32 %v201_v25, %v130_v22 }
 0x121   :  { %v3257_v29 = vmul.f32 0.17677669, %v200_v24 }
 0x122   :  { %v205_v28 = vpop.f32.mrb[2].mxu0  ;;  %2553 = vmatpush3.xpose.msk.msra.mxu1 %vm327_vm1, %v3253_v27 }
 0x123   :  { %v206_v30 = vadd.f32 %v205_v28, %v126_v21  ;;  %v207_v31 = vpop.f32.mrb[3].mxu0  ;;  %2562 = vmatprep.subr.mxu1 %v2951_v0 }
 0x124   :  { %v3260_v32 = vadd.f32 %v207_v31, %v130_v22 }
 0x125   :  { %2555 = vmatmul.mubr.msk.f32.vlgmr.msra.gmra.mrb[2].mxu1 %vm327_vm1, %v3257_v29  ;;  %v3268_v33 = vmul.f32 0.17677669, %v206_v30 }
 0x126   :  { %729 = vrot.lane.b32.xlu1 %v3260_v32, %s2953_s3  ;;  %2558 = vmatpush3.xpose.msk.msra.mxu0 %vm327_vm1, %v3260_v32  ;;  %v2551_v35 = vpop.f32.mrb[0].mxu1 }
 0x127   :  { %2567 = vmatprep.subr.mxu0 %v2951_v0  ;;  %2564 = vmatprep.mubr.msk.f32.mxu1 %vm2952_vm0, %v2951_v0  ;;  %v3282_v36 = vadd.f32 %v2551_v35, %v2366_v34  ;;  %v299_v37 = vpop.f32.mrb[1].mxu1 }
 0x128   :  { %v3284_v38 = vadd.f32 %v2366_v34, %v299_v37 }
 0x129   :  { %2560 = vmatmul.mubr.msk.f32.vlgmr.msra.gmra.mrb[4].mxu0 %vm327_vm1, %v3268_v33 }
 0x12a   :  { %727 = vrot.lane.b32.xlu1 %v3268_v33, %s2953_s3  ;;  %2569 = vmatprep.mubr.msk.f32.mxu0 %vm2952_vm0, %v2951_v0 }
 0x12b   :  { %2568 = vmatpush3.msra.mxu0 %v3282_v36  ;;  %2563 = vmatpush3.msra.mxu1 %v3284_v38 }
 0x12c   :  { %2577 = vmatprep.subr.mxu0 %v2951_v0  ;;  %2572 = vmatprep.subr.mxu1 %v2951_v0 }
 0x198   :  { %v730_v51 = vpop.permute.xlu1 %729 }
 0x19c   :  { %v728_v53 = vpop.permute.xlu1 %727 }
 0x1f8   :  { %v400_v39 = vpop.f32.mrb[2].mxu1 }
 0x1f9   :  { %v2556_v40 = vpop.f32.mrb[3].mxu1  ;;  %v481_v59 = vsel %vm480_vm2, %v400_v39, -inf }
 0x1fc   :  { %v476_v41 = vpop.f32.mrb[4].mxu0 }
 0x1fd   :  { %v2561_v42 = vpop.f32.mrb[5].mxu0  ;;  %v484_v43 = vsel %vm480_vm2, %v476_v41, -inf }
 0x1fe   :  { %485 = vmax.xlane.f32.xlu0 %v484_v43 }
 0x28b   :  { %v486_v44 = vpop.xlane.xlu0 %485 }
 0x28c   :  { %v488_v45 = vsub.f32 %v476_v41, %v486_v44 }
 0x28e   :  { %v491_v46 = vmul.f32 1.442695, %v488_v45 }
 0x290   :  { %2851 = vpow2.f32 %v491_v46 }
 0x29a   :  { %v2852_v47 = vpop.eup %2851 }
 0x29b   :  { %v496_v48 = vsel %vm480_vm2, %v2852_v47, 0.0 }
 0x29c   :  { %497 = vadd.xlane.f32.xlu0 %v496_v48 }
 0x329   :  { %v498_v49 = vpop.xlane.xlu0 %497 }
 0x32a   :  { %2853 = vrcp.f32 %v498_v49 }
 0x334   :  { %v2854_v50 = vpop.eup %2853 }
 0x335   :  { %v502_v52 = vmul.f32 %v2854_v50, %v2852_v47 }
 0x337   :  { %2570 = vmatmul.mubr.msk.f32.vlgmr.msra.gmra.mrb[6].mxu0 %vm480_vm2, %v502_v52 }
 0x338   :  { %2578 = vmatpush3.xpose.msk.msra.mxu0 %vm327_vm1, %v730_v51  ;;  %2579 = vmatprep.mubr.msk.f32.mxu0 %vm2952_vm0, %v2951_v0 }
 0x339   :  { %2587 = vmatprep.subr.mxu0 %v2951_v0 }
 0x33b   :  { %2580 = vmatmul.mubr.msk.f32.vlgmr.msra.gmra.mrb[8].mxu0 %vm327_vm1, %v728_v53 }
 0x33c   :  { %2589 = vmatprep.mubr.msk.f32.mxu0 %vm2952_vm0, %v2951_v0 }
 0x40a   :  { %v3300_v54 = vpop.f32.mrb[6].mxu0 }
 0x40b   :  { %v2571_v55 = vpop.f32.mrb[7].mxu0 }
 0x40e   :  { %v801_v56 = vpop.f32.mrb[8].mxu0 }
 0x40f   :  { %v2581_v57 = vpop.f32.mrb[9].mxu0  ;;  %v808_v58 = vsel %vm480_vm2, %v801_v56, -inf }
 0x410   :  { %809 = vmax.xlane.f32.xlu0 %v808_v58 }
 0x426   :  { %905 = vrot.lane.b32.xlu0 %v3282_v36, %s2953_s3 }
 0x42a   :  { %1145 = vrot.lane.b32.xlu0 %v3253_v27, %s2954_s5 }
 0x42e   :  { %1143 = vrot.lane.b32.xlu0 %v3257_v29, %s2954_s5 }
 0x432   :  { %1223 = vrot.lane.b32.xlu0 %v3260_v32, %s2954_s5 }
 0x451   :  { %482 = vmax.xlane.f32.xlu0 %v481_v59 }
 0x467   :  { %651 = vrot.lane.b32.xlu0 %v3253_v27, %s2953_s3 }
 0x49d   :  { %v810_v60 = vpop.xlane.xlu0 %809 }
 0x49e   :  { %v812_v61 = vsub.f32 %v801_v56, %v810_v60 }
 0x4a0   :  { %v815_v62 = vmul.f32 1.442695, %v812_v61 }
 0x4a1   :  { %v906_v63 = vpop.permute.xlu0 %905 }
 0x4a2   :  { %2855 = vpow2.f32 %v815_v62  ;;  %2588 = vmatpush3.msra.mxu0 %v906_v63 }
 0x4a3   :  { %2614 = vmatprep.subr.mxu0 %v2951_v0 }
 0x4a5   :  { %v1146_v3 = vpop.permute.xlu0 %1145 }
 0x4a9   :  { %v1144_v4 = vpop.permute.xlu0 %1143 }
 0x4ac   :  { %v2856_v1 = vpop.eup %2855 }
 0x4ad   :  { %v820_v2 = vsel %vm480_vm2, %v2856_v1, 0.0  ;;  %v1224_v5 = vpop.permute.xlu0 %1223 }
 0x4ae   :  { %821 = vadd.xlane.f32.xlu1 %v820_v2 }
 0x4bf   :  { %1221 = vrot.lane.b32.xlu1 %v3268_v33, %s2954_s5 }
 0x4de   :  { %v483_v6 = vpop.xlane.xlu0 %482 }
 0x4df   :  { %v487_v7 = vsub.f32 %v400_v39, %v483_v6 }
 0x4e1   :  { %v489_v8 = vmul.f32 1.442695, %v487_v7 }
 0x4e2   :  { %v652_v22 = vpop.permute.xlu0 %651 }
 0x4e3   :  { %2857 = vpow2.f32 %v489_v8 }
 0x4ed   :  { %v2858_v10 = vpop.eup %2857 }
 0x4ee   :  { %v493_v11 = vsel %vm480_vm2, %v2858_v10, 0.0 }
 0x4ef   :  { %494 = vadd.xlane.f32.xlu1 %v493_v11  ;;  %v313_v11 = vld [vmem:[#allocation2 + $0x28] sm:$0xff] }
 0x500   :  { %649 = vrot.lane.b32.xlu1 %v3257_v29, %s2953_s3 }
 0x53b   :  { %v822_v12 = vpop.xlane.xlu1 %821 }
 0x53c   :  { %2859 = vrcp.f32 %v822_v12  ;;  %v314_v12 = vld [vmem:[#allocation2 + $0x30] sm:$0xff] }
 0x53f   :  { %v1222_v15 = vpop.permute.xlu1 %1221 }
 0x546   :  { %v2860_v13 = vpop.eup %2859 }
 0x547   :  { %v826_v14 = vmul.f32 %v2860_v13, %v2856_v1 }
 0x549   :  { %2590 = vmatmul.mubr.msk.f32.vlgmr.msra.gmra.mrb[10].mxu0 %vm480_vm2, %v826_v14  ;;  %v315_v14 = vld [vmem:[#allocation2 + $0x38] sm:$0xff] }
 0x54a   :  { %2615 = vmatpush3.xpose.msk.msra.mxu0 %vm327_vm1, %v1146_v3  ;;  %2616 = vmatprep.mubr.msk.f32.mxu0 %vm2952_vm0, %v2951_v0 }
 0x54b   :  { %2619 = vmatprep.subr.mxu0 %v2951_v0 }
 0x54d   :  { %2617 = vmatmul.mubr.msk.f32.vlgmr.msra.gmra.mrb[12].mxu0 %vm327_vm1, %v1144_v4 }
 0x54e   :  { %2620 = vmatpush3.xpose.msk.msra.mxu0 %vm327_vm1, %v1224_v5  ;;  %2621 = vmatprep.mubr.msk.f32.mxu0 %vm2952_vm0, %v2951_v0 }
 0x54f   :  { %2624 = vmatprep.subr.mxu0 %v2951_v0 }
 0x551   :  { %2622 = vmatmul.mubr.msk.f32.vlgmr.msra.gmra.mrb[14].mxu0 %vm327_vm1, %v1222_v15  ;;  %v2744_v15 = vpack.c.bf16 %v315_v14, %v314_v12 }
 0x552   :  { %2626 = vmatprep.mubr.msk.f32.mxu0 %vm2952_vm0, %v2951_v0 }
 0x57c   :  { %v495_v16 = vpop.xlane.xlu1 %494 }
 0x57d   :  { %2861 = vrcp.f32 %v495_v16  ;;  %v308_v16 = vld [vmem:[#allocation2] sm:$0xff] }
 0x580   :  { %v650_v23 = vpop.permute.xlu1 %649 }
 0x587   :  { %v2862_v19 = vpop.eup %2861 }
 0x588   :  { %v501_v21 = vmul.f32 %v2862_v19, %v2858_v10  ;;  %v312_v10 = vld [vmem:[#allocation2 + $0x20] sm:$0xff]  ;;  %v309_v19 = vld [vmem:[#allocation2 + $0x8] sm:$0xff] }
 0x589   :  { %v2740_v13 = vpack.c.bf16 %v313_v11, %v312_v10 }
 0x58a   :  { %2565 = vmatmul.mubr.msk.f32.vlgmr.msra.gmra.mrb[4].mxu1 %vm480_vm2, %v501_v21  ;;  %v2748_v21 = vpack.c.bf16 %v309_v19, %v308_v16  ;;  %v2021_v16 = vld [vmem:[%s3571_s10 + $0x8] sm:$0xff]  ;;  %v2023_v19 = vld [vmem:[%s3571_s10 + $0x18] sm:$0xff] }
 0x58b   :  { %2573 = vmatpush3.xpose.msk.msra.mxu1 %vm327_vm1, %v652_v22  ;;  %2574 = vmatprep.mubr.msk.f32.mxu1 %vm2952_vm0, %v2951_v0 }
 0x58c   :  { %2582 = vmatprep.subr.mxu1 %v2951_v0 }
 0x58e   :  { %2575 = vmatmul.mubr.msk.f32.vlgmr.msra.gmra.mrb[6].mxu1 %vm327_vm1, %v650_v23 }
 0x58f   :  { %2584 = vmatprep.mubr.msk.f32.mxu1 %vm2952_vm0, %v2951_v0 }
 0x61c   :  { %v3342_v24 = vpop.f32.mrb[10].mxu0 }
 0x61d   :  { %v2591_v25 = vpop.f32.mrb[11].mxu0 }
 0x620   :  { %v1217_v28 = vpop.f32.mrb[12].mxu0 }
 0x621   :  { %v2618_v30 = vpop.f32.mrb[13].mxu0  ;;  %v1299_v31 = vsel %vm480_vm2, %v1217_v28, -inf }
 0x622   :  { %1300 = vmax.xlane.f32.xlu0 %v1299_v31 }
 0x624   :  { %v1295_v34 = vpop.f32.mrb[14].mxu0 }
 0x625   :  { %v2623_v35 = vpop.f32.mrb[15].mxu0  ;;  %v1302_v37 = vsel %vm480_vm2, %v1295_v34, -inf }
 0x626   :  { %1303 = vmax.xlane.f32.xlu1 %v1302_v37 }
 0x637   :  { %1397 = vrot.lane.b32.xlu1 %v3282_v36, %s2954_s5 }
 0x638   :  { %1321 = vrot.lane.b32.xlu0 %v3284_v38, %s2954_s5 }
 0x63b   :  { %1636 = vrot.lane.b32.xlu1 %v3260_v32, %s2955_s24 }
 0x65d   :  { %v3352_v39 = vpop.f32.mrb[4].mxu1 }
 0x65e   :  { %v2566_v40 = vpop.f32.mrb[5].mxu1 }
 0x661   :  { %v723_v41 = vpop.f32.mrb[6].mxu1 }
 0x662   :  { %v2576_v42 = vpop.f32.mrb[7].mxu1  ;;  %v805_v43 = vsel %vm480_vm2, %v723_v41, -inf }
 0x663   :  { %806 = vmax.xlane.f32.xlu1 %v805_v43  ;;  %v311_v42 = vld [vmem:[#allocation2 + $0x18] sm:$0xff] }
 0x6af   :  { %v1301_v44 = vpop.xlane.xlu0 %1300 }
 0x6b0   :  { %v1305_v45 = vsub.f32 %v1217_v28, %v1301_v44 }
 0x6b2   :  { %v1307_v46 = vmul.f32 1.442695, %v1305_v45 }
 0x6b3   :  { %v1322_v47 = vpop.permute.xlu0 %1321  ;;  %v1304_v32 = vpop.xlane.xlu1 %1303 }
 0x6b4   :  { %2863 = vpow2.f32 %v1307_v46  ;;  %2625 = vmatpush3.msra.mxu0 %v1322_v47  ;;  %v1306_v50 = vsub.f32 %v1295_v34, %v1304_v32  ;;  %v316_v46 = vld [vmem:[#allocation2 + $0x40] sm:$0xff]  ;;  %v317_v47 = vld [vmem:[#allocation2 + $0x48] sm:$0xff]  ;;  %v319_v32 = vld [vmem:[#allocation2 + $0x58] sm:$0xff] }
 0x6b5   :  { %2629 = vmatprep.subr.mxu0 %v2951_v0 }
 0x6b6   :  { %v1309_v51 = vmul.f32 1.442695, %v1306_v50 }
 0x6b7   :  { %v1398_v55 = vpop.permute.xlu1 %1397 }
 0x6b8   :  { %2865 = vpow2.f32 %v1309_v51 }
 0x6bb   :  { %v1637_v56 = vpop.permute.xlu1 %1636 }
 0x6be   :  { %v2864_v48 = vpop.eup %2863 }
 0x6bf   :  { %v1311_v49 = vsel %vm480_vm2, %v2864_v48, 0.0 }
 0x6c0   :  { %1312 = vadd.xlane.f32.xlu0 %v1311_v49  ;;  %v318_v49 = vld [vmem:[#allocation2 + $0x50] sm:$0xff] }
 0x6c1   :  { %v2760_v50 = vpack.c.bf16 %v319_v32, %v318_v49 }
 0x6c2   :  { %v2866_v52 = vpop.eup %2865 }
 0x6c3   :  { %v1314_v53 = vsel %vm480_vm2, %v2866_v52, 0.0 }
 0x6d6   :  { %1558 = vrot.lane.b32.xlu0 %v3253_v27, %s2955_s24 }
 0x6f0   :  { %v807_v57 = vpop.xlane.xlu1 %806 }
 0x6f1   :  { %v811_v58 = vsub.f32 %v723_v41, %v807_v57  ;;  %v310_v41 = vld [vmem:[#allocation2 + $0x10] sm:$0xff] }
 0x6f2   :  { %v2752_v44 = vpack.c.bf16 %v311_v42, %v310_v41  ;;  %v2028_v41 = vld [vmem:[%s3571_s10 + $0x40] sm:$0xff]  ;;  %v2030_v42 = vld [vmem:[%s3571_s10 + $0x50] sm:$0xff] }
 0x6f3   :  { %v813_v59 = vmul.f32 1.442695, %v811_v58 }
 0x6f5   :  { %1315 = vadd.xlane.f32.xlu0 %v1314_v53  ;;  %2867 = vpow2.f32 %v813_v59 }
 0x6ff   :  { %v2868_v27 = vpop.eup %2867 }
 0x700   :  { %v817_v60 = vsel %vm480_vm2, %v2868_v27, 0.0 }
 0x70b   :  { %1556 = vrot.lane.b32.xlu0 %v3257_v29, %s2955_s24 }
 0x70f   :  { %1634 = vrot.lane.b32.xlu0 %v3268_v33, %s2955_s24 }
 0x72e   :  { %818 = vadd.xlane.f32.xlu0 %v817_v60  ;;  %v321_v60 = vld [vmem:[#allocation2 + $0x68] sm:$0xff] }
 0x744   :  { %828 = vrot.lane.b32.xlu0 %v3284_v38, %s2953_s3 }
 0x748   :  { %1810 = vrot.lane.b32.xlu0 %v3282_v36, %s2955_s24 }
 0x74d   :  { %v1313_v61 = vpop.xlane.xlu0 %1312 }
 0x74e   :  { %2869 = vrcp.f32 %v1313_v61 }
 0x751   :  { %v1559_v33 = vpop.permute.xlu0 %1558 }
 0x758   :  { %v2870_v29 = vpop.eup %2869 }
 0x759   :  { %v1319_v62 = vmul.f32 %v2870_v29, %v2864_v48  ;;  %v2756_v48 = vpack.c.bf16 %v317_v47, %v316_v46 }
 0x75b   :  { %2627 = vmatmul.mubr.msk.f32.vlgmr.msra.gmra.mrb[16].mxu0 %vm480_vm2, %v1319_v62 }
 0x75c   :  { %2630 = vmatpush3.msra.mxu0 %v1398_v55  ;;  %2631 = vmatprep.mubr.msk.f32.mxu0 %vm2952_vm0, %v2951_v0 }
 0x75d   :  { %2645 = vmatprep.subr.mxu0 %v2951_v0 }
 0x782   :  { %v1316_v63 = vpop.xlane.xlu0 %1315 }
 0x783   :  { %2871 = vrcp.f32 %v1316_v63 }
 0x786   :  { %v1557_v36 = vpop.permute.xlu0 %1556 }
 0x78a   :  { %v1635_v3 = vpop.permute.xlu0 %1634 }
 0x78d   :  { %v2872_v1 = vpop.eup %2871 }
 0x78e   :  { %v1320_v2 = vmul.f32 %v2872_v1, %v2866_v52 }
 0x790   :  { %2632 = vmatmul.mubr.msk.f32.vlgmr.msra.gmra.mrb[18].mxu0 %vm480_vm2, %v1320_v2 }
 0x791   :  { %2646 = vmatpush3.xpose.msk.msra.mxu0 %vm327_vm1, %v1559_v33  ;;  %2647 = vmatprep.mubr.msk.f32.mxu0 %vm2952_vm0, %v2951_v0 }
 0x792   :  { %2650 = vmatprep.subr.mxu0 %v2951_v0 }
 0x794   :  { %2648 = vmatmul.mubr.msk.f32.vlgmr.msra.gmra.mrb[20].mxu0 %vm327_vm1, %v1557_v36  ;;  %v323_v36 = vld [vmem:[#allocation2 + $0x78] sm:$0xff] }
 0x795   :  { %2651 = vmatpush3.xpose.msk.msra.mxu0 %vm327_vm1, %v1637_v56  ;;  %2652 = vmatprep.mubr.msk.f32.mxu0 %vm2952_vm0, %v2951_v0 }
 0x796   :  { %2660 = vmatprep.subr.mxu0 %v2951_v0 }
 0x798   :  { %2653 = vmatmul.mubr.msk.f32.vlgmr.msra.gmra.mrb[22].mxu0 %vm327_vm1, %v1635_v3 }
 0x799   :  { %2662 = vmatprep.mubr.msk.f32.mxu0 %vm2952_vm0, %v2951_v0 }
 0x7bb   :  { %v819_v4 = vpop.xlane.xlu0 %818 }
 0x7bc   :  { %2873 = vrcp.f32 %v819_v4 }
 0x7bf   :  { %v829_v5 = vpop.permute.xlu0 %828 }
 0x7c0   :  { %2583 = vmatpush3.msra.mxu1 %v829_v5 }
 0x7c1   :  { %2741 = vmatprep.subr.bf16.mxu1 %v2740_v13 }
 0x7c3   :  { %v1811_v6 = vpop.permute.xlu0 %1810 }
 0x7c4   :  { %2661 = vmatpush3.msra.mxu0 %v1811_v6 }
 0x7c6   :  { %v2874_v7 = vpop.eup %2873 }
 0x7c7   :  { %v825_v8 = vmul.f32 %v2874_v7, %v2868_v27  ;;  %v320_v27 = vld [vmem:[#allocation2 + $0x60] sm:$0xff] }
 0x7c8   :  { %v2764_v29 = vpack.c.bf16 %v321_v60, %v320_v27  ;;  %v2041_v60 = vld [vmem:[%s3571_s10 + $0xa8] sm:$0xff] }
 0x7c9   :  { %2585 = vmatmul.mubr.msk.f32.vlgmr.msra.gmra.mrb[8].mxu1 %vm480_vm2, %v825_v8  ;;  %v2399_v8 = vld [vmem:[%s3568_s7] ss:$0 sm:$0xff] }
 0x7ca   :  { %2743 = vmatpush3.bf16.msra.mxu1 %v2740_v13 }
 0x7cb   :  { %2745 = vmatprep.subr.bf16.mxu1 %v2744_v15 }
 0x7ce   :  { %2747 = vmatpush3.bf16.msra.mxu1 %v2744_v15 }
 0x7cf   :  { %2749 = vmatprep.subr.bf16.mxu1 %v2748_v21 }
 0x82e   :  { %v1393_v22 = vpop.f32.mrb[16].mxu0 }
 0x82f   :  { %v2628_v23 = vpop.f32.mrb[17].mxu0 }
 0x830   :  { %v2027_v23 = vld [vmem:[%s3571_s10 + $0x38] sm:$0xff] }
 0x863   :  { %v1469_v25 = vpop.f32.mrb[18].mxu0 }
 0x864   :  { %v2633_v28 = vpop.f32.mrb[19].mxu0 }
 0x867   :  { %v1630_v30 = vpop.f32.mrb[20].mxu0 }
 0x868   :  { %v2649_v31 = vpop.f32.mrb[21].mxu0  ;;  %v1712_v34 = vsel %vm480_vm2, %v1630_v30, -inf }
 0x869   :  { %1713 = vmax.xlane.f32.xlu1 %v1712_v34  ;;  %v2026_v31 = vld [vmem:[%s3571_s10 + $0x30] sm:$0xff]  ;;  %v2029_v34 = vld [vmem:[%s3571_s10 + $0x48] sm:$0xff] }
 0x86b   :  { %v1708_v35 = vpop.f32.mrb[22].mxu0 }
 0x86c   :  { %v2654_v37 = vpop.f32.mrb[23].mxu0  ;;  %v1715_v40 = vsel %vm480_vm2, %v1708_v35, -inf }
 0x86d   :  { %1716 = vmax.xlane.f32.xlu1 %v1715_v40 }
 0x89c   :  { %v900_v43 = vpop.f32.mrb[8].mxu1 }
 0x89d   :  { %v2586_v45 = vpop.f32.mrb[9].mxu1  ;;  %2600 = vmatprep.mubr.msk.f32.mxu1 %vm327_vm1, %v900_v43  ;;  %v2782_v43 = vpack.c.bf16 %v2030_v42, %v2028_v41 }
 0x89e   :  { %2601 = vmatmul.mubr.msk.f32.vlgmr.msra.gmra.mrb[10].mxu1 %vm327_vm1, %v3342_v24 }
 0x89f   :  { %2751 = vmatpush3.bf16.msra.mxu1 %v2748_v21  ;;  %2611 = vmatprep.mubr.msk.f32.mxu1 %vm327_vm1, %v3352_v39  ;;  %v2020_v21 = vld [vmem:[%s3571_s10] sm:$0xff] }
 0x8a0   :  { %2753 = vmatprep.subr.bf16.mxu1 %v2752_v44 }
 0x8a3   :  { %2755 = vmatpush3.bf16.msra.mxu1 %v2752_v44 }
 0x8a4   :  { %2757 = vmatprep.subr.bf16.mxu1 %v2756_v48 }
 0x8a6   :  { %2612 = vmatmul.mubr.msk.f32.vlgmr.msra.gmra.mrb[10].mxu1 %vm327_vm1, %v3300_v54 }
 0x8a7   :  { %2759 = vmatpush3.bf16.msra.mxu1 %v2756_v48  ;;  %2642 = vmatprep.mubr.msk.f32.mxu1 %vm327_vm1, %v1393_v22  ;;  %v2772_v22 = vpack.c.bf16 %v2023_v19, %v2021_v16  ;;  %v2178_v16 = vld [vmem:[#allocation4 + $0x8] sm:$0xff] }
 0x8a8   :  { %2761 = vmatprep.subr.bf16.mxu1 %v2760_v50 }
 0x8a9   :  { %2773 = vmatprep.subr.bf16.mxu0 %v2772_v22 }
 0x8ab   :  { %2763 = vmatpush3.bf16.msra.mxu1 %v2760_v50 }
 0x8ac   :  { %2655 = vmatprep.subr.mxu1 %v2951_v0 }
 0x8ae   :  { %2643 = vmatmul.mubr.msk.f32.vlgmr.msra.gmra.mrb[10].mxu1 %vm327_vm1, %v1469_v25 }
 0x8af   :  { %2657 = vmatprep.mubr.msk.f32.mxu1 %vm2952_vm0, %v2951_v0 }
 0x8f6   :  { %v1714_v24 = vpop.xlane.xlu1 %1713 }
 0x8f7   :  { %v1718_v39 = vsub.f32 %v1630_v30, %v1714_v24  ;;  %v2024_v30 = vld [vmem:[%s3571_s10 + $0x20] sm:$0xff]  ;;  %v2033_v24 = vld [vmem:[%s3571_s10 + $0x68] sm:$0xff] }
 0x8f8   :  { %v2778_v37 = vpack.c.bf16 %v2026_v31, %v2024_v30  ;;  %v2400_v30 = vld [vmem:[%s3569_s8] ss:$0 sm:$0xff] }
 0x8f9   :  { %v1720_v51 = vmul.f32 1.442695, %v1718_v39  ;;  %v2035_v39 = vld [vmem:[%s3571_s10 + $0x78] sm:$0xff] }
 0x8fa   :  { %v1717_v52 = vpop.xlane.xlu1 %1716 }
 0x8fb   :  { %2875 = vpow2.f32 %v1720_v51  ;;  %v1719_v53 = vsub.f32 %v1708_v35, %v1717_v52  ;;  %v2031_v35 = vld [vmem:[%s3571_s10 + $0x58] sm:$0xff]  ;;  %v2784_v51 = vpack.c.bf16 %v2035_v39, %v2033_v24  ;;  %v2032_v52 = vld [vmem:[%s3571_s10 + $0x60] sm:$0xff]  ;;  %v2198_v24 = vld [vmem:[#allocation4 + $0xa8] sm:$0xff] }
 0x8fc   :  { %v2780_v40 = vpack.c.bf16 %v2031_v35, %v2029_v34  ;;  %v2401_v34 = vld [vmem:[%s3570_s9] ss:$0 sm:$0xff] }
 0x8fd   :  { %v1722_v55 = vmul.f32 1.442695, %v1719_v53  ;;  %v2034_v53 = vld [vmem:[%s3571_s10 + $0x70] sm:$0xff]  ;;  %v2181_v39 = vld [vmem:[#allocation4 + $0x20] sm:$0xff] }
 0x8ff   :  { %2877 = vpow2.f32 %v1722_v55  ;;  %v2786_v55 = vpack.c.bf16 %v2034_v53, %v2032_v52  ;;  %v2200_v53 = vld [vmem:[#allocation4 + $0xb8] sm:$0xff] }
 0x905   :  { %v2876_v54 = vpop.eup %2875 }
 0x906   :  { %v1724_v56 = vsel %vm480_vm2, %v2876_v54, 0.0 }
 0x907   :  { %1725 = vadd.xlane.f32.xlu1 %v1724_v56  ;;  %v2039_v56 = vld [vmem:[%s3571_s10 + $0x98] sm:$0xff] }
 0x909   :  { %v2878_v57 = vpop.eup %2877 }
 0x90a   :  { %v1727_v58 = vsel %vm480_vm2, %v2878_v57, 0.0 }
 0x90b   :  { %1728 = vadd.xlane.f32.xlu1 %v1727_v58  ;;  %v2036_v58 = vld [vmem:[%s3571_s10 + $0x80] sm:$0xff] }
 0x91c   :  { %1734 = vrot.lane.b32.xlu1 %v3284_v38, %s2955_s24  ;;  %v322_v38 = vld [vmem:[#allocation2 + $0x70] sm:$0xff] }
 0x91d   :  { %v2768_v3 = vpack.c.bf16 %v323_v36, %v322_v38  ;;  %v2044_v38 = vld [vmem:[%s3571_s10 + $0xc0] sm:$0xff]  ;;  %v2046_v36 = vld [vmem:[%s3571_s10 + $0xd0] sm:$0xff] }
 0x994   :  { %v1726_v59 = vpop.xlane.xlu1 %1725 }
 0x995   :  { %2879 = vrcp.f32 %v1726_v59  ;;  %v2038_v59 = vld [vmem:[%s3571_s10 + $0x90] sm:$0xff] }
 0x996   :  { %v2790_v27 = vpack.c.bf16 %v2038_v59, %v2036_v58  ;;  %v2201_v58 = vld [vmem:[#allocation4 + $0xc0] sm:$0xff]  ;;  %v2202_v59 = vld [vmem:[#allocation4 + $0xc8] sm:$0xff] }
 0x998   :  { %v1729_v61 = vpop.xlane.xlu1 %1728 }
 0x999   :  { %2881 = vrcp.f32 %v1729_v61  ;;  %v2043_v61 = vld [vmem:[%s3571_s10 + $0xb8] sm:$0xff] }
 0x99c   :  { %v1735_v62 = vpop.permute.xlu1 %1734 }
 0x99d   :  { %2656 = vmatpush3.msra.mxu1 %v1735_v62  ;;  %v2040_v62 = vld [vmem:[%s3571_s10 + $0xa0] sm:$0xff] }
 0x99e   :  { %2765 = vmatprep.subr.bf16.mxu1 %v2764_v29 }
 0x99f   :  { %v2880_v33 = vpop.eup %2879 }
 0x9a0   :  { %v1732_v63 = vmul.f32 %v2880_v33, %v2876_v54  ;;  %v2037_v54 = vld [vmem:[%s3571_s10 + $0x88] sm:$0xff]  ;;  %v2042_v33 = vld [vmem:[%s3571_s10 + $0xb0] sm:$0xff] }
 0x9a2   :  { %2658 = vmatmul.mubr.msk.f32.vlgmr.msra.gmra.mrb[12].mxu1 %vm480_vm2, %v1732_v63  ;;  %v2045_v63 = vld [vmem:[%s3571_s10 + $0xc8] sm:$0xff] }
 0x9a3   :  { %v2882_v1 = vpop.eup %2881  ;;  %2767 = vmatpush3.bf16.msra.mxu1 %v2764_v29  ;;  %v2792_v29 = vpack.c.bf16 %v2043_v61, %v2041_v60  ;;  %v2820_v60 = vpack.c.bf16 %v2202_v59, %v2201_v58  ;;  %v2186_v61 = vld [vmem:[#allocation4 + $0x48] sm:$0xff] }
 0x9a4   :  { %v1733_v2 = vmul.f32 %v2882_v1, %v2878_v57  ;;  %2769 = vmatprep.subr.bf16.mxu1 %v2768_v3  ;;  %v2788_v57 = vpack.c.bf16 %v2039_v56, %v2037_v54  ;;  %v2794_v1 = vpack.c.bf16 %v2042_v33, %v2040_v62  ;;  %v2183_v54 = vld [vmem:[#allocation4 + $0x30] sm:$0xff]  ;;  %v2184_v56 = vld [vmem:[#allocation4 + $0x38] sm:$0xff] }
 0x9a5   :  { %v2204_v62 = vld [vmem:[#allocation4 + $0xd8] sm:$0xff] }
 0x9a6   :  { %2663 = vmatmul.mubr.msk.f32.vlgmr.msra.gmra.mrb[24].mxu0 %vm480_vm2, %v1733_v2  ;;  %v2047_v2 = vld [vmem:[%s3571_s10 + $0xd8] sm:$0xff] }
 0x9a7   :  { %2128 = vmatprep.mubr.f32.mxu0 %v2951_v0  ;;  %2771 = vmatpush3.bf16.msra.mxu1 %v2768_v3  ;;  %v2796_v3 = vpack.c.bf16 %v2047_v2, %v2045_v63  ;;  %v2188_v2 = vld [vmem:[#allocation4 + $0x58] sm:$0xff] }
 0xa75   :  { %v1806_v4 = vpop.f32.mrb[12].mxu1 }
 0xa76   :  { %v2659_v5 = vpop.f32.mrb[13].mxu1  ;;  %2673 = vmatprep.mubr.msk.f32.mxu1 %vm327_vm1, %v1806_v4  ;;  %v2049_v4 = vld [vmem:[%s3571_s10 + $0xe8] sm:$0xff] }
 0xa77   :  { %v2051_v5 = vld [vmem:[%s3571_s10 + $0xf8] sm:$0xff] }
 0xa79   :  { %v1882_v6 = vpop.f32.mrb[24].mxu0 }
 0xa7a   :  { %v2664_v7 = vpop.f32.mrb[25].mxu0  ;;  %2674 = vmatmul.mubr.msk.f32.vlgmr.msra.gmra.mrb[10].mxu1 %vm327_vm1, %v1882_v6  ;;  %v2798_v6 = vpack.c.bf16 %v2046_v36, %v2044_v38  ;;  %v2205_v38 = vld [vmem:[#allocation4 + $0xe0] sm:$0xff]  ;;  %v2206_v36 = vld [vmem:[#allocation4 + $0xe8] sm:$0xff] }
 0xa7b   :  { %v2800_v7 = vpack.c.bf16 %v2051_v5, %v2049_v4  ;;  %v2828_v4 = vpack.c.bf16 %v2206_v36, %v2205_v38  ;;  %v2189_v5 = vld [vmem:[#allocation4 + $0x60] sm:$0xff] }
 0xb4d   :  { %v2675_v10 = vpop.f32.mrb[10].mxu1 }
 0xb4e   :  { %v1976_v11 = vadd.f32 %v2675_v10, %v2399_v8  ;;  %v1958_v12 = vpop.f32.mrb[11].mxu1  ;;  %v2050_v10 = vld [vmem:[%s3571_s10 + $0xf0] sm:$0xff] }
 0xb4f   :  { %v1975_v13 = vadd.f32 %v2399_v8, %v1958_v12  ;;  %v2048_v8 = vld [vmem:[%s3571_s10 + $0xe0] sm:$0xff] }
 0xb50   :  { %v1978_v14 = vadd.f32 %v1976_v11, %v3222_v9  ;;  %v2022_v9 = vld [vmem:[%s3571_s10 + $0x10] sm:$0xff]  ;;  %v2802_v11 = vpack.c.bf16 %v2050_v10, %v2048_v8  ;;  %v2193_v12 = vld [vmem:[#allocation4 + $0x80] sm:$0xff]  ;;  %v2208_v8 = vld [vmem:[#allocation4 + $0xf8] sm:$0xff] }
 0xb51   :  { %v1977_v15 = vadd.f32 %v1975_v13, %v3128_v26  ;;  %v2025_v26 = vld [vmem:[%s3571_s10 + $0x28] sm:$0xff]  ;;  %v2774_v25 = vpack.c.bf16 %v2022_v9, %v2020_v21 }
 0xb52   :  { %1983 = vadd.xlane.f32.xlu1 %v1978_v14  ;;  %v2776_v28 = vpack.c.bf16 %v2027_v23, %v2025_v26  ;;  %v2194_v13 = vld [vmem:[#allocation4 + $0x88] sm:$0xff] }
 0xb53   :  { %1981 = vadd.xlane.f32.xlu0 %v1977_v15  ;;  %2775 = vmatpush1.bf16.msra.mxu0 %v2774_v25 }
 0xb54   :  { %2777 = vmatprep.subr.bf16.mxu0 %v2776_v28 }
 0xb57   :  { %2779 = vmatpush1.bf16.msra.mxu0 %v2778_v37 }
 0xb58   :  { %2781 = vmatprep.subr.bf16.mxu0 %v2780_v40 }
 0xb5b   :  { %2783 = vmatpush1.bf16.msra.mxu0 %v2782_v43 }
 0xb5c   :  { %2785 = vmatprep.subr.bf16.mxu0 %v2784_v51  ;;  %v2182_v51 = vld [vmem:[#allocation4 + $0x28] sm:$0xff] }
 0xb5d   :  { %v2814_v52 = vpack.c.bf16 %v2182_v51, %v2181_v39 }
 0xb5f   :  { %2787 = vmatpush1.bf16.msra.mxu0 %v2786_v55 }
 0xb60   :  { %2789 = vmatprep.subr.bf16.mxu0 %v2788_v57  ;;  %v2818_v57 = vpack.c.bf16 %v2184_v56, %v2183_v54 }
 0xb63   :  { %2791 = vmatpush1.bf16.msra.mxu0 %v2790_v27  ;;  %v2185_v27 = vld [vmem:[#allocation4 + $0x40] sm:$0xff] }
 0xb64   :  { %2793 = vmatprep.subr.bf16.mxu0 %v2792_v29  ;;  %v2203_v29 = vld [vmem:[#allocation4 + $0xd0] sm:$0xff]  ;;  %v2822_v33 = vpack.c.bf16 %v2186_v61, %v2185_v27 }
 0xb65   :  { %v2824_v63 = vpack.c.bf16 %v2204_v62, %v2203_v29 }
 0xb67   :  { %2795 = vmatpush1.bf16.msra.mxu0 %v2794_v1  ;;  %v2187_v1 = vld [vmem:[#allocation4 + $0x50] sm:$0xff] }
 0xb68   :  { %2797 = vmatprep.subr.bf16.mxu0 %v2796_v3  ;;  %v2826_v3 = vpack.c.bf16 %v2188_v2, %v2187_v1  ;;  %v2402_v2 = vld [vmem:[%s3574_s13] ss:$0 sm:$0xff] }
 0xb6b   :  { %2799 = vmatpush1.bf16.msra.mxu0 %v2798_v6  ;;  %v2190_v6 = vld [vmem:[#allocation4 + $0x68] sm:$0xff] }
 0xb6c   :  { %2801 = vmatprep.subr.bf16.mxu0 %v2800_v7  ;;  %v2207_v7 = vld [vmem:[#allocation4 + $0xf0] sm:$0xff]  ;;  %v2830_v10 = vpack.c.bf16 %v2190_v6, %v2189_v5 }
 0xb6f   :  { %2803 = vmatpush1.bf16.msra.mxu0 %v2802_v11  ;;  %v2832_v11 = vpack.c.bf16 %v2208_v8, %v2207_v7 }
 0xbdf   :  { %v1984_v44 = vpop.xlane.xlu1 %1983 }
 0xbe0   :  { %v1982_v45 = vpop.xlane.xlu0 %1981  ;;  %v1987_v46 = vmul.f32 0.0078125, %v1984_v44  ;;  %v2195_v44 = vld [vmem:[#allocation4 + $0x90] sm:$0xff] }
 0xbe1   :  { %v1986_v47 = vmul.f32 0.0078125, %v1982_v45  ;;  %v2196_v45 = vld [vmem:[#allocation4 + $0x98] sm:$0xff] }
 0xbe2   :  { %v3453_v49 = vsub.f32 %v1978_v14, %v1987_v46  ;;  %v2177_v14 = vld [vmem:[#allocation4] sm:$0xff]  ;;  %v2808_v46 = vpack.c.bf16 %v2196_v45, %v2195_v44 }
 0xbe3   :  { %v3451_v48 = vsub.f32 %v1977_v15, %v1986_v47  ;;  %v2804_v15 = vpack.c.bf16 %v2194_v13, %v2193_v12  ;;  %v2806_v19 = vpack.c.bf16 %v2178_v16, %v2177_v14  ;;  %v2179_v47 = vld [vmem:[#allocation4 + $0x10] sm:$0xff]  ;;  %v2192_v13 = vld [vmem:[#allocation4 + $0x78] sm:$0xff] }
 0xbe4   :  { %v1991_v50 = vmul.f32 %v3453_v49, %v3453_v49  ;;  %v2191_v12 = vld [vmem:[#allocation4 + $0x70] sm:$0xff] }
 0xbe5   :  { %v1990_v32 = vmul.f32 %v3451_v48, %v3451_v48  ;;  %2805 = vmatprep.subr.bf16.mxu1 %v2804_v15  ;;  %v2834_v14 = vpack.c.bf16 %v2192_v13, %v2191_v12  ;;  %v2052_v15 = vld [vmem:[%s3572_s11] sm:$0x3] }
 0xbe6   :  { %2807 = vmatpush3.bf16.msra.mxu1 %v2806_v19  ;;  %v2057_v16 = vrot.slane %v2052_v15, %v125_v18  ;;  %v2061_v19 = vrot.slane %v2052_v15, %v129_v20 }
 0xbe7   :  { %1992 = vadd.xlane.f32.xlu0 %v1990_v32  ;;  %2809 = vmatprep.subr.bf16.mxu1 %v2808_v46 }
 0xbeb   :  { %1994 = vadd.xlane.f32.xlu0 %v1991_v50  ;;  %v2197_v50 = vld [vmem:[#allocation4 + $0xa0] sm:$0xff] }
 0xc74   :  { %v1993_v21 = vpop.xlane.xlu0 %1992 }
 0xc75   :  { %v1996_v22 = vmul.f32 0.0078125, %v1993_v21 }
 0xc77   :  { %v1998_v9 = vadd.f32 1e-05, %v1996_v22 }
 0xc78   :  { %v1995_v26 = vpop.xlane.xlu0 %1994 }
 0xc79   :  { %2883 = vrsqrt.f32 %v1998_v9  ;;  %v1997_v23 = vmul.f32 0.0078125, %v1995_v26 }
 0xc7b   :  { %v1999_v25 = vadd.f32 1e-05, %v1997_v23 }
 0xc7d   :  { %2885 = vrsqrt.f32 %v1999_v25 }
 0xc83   :  { %v2884_v28 = vpop.eup %2883 }
 0xc84   :  { %v2002_v31 = vmul.f32 %v2884_v28, %v3451_v48  ;;  %v2180_v48 = vld [vmem:[#allocation4 + $0x18] sm:$0xff] }
 0xc85   :  { %v2810_v32 = vpack.c.bf16 %v2180_v48, %v2179_v47 }
 0xc86   :  { %v2010_v35 = vmul.f32 %v2400_v30, %v2002_v31 }
 0xc87   :  { %v2886_v37 = vpop.eup %2885  ;;  %2811 = vmatpush3.bf16.msra.mxu1 %v2810_v32 }
 0xc88   :  { %v3526_v40 = vadd.f32 %v2401_v34, %v2010_v35  ;;  %v2003_v41 = vmul.f32 %v2886_v37, %v3453_v49  ;;  %v2812_v49 = vpack.c.bf16 %v2198_v24, %v2197_v50 }
 0xc8a   :  { %2129 = vmatmul.mubr.f32.vlgmr.msra.gmra.mrb[26].mxu0 %v3526_v40  ;;  %v2011_v42 = vmul.f32 %v2400_v30, %v2003_v41  ;;  %2813 = vmatprep.subr.bf16.mxu1 %v2812_v49 }
 0xc8b   :  { %2134 = vmatprep.mubr.f32.mxu0 %v2951_v0  ;;  %2815 = vmatpush3.bf16.msra.mxu1 %v2814_v52  ;;  %v2199_v0 = vld [vmem:[#allocation4 + $0xb0] sm:$0xff] }
 0xc8c   :  { %v3531_v43 = vadd.f32 %v2401_v34, %v2011_v42  ;;  %v2816_v55 = vpack.c.bf16 %v2200_v53, %v2199_v0 }
 0xc8e   :  { %2135 = vmatmul.mubr.f32.gmra.mrb[28].mxu0 %v3531_v43  ;;  %2817 = vmatprep.subr.bf16.mxu1 %v2816_v55 }
 0xc8f   :  { %2819 = vmatpush3.bf16.msra.mxu1 %v2818_v57 }
 0xc90   :  { %2821 = vmatprep.subr.bf16.mxu1 %v2820_v60 }
 0xc93   :  { %2823 = vmatpush3.bf16.msra.mxu1 %v2822_v33 }
 0xc94   :  { %2825 = vmatprep.subr.bf16.mxu1 %v2824_v63 }
 0xc97   :  { %2827 = vmatpush3.bf16.msra.mxu1 %v2826_v3 }
 0xc98   :  { %2829 = vmatprep.subr.bf16.mxu1 %v2828_v4 }
 0xc9b   :  { %2831 = vmatpush3.bf16.msra.mxu1 %v2830_v10 }
 0xc9c   :  { %2833 = vmatprep.subr.bf16.mxu1 %v2832_v11 }
 0xc9f   :  { %2835 = vmatpush3.bf16.msra.mxu1 %v2834_v14 }
 0xd5d   :  { %v2130_v21 = vpop.f32.mrb[26].mxu0 }
 0xd5e   :  { %v2131_v22 = vadd.f32 %v2130_v21, %v2057_v16  ;;  %v2132_v9 = vpop.f32.mrb[27].mxu0 }
 0xd5f   :  { %v2133_v26 = vadd.f32 %v2132_v9, %v2061_v19 }
 0xd60   :  { %v2145_v23 = vmul.f32 0.044715, %v2131_v22  ;;  %v2141_v56 = vmul.f32 0.5, %v2131_v22 }
 0xd61   :  { %v2146_v25 = vmul.f32 0.044715, %v2133_v26  ;;  %v2136_v28 = vpop.f32.mrb[28].mxu0  ;;  %v2142_v55 = vmul.f32 0.5, %v2133_v26 }
 0xd62   :  { %v2149_v30 = vmul.f32 %v2145_v23, %v2131_v22  ;;  %v2137_v31 = vadd.f32 %v2136_v28, %v2057_v16  ;;  %v2138_v34 = vpop.f32.mrb[29].mxu0  ;;  %v2403_v28 = vld [vmem:[%s3575_s14] ss:$0 sm:$0xff] }
 0xd63   :  { %v2150_v35 = vmul.f32 %v2146_v25, %v2133_v26  ;;  %v2139_v37 = vadd.f32 %v2138_v34, %v2061_v19 }
 0xd64   :  { %v2153_v41 = vmul.f32 %v2149_v30, %v2131_v22  ;;  %v2147_v42 = vmul.f32 0.044715, %v2137_v31  ;;  %v2143_v62 = vmul.f32 0.5, %v2137_v31 }
 0xd65   :  { %v2148_v44 = vmul.f32 0.044715, %v2139_v37  ;;  %v2154_v45 = vmul.f32 %v2150_v35, %v2133_v26  ;;  %v2144_v61 = vmul.f32 0.5, %v2139_v37 }
 0xd66   :  { %v2157_v18 = vadd.f32 %v2153_v41, %v2131_v22  ;;  %v2151_v46 = vmul.f32 %v2147_v42, %v2137_v31 }
 0xd67   :  { %v2152_v17 = vmul.f32 %v2148_v44, %v2139_v37  ;;  %v2158_v20 = vadd.f32 %v2154_v45, %v2133_v26 }
 0xd68   :  { %v2161_v47 = vmul.f32 0.7978846, %v2157_v18  ;;  %v2155_v48 = vmul.f32 %v2151_v46, %v2137_v31 }
 0xd69   :  { %v2162_v32 = vmul.f32 0.7978846, %v2158_v20  ;;  %v2156_v50 = vmul.f32 %v2152_v17, %v2139_v37 }
 0xd6a   :  { %2887 = vtanh.f32 %v2161_v47  ;;  %v2159_v24 = vadd.f32 %v2155_v48, %v2137_v31  ;;  %v2404_v31 = vld [vmem:[%s3576_s15] ss:$0 sm:$0xff] }
 0xd6b   :  { %2889 = vtanh.f32 %v2162_v32  ;;  %v2160_v49 = vadd.f32 %v2156_v50, %v2139_v37 }
 0xd6c   :  { %v2163_v39 = vmul.f32 0.7978846, %v2159_v24 }
 0xd6d   :  { %v2164_v51 = vmul.f32 0.7978846, %v2160_v49 }
 0xd6e   :  { %2891 = vtanh.f32 %v2163_v39 }
 0xd6f   :  { %2893 = vtanh.f32 %v2164_v51 }
 0xd74   :  { %v2888_v52 = vpop.eup %2887 }
 0xd75   :  { %v2890_v0 = vpop.eup %2889  ;;  %v2169_v53 = vadd.f32 1.0, %v2888_v52 }
 0xd76   :  { %v2170_v54 = vadd.f32 1.0, %v2890_v0 }
 0xd77   :  { %v2173_v27 = vmul.f32 %v2169_v53, %v2141_v56 }
 0xd78   :  { %v2892_v57 = vpop.eup %2891  ;;  %v2174_v58 = vmul.f32 %v2170_v54, %v2142_v55 }
 0xd79   :  { %v2894_v59 = vpop.eup %2893  ;;  %v2171_v60 = vadd.f32 1.0, %v2892_v57 }
 0xd7a   :  { %2280 = vmatprep.mubr.f32.mxu1 %v2174_v58  ;;  %v2172_v29 = vadd.f32 1.0, %v2894_v59 }
 0xd7b   :  { %2281 = vmatmul.mubr.f32.vlgmr.msra.gmra.mrb[14].mxu1 %v2173_v27  ;;  %v2175_v63 = vmul.f32 %v2171_v60, %v2143_v62 }
 0xd7c   :  { %v2176_v33 = vmul.f32 %v2172_v29, %v2144_v61 }
 0xd7e   :  { %2285 = vmatprep.mubr.f32.mxu1 %v2176_v33 }
 0xd7f   :  { %2286 = vmatmul.mubr.f32.gmra.mrb[16].mxu1 %v2175_v63 }
 0xe4e   :  { %v2511_v1 = vpop.f32.mrb[14].mxu1 }
 0xe4f   :  { %v2512_v38 = vpop.f32.mrb[15].mxu1 }
 0xe50   :  { %v2513_v36 = vadd.f32 %v2512_v38, %v2511_v1 }
 0xe52   :  { %v2283_v3 = vadd.f32 %v2513_v36, %v2402_v2  ;;  %v2514_v4 = vpop.f32.mrb[16].mxu1 }
 0xe53   :  { %v2515_v5 = vpop.f32.mrb[17].mxu1 }
 0xe54   :  { %v2516_v6 = vadd.f32 %v2515_v5, %v2514_v4  ;;  %v2291_v7 = vadd.f32 %v2283_v3, %v3526_v40 }
 0xe56   :  { %v2288_v8 = vadd.f32 %v2516_v6, %v2402_v2  ;;  %2295 = vadd.xlane.f32.xlu0 %v2291_v7 }
 0xe58   :  { %v2292_v10 = vadd.f32 %v2288_v8, %v3531_v43 }
 0xe5a   :  { %2297 = vadd.xlane.f32.xlu0 %v2292_v10 }
 0xee3   :  { %v2296_v11 = vpop.xlane.xlu0 %2295 }
 0xee4   :  { %v2299_v12 = vmul.f32 0.0078125, %v2296_v11 }
 0xee6   :  { %v2301_v13 = vsub.f32 %v2291_v7, %v2299_v12 }
 0xee7   :  { %v2298_v14 = vpop.xlane.xlu0 %2297 }
 0xee8   :  { %v2300_v15 = vmul.f32 0.0078125, %v2298_v14  ;;  %v2303_v16 = vmul.f32 %v2301_v13, %v2301_v13 }
 0xeea   :  { %v2302_v19 = vsub.f32 %v2292_v10, %v2300_v15  ;;  %2305 = vadd.xlane.f32.xlu0 %v2303_v16 }
 0xeec   :  { %v2304_v21 = vmul.f32 %v2302_v19, %v2302_v19 }
 0xeee   :  { %2307 = vadd.xlane.f32.xlu1 %v2304_v21 }
 0xf77   :  { %v2306_v22 = vpop.xlane.xlu0 %2305 }
 0xf78   :  { %v2309_v9 = vmul.f32 0.0078125, %v2306_v22 }
 0xf7a   :  { %v2311_v26 = vadd.f32 1e-05, %v2309_v9 }
 0xf7b   :  { %v2308_v23 = vpop.xlane.xlu1 %2307 }
 0xf7c   :  { %2895 = vrsqrt.f32 %v2311_v26  ;;  %v2310_v40 = vmul.f32 0.0078125, %v2308_v23 }
 0xf7e   :  { %v2312_v25 = vadd.f32 1e-05, %v2310_v40 }
 0xf80   :  { %2897 = vrsqrt.f32 %v2312_v25 }
 0xf86   :  { %v2896_v43 = vpop.eup %2895 }
 0xf87   :  { %v2315_v30 = vmul.f32 %v2896_v43, %v2301_v13 }
 0xf89   :  { %v2323_v34 = vmul.f32 %v2403_v28, %v2315_v30 }
 0xf8a   :  { %v2898_v35 = vpop.eup %2897 }
 0xf8b   :  { %v2331_v37 = vadd.f32 %v2404_v31, %v2323_v34  ;;  %v2316_v41 = vmul.f32 %v2898_v35, %v2302_v19 }
 0xf8d   :  { %2333 = vst [vmem:[%s3577_s16] sm:$0xff] %v2331_v37  ;;  %v2335_v42 = vrot.slane %v2331_v37, 4  ;;  %v2324_v44 = vmul.f32 %v2403_v28, %v2316_v41 }
 0xf8f   :  { %v2336_v45 = vadd.f32 %v2335_v42, %v2331_v37  ;;  %v2332_v18 = vadd.f32 %v2404_v31, %v2324_v44 }
 0xf91   :  { %v2337_v46 = vrot.slane %v2336_v45, 2  ;;  %2334 = vst [vmem:[%s3577_s16 + $0x8] sm:$0xff] %v2332_v18  ;;  %v2341_v17 = vrot.slane %v2332_v18, 4 }
 0xf93   :  { %v2338_v20 = vadd.f32 %v2337_v46, %v2336_v45  ;;  %v2342_v47 = vadd.f32 %v2341_v17, %v2332_v18 }
 0xf95   :  { %v2339_v48 = vrot.slane %v2338_v20, 1  ;;  %v2343_v32 = vrot.slane %v2342_v47, 2 }
 0xf97   :  { %v2344_v50 = vadd.f32 %v2343_v32, %v2342_v47  ;;  %v2340_v24 = vadd.f32 %v2339_v48, %v2338_v20 }
 0xf99   :  { %v2345_v49 = vrot.slane %v2344_v50, 1  ;;  %v2348_v51 = vmul.f32 0.125, %v2340_v24 }
 0xf9b   :  { %v2346_v39 = vadd.f32 %v2345_v49, %v2344_v50 }
 0xf9d   :  { %v2349_v52 = vmul.f32 0.125, %v2346_v39 }
 0xf9f   :  { %v2353_v0 = vsel %vm2352_vm3, %v2349_v52, %v2348_v51 }
 0xfa0   :  { %2355 = vst [vmem:[%s3578_s17] sm:$0x3] %v2353_v0 }
 0xfa1   :  { %2364 = vsyncpa [#allocation3], 1 }
 0xfa2   :  { %2365 = vsyncpa [#allocation5], 1 }

// kernel: dit_forward.11
= control target key start
LH: loop header
LB: loop body
LE: loop exit
PB: predicated region body
PF: predicated region fallthrough
CT: control target
= control target key end

     0   :  { %v458_v3 = vmov 0.0   ;;  %vm321_vm0 = vcmask 58368   ;;  %s694_s3 = inlined_call_operand.vmem [shape: f32[128,256], index: 3, kind: input, shape index: {}]   ;;  %s695_s2 = inlined_call_operand.vmem [shape: f32[2,128], index: 2, kind: input, shape index: {}]   ;;  %s696_s1 = inlined_call_operand.vmem [shape: f32[2,128], index: 1, kind: input, shape index: {}]   ;;  %s697_s5 = inlined_call_operand.vmem [shape: f32[128,8], index: 5, kind: input, shape index: {}]   ;;  %s698_s4 = inlined_call_operand.vmem [shape: f32[1,256], index: 4, kind: input, shape index: {}]   ;;  %s699_s0 = inlined_call_operand.vmem [shape: f32[16,128], index: 0, kind: input, shape index: {}]   ;;  %s700_s6 = inlined_call_operand.vmem [shape: f32[1,8], index: 6, kind: input, shape index: {}]   ;;  %s701_s7 = inlined_call_operand.vmem [shape: f32[8,2,8], index: 7, kind: output, shape index: {}]  }
   0x1   :  { %v37_v0 = vld [vmem:[%s694_s3 + $0x8] sm:$0xff]  ;;  %v39_v1 = vld [vmem:[%s694_s3 + $0x18] sm:$0xff]  ;;  %v36_v2 = vld [vmem:[%s694_s3] sm:$0xff]  ;;  %144 = vmatprep.mubr.f32.mxu0 %v458_v3 }
   0x2   :  { %v388_v4 = vpack.c.bf16 %v39_v1, %v37_v0  ;;  %v38_v5 = vld [vmem:[%s694_s3 + $0x10] sm:$0xff]  ;;  %v41_v6 = vld [vmem:[%s694_s3 + $0x28] sm:$0xff]  ;;  %v43_v7 = vld [vmem:[%s694_s3 + $0x38] sm:$0xff] }
   0x3   :  { %v390_v8 = vpack.c.bf16 %v38_v5, %v36_v2  ;;  %v392_v9 = vpack.c.bf16 %v43_v7, %v41_v6  ;;  %v40_v10 = vld [vmem:[%s694_s3 + $0x20] sm:$0xff]  ;;  %v42_v11 = vld [vmem:[%s694_s3 + $0x30] sm:$0xff]  ;;  %v45_v12 = vld [vmem:[%s694_s3 + $0x48] sm:$0xff] }
   0x4   :  { %389 = vmatprep.subr.bf16.mxu0 %v388_v4  ;;  %v47_v13 = vld [vmem:[%s694_s3 + $0x58] sm:$0xff]  ;;  %v394_v14 = vpack.c.bf16 %v42_v11, %v40_v10  ;;  %v44_v16 = vld [vmem:[%s694_s3 + $0x40] sm:$0xff]  ;;  %v46_v17 = vld [vmem:[%s694_s3 + $0x50] sm:$0xff] }
   0x5   :  { %391 = vmatpush1.bf16.msra.mxu0 %v390_v8  ;;  %v396_v15 = vpack.c.bf16 %v47_v13, %v45_v12  ;;  %v49_v18 = vld [vmem:[%s694_s3 + $0x68] sm:$0xff]  ;;  %v51_v19 = vld [vmem:[%s694_s3 + $0x78] sm:$0xff]  ;;  %v398_v20 = vpack.c.bf16 %v46_v17, %v44_v16  ;;  %v48_v22 = vld [vmem:[%s694_s3 + $0x60] sm:$0xff] }
   0x6   :  { %393 = vmatprep.subr.bf16.mxu0 %v392_v9  ;;  %v400_v21 = vpack.c.bf16 %v51_v19, %v49_v18  ;;  %v50_v23 = vld [vmem:[%s694_s3 + $0x70] sm:$0xff]  ;;  %v53_v24 = vld [vmem:[%s694_s3 + $0x88] sm:$0xff]  ;;  %v55_v25 = vld [vmem:[%s694_s3 + $0x98] sm:$0xff]  ;;  %v70_v18 = vlaneseq }
   0x7   :  { %v26_v26 = vld [vmem:[%s695_s2] sm:$0x3]  ;;  %v180_v29 = vld [vmem:[%s697_s5 + $0x8] sm:$0xff]  ;;  %v402_v30 = vpack.c.bf16 %v50_v23, %v48_v22  ;;  %v181_v34 = vld [vmem:[%s697_s5 + $0x10] sm:$0xff]  ;;  %v404_v36 = vpack.c.bf16 %v55_v25, %v53_v24  ;;  %v459_v22 = vmov 1983009808  }
   0x8   :  { %v27_v27 = vld [vmem:[%s696_s1] sm:$0x3]  ;;  %v182_v35 = vld [vmem:[%s697_s5 + $0x18] sm:$0xff]  ;;  %v54_v37 = vld [vmem:[%s694_s3 + $0x90] sm:$0xff]  ;;  %v71_v19 = vshrl.u32 %v70_v18, 7  ;;  %v156_v23 = vunpack.c.l.s4 %v459_v22 }
   0x9   :  { %395 = vmatpush1.bf16.msra.mxu0 %v394_v14  ;;  %v179_v28 = vld [vmem:[%s697_s5] sm:$0xff]  ;;  %v28_v32 = vadd.f32 %v27_v27, %v26_v26  ;;  %v424_v38 = vpack.c.bf16 %v182_v35, %v181_v34  ;;  %v184_v40 = vld [vmem:[%s697_s5 + $0x28] sm:$0xff]  ;;  %v59_v42 = vld [vmem:[%s694_s3 + $0xb8] sm:$0xff] }
   0xa   :  { %397 = vmatprep.subr.bf16.mxu0 %v396_v15  ;;  %v52_v31 = vld [vmem:[%s694_s3 + $0x80] sm:$0xff]  ;;  %v420_v33 = vpack.c.bf16 %v180_v29, %v179_v28  ;;  %v57_v41 = vld [vmem:[%s694_s3 + $0xa8] sm:$0xff]  ;;  %v58_v49 = vld [vmem:[%s694_s3 + $0xb0] sm:$0xff]  ;;  %v76_v24 = vsub.s32 1, %v71_v19  ;;  %v157_v26 = vunpack.c.0.s8 %v156_v23 }
   0xb   :  { %v183_v39 = vld [vmem:[%s697_s5 + $0x20] sm:$0xff]  ;;  %v29_v43 = vsub.f32 0.0, %v28_v32  ;;  %v406_v44 = vpack.c.bf16 %v54_v37, %v52_v31  ;;  %v408_v48 = vpack.c.bf16 %v59_v42, %v57_v41  ;;  %v185_v50 = vld [vmem:[%s697_s5 + $0x30] sm:$0xff]  ;;  %v186_v51 = vld [vmem:[%s697_s5 + $0x38] sm:$0xff] }
   0xc   :  { %421 = vmatprep.subr.bf16.mxu1 %v420_v33  ;;  %v56_v45 = vld [vmem:[%s694_s3 + $0xa0] sm:$0xff]  ;;  %v428_v47 = vpack.c.bf16 %v184_v40, %v183_v39  ;;  %v61_v52 = vld [vmem:[%s694_s3 + $0xc8] sm:$0xff]  ;;  %v63_v53 = vld [vmem:[%s694_s3 + $0xd8] sm:$0xff]  ;;  %v432_v56 = vpack.c.bf16 %v186_v51, %v185_v50  ;;  %v160_v31 = vsub.s32 %v157_v26, %v71_v19 }
   0xd   :  { %399 = vmatpush1.bf16.msra.mxu0 %v398_v20  ;;  %423 = vmatpush3.bf16.msra.mxu1 %v420_v33  ;;  %v30_v46 = vmul.f32 1.442695, %v29_v43  ;;  %v410_v54 = vpack.c.bf16 %v58_v49, %v56_v45  ;;  %v60_v55 = vld [vmem:[%s694_s3 + $0xc0] sm:$0xff]  ;;  %v412_v57 = vpack.c.bf16 %v63_v53, %v61_v52  ;;  %v62_v58 = vld [vmem:[%s694_s3 + $0xd0] sm:$0xff]  ;;  %v188_v60 = vld [vmem:[%s697_s5 + $0x48] sm:$0xff]  ;;  %v72_v20 = vsub.s32 0, %v71_v19 }
   0xe   :  { %401 = vmatprep.subr.bf16.mxu0 %v400_v21  ;;  %425 = vmatprep.subr.bf16.mxu1 %v424_v38  ;;  %v187_v59 = vld [vmem:[%s697_s5 + $0x40] sm:$0xff]  ;;  %v65_v61 = vld [vmem:[%s694_s3 + $0xe8] sm:$0xff]  ;;  %v67_v62 = vld [vmem:[%s694_s3 + $0xf8] sm:$0xff]  ;;  %v414_v63 = vpack.c.bf16 %v62_v58, %v60_v55 }
   0xf   :  { %454 = vpow2.f32 %v30_v46  ;;  %v436_v0 = vpack.c.bf16 %v188_v60, %v187_v59  ;;  %v416_v1 = vpack.c.bf16 %v67_v62, %v65_v61  ;;  %v64_v2 = vld [vmem:[%s694_s3 + $0xe0] sm:$0xff]  ;;  %v66_v3 = vld [vmem:[%s694_s3 + $0xf0] sm:$0xff]  ;;  %v190_v10 = vld [vmem:[%s697_s5 + $0x58] sm:$0xff] }
  0x10   :  { %v418_v5 = vpack.c.bf16 %v66_v3, %v64_v2  ;;  %v189_v9 = vld [vmem:[%s697_s5 + $0x50] sm:$0xff]  ;;  %v191_v12 = vld [vmem:[%s697_s5 + $0x60] sm:$0xff]  ;;  %v192_v13 = vld [vmem:[%s697_s5 + $0x68] sm:$0xff] }
  0x11   :  { %403 = vmatpush1.bf16.msra.mxu0 %v402_v30  ;;  %427 = vmatpush3.bf16.msra.mxu1 %v424_v38  ;;  %v440_v11 = vpack.c.bf16 %v190_v10, %v189_v9  ;;  %v444_v14 = vpack.c.bf16 %v192_v13, %v191_v12  ;;  %v193_v15 = vld [vmem:[%s697_s5 + $0x70] sm:$0xff]  ;;  %v194_v16 = vld [vmem:[%s697_s5 + $0x78] sm:$0xff]  ;;  %v68_v21 = vld [vmem:[%s698_s4] sm:$0x3] }
  0x12   :  { %405 = vmatprep.subr.bf16.mxu0 %v404_v36  ;;  %429 = vmatprep.subr.bf16.mxu1 %v428_v47  ;;  %v448_v17 = vpack.c.bf16 %v194_v16, %v193_v15  ;;  %v73_v25 = vrot.slane %v68_v21, %v72_v20  ;;  %v77_v27 = vrot.slane %v68_v21, %v76_v24  ;;  %v151_v37 = vld [vmem:[%s699_s0] sm:$0xff]  ;;  %v152_v38 = vld [vmem:[%s699_s0 + $0x8] sm:$0xff] }
  0x13   :  { %v334_v45 = vld [vmem:[%s700_s6] ss:$0 sm:$0xff] }
  0x15   :  { %407 = vmatpush1.bf16.msra.mxu0 %v406_v44  ;;  %431 = vmatpush3.bf16.msra.mxu1 %v428_v47 }
  0x16   :  { %409 = vmatprep.subr.bf16.mxu0 %v408_v48  ;;  %433 = vmatprep.subr.bf16.mxu1 %v432_v56 }
  0x19   :  { %411 = vmatpush1.bf16.msra.mxu0 %v410_v54  ;;  %435 = vmatpush3.bf16.msra.mxu1 %v432_v56  ;;  %v455_v4 = vpop.eup %454 }
  0x1a   :  { %413 = vmatprep.subr.bf16.mxu0 %v412_v57  ;;  %437 = vmatprep.subr.bf16.mxu1 %v436_v0  ;;  %v32_v6 = vadd.f32 1.0, %v455_v4 }
  0x1c   :  { %456 = vrcp.f32 %v32_v6 }
  0x1d   :  { %415 = vmatpush1.bf16.msra.mxu0 %v414_v63  ;;  %439 = vmatpush3.bf16.msra.mxu1 %v436_v0 }
  0x1e   :  { %417 = vmatprep.subr.bf16.mxu0 %v416_v1  ;;  %441 = vmatprep.subr.bf16.mxu1 %v440_v11 }
  0x21   :  { %419 = vmatpush1.bf16.msra.mxu0 %v418_v5  ;;  %443 = vmatpush3.bf16.msra.mxu1 %v440_v11 }
  0x22   :  { %445 = vmatprep.subr.bf16.mxu1 %v444_v14 }
  0x25   :  { %447 = vmatpush3.bf16.msra.mxu1 %v444_v14 }
  0x26   :  { %v457_v7 = vpop.eup %456  ;;  %449 = vmatprep.subr.bf16.mxu1 %v448_v17 }
  0x27   :  { %v35_v8 = vmul.f32 %v457_v7, %v28_v32 }
  0x29   :  { %145 = vmatmul.mubr.f32.vlgmr.msra.gmra.mrb[0].mxu0 %v35_v8  ;;  %451 = vmatpush3.bf16.msra.mxu1 %v448_v17 }
  0xfc   :  { %v146_v28 = vpop.f32.mrb[0].mxu0 }
  0xfd   :  { %v147_v29 = vadd.f32 %v146_v28, %v73_v25  ;;  %v148_v30 = vpop.f32.mrb[1].mxu0 }
  0xfe   :  { %v149_v32 = vadd.f32 %v148_v30, %v77_v27 }
  0xff   :  { %v167_v33 = vcombine.low %v147_v29, %v147_v29 }
 0x100   :  { %v154_v34 = vcombine.low %v149_v32, %v149_v32 }
 0x101   :  { %v174_v36 = vrot.slane %v167_v33, %v160_v31 }
 0x102   :  { %v161_v35 = vrot.slane %v154_v34, %v160_v31 }
 0x103   :  { %v175_v41 = vcombine.low %v174_v36, %v174_v36 }
 0x104   :  { %v162_v39 = vcombine.low %v161_v35, %v161_v35 }
 0x106   :  { %v164_v40 = vmul.f32 %v162_v39, %v151_v37  ;;  %v165_v42 = vmul.f32 %v162_v39, %v152_v38 }
 0x108   :  { %v177_v43 = vadd.f32 %v175_v41, %v164_v40  ;;  %v178_v44 = vadd.f32 %v175_v41, %v165_v42 }
 0x10a   :  { %385 = vmatprep.mubr.f32.mxu1 %v177_v43 }
 0x10b   :  { %386 = vmatmul.mubr.f32.vlgmr.msra.gmra.mrb[0].mxu1 %v178_v44 }
 0x1de   :  { %v387_v46 = vpop.f32.mrb[0].mxu1 }
 0x1df   :  { %v274_v47 = vadd.f32 %v387_v46, %v334_v45  ;;  %v268_v48 = vpop.f32.mrb[1].mxu1 }
 0x1e0   :  { %v269_v49 = vadd.f32 %v334_v45, %v268_v48 }
 0x1e1   :  { %v296_v50 = vcombine.high %v274_v47, %v274_v47  ;;  %v303_v51 = vrot.slane %v274_v47, %v160_v31 }
 0x1e2   :  { %v279_v52 = vcombine.high %v269_v49, %v269_v49  ;;  %v286_v53 = vrot.slane %v269_v49, %v160_v31 }
 0x1e3   :  { %v310_v54 = vrot.slane %v296_v50, %v160_v31  ;;  %v311_v55 = vcombine.high %v303_v51, %v303_v51  ;;  %326 = vst.msk [vmem:[%s701_s7 + $0x8] sm:$0x3] %vm321_vm0, %v303_v51 }
 0x1e4   :  { %v293_v56 = vrot.slane %v279_v52, %v160_v31  ;;  %v294_v57 = vcombine.high %v286_v53, %v286_v53  ;;  %322 = vst.msk [vmem:[%s701_s7] sm:$0x3] %vm321_vm0, %v286_v53 }
 0x1e5   :  { %v312_v58 = vcombine.high %v310_v54, %v310_v54  ;;  %327 = vst.msk [vmem:[%s701_s7 + $0xa] sm:$0x3] %vm321_vm0, %v311_v55  ;;  %328 = vst.msk [vmem:[%s701_s7 + $0xc] sm:$0x3] %vm321_vm0, %v310_v54 }
 0x1e6   :  { %v295_v59 = vcombine.high %v293_v56, %v293_v56  ;;  %323 = vst.msk [vmem:[%s701_s7 + $0x2] sm:$0x3] %vm321_vm0, %v294_v57  ;;  %324 = vst.msk [vmem:[%s701_s7 + $0x4] sm:$0x3] %vm321_vm0, %v293_v56 }
 0x1e7   :  { %329 = vst.msk [vmem:[%s701_s7 + $0xe] sm:$0x3] %vm321_vm0, %v312_v58 }
 0x1e8   :  { %325 = vst.msk [vmem:[%s701_s7 + $0x6] sm:$0x3] %vm321_vm0, %v295_v59 }

// kernel: dit_forward.9
= control target key start
LH: loop header
LB: loop body
LE: loop exit
PB: predicated region body
PF: predicated region fallthrough
CT: control target
= control target key end

     0   :  { %s10167_s0 = inlined_call_operand.vmem [shape: f32[16,128], index: 0, kind: input, shape index: {}]   ;;  %s10168_s1 = inlined_call_operand.vmem [shape: f32[2,128], index: 1, kind: input, shape index: {}]   ;;  %s10169_s2 = inlined_call_operand.vmem [shape: f32[2,128], index: 2, kind: input, shape index: {}]   ;;  %s10170_s3 = inlined_call_operand.vmem [shape: f32[128,384], index: 3, kind: input, shape index: {}]   ;;  %s10171_s4 = inlined_call_operand.vmem [shape: f32[1,384], index: 4, kind: input, shape index: {}]   ;;  %s10172_s5 = inlined_call_operand.hbm [shape: f32[128,128], index: 5, kind: input, shape index: {}]   ;;  %s10173_s6 = inlined_call_operand.vmem [shape: f32[1,128], index: 6, kind: input, shape index: {}]   ;;  %s10174_s7 = inlined_call_operand.vmem [shape: f32[1,128], index: 7, kind: input, shape index: {}]   ;;  %s10175_s8 = inlined_call_operand.vmem [shape: f32[1,128], index: 8, kind: input, shape index: {}]   ;;  %s10176_s9 = inlined_call_operand.vmem [shape: f32[1,128], index: 9, kind: input, shape index: {}]   ;;  %s10177_s10 = inlined_call_operand.vmem [shape: f32[1,128], index: 10, kind: input, shape index: {}]   ;;  %s10178_s11 = inlined_call_operand.vmem [shape: f32[128,768], index: 11, kind: input, shape index: {}]   ;;  %s10179_s12 = inlined_call_operand.vmem [shape: f32[1,768], index: 12, kind: input, shape index: {}]   ;;  %s10180_s13 = inlined_call_operand.vmem [shape: f32[128,256], index: 13, kind: input, shape index: {}]   ;;  %s10181_s14 = inlined_call_operand.vmem [shape: f32[1,256], index: 14, kind: input, shape index: {}]   ;;  %s10182_s15 = inlined_call_operand.hbm [shape: f32[256,128], index: 15, kind: input, shape index: {}]   ;;  %s10183_s16 = inlined_call_operand.hbm [shape: f32[1,128], index: 16, kind: input, shape index: {}]   ;;  %s10184_s17 = inlined_call_operand.vmem [shape: f32[16,128], index: 17, kind: output, shape index: {}]  }
   0x1   :  { %10187 = sst [smem:[#allocation9_spill]] %s10167_s0 }
   0x2   :  { %10188 = sst [smem:[#allocation10_spill]] %s10168_s1 }
   0x3   :  { %22 = vsyncpa [#allocation3], 0 }
   0x4   :  { %23 = vsyncpa [#allocation5], 0  ;;  %s8431_s24 = smov [#allocation4]   ;;  %s8432_s26 = smov [#allocation2]  }
   0x5   :  { %s69_s25 = sshll.u32 %s8431_s24, 4  ;;  %s39_s27 = sshll.u32 %s8432_s26, 4  ;;  %s70_s25 = int_to_ptr.vmem [resolvable:$true] %s69_s25  ;;  %s8532_s27 = int_to_ptr.vmem [resolvable:$true] %s39_s27 }
   0x6   :  { %s8361_s0 = scalar_lea.hbm %s10182_s15, 4096 }
   0x7   :  { %p8362_p0 = scmp.ne.s32.totalorder %s10182_s15, %s8361_s0  ;;  %p8365_p1 = scmp.lt.u32.totalorder %s8361_s0, %s10182_s15 }
   0x9   :  { %p8367_p2 = pnand %p8365_p1, %p8362_p0 }
   0xb   :  { %8370 = shalt.err (!%p8367_p2)
}
   0xc   :  { %s8371_s20 = scalar_lea.vmem %s70_s25, 4096  ;;  %p8376_p4 = scmp.lt.s32.totalorder %s70_s25, %s70_s25 }
   0xd   :  { %p8372_p3 = scmp.ne.s32.totalorder %s70_s25, %s8371_s20  ;;  %p8377_p5 = scmp.lt.s32.totalorder %s8371_s20, %s8371_s20 }
   0xf   :  { %p8378_p6 = por %p8377_p5, %p8376_p4 }
  0x11   :  { %p8379_p7 = pnand %p8378_p6, %p8372_p3 }
  0x13   :  { %8382 = shalt.err (!%p8379_p7)
}
  0x14   :  { %s8433_s21 = smov 128   ;;  %s8434_s22 = smov 8  }
  0x15   :  { %75 = dma.hbm_to_vmem [thread:$0]  %s10182_s15, 4096, %s70_s25, [#allocation5], %s8433_s21, %s8433_s21, %s8434_s22  }
  0x16   :  { %s8383_s29 = scalar_lea.hbm %s10172_s5, 2048 }
  0x17   :  { %p8384_p8 = scmp.ne.s32.totalorder %s10172_s5, %s8383_s29  ;;  %p8387_p9 = scmp.lt.u32.totalorder %s8383_s29, %s10172_s5 }
  0x19   :  { %p8389_p10 = pnand %p8387_p9, %p8384_p8 }
  0x1b   :  { %8392 = shalt.err (!%p8389_p10)
}
  0x1c   :  { %s8393_s1 = scalar_lea.vmem %s8532_s27, 2048  ;;  %p8398_p12 = scmp.lt.s32.totalorder %s8532_s27, %s8532_s27 }
  0x1d   :  { %p8394_p11 = scmp.ne.s32.totalorder %s8532_s27, %s8393_s1  ;;  %p8399_p13 = scmp.lt.s32.totalorder %s8393_s1, %s8393_s1 }
  0x1f   :  { %p8400_p0 = por %p8399_p13, %p8398_p12 }
  0x21   :  { %p8401_p1 = pnand %p8400_p0, %p8394_p11 }
  0x23   :  { %8404 = shalt.err (!%p8401_p1)
}
  0x24   :  { %45 = dma.hbm_to_vmem [thread:$0]  %s10172_s5, 2048, %s8532_s27, [#allocation3], %s8433_s21, %s8433_s21, %s8434_s22  }
  0x25   :  { %s8435_s20 = smov [#allocation6]   ;;  %s8405_s28 = scalar_lea.hbm %s10183_s16, 16 }
  0x26   :  { %s82_s23 = sshll.u32 %s8435_s20, 4  ;;  %p8406_p2 = scmp.ne.s32.totalorder %s10183_s16, %s8405_s28  ;;  %s83_s23 = int_to_ptr.vmem [resolvable:$true] %s82_s23 }
  0x27   :  { %p8409_p3 = scmp.lt.u32.totalorder %s8405_s28, %s10183_s16 }
  0x29   :  { %p8411_p4 = pnand %p8409_p3, %p8406_p2 }
  0x2b   :  { %8414 = shalt.err (!%p8411_p4)
}
  0x2c   :  { %s8415_s19 = scalar_lea.vmem %s83_s23, 16  ;;  %s8419_s5 = scalar_lea.vmem %s83_s23, 32 }
  0x2d   :  { %p8416_p5 = scmp.ne.s32.totalorder %s83_s23, %s8415_s19  ;;  %p8420_p6 = scmp.lt.s32.totalorder %s83_s23, %s83_s23 }
  0x2e   :  { %p8421_p7 = scmp.lt.s32.totalorder %s8419_s5, %s8415_s19 }
  0x30   :  { %p8422_p8 = por %p8421_p7, %p8420_p6 }
  0x32   :  { %p8423_p9 = pnand %p8422_p8, %p8416_p5 }
  0x34   :  { %8426 = shalt.err (!%p8423_p9)
}
  0x35   :  { %85 = dma.hbm_to_vmem [thread:$0]  %s10183_s16, 16, %s83_s23, [#allocation5]  }
  0x36   :  { %8427 = dma.done.wait [#allocation3], 2048  }
  0x37   :  { %8428 = vsyncadd [#allocation3], 4294965248 }
  0x38   :  { %8429 = dma.done.wait [#allocation5], 4112  }
  0x39   :  { %8430 = vsyncadd [#allocation5], 4294963184  ;;  %v8436_v0 = vmov 0.0   ;;  %s10189_s15 = sld [smem:[#allocation9_spill]]  ;;  %v108_v3 = vld [vmem:[%s10178_s11 + $0x8] sm:$0xff]  ;;  %v114_v4 = vld [vmem:[%s10178_s11 + $0x38] sm:$0xff] }
  0x3a   :  { %299 = vmatprep.mubr.f32.mxu0 %v8436_v0  ;;  %370 = vmatprep.mubr.f32.mxu1 %v8436_v0  ;;  %v107_v5 = vld [vmem:[%s10178_s11] sm:$0xff]  ;;  %v113_v6 = vld [vmem:[%s10178_s11 + $0x30] sm:$0xff]  ;;  %v7937_v7 = vpack.c.bf16 %v114_v4, %v108_v3  ;;  %v120_v9 = vld [vmem:[%s10178_s11 + $0x68] sm:$0xff]  ;;  %s10190_s0 = sld [smem:[#allocation10_spill]]  ;;  %vm8438_vm0 = vmmov 0   ;;  %vm873_vm1 = vcmask 261120  }
  0x3b   :  { %v7939_v8 = vpack.c.bf16 %v113_v6, %v107_v5  ;;  %v126_v10 = vld [vmem:[%s10178_s11 + $0x98] sm:$0xff]  ;;  %v119_v11 = vld [vmem:[%s10178_s11 + $0x60] sm:$0xff]  ;;  %v125_v13 = vld [vmem:[%s10178_s11 + $0x90] sm:$0xff]  ;;  %vm1567_vm2 = vcmask 1041408   ;;  %vm1474_vm3 = vcmask 9216   ;;  %vm1563_vm4 = vcmask 15360  }
  0x3c   :  { %v7941_v12 = vpack.c.bf16 %v126_v10, %v120_v9  ;;  %v132_v14 = vld [vmem:[%s10178_s11 + $0xc8] sm:$0xff]  ;;  %v138_v15 = vld [vmem:[%s10178_s11 + $0xf8] sm:$0xff]  ;;  %7938 = vmatprep.subr.bf16.mxu0 %v7937_v7  ;;  %v7943_v16 = vpack.c.bf16 %v125_v13, %v119_v11  ;;  %v131_v18 = vld [vmem:[%s10178_s11 + $0xc0] sm:$0xff]  ;;  %s8440_s30 = smov 64   ;;  %s8441_s18 = smov 32  }
  0x3d   :  { %7940 = vmatpush1.bf16.msra.mxu0 %v7939_v8  ;;  %v7945_v17 = vpack.c.bf16 %v138_v15, %v132_v14  ;;  %v137_v19 = vld [vmem:[%s10178_s11 + $0xf0] sm:$0xff]  ;;  %v144_v20 = vld [vmem:[%s10178_s11 + $0x128] sm:$0xff]  ;;  %v150_v21 = vld [vmem:[%s10178_s11 + $0x158] sm:$0xff] }
  0x3e   :  { %7942 = vmatprep.subr.bf16.mxu0 %v7941_v12  ;;  %v7947_v22 = vpack.c.bf16 %v137_v19, %v131_v18  ;;  %v7949_v23 = vpack.c.bf16 %v150_v21, %v144_v20  ;;  %v143_v24 = vld [vmem:[%s10178_s11 + $0x120] sm:$0xff]  ;;  %v149_v25 = vld [vmem:[%s10178_s11 + $0x150] sm:$0xff]  ;;  %v156_v26 = vld [vmem:[%s10178_s11 + $0x188] sm:$0xff] }
  0x3f   :  { %v8580_v1 = vld [vmem:[%s10189_s15] sm:$0xff]  ;;  %v8585_v2 = vld [vmem:[%s10189_s15 + $0x8] sm:$0xff]  ;;  %v162_v27 = vld [vmem:[%s10178_s11 + $0x1b8] sm:$0xff]  ;;  %v7951_v31 = vpack.c.bf16 %v149_v25, %v143_v24 }
  0x40   :  { %450 = vadd.xlane.f32.xlu0 %v8580_v1  ;;  %v97_v28 = vld [vmem:[%s10169_s2] sm:$0x3]  ;;  %v7953_v32 = vpack.c.bf16 %v162_v27, %v156_v26  ;;  %v161_v34 = vld [vmem:[%s10178_s11 + $0x1b0] sm:$0xff]  ;;  %v168_v36 = vld [vmem:[%s10178_s11 + $0x1e8] sm:$0xff] }
  0x41   :  { %7944 = vmatpush1.bf16.msra.mxu0 %v7943_v16  ;;  %v98_v29 = vld [vmem:[%s10190_s0] sm:$0x3]  ;;  %v174_v37 = vld [vmem:[%s10178_s11 + $0x218] sm:$0xff]  ;;  %v173_v42 = vld [vmem:[%s10178_s11 + $0x210] sm:$0xff] }
  0x42   :  { %7946 = vmatprep.subr.bf16.mxu0 %v7945_v17  ;;  %v8649_v30 = vadd.f32 %v98_v29, %v97_v28  ;;  %v155_v33 = vld [vmem:[%s10178_s11 + $0x180] sm:$0xff]  ;;  %v7957_v40 = vpack.c.bf16 %v174_v37, %v168_v36  ;;  %v180_v43 = vld [vmem:[%s10178_s11 + $0x248] sm:$0xff]  ;;  %v186_v44 = vld [vmem:[%s10178_s11 + $0x278] sm:$0xff] }
  0x43   :  { %v7955_v39 = vpack.c.bf16 %v161_v34, %v155_v33  ;;  %v167_v41 = vld [vmem:[%s10178_s11 + $0x1e0] sm:$0xff]  ;;  %v7961_v46 = vpack.c.bf16 %v186_v44, %v180_v43  ;;  %v185_v48 = vld [vmem:[%s10178_s11 + $0x270] sm:$0xff]  ;;  %v192_v49 = vld [vmem:[%s10178_s11 + $0x2a8] sm:$0xff] }
  0x44   :  { %452 = vadd.xlane.f32.xlu0 %v8585_v2  ;;  %v100_v35 = vsub.f32 0.0, %v8649_v30  ;;  %v7959_v45 = vpack.c.bf16 %v173_v42, %v167_v41  ;;  %v179_v47 = vld [vmem:[%s10178_s11 + $0x240] sm:$0xff]  ;;  %v198_v50 = vld [vmem:[%s10178_s11 + $0x2d8] sm:$0xff]  ;;  %v197_v52 = vld [vmem:[%s10178_s11 + $0x2d0] sm:$0xff] }
  0x45   :  { %7948 = vmatpush1.bf16.msra.mxu0 %v7947_v22  ;;  %v191_v51 = vld [vmem:[%s10178_s11 + $0x2a0] sm:$0xff]  ;;  %v7963_v53 = vpack.c.bf16 %v185_v48, %v179_v47  ;;  %v110_v54 = vld [vmem:[%s10178_s11 + $0x18] sm:$0xff]  ;;  %v116_v55 = vld [vmem:[%s10178_s11 + $0x48] sm:$0xff]  ;;  %v7965_v57 = vpack.c.bf16 %v198_v50, %v192_v49 }
  0x46   :  { %7950 = vmatprep.subr.bf16.mxu0 %v7949_v23  ;;  %v101_v38 = vmul.f32 1.442695, %v100_v35  ;;  %v109_v56 = vld [vmem:[%s10178_s11 + $0x10] sm:$0xff]  ;;  %v7969_v58 = vpack.c.bf16 %v116_v55, %v110_v54  ;;  %v115_v59 = vld [vmem:[%s10178_s11 + $0x40] sm:$0xff]  ;;  %v122_v60 = vld [vmem:[%s10178_s11 + $0x78] sm:$0xff]  ;;  %v7967_v8 = vpack.c.bf16 %v197_v52, %v191_v51 }
  0x47   :  { %v128_v61 = vld [vmem:[%s10178_s11 + $0xa8] sm:$0xff]  ;;  %v7971_v62 = vpack.c.bf16 %v115_v59, %v109_v56  ;;  %v118_v4 = vld [vmem:[%s10178_s11 + $0x58] sm:$0xff]  ;;  %v121_v5 = vld [vmem:[%s10178_s11 + $0x70] sm:$0xff] }
  0x48   :  { %8210 = vpow2.f32 %v101_v38  ;;  %v7973_v63 = vpack.c.bf16 %v128_v61, %v122_v60  ;;  %v112_v3 = vld [vmem:[%s10178_s11 + $0x28] sm:$0xff]  ;;  %7970 = vmatprep.subr.bf16.mxu1 %v7969_v58  ;;  %v127_v7 = vld [vmem:[%s10178_s11 + $0xa0] sm:$0xff]  ;;  %v134_v11 = vld [vmem:[%s10178_s11 + $0xd8] sm:$0xff] }
  0x49   :  { %7952 = vmatpush1.bf16.msra.mxu0 %v7951_v31  ;;  %7972 = vmatpush1.bf16.msra.mxu1 %v7971_v62  ;;  %v7975_v10 = vpack.c.bf16 %v127_v7, %v121_v5  ;;  %v140_v12 = vld [vmem:[%s10178_s11 + $0x108] sm:$0xff]  ;;  %v8001_v13 = vpack.c.bf16 %v118_v4, %v112_v3  ;;  %v133_v15 = vld [vmem:[%s10178_s11 + $0xd0] sm:$0xff]  ;;  %v139_v16 = vld [vmem:[%s10178_s11 + $0x100] sm:$0xff] }
  0x4a   :  { %7954 = vmatprep.subr.bf16.mxu0 %v7953_v32  ;;  %7974 = vmatprep.subr.bf16.mxu1 %v7973_v63  ;;  %v7977_v14 = vpack.c.bf16 %v140_v12, %v134_v11  ;;  %v146_v17 = vld [vmem:[%s10178_s11 + $0x138] sm:$0xff]  ;;  %v152_v18 = vld [vmem:[%s10178_s11 + $0x168] sm:$0xff]  ;;  %v7979_v19 = vpack.c.bf16 %v139_v16, %v133_v15  ;;  %v145_v21 = vld [vmem:[%s10178_s11 + $0x130] sm:$0xff] }
  0x4b   :  { %v7981_v20 = vpack.c.bf16 %v152_v18, %v146_v17  ;;  %v151_v22 = vld [vmem:[%s10178_s11 + $0x160] sm:$0xff]  ;;  %v158_v23 = vld [vmem:[%s10178_s11 + $0x198] sm:$0xff]  ;;  %v164_v24 = vld [vmem:[%s10178_s11 + $0x1c8] sm:$0xff] }
  0x4c   :  { %v111_v25 = vld [vmem:[%s10178_s11 + $0x20] sm:$0xff]  ;;  %v117_v26 = vld [vmem:[%s10178_s11 + $0x50] sm:$0xff]  ;;  %v7983_v27 = vpack.c.bf16 %v151_v22, %v145_v21  ;;  %v124_v28 = vld [vmem:[%s10178_s11 + $0x88] sm:$0xff]  ;;  %v7985_v29 = vpack.c.bf16 %v164_v24, %v158_v23 }
  0x4d   :  { %7956 = vmatpush1.bf16.msra.mxu0 %v7955_v39  ;;  %7976 = vmatpush1.bf16.msra.mxu1 %v7975_v10  ;;  %v157_v31 = vld [vmem:[%s10178_s11 + $0x190] sm:$0xff]  ;;  %v163_v32 = vld [vmem:[%s10178_s11 + $0x1c0] sm:$0xff]  ;;  %v130_v33 = vld [vmem:[%s10178_s11 + $0xb8] sm:$0xff]  ;;  %v8003_v37 = vpack.c.bf16 %v117_v26, %v111_v25 }
  0x4e   :  { %7958 = vmatprep.subr.bf16.mxu0 %v7957_v40  ;;  %7978 = vmatprep.subr.bf16.mxu1 %v7977_v14  ;;  %v170_v34 = vld [vmem:[%s10178_s11 + $0x1f8] sm:$0xff]  ;;  %v176_v35 = vld [vmem:[%s10178_s11 + $0x228] sm:$0xff]  ;;  %v123_v38 = vld [vmem:[%s10178_s11 + $0x80] sm:$0xff]  ;;  %v7987_v40 = vpack.c.bf16 %v163_v32, %v157_v31  ;;  %v8005_v42 = vpack.c.bf16 %v130_v33, %v124_v28 }
  0x4f   :  { %v129_v39 = vld [vmem:[%s10178_s11 + $0xb0] sm:$0xff]  ;;  %v136_v43 = vld [vmem:[%s10178_s11 + $0xe8] sm:$0xff]  ;;  %v7989_v44 = vpack.c.bf16 %v176_v35, %v170_v34  ;;  %v182_v47 = vld [vmem:[%s10178_s11 + $0x258] sm:$0xff] }
  0x50   :  { %v188_v48 = vld [vmem:[%s10178_s11 + $0x288] sm:$0xff]  ;;  %v8007_v49 = vpack.c.bf16 %v129_v39, %v123_v38  ;;  %v135_v50 = vld [vmem:[%s10178_s11 + $0xe0] sm:$0xff]  ;;  %v141_v51 = vld [vmem:[%s10178_s11 + $0x110] sm:$0xff] }
  0x51   :  { %7960 = vmatpush1.bf16.msra.mxu0 %v7959_v45  ;;  %7980 = vmatpush1.bf16.msra.mxu1 %v7979_v19  ;;  %v169_v45 = vld [vmem:[%s10178_s11 + $0x1f0] sm:$0xff]  ;;  %v148_v54 = vld [vmem:[%s10178_s11 + $0x148] sm:$0xff]  ;;  %v7993_v55 = vpack.c.bf16 %v188_v48, %v182_v47  ;;  %v154_v58 = vld [vmem:[%s10178_s11 + $0x178] sm:$0xff]  ;;  %v8011_v61 = vpack.c.bf16 %v141_v51, %v135_v50 }
  0x52   :  { %7962 = vmatprep.subr.bf16.mxu0 %v7961_v46  ;;  %v8211_v6 = vpop.eup %8210  ;;  %7982 = vmatprep.subr.bf16.mxu1 %v7981_v20  ;;  %v175_v46 = vld [vmem:[%s10178_s11 + $0x220] sm:$0xff]  ;;  %v181_v56 = vld [vmem:[%s10178_s11 + $0x250] sm:$0xff]  ;;  %v194_v59 = vld [vmem:[%s10178_s11 + $0x2b8] sm:$0xff]  ;;  %v8013_v4 = vpack.c.bf16 %v154_v58, %v148_v54 }
  0x53   :  { %v103_v9 = vadd.f32 1.0, %v8211_v6  ;;  %v7991_v52 = vpack.c.bf16 %v175_v46, %v169_v45  ;;  %v200_v60 = vld [vmem:[%s10178_s11 + $0x2e8] sm:$0xff]  ;;  %v147_v62 = vld [vmem:[%s10178_s11 + $0x140] sm:$0xff]  ;;  %v153_v63 = vld [vmem:[%s10178_s11 + $0x170] sm:$0xff] }
  0x54   :  { %v160_v5 = vld [vmem:[%s10178_s11 + $0x1a8] sm:$0xff]  ;;  %v7997_v6 = vpack.c.bf16 %v200_v60, %v194_v59  ;;  %v193_v7 = vld [vmem:[%s10178_s11 + $0x2b0] sm:$0xff]  ;;  %v519_v11 = vld [vmem:[%s10170_s3 + $0x20] sm:$0xff]  ;;  %v8015_v12 = vpack.c.bf16 %v153_v63, %v147_v62 }
  0x55   :  { %7964 = vmatpush1.bf16.msra.mxu0 %v7963_v53  ;;  %8212 = vrcp.f32 %v103_v9  ;;  %7984 = vmatpush1.bf16.msra.mxu1 %v7983_v27  ;;  %v166_v9 = vld [vmem:[%s10178_s11 + $0x1d8] sm:$0xff]  ;;  %v516_v10 = vld [vmem:[%s10170_s3 + $0x8] sm:$0xff]  ;;  %v165_v14 = vld [vmem:[%s10178_s11 + $0x1d0] sm:$0xff] }
  0x56   :  { %7966 = vmatprep.subr.bf16.mxu0 %v7965_v57  ;;  %7986 = vmatprep.subr.bf16.mxu1 %v7985_v29  ;;  %v187_v57 = vld [vmem:[%s10178_s11 + $0x280] sm:$0xff]  ;;  %v8017_v16 = vpack.c.bf16 %v166_v9, %v160_v5  ;;  %v172_v17 = vld [vmem:[%s10178_s11 + $0x208] sm:$0xff]  ;;  %v8033_v18 = vpack.c.bf16 %v519_v11, %v516_v10  ;;  %v518_v20 = vld [vmem:[%s10170_s3 + $0x18] sm:$0xff] }
  0x57   :  { %v7995_v3 = vpack.c.bf16 %v187_v57, %v181_v56  ;;  %v515_v19 = vld [vmem:[%s10170_s3] sm:$0xff]  ;;  %v178_v21 = vld [vmem:[%s10178_s11 + $0x238] sm:$0xff]  ;;  %v525_v23 = vld [vmem:[%s10170_s3 + $0x50] sm:$0xff] }
  0x58   :  { %v522_v22 = vld [vmem:[%s10170_s3 + $0x38] sm:$0xff]  ;;  %v171_v25 = vld [vmem:[%s10178_s11 + $0x200] sm:$0xff]  ;;  %v8035_v26 = vpack.c.bf16 %v518_v20, %v515_v19  ;;  %v8021_v27 = vpack.c.bf16 %v178_v21, %v172_v17  ;;  %v177_v28 = vld [vmem:[%s10178_s11 + $0x230] sm:$0xff] }
  0x59   :  { %7968 = vmatpush1.bf16.msra.mxu0 %v7967_v8  ;;  %7988 = vmatpush1.bf16.msra.mxu1 %v7987_v40  ;;  %v199_v8 = vld [vmem:[%s10178_s11 + $0x2e0] sm:$0xff]  ;;  %v8037_v29 = vpack.c.bf16 %v525_v23, %v522_v22  ;;  %v521_v31 = vld [vmem:[%s10170_s3 + $0x30] sm:$0xff]  ;;  %v524_v32 = vld [vmem:[%s10170_s3 + $0x48] sm:$0xff]  ;;  %v8023_v35 = vpack.c.bf16 %v177_v28, %v171_v25 }
  0x5a   :  { %8002 = vmatprep.subr.bf16.mxu0 %v8001_v13  ;;  %7990 = vmatprep.subr.bf16.mxu1 %v7989_v44  ;;  %v159_v13 = vld [vmem:[%s10178_s11 + $0x1a0] sm:$0xff]  ;;  %v7999_v15 = vpack.c.bf16 %v199_v8, %v193_v7  ;;  %v184_v33 = vld [vmem:[%s10178_s11 + $0x268] sm:$0xff]  ;;  %v190_v34 = vld [vmem:[%s10178_s11 + $0x298] sm:$0xff] }
  0x5b   :  { %v8019_v24 = vpack.c.bf16 %v165_v14, %v159_v13  ;;  %v183_v38 = vld [vmem:[%s10178_s11 + $0x260] sm:$0xff]  ;;  %v189_v39 = vld [vmem:[%s10178_s11 + $0x290] sm:$0xff]  ;;  %v196_v40 = vld [vmem:[%s10178_s11 + $0x2c8] sm:$0xff] }
  0x5c   :  { %v195_v45 = vld [vmem:[%s10178_s11 + $0x2c0] sm:$0xff]  ;;  %v201_v46 = vld [vmem:[%s10178_s11 + $0x2f0] sm:$0xff]  ;;  %v520_v47 = vld [vmem:[%s10170_s3 + $0x28] sm:$0xff] }
  0x5d   :  { %7992 = vmatpush1.bf16.msra.mxu1 %v7991_v52  ;;  %v8031_v48 = vpack.c.bf16 %v201_v46, %v195_v45  ;;  %v523_v58 = vld [vmem:[%s10170_s3 + $0x40] sm:$0xff]  ;;  %v529_v5 = vld [vmem:[%s10170_s3 + $0x70] sm:$0xff]  ;;  %v532_v7 = vld [vmem:[%s10170_s3 + $0x88] sm:$0xff] }
  0x5e   :  { %7994 = vmatprep.subr.bf16.mxu1 %v7993_v55  ;;  %v527_v60 = vld [vmem:[%s10170_s3 + $0x60] sm:$0xff]  ;;  %v533_v8 = vld [vmem:[%s10170_s3 + $0x90] sm:$0xff]  ;;  %v536_v9 = vld [vmem:[%s10170_s3 + $0xa8] sm:$0xff]  ;;  %v8073_v10 = vpack.c.bf16 %v532_v7, %v529_v5 }
  0x5f   :  { %v8213_v36 = vpop.eup %8212  ;;  %v8047_v11 = vpack.c.bf16 %v536_v9, %v533_v8  ;;  %v543_v13 = vld [vmem:[%s10170_s3 + $0xe0] sm:$0xff]  ;;  %v546_v21 = vld [vmem:[%s10170_s3 + $0xf8] sm:$0xff]  ;;  %v549_v22 = vld [vmem:[%s10170_s3 + $0x110] sm:$0xff] }
  0x60   :  { %v8785_v41 = vmul.f32 %v8213_v36, %v8649_v30  ;;  %v142_v30 = vld [vmem:[%s10178_s11 + $0x118] sm:$0xff]  ;;  %v8039_v36 = vpack.c.bf16 %v524_v32, %v521_v31  ;;  %v535_v14 = vld [vmem:[%s10170_s3 + $0xa0] sm:$0xff]  ;;  %v541_v23 = vld [vmem:[%s10170_s3 + $0xd0] sm:$0xff] }
  0x61   :  { %v8009_v53 = vpack.c.bf16 %v142_v30, %v136_v43  ;;  %7996 = vmatpush1.bf16.msra.mxu1 %v7995_v3  ;;  %v8027_v43 = vpack.c.bf16 %v189_v39, %v183_v38  ;;  %v517_v30 = vld [vmem:[%s10170_s3 + $0x10] sm:$0xff]  ;;  %v534_v3 = vld [vmem:[%s10170_s3 + $0x98] sm:$0xff]  ;;  %v539_v17 = vld [vmem:[%s10170_s3 + $0xc0] sm:$0xff] }
  0x62   :  { %300 = vmatmul.mubr.f32.vlgmr.msra.gmra.mrb[0].mxu0 %v8785_v41  ;;  %7998 = vmatprep.subr.bf16.mxu1 %v7997_v6  ;;  %v544_v25 = vld [vmem:[%s10170_s3 + $0xe8] sm:$0xff]  ;;  %v555_v32 = vld [vmem:[%s10170_s3 + $0x140] sm:$0xff]  ;;  %v557_v46 = vld [vmem:[%s10170_s3 + $0x150] sm:$0xff] }
  0x63   :  { %8004 = vmatpush1.bf16.msra.mxu0 %v8003_v37  ;;  %441 = vmatprep.mubr.f32.mxu0 %v8436_v0  ;;  %v8025_v37 = vpack.c.bf16 %v190_v34, %v184_v33  ;;  %v8081_v28 = vpack.c.bf16 %v544_v25, %v541_v23  ;;  %v552_v31 = vld [vmem:[%s10170_s3 + $0x128] sm:$0xff]  ;;  %v547_v33 = vld [vmem:[%s10170_s3 + $0x100] sm:$0xff] }
  0x64   :  { %8006 = vmatprep.subr.bf16.mxu0 %v8005_v42  ;;  %v202_v42 = vld [vmem:[%s10178_s11 + $0x2f8] sm:$0xff]  ;;  %v8057_v34 = vpack.c.bf16 %v555_v32, %v552_v31  ;;  %v556_v45 = vld [vmem:[%s10170_s3 + $0x148] sm:$0xff] }
  0x65   :  { %8000 = vmatpush1.bf16.msra.mxu1 %v7999_v15  ;;  %v8029_v44 = vpack.c.bf16 %v202_v42, %v196_v40  ;;  %v558_v40 = vld [vmem:[%s10170_s3 + $0x158] sm:$0xff]  ;;  %v561_v42 = vld [vmem:[%s10170_s3 + $0x170] sm:$0xff] }
  0x66   :  { %8034 = vmatprep.subr.bf16.mxu1 %v8033_v18  ;;  %v542_v18 = vld [vmem:[%s10170_s3 + $0xd8] sm:$0xff] }
  0x67   :  { %8008 = vmatpush1.bf16.msra.mxu0 %v8007_v49  ;;  %v8065_v49 = vpack.c.bf16 %v520_v47, %v517_v30  ;;  %v8051_v20 = vpack.c.bf16 %v542_v18, %v539_v17  ;;  %v560_v30 = vld [vmem:[%s10170_s3 + $0x168] sm:$0xff]  ;;  %v7188_v17 = vld [vmem:[%s10174_s7] ss:$0 sm:$0xff] }
  0x68   :  { %8010 = vmatprep.subr.bf16.mxu0 %v8009_v53  ;;  %371 = vmatmul.mubr.f32.vlgmr.msra.gmra.mrb[0].mxu1 %v8785_v41 }
  0x69   :  { %8036 = vmatpush1.bf16.msra.mxu1 %v8035_v26  ;;  %644 = vmatprep.mubr.f32.mxu1 %v8436_v0  ;;  %v545_v26 = vld [vmem:[%s10170_s3 + $0xf0] sm:$0xff] }
  0x6a   :  { %8038 = vmatprep.subr.bf16.mxu1 %v8037_v29 }
  0x6b   :  { %8012 = vmatpush1.bf16.msra.mxu0 %v8011_v61  ;;  %v530_v61 = vld [vmem:[%s10170_s3 + $0x78] sm:$0xff] }
  0x6c   :  { %8014 = vmatprep.subr.bf16.mxu0 %v8013_v4  ;;  %v8043_v63 = vpack.c.bf16 %v530_v61, %v527_v60  ;;  %v537_v4 = vld [vmem:[%s10170_s3 + $0xb0] sm:$0xff] }
  0x6d   :  { %8040 = vmatpush1.bf16.msra.mxu1 %v8039_v36  ;;  %v8045_v6 = vpack.c.bf16 %v537_v4, %v534_v3  ;;  %v551_v36 = vld [vmem:[%s10170_s3 + $0x120] sm:$0xff] }
  0x6f   :  { %8016 = vmatpush1.bf16.msra.mxu0 %v8015_v12  ;;  %v540_v12 = vld [vmem:[%s10170_s3 + $0xc8] sm:$0xff] }
  0x70   :  { %8018 = vmatprep.subr.bf16.mxu0 %v8017_v16  ;;  %v8049_v15 = vpack.c.bf16 %v543_v13, %v540_v12  ;;  %v538_v16 = vld [vmem:[%s10170_s3 + $0xb8] sm:$0xff] }
  0x71   :  { %v8077_v19 = vpack.c.bf16 %v538_v16, %v535_v14 }
  0x73   :  { %8020 = vmatpush1.bf16.msra.mxu0 %v8019_v24  ;;  %v8053_v24 = vpack.c.bf16 %v549_v22, %v546_v21 }
  0x74   :  { %8022 = vmatprep.subr.bf16.mxu0 %v8021_v27  ;;  %v548_v27 = vld [vmem:[%s10170_s3 + $0x108] sm:$0xff] }
  0x75   :  { %v8055_v29 = vpack.c.bf16 %v548_v27, %v545_v26 }
  0x77   :  { %8024 = vmatpush1.bf16.msra.mxu0 %v8023_v35  ;;  %v550_v35 = vld [vmem:[%s10170_s3 + $0x118] sm:$0xff] }
  0x78   :  { %8026 = vmatprep.subr.bf16.mxu0 %v8025_v37  ;;  %v554_v37 = vld [vmem:[%s10170_s3 + $0x138] sm:$0xff]  ;;  %v8085_v38 = vpack.c.bf16 %v550_v35, %v547_v33 }
  0x79   :  { %v8059_v39 = vpack.c.bf16 %v554_v37, %v551_v36 }
  0x7b   :  { %8028 = vmatpush1.bf16.msra.mxu0 %v8027_v43  ;;  %v553_v43 = vld [vmem:[%s10170_s3 + $0x130] sm:$0xff] }
  0x7c   :  { %8030 = vmatprep.subr.bf16.mxu0 %v8029_v44  ;;  %v8061_v44 = vpack.c.bf16 %v561_v42, %v558_v40  ;;  %v8089_v47 = vpack.c.bf16 %v556_v45, %v553_v43 }
  0x7f   :  { %8032 = vmatpush1.bf16.msra.mxu0 %v8031_v48  ;;  %v8063_v48 = vpack.c.bf16 %v560_v30, %v557_v46 }
  0x80   :  { %8066 = vmatprep.subr.bf16.mxu0 %v8065_v49 }
  0x82   :  { %442 = vmatmul.mubr.f32.vlgmr.msra.gmra.mrb[2].mxu0 %v8785_v41  ;;  %v528_v41 = vld [vmem:[%s10170_s3 + $0x68] sm:$0xff] }
  0x83   :  { %8068 = vmatpush3.bf16.msra.mxu0 %v8065_v49  ;;  %v559_v49 = vld [vmem:[%s10170_s3 + $0x160] sm:$0xff] }
  0xcd   :  { %v451_v50 = vpop.xlane.xlu0 %450 }
  0xce   :  { %v455_v51 = vmul.f32 0.0078125, %v451_v50  ;;  %v562_v50 = vld [vmem:[%s10170_s3 + $0x178] sm:$0xff] }
  0xd0   :  { %v8925_v52 = vsub.f32 %v8580_v1, %v455_v51  ;;  %v531_v1 = vld [vmem:[%s10170_s3 + $0x80] sm:$0xff]  ;;  %v8093_v51 = vpack.c.bf16 %v562_v50, %v559_v49 }
  0xd1   :  { %v453_v53 = vpop.xlane.xlu0 %452  ;;  %v8041_v59 = vpack.c.bf16 %v531_v1, %v528_v41  ;;  %v205_v41 = vlaneseq }
  0xd2   :  { %v456_v54 = vmul.f32 0.0078125, %v453_v53  ;;  %v459_v55 = vmul.f32 %v8925_v52, %v8925_v52 }
  0xd3   :  { %8042 = vmatprep.subr.bf16.mxu1 %v8041_v59  ;;  %v9054_v1 = vshrl.u32 %v205_v41, 7  ;;  %v203_v59 = vld [vmem:[%s10179_s12] sm:$0x3f] }
  0xd4   :  { %461 = vadd.xlane.f32.xlu1 %v459_v55  ;;  %v8930_v56 = vsub.f32 %v8585_v2, %v456_v54  ;;  %v526_v2 = vld [vmem:[%s10170_s3 + $0x58] sm:$0xff]  ;;  %8044 = vmatpush1.bf16.msra.mxu1 %v8043_v63 }
  0xd5   :  { %v8069_v62 = vpack.c.bf16 %v526_v2, %v523_v58  ;;  %8046 = vmatprep.subr.bf16.mxu1 %v8045_v6  ;;  %v9057_v58 = vsub.s32 0, %v9054_v1  ;;  %v9064_v3 = vsub.s32 1, %v9054_v1  ;;  %v10186_v37 = vsub.s32 2, %v9054_v1 }
  0xd6   :  { %v460_v57 = vmul.f32 %v8930_v56, %v8930_v56 }
  0xd7   :  { %8070 = vmatprep.subr.bf16.mxu0 %v8069_v62  ;;  %v208_v61 = vrot.slane %v203_v59, %v9057_v58  ;;  %v212_v9 = vrot.slane %v203_v59, %v9064_v3 }
  0xd8   :  { %463 = vadd.xlane.f32.xlu1 %v460_v57  ;;  %8072 = vmatpush3.bf16.msra.mxu0 %v8069_v62  ;;  %v8437_v62 = vmov 1983009808  }
  0xd9   :  { %8074 = vmatprep.subr.bf16.mxu0 %v8073_v10  ;;  %8048 = vmatpush1.bf16.msra.mxu1 %v8047_v11  ;;  %v492_v63 = vunpack.c.l.s4 %v8437_v62 }
  0xda   :  { %8050 = vmatprep.subr.bf16.mxu1 %v8049_v15 }
  0xdb   :  { %v493_v8 = vunpack.c.0.s8 %v492_v63 }
  0xdc   :  { %8076 = vmatpush3.bf16.msra.mxu0 %v8073_v10 }
  0xdd   :  { %8078 = vmatprep.subr.bf16.mxu0 %v8077_v19  ;;  %8052 = vmatpush1.bf16.msra.mxu1 %v8051_v20  ;;  %v9068_v12 = vsub.s32 %v493_v8, %v9054_v1 }
  0xde   :  { %8054 = vmatprep.subr.bf16.mxu1 %v8053_v24 }
  0xe0   :  { %8080 = vmatpush3.bf16.msra.mxu0 %v8077_v19  ;;  %v7189_v19 = vld [vmem:[%s10175_s8] ss:$0 sm:$0xff] }
  0xe1   :  { %8082 = vmatprep.subr.bf16.mxu0 %v8081_v28  ;;  %8056 = vmatpush1.bf16.msra.mxu1 %v8055_v29 }
  0xe2   :  { %8058 = vmatprep.subr.bf16.mxu1 %v8057_v34 }
  0xe4   :  { %8084 = vmatpush3.bf16.msra.mxu0 %v8081_v28 }
  0xe5   :  { %8086 = vmatprep.subr.bf16.mxu0 %v8085_v38  ;;  %8060 = vmatpush1.bf16.msra.mxu1 %v8059_v39 }
  0xe6   :  { %8062 = vmatprep.subr.bf16.mxu1 %v8061_v44 }
  0xe8   :  { %8088 = vmatpush3.bf16.msra.mxu0 %v8085_v38 }
  0xe9   :  { %8090 = vmatprep.subr.bf16.mxu0 %v8089_v47  ;;  %8064 = vmatpush1.bf16.msra.mxu1 %v8063_v48 }
  0xea   :  { %7573 = vmatprep.subr.mxu1 %v8436_v0 }
  0xec   :  { %8092 = vmatpush3.bf16.msra.mxu0 %v8089_v47 }
  0xed   :  { %8094 = vmatprep.subr.bf16.mxu0 %v8093_v51 }
  0xf0   :  { %8096 = vmatpush3.bf16.msra.mxu0 %v8093_v51 }
  0xf1   :  { %7608 = vmatprep.subr.mxu0 %v8436_v0 }
 0x135   :  { %v301_v53 = vpop.f32.mrb[0].mxu0 }
 0x136   :  { %v303_v54 = vpop.f32.mrb[1].mxu0  ;;  %v302_v7 = vadd.f32 %v301_v53, %v208_v61 }
 0x137   :  { %v304_v13 = vadd.f32 %v303_v54, %v212_v9 }
 0x138   :  { %v490_v11 = vcombine.low %v302_v7, %v302_v7 }
 0x139   :  { %v503_v15 = vcombine.low %v304_v13, %v304_v13 }
 0x13a   :  { %v497_v14 = vrot.slane %v490_v11, %v9068_v12 }
 0x13b   :  { %v9050_v55 = vpop.f32.mrb[0].mxu1  ;;  %v510_v22 = vrot.slane %v503_v15, %v9068_v12 }
 0x13c   :  { %v9052_v57 = vpop.f32.mrb[1].mxu1  ;;  %v498_v21 = vcombine.low %v497_v14, %v497_v14 }
 0x13d   :  { %v511_v28 = vcombine.low %v510_v22, %v510_v22 }
 0x155   :  { %v9081_v33 = vpop.f32.mrb[2].mxu0 }
 0x156   :  { %v9083_v34 = vpop.f32.mrb[3].mxu0 }
 0x161   :  { %v462_v2 = vpop.xlane.xlu1 %461 }
 0x162   :  { %v465_v60 = vmul.f32 0.0078125, %v462_v2 }
 0x164   :  { %v467_v4 = vadd.f32 1e-05, %v465_v60 }
 0x165   :  { %v464_v5 = vpop.xlane.xlu1 %463 }
 0x166   :  { %8214 = vrsqrt.f32 %v467_v4  ;;  %v466_v6 = vmul.f32 0.0078125, %v464_v5 }
 0x168   :  { %v468_v10 = vadd.f32 1e-05, %v466_v6 }
 0x16a   :  { %8216 = vrsqrt.f32 %v468_v10 }
 0x170   :  { %v8215_v16 = vpop.eup %8214 }
 0x171   :  { %v471_v18 = vmul.f32 %v8215_v16, %v8925_v52 }
 0x173   :  { %v479_v20 = vmul.f32 %v7188_v17, %v471_v18 }
 0x174   :  { %v8217_v23 = vpop.eup %8216 }
 0x175   :  { %v472_v24 = vmul.f32 %v8217_v23, %v8930_v56  ;;  %v487_v25 = vadd.f32 %v7189_v19, %v479_v20  ;;  %v563_v56 = vld [vmem:[%s10171_s4] sm:$0x7]  ;;  %s8439_s4 = smov 96  }
 0x176   :  { %v568_v35 = vrot.slane %v563_v56, %v9057_v58  ;;  %v572_v36 = vrot.slane %v563_v56, %v9064_v3  ;;  %v576_v43 = vrot.slane %v563_v56, %v10186_v37 }
 0x177   :  { %v480_v26 = vmul.f32 %v7188_v17, %v472_v24  ;;  %v500_v27 = vmul.f32 %v498_v21, %v487_v25 }
 0x179   :  { %v488_v29 = vadd.f32 %v7189_v19, %v480_v26  ;;  %v513_v31 = vadd.f32 %v511_v28, %v500_v27 }
 0x17b   :  { %v501_v32 = vmul.f32 %v498_v21, %v488_v29  ;;  %645 = vmatmul.mubr.f32.vlgmr.msra.gmra.mrb[2].mxu1 %v513_v31  ;;  %7570 = vmatprep.mubr.f32.mxu0 %v513_v31 }
 0x17c   :  { %650 = vmatprep.mubr.f32.mxu1 %v8436_v0 }
 0x17d   :  { %v514_v52 = vadd.f32 %v511_v28, %v501_v32 }
 0x17f   :  { %651 = vmatmul.mubr.f32.gmra.mrb[4].mxu1 %v514_v52  ;;  %7571 = vmatmul.mubr.f32.vlgmr.msra.gmra.mrb[4].mxu0 %v514_v52 }
 0x180   :  { %7575 = vmatprep.mubr.msk.f32.mxu1 %vm8438_vm0, %v8436_v0  ;;  %7610 = vmatprep.mubr.msk.f32.mxu0 %vm8438_vm0, %v8436_v0 }
 0x24e   :  { %v646_v38 = vpop.f32.mrb[2].mxu1 }
 0x24f   :  { %v647_v39 = vadd.f32 %v646_v38, %v568_v35  ;;  %v648_v40 = vpop.f32.mrb[3].mxu1 }
 0x250   :  { %v649_v42 = vadd.f32 %v648_v40, %v572_v36 }
 0x251   :  { %v758_v44 = vrot.slane %v647_v39, %v9068_v12  ;;  %v751_v53 = vcombine.high %v647_v39, %v647_v39 }
 0x252   :  { %v9099_v45 = vrot.slane %v649_v42, %v9068_v12  ;;  %v652_v46 = vpop.f32.mrb[4].mxu1  ;;  %v7572_v30 = vpop.f32.mrb[4].mxu0  ;;  %v803_v2 = vcombine.high %v649_v42, %v649_v42 }
 0x253   :  { %v653_v47 = vadd.f32 %v652_v46, %v568_v35  ;;  %v654_v48 = vpop.f32.mrb[5].mxu1  ;;  %v723_v49 = vpop.f32.mrb[5].mxu0  ;;  %v9101_v50 = vadd.f32 %v7572_v30, %v576_v43  ;;  %v766_v54 = vcombine.high %v758_v44, %v758_v44  ;;  %v9105_v41 = vmul.f32 0.17677669, %v758_v44 }
 0x254   :  { %v655_v51 = vadd.f32 %v654_v48, %v572_v36  ;;  %7574 = vmatpush3.xpose.msk.msra.mxu1 %vm873_vm1, %v9099_v45  ;;  %v9110_v60 = vcombine.high %v9099_v45, %v9099_v45  ;;  %v765_v63 = vrot.slane %v751_v53, %v9068_v12  ;;  %v9127_v6 = vrot.slane %v803_v2, %v9068_v12 }
 0x255   :  { %v768_v59 = vcombine.high %v653_v47, %v653_v47  ;;  %7578 = vmatprep.subr.mxu1 %v8436_v0  ;;  %v9120_v4 = vmul.f32 0.17677669, %v766_v54  ;;  %v9129_v8 = vadd.f32 %v723_v49, %v576_v43  ;;  %v775_v18 = vrot.slane %v653_v47, %v9068_v12 }
 0x256   :  { %v820_v62 = vcombine.high %v655_v51, %v655_v51  ;;  %v767_v11 = vcombine.high %v765_v63, %v765_v63  ;;  %v9145_v13 = vmul.f32 0.17677669, %v765_v63  ;;  %v9152_v14 = vcombine.high %v9127_v6, %v9127_v6 }
 0x257   :  { %v782_v61 = vrot.slane %v768_v59, %v9068_v12  ;;  %7576 = vmatmul.mubr.msk.f32.vlgmr.msra.gmra.mrb[6].mxu1 %vm873_vm1, %v9105_v41  ;;  %v9139_v10 = vrot.slane %v9129_v8, %v9068_v12  ;;  %v9175_v19 = vrot.slane %v655_v51, %v9068_v12  ;;  %v783_v20 = vcombine.high %v775_v18, %v775_v18 }
 0x258   :  { %7579 = vmatpush3.xpose.msk.msra.mxu1 %vm873_vm1, %v9110_v60  ;;  %7580 = vmatprep.mubr.msk.f32.mxu1 %vm8438_vm0, %v8436_v0  ;;  %v9123_v5 = vrot.slane %v820_v62, %v9068_v12  ;;  %v9167_v17 = vmul.f32 0.17677669, %v767_v11  ;;  %v9187_v21 = vmul.f32 0.17677669, %v775_v18  ;;  %v9233_v53 = vrot.slane %v9099_v45, %v9068_v12 }
 0x259   :  { %7583 = vmatprep.subr.mxu1 %v8436_v0  ;;  %v784_v7 = vcombine.high %v782_v61, %v782_v61  ;;  %v9159_v16 = vcombine.high %v9139_v10, %v9139_v10  ;;  %v9192_v22 = vcombine.high %v9175_v19, %v9175_v19  ;;  %v9200_v23 = vmul.f32 0.17677669, %v783_v20 }
 0x25a   :  { %v9133_v9 = vcombine.high %v9123_v5, %v9123_v5  ;;  %v9209_v24 = vmul.f32 0.17677669, %v782_v61  ;;  %v9239_v54 = vrot.slane %v9110_v60, %v9068_v12  ;;  %v9245_v59 = vrot.slane %v9105_v41, %v9068_v12 }
 0x25b   :  { %7581 = vmatmul.mubr.msk.f32.vlgmr.msra.gmra.mrb[8].mxu1 %vm873_vm1, %v9120_v4  ;;  %v9154_v15 = vmul.f32 0.17677669, %v784_v7  ;;  %v9251_v45 = vrot.slane %v9120_v4, %v9068_v12  ;;  %v9257_v2 = vrot.slane %v9152_v14, %v9068_v12  ;;  %v9265_v60 = vrot.slane %v9127_v6, %v9068_v12 }
 0x25c   :  { %7584 = vmatpush3.xpose.msk.msra.mxu1 %vm873_vm1, %v9127_v6  ;;  %7585 = vmatprep.mubr.msk.f32.mxu1 %vm8438_vm0, %v8436_v0 }
 0x25d   :  { %7609 = vmatpush3.xpose.msk.msra.mxu0 %vm873_vm1, %v9133_v9  ;;  %7588 = vmatprep.subr.mxu1 %v8436_v0 }
 0x25e   :  { %7618 = vmatprep.subr.mxu0 %v8436_v0 }
 0x25f   :  { %7586 = vmatmul.mubr.msk.f32.vlgmr.msra.gmra.mrb[10].mxu1 %vm873_vm1, %v9145_v13 }
 0x260   :  { %7611 = vmatmul.mubr.msk.f32.vlgmr.msra.gmra.mrb[6].mxu0 %vm873_vm1, %v9154_v15  ;;  %7589 = vmatpush3.xpose.msk.msra.mxu1 %vm873_vm1, %v9152_v14 }
 0x261   :  { %7619 = vmatpush3.msk.msra.mxu0 %vm1567_vm2, %v9159_v16  ;;  %7590 = vmatprep.mubr.msk.f32.mxu1 %vm8438_vm0, %v8436_v0 }
 0x262   :  { %7593 = vmatprep.subr.mxu1 %v8436_v0  ;;  %7620 = vmatprep.mubr.msk.f32.mxu0 %vm8438_vm0, %v8436_v0 }
 0x263   :  { %7591 = vmatmul.mubr.msk.f32.vlgmr.msra.gmra.mrb[12].mxu1 %vm873_vm1, %v9167_v17  ;;  %7628 = vmatprep.subr.mxu0 %v8436_v0 }
 0x264   :  { %7594 = vmatpush3.xpose.msk.msra.mxu1 %vm873_vm1, %v9175_v19  ;;  %7595 = vmatprep.mubr.msk.f32.mxu1 %vm8438_vm0, %v8436_v0 }
 0x265   :  { %7598 = vmatprep.subr.mxu1 %v8436_v0 }
 0x267   :  { %7596 = vmatmul.mubr.msk.f32.vlgmr.msra.gmra.mrb[14].mxu1 %vm873_vm1, %v9187_v21 }
 0x268   :  { %7599 = vmatpush3.xpose.msk.msra.mxu1 %vm873_vm1, %v9192_v22  ;;  %7600 = vmatprep.mubr.msk.f32.mxu1 %vm8438_vm0, %v8436_v0 }
 0x269   :  { %7603 = vmatprep.subr.mxu1 %v8436_v0 }
 0x26b   :  { %7601 = vmatmul.mubr.msk.f32.vlgmr.msra.gmra.mrb[16].mxu1 %vm873_vm1, %v9200_v23 }
 0x26c   :  { %7604 = vmatpush3.xpose.msk.msra.mxu1 %vm873_vm1, %v9123_v5  ;;  %7605 = vmatprep.mubr.msk.f32.mxu1 %vm8438_vm0, %v8436_v0 }
 0x26d   :  { %7613 = vmatprep.subr.mxu1 %v8436_v0 }
 0x26f   :  { %7606 = vmatmul.mubr.msk.f32.vlgmr.msra.gmra.mrb[18].mxu1 %vm873_vm1, %v9209_v24 }
 0x270   :  { %7614 = vmatpush3.msk.msra.mxu1 %vm1567_vm2, %v9139_v10  ;;  %7615 = vmatprep.mubr.msk.f32.mxu1 %vm8438_vm0, %v8436_v0 }
 0x271   :  { %7623 = vmatprep.subr.mxu1 %v8436_v0 }
 0x32a   :  { %v945_v25 = vpop.f32.mrb[6].mxu1 }
 0x32b   :  { %v7577_v26 = vpop.f32.mrb[7].mxu1  ;;  %v1475_v27 = vsel %vm1474_vm3, %v945_v25, -inf }
 0x32c   :  { %1476 = vmax.xlane.f32.xlu0 %v1475_v27 }
 0x32e   :  { %v1020_v28 = vpop.f32.mrb[8].mxu1 }
 0x32f   :  { %v7582_v29 = vpop.f32.mrb[9].mxu1  ;;  %v1478_v31 = vsel %vm1474_vm3, %v1020_v28, -inf }
 0x330   :  { %1479 = vmax.xlane.f32.xlu1 %v1478_v31 }
 0x332   :  { %v1095_v32 = vpop.f32.mrb[10].mxu1 }
 0x333   :  { %v9221_v52 = vpop.f32.mrb[6].mxu0  ;;  %v7587_v56 = vpop.f32.mrb[11].mxu1  ;;  %v1481_v35 = vsel %vm1474_vm3, %v1095_v32, -inf }
 0x334   :  { %v7612_v36 = vpop.f32.mrb[7].mxu0  ;;  %1482 = vmax.xlane.f32.xlu0 %v1481_v35  ;;  %v1496_v51 = vsel %vm1474_vm3, %v9221_v52, -inf }
 0x336   :  { %v1170_v38 = vpop.f32.mrb[12].mxu1 }
 0x337   :  { %v7592_v39 = vpop.f32.mrb[13].mxu1  ;;  %v1484_v40 = vsel %vm1474_vm3, %v1170_v38, -inf }
 0x338   :  { %1485 = vmax.xlane.f32.xlu1 %v1484_v40 }
 0x33a   :  { %v1245_v42 = vpop.f32.mrb[14].mxu1 }
 0x33b   :  { %v7597_v43 = vpop.f32.mrb[15].mxu1  ;;  %v1487_v44 = vsel %vm1474_vm3, %v1245_v42, -inf }
 0x33c   :  { %1488 = vmax.xlane.f32.xlu0 %v1487_v44 }
 0x33e   :  { %v1320_v46 = vpop.f32.mrb[16].mxu1 }
 0x33f   :  { %v7602_v30 = vpop.f32.mrb[17].mxu1  ;;  %v1490_v47 = vsel %vm1474_vm3, %v1320_v46, -inf }
 0x340   :  { %1491 = vmax.xlane.f32.xlu1 %v1490_v47 }
 0x342   :  { %v9227_v48 = vpop.f32.mrb[18].mxu1 }
 0x343   :  { %v7607_v49 = vpop.f32.mrb[19].mxu1  ;;  %v1493_v41 = vsel %vm1474_vm3, %v9227_v48, -inf }
 0x344   :  { %1497 = vmax.xlane.f32.xlu1 %v1496_v51 }
 0x352   :  { %2181 = vrot.lane.b32.xlu0 %v9233_v53, %s8439_s4 }
 0x355   :  { %2273 = vrot.lane.b32.xlu1 %v9239_v54, %s8439_s4 }
 0x359   :  { %2172 = vrot.lane.b32.xlu1 %v9245_v59, %s8439_s4 }
 0x35d   :  { %2264 = vrot.lane.b32.xlu1 %v9251_v45, %s8439_s4 }
 0x361   :  { %2457 = vrot.lane.b32.xlu1 %v9257_v2, %s8439_s4 }
 0x371   :  { %1494 = vmax.xlane.f32.xlu0 %v1493_v41 }
 0x387   :  { %2365 = vrot.lane.b32.xlu0 %v9265_v60, %s8439_s4 }
 0x3b9   :  { %v1477_v61 = vpop.xlane.xlu0 %1476 }
 0x3ba   :  { %v1499_v62 = vsub.f32 %v945_v25, %v1477_v61 }
 0x3bc   :  { %v1507_v63 = vmul.f32 1.442695, %v1499_v62 }
 0x3bd   :  { %v1480_v4 = vpop.xlane.xlu1 %1479 }
 0x3be   :  { %8218 = vpow2.f32 %v1507_v63  ;;  %v1500_v7 = vsub.f32 %v1020_v28, %v1480_v4  ;;  %v9300_v63 = vrot.slane %v9145_v13, %v9068_v12  ;;  %v9306_v4 = vrot.slane %v9167_v17, %v9068_v12 }
 0x3bf   :  { %v9321_v17 = vrot.slane %v9200_v23, %v9068_v12 }
 0x3c0   :  { %v1509_v11 = vmul.f32 1.442695, %v1500_v7 }
 0x3c1   :  { %v1483_v14 = vpop.xlane.xlu0 %1482 }
 0x3c2   :  { %8220 = vpow2.f32 %v1509_v11  ;;  %v1501_v18 = vsub.f32 %v1095_v32, %v1483_v14  ;;  %v9314_v11 = vrot.slane %v9192_v22, %v9068_v12  ;;  %v9333_v22 = vrot.slane %v9154_v15, %v9068_v12 }
 0x3c3   :  { %v9349_v15 = vrot.slane %v9187_v21, %v9068_v12 }
 0x3c4   :  { %v1511_v20 = vmul.f32 1.442695, %v1501_v18 }
 0x3c5   :  { %v1486_v27 = vpop.xlane.xlu1 %1485 }
 0x3c6   :  { %8222 = vpow2.f32 %v1511_v20  ;;  %v1502_v36 = vsub.f32 %v1170_v38, %v1486_v27  ;;  %v9327_v20 = vrot.slane %v9133_v9, %v9068_v12  ;;  %v9343_v9 = vrot.slane %v9175_v19, %v9068_v12 }
 0x3c7   :  { %v9355_v27 = vrot.slane %v9123_v5, %v9068_v12  ;;  %v9361_v19 = vrot.slane %v9209_v24, %v9068_v12  ;;  %v839_v24 = vcombine.high %v9129_v8, %v9129_v8 }
 0x3c8   :  { %v9269_v26 = vpop.eup %8218 }
 0x3c9   :  { %v1489_v6 = vpop.xlane.xlu0 %1488  ;;  %v1523_v29 = vsel %vm1474_vm3, %v9269_v26, 0.0 }
 0x3ca   :  { %v1503_v31 = vsub.f32 %v1245_v42, %v1489_v6  ;;  %1524 = vadd.xlane.f32.xlu0 %v1523_v29  ;;  %v1513_v42 = vmul.f32 1.442695, %v1502_v36 }
 0x3cc   :  { %v9273_v25 = vpop.eup %8220  ;;  %v1515_v56 = vmul.f32 1.442695, %v1503_v31 }
 0x3cd   :  { %v1492_v35 = vpop.xlane.xlu1 %1491  ;;  %v1526_v28 = vsel %vm1474_vm3, %v9273_v25, 0.0  ;;  %v9308_v7 = vpop.permute.xlu0 %2181 }
 0x3ce   :  { %8224 = vpow2.f32 %v1515_v56  ;;  %1527 = vadd.xlane.f32.xlu1 %v1526_v28  ;;  %v1504_v44 = vsub.f32 %v1320_v46, %v1492_v35 }
 0x3d0   :  { %v9277_v32 = vpop.eup %8222  ;;  %v1517_v49 = vmul.f32 1.442695, %v1504_v44 }
 0x3d1   :  { %v1498_v39 = vpop.xlane.xlu1 %1497  ;;  %v1529_v40 = vsel %vm1474_vm3, %v9277_v32, 0.0 }
 0x3d2   :  { %v1506_v43 = vsub.f32 %v9221_v52, %v1498_v39  ;;  %1530 = vadd.xlane.f32.xlu0 %v1529_v40  ;;  %v9379_v40 = vrot.slane %v839_v24, %v9068_v12 }
 0x3d4   :  { %v1521_v30 = vmul.f32 1.442695, %v1506_v43 }
 0x3d5   :  { %v9365_v6 = vpop.permute.xlu1 %2273 }
 0x3d6   :  { %8226 = vpow2.f32 %v1521_v30 }
 0x3d7   :  { %8228 = vpow2.f32 %v1513_v42 }
 0x3d8   :  { %v9282_v47 = vpop.eup %8224  ;;  %8230 = vpow2.f32 %v1517_v49 }
 0x3d9   :  { %v1535_v51 = vsel %vm1474_vm3, %v9282_v47, 0.0  ;;  %v9367_v21 = vpop.permute.xlu1 %2172 }
 0x3da   :  { %1536 = vadd.xlane.f32.xlu0 %v1535_v51 }
 0x3dd   :  { %v9369_v29 = vpop.permute.xlu1 %2264 }
 0x3e0   :  { %v9286_v38 = vpop.eup %8226 }
 0x3e1   :  { %v1544_v41 = vsel %vm1474_vm3, %v9286_v38, 0.0  ;;  %v9290_v52 = vpop.eup %8228  ;;  %v9373_v5 = vpop.permute.xlu1 %2457 }
 0x3e2   :  { %1545 = vadd.xlane.f32.xlu1 %v1544_v41  ;;  %v1532_v46 = vsel %vm1474_vm3, %v9290_v52, 0.0  ;;  %v9294_v61 = vpop.eup %8230 }
 0x3e3   :  { %v1538_v62 = vsel %vm1474_vm3, %v9294_v61, 0.0 }
 0x3e6   :  { %1533 = vadd.xlane.f32.xlu1 %v1532_v46 }
 0x3ea   :  { %1539 = vadd.xlane.f32.xlu1 %v1538_v62 }
 0x3f0   :  { %2356 = vrot.lane.b32.xlu0 %v9300_v63, %s8439_s4 }
 0x3fb   :  { %2448 = vrot.lane.b32.xlu1 %v9306_v4, %s8439_s4 }
 0x3fe   :  { %v1495_v14 = vpop.xlane.xlu0 %1494 }
 0x3ff   :  { %v1505_v13 = vsub.f32 %v9227_v48, %v1495_v14  ;;  %2641 = vrot.lane.b32.xlu1 %v9314_v11, %s8439_s4 }
 0x401   :  { %v1519_v18 = vmul.f32 1.442695, %v1505_v13 }
 0x402   :  { %v9371_v31 = vpop.permute.xlu0 %2365 }
 0x403   :  { %8232 = vpow2.f32 %v1519_v18  ;;  %2632 = vrot.lane.b32.xlu1 %v9321_v17, %s8439_s4 }
 0x407   :  { %2825 = vrot.lane.b32.xlu1 %v9327_v20, %s8439_s4 }
 0x40b   :  { %2816 = vrot.lane.b32.xlu1 %v9333_v22, %s8439_s4 }
 0x40d   :  { %v9337_v23 = vpop.eup %8232 }
 0x40e   :  { %v1541_v48 = vsel %vm1474_vm3, %v9337_v23, 0.0 }
 0x40f   :  { %1542 = vadd.xlane.f32.xlu0 %v1541_v48 }
 0x425   :  { %2549 = vrot.lane.b32.xlu0 %v9343_v9, %s8439_s4 }
 0x429   :  { %2540 = vrot.lane.b32.xlu0 %v9349_v15, %s8439_s4 }
 0x42d   :  { %2733 = vrot.lane.b32.xlu0 %v9355_v27, %s8439_s4 }
 0x431   :  { %2724 = vrot.lane.b32.xlu0 %v9361_v19, %s8439_s4 }
 0x457   :  { %v1525_v56 = vpop.xlane.xlu0 %1524 }
 0x458   :  { %8234 = vrcp.f32 %v1525_v56 }
 0x45b   :  { %v1528_v35 = vpop.xlane.xlu1 %1527 }
 0x45c   :  { %8236 = vrcp.f32 %v1528_v35 }
 0x45f   :  { %v1531_v28 = vpop.xlane.xlu0 %1530 }
 0x460   :  { %8238 = vrcp.f32 %v1531_v28 }
 0x462   :  { %v8235_v36 = vpop.eup %8234 }
 0x463   :  { %v1555_v39 = vmul.f32 %v8235_v36, %v9269_v26  ;;  %v9390_v26 = vcombine.high %v9379_v40, %v9379_v40 }
 0x465   :  { %7616 = vmatmul.mubr.msk.f32.vlgmr.msra.gmra.mrb[20].mxu1 %vm1563_vm4, %v1555_v39 }
 0x466   :  { %v8237_v43 = vpop.eup %8236  ;;  %7624 = vmatpush3.msk.msra.mxu1 %vm1567_vm2, %v9379_v40  ;;  %7625 = vmatprep.mubr.msk.f32.mxu1 %vm8438_vm0, %v8436_v0 }
 0x467   :  { %v1537_v42 = vpop.xlane.xlu0 %1536  ;;  %v1556_v8 = vmul.f32 %v8237_v43, %v9273_v25  ;;  %7633 = vmatprep.subr.mxu1 %v8436_v0  ;;  %v9401_v25 = vrot.slane %v9101_v50, %v9068_v12 }
 0x468   :  { %8240 = vrcp.f32 %v1537_v42 }
 0x469   :  { %7621 = vmatmul.mubr.msk.f32.vlgmr.msra.gmra.mrb[8].mxu0 %vm1563_vm4, %v1556_v8  ;;  %v9424_v13 = vcombine.high %v9401_v25, %v9401_v25 }
 0x46a   :  { %v8239_v44 = vpop.eup %8238  ;;  %7629 = vmatpush3.msk.msra.mxu0 %vm1567_vm2, %v9390_v26  ;;  %7630 = vmatprep.mubr.msk.f32.mxu0 %vm8438_vm0, %v8436_v0 }
 0x46b   :  { %v1557_v30 = vmul.f32 %v8239_v44, %v9277_v32  ;;  %7638 = vmatprep.subr.mxu0 %v8436_v0  ;;  %v856_v32 = vcombine.high %v9101_v50, %v9101_v50 }
 0x46d   :  { %7626 = vmatmul.mubr.msk.f32.vlgmr.msra.gmra.mrb[22].mxu1 %vm1563_vm4, %v1557_v30  ;;  %v9413_v62 = vrot.slane %v856_v32, %v9068_v12 }
 0x46e   :  { %7634 = vmatpush3.msk.msra.mxu1 %vm1567_vm2, %v9401_v25  ;;  %7635 = vmatprep.mubr.msk.f32.mxu1 %vm8438_vm0, %v8436_v0 }
 0x46f   :  { %v1546_v49 = vpop.xlane.xlu1 %1545  ;;  %7643 = vmatprep.subr.mxu1 %v8436_v0 }
 0x472   :  { %v8241_v51 = vpop.eup %8240 }
 0x473   :  { %v1534_v41 = vpop.xlane.xlu1 %1533  ;;  %v1559_v46 = vmul.f32 %v8241_v51, %v9282_v47 }
 0x474   :  { %8242 = vrcp.f32 %v1534_v41 }
 0x475   :  { %7636 = vmatmul.mubr.msk.f32.vlgmr.msra.gmra.mrb[24].mxu1 %vm1563_vm4, %v1559_v46 }
 0x476   :  { %7644 = vmatpush3.msk.msra.mxu1 %vm1567_vm2, %v9413_v62  ;;  %7645 = vmatprep.mubr.msk.f32.mxu1 %vm8438_vm0, %v8436_v0 }
 0x477   :  { %v1540_v14 = vpop.xlane.xlu1 %1539  ;;  %7653 = vmatprep.subr.mxu1 %v8436_v0 }
 0x478   :  { %8244 = vrcp.f32 %v1540_v14 }
 0x479   :  { %8246 = vrcp.f32 %v1546_v49 }
 0x47b   :  { %v2449_v48 = vpop.permute.xlu1 %2448 }
 0x47e   :  { %v8243_v50 = vpop.eup %8242 }
 0x47f   :  { %v1558_v47 = vmul.f32 %v8243_v50, %v9290_v52  ;;  %v9435_v52 = vcombine.high %v9413_v62, %v9413_v62  ;;  %v2642_v24 = vpop.permute.xlu1 %2641 }
 0x481   :  { %7631 = vmatmul.mubr.msk.f32.vlgmr.msra.gmra.mrb[10].mxu0 %vm1563_vm4, %v1558_v47 }
 0x482   :  { %v8245_v18 = vpop.eup %8244  ;;  %7639 = vmatpush3.msk.msra.mxu0 %vm1567_vm2, %v9424_v13  ;;  %7640 = vmatprep.mubr.msk.f32.mxu0 %vm8438_vm0, %v8436_v0 }
 0x483   :  { %7648 = vmatprep.subr.mxu0 %v8436_v0  ;;  %v1560_v56 = vmul.f32 %v8245_v18, %v9294_v61  ;;  %v8247_v35 = vpop.eup %8246  ;;  %v2633_v61 = vpop.permute.xlu1 %2632 }
 0x484   :  { %v1562_v28 = vmul.f32 %v8247_v35, %v9286_v38 }
 0x485   :  { %7641 = vmatmul.mubr.msk.f32.vlgmr.msra.gmra.mrb[12].mxu0 %vm1563_vm4, %v1560_v56 }
 0x486   :  { %7649 = vmatpush3.msk.msra.mxu0 %vm1567_vm2, %v9435_v52  ;;  %7650 = vmatprep.mubr.msk.f32.mxu0 %vm8438_vm0, %v8436_v0 }
 0x487   :  { %7658 = vmatprep.subr.mxu0 %v8436_v0  ;;  %v2826_v38 = vpop.permute.xlu1 %2825 }
 0x489   :  { %7651 = vmatmul.mubr.msk.f32.vlgmr.msra.gmra.mrb[14].mxu0 %vm1563_vm4, %v1562_v28 }
 0x48a   :  { %7660 = vmatprep.mubr.msk.f32.mxu0 %vm8438_vm0, %v8436_v0 }
 0x48d   :  { %7659 = vmatpush3.xpose.msk.msra.mxu0 %vm873_vm1, %v9365_v6  ;;  %v2357_v6 = vpop.permute.xlu0 %2356 }
 0x48e   :  { %7668 = vmatprep.subr.mxu0 %v8436_v0 }
 0x490   :  { %7661 = vmatmul.mubr.msk.f32.vlgmr.msra.gmra.mrb[16].mxu0 %vm873_vm1, %v9369_v29  ;;  %v2817_v29 = vpop.permute.xlu1 %2816 }
 0x491   :  { %7669 = vmatpush3.xpose.msk.msra.mxu0 %vm873_vm1, %v9373_v5  ;;  %7670 = vmatprep.mubr.msk.f32.mxu0 %vm8438_vm0, %v8436_v0 }
 0x492   :  { %7678 = vmatprep.subr.mxu0 %v8436_v0 }
 0x494   :  { %7671 = vmatmul.mubr.msk.f32.vlgmr.msra.gmra.mrb[18].mxu0 %vm873_vm1, %v2449_v48 }
 0x495   :  { %7679 = vmatpush3.xpose.msk.msra.mxu0 %vm873_vm1, %v2642_v24  ;;  %7680 = vmatprep.mubr.msk.f32.mxu0 %vm8438_vm0, %v8436_v0 }
 0x496   :  { %7688 = vmatprep.subr.mxu0 %v8436_v0 }
 0x498   :  { %7681 = vmatmul.mubr.msk.f32.vlgmr.msra.gmra.mrb[20].mxu0 %vm873_vm1, %v2633_v61 }
 0x499   :  { %7689 = vmatpush3.xpose.msk.msra.mxu0 %vm873_vm1, %v2826_v38  ;;  %7690 = vmatprep.mubr.msk.f32.mxu0 %vm8438_vm0, %v8436_v0 }
 0x49a   :  { %7698 = vmatprep.subr.mxu0 %v8436_v0 }
 0x49c   :  { %7691 = vmatmul.mubr.msk.f32.vlgmr.msra.gmra.mrb[22].mxu0 %vm873_vm1, %v2817_v29  ;;  %v1543_v5 = vpop.xlane.xlu0 %1542 }
 0x49d   :  { %8248 = vrcp.f32 %v1543_v5  ;;  %7700 = vmatprep.mubr.msk.f32.mxu0 %vm8438_vm0, %v8436_v0 }
 0x4a0   :  { %v2550_v39 = vpop.permute.xlu0 %2549 }
 0x4a4   :  { %v2541_v42 = vpop.permute.xlu0 %2540 }
 0x4a7   :  { %v8249_v36 = vpop.eup %8248 }
 0x4a8   :  { %v1561_v43 = vmul.f32 %v8249_v36, %v9337_v23 }
 0x4aa   :  { %7646 = vmatmul.mubr.msk.f32.vlgmr.msra.gmra.mrb[26].mxu1 %vm1563_vm4, %v1561_v43 }
 0x4ab   :  { %7654 = vmatpush3.xpose.msk.msra.mxu1 %vm873_vm1, %v9308_v7  ;;  %7655 = vmatprep.mubr.msk.f32.mxu1 %vm8438_vm0, %v8436_v0  ;;  %v2734_v7 = vpop.permute.xlu0 %2733 }
 0x4ac   :  { %7663 = vmatprep.subr.mxu1 %v8436_v0 }
 0x4ae   :  { %7656 = vmatmul.mubr.msk.f32.vlgmr.msra.gmra.mrb[28].mxu1 %vm873_vm1, %v9367_v21 }
 0x4af   :  { %7664 = vmatpush3.xpose.msk.msra.mxu1 %vm873_vm1, %v9371_v31  ;;  %7665 = vmatprep.mubr.msk.f32.mxu1 %vm8438_vm0, %v8436_v0  ;;  %v2725_v23 = vpop.permute.xlu0 %2724 }
 0x4b0   :  { %7673 = vmatprep.subr.mxu1 %v8436_v0 }
 0x4b2   :  { %7666 = vmatmul.mubr.msk.f32.vlgmr.msra.gmra.mrb[30].mxu1 %vm873_vm1, %v2357_v6 }
 0x4b3   :  { %7674 = vmatpush3.xpose.msk.msra.mxu1 %vm873_vm1, %v2550_v39  ;;  %7675 = vmatprep.mubr.msk.f32.mxu1 %vm8438_vm0, %v8436_v0 }
 0x4b4   :  { %7683 = vmatprep.subr.mxu1 %v8436_v0 }
 0x4b6   :  { %7676 = vmatmul.mubr.msk.f32.vlgmr.msra.gmra.mrb[32].mxu1 %vm873_vm1, %v2541_v42 }
 0x4b7   :  { %7684 = vmatpush3.xpose.msk.msra.mxu1 %vm873_vm1, %v2734_v7  ;;  %7685 = vmatprep.mubr.msk.f32.mxu1 %vm8438_vm0, %v8436_v0 }
 0x4b8   :  { %7693 = vmatprep.subr.mxu1 %v8436_v0 }
 0x4ba   :  { %7686 = vmatmul.mubr.msk.f32.vlgmr.msra.gmra.mrb[34].mxu1 %vm873_vm1, %v2725_v23 }
 0x4bb   :  { %7695 = vmatprep.mubr.msk.f32.mxu1 %vm8438_vm0, %v8436_v0 }
 0x538   :  { %v1636_v21 = vpop.f32.mrb[20].mxu1 }
 0x539   :  { %v7617_v31 = vpop.f32.mrb[21].mxu1 }
 0x53c   :  { %v1711_v8 = vpop.f32.mrb[8].mxu0 }
 0x53d   :  { %v3790_v44 = vcombine.low %v1636_v21, %v1711_v8  ;;  %v7622_v30 = vpop.f32.mrb[9].mxu0 }
 0x53f   :  { %v9498_v47 = vrot.slane %v3790_v44, %v9068_v12 }
 0x540   :  { %v1786_v49 = vpop.f32.mrb[22].mxu1 }
 0x541   :  { %v7627_v32 = vpop.f32.mrb[23].mxu1 }
 0x542   :  { %v9524_v32 = vrot.slane %v9159_v16, %v9068_v12 }
 0x548   :  { %v1936_v51 = vpop.f32.mrb[24].mxu1 }
 0x549   :  { %v7637_v41 = vpop.f32.mrb[25].mxu1 }
 0x554   :  { %v1861_v46 = vpop.f32.mrb[10].mxu0 }
 0x555   :  { %v3791_v14 = vcombine.low %v1786_v49, %v1861_v46  ;;  %v7632_v50 = vpop.f32.mrb[11].mxu0 }
 0x556   :  { %v9533_v50 = vrot.slane %v9379_v40, %v9068_v12 }
 0x557   :  { %v9501_v18 = vrot.slane %v3791_v14, %v9068_v12 }
 0x558   :  { %v2011_v48 = vpop.f32.mrb[12].mxu0 }
 0x559   :  { %v3806_v56 = vcombine.low %v9498_v47, %v9501_v18  ;;  %v3807_v35 = vcombine.low %v1936_v51, %v2011_v48  ;;  %v7642_v28 = vpop.f32.mrb[13].mxu0 }
 0x55a   :  { %v9540_v28 = vrot.slane %v9390_v26, %v9068_v12 }
 0x55b   :  { %v9517_v30 = vrot.slane %v3807_v35, %v9068_v12 }
 0x55c   :  { %v2161_v24 = vpop.f32.mrb[14].mxu0 }
 0x55d   :  { %v7652_v61 = vpop.f32.mrb[15].mxu0 }
 0x563   :  { %v2345_v38 = vpop.f32.mrb[16].mxu0 }
 0x564   :  { %v7662_v6 = vpop.f32.mrb[17].mxu0  ;;  %v2904_v29 = vsel %vm1474_vm3, %v2345_v38, -inf }
 0x565   :  { %2905 = vmax.xlane.f32.xlu1 %v2904_v29  ;;  %v9548_v6 = vrot.slane %v9424_v13, %v9068_v12  ;;  %v9562_v13 = vrot.slane %v9401_v25, %v9068_v12 }
 0x567   :  { %v9506_v5 = vpop.f32.mrb[18].mxu0 }
 0x568   :  { %v7672_v36 = vpop.f32.mrb[19].mxu0  ;;  %v2910_v40 = vsel %vm1474_vm3, %v9506_v5, -inf }
 0x56b   :  { %v9508_v39 = vpop.f32.mrb[20].mxu0 }
 0x56c   :  { %v7682_v43 = vpop.f32.mrb[21].mxu0  ;;  %v2916_v42 = vsel %vm1474_vm3, %v9508_v39, -inf }
 0x56d   :  { %2917 = vmax.xlane.f32.xlu1 %v2916_v42  ;;  %v9556_v42 = vrot.slane %v9139_v10, %v9068_v12 }
 0x56f   :  { %v9512_v7 = vpop.f32.mrb[22].mxu0 }
 0x570   :  { %v7692_v23 = vpop.f32.mrb[23].mxu0  ;;  %v2922_v21 = vsel %vm1474_vm3, %v9512_v7, -inf }
 0x571   :  { %2923 = vmax.xlane.f32.xlu1 %v2922_v21 }
 0x57d   :  { %v2086_v31 = vpop.f32.mrb[26].mxu1 }
 0x57e   :  { %v3808_v8 = vcombine.low %v2086_v31, %v2161_v24  ;;  %v7647_v44 = vpop.f32.mrb[27].mxu1 }
 0x580   :  { %v9520_v49 = vrot.slane %v3808_v8, %v9068_v12 }
 0x581   :  { %v2253_v51 = vpop.f32.mrb[28].mxu1 }
 0x582   :  { %v3823_v41 = vcombine.low %v9517_v30, %v9520_v49  ;;  %3080 = vrot.lane.b32.xlu1 %v9524_v32, %s8439_s4  ;;  %v7657_v46 = vpop.f32.mrb[29].mxu1  ;;  %v2901_v14 = vsel %vm1474_vm3, %v2253_v51, -inf }
 0x583   :  { %2902 = vmax.xlane.f32.xlu0 %v2901_v14 }
 0x585   :  { %v2437_v48 = vpop.f32.mrb[30].mxu1 }
 0x586   :  { %3164 = vrot.lane.b32.xlu1 %v9533_v50, %s8439_s4  ;;  %v7667_v16 = vpop.f32.mrb[31].mxu1  ;;  %v2907_v35 = vsel %vm1474_vm3, %v2437_v48, -inf }
 0x587   :  { %2908 = vmax.xlane.f32.xlu0 %v2907_v35 }
 0x589   :  { %v2621_v24 = vpop.f32.mrb[32].mxu1 }
 0x58a   :  { %3248 = vrot.lane.b32.xlu1 %v9540_v28, %s8439_s4  ;;  %v7677_v61 = vpop.f32.mrb[33].mxu1  ;;  %v2913_v26 = vsel %vm1474_vm3, %v2621_v24, -inf }
 0x58b   :  { %2911 = vmax.xlane.f32.xlu0 %v2910_v40 }
 0x58d   :  { %v2805_v29 = vpop.f32.mrb[34].mxu1 }
 0x58e   :  { %3416 = vrot.lane.b32.xlu1 %v9548_v6, %s8439_s4  ;;  %v7687_v36 = vpop.f32.mrb[35].mxu1  ;;  %v2919_v43 = vsel %vm1474_vm3, %v2805_v29, -inf }
 0x58f   :  { %2914 = vmax.xlane.f32.xlu0 %v2913_v26 }
 0x593   :  { %2920 = vmax.xlane.f32.xlu0 %v2919_v43 }
 0x5a9   :  { %2996 = vrot.lane.b32.xlu0 %v9556_v42, %s8439_s4 }
 0x5ad   :  { %3332 = vrot.lane.b32.xlu0 %v9562_v13, %s8439_s4 }
 0x5f2   :  { %v2906_v23 = vpop.xlane.xlu1 %2905 }
 0x5f3   :  { %v2926_v21 = vsub.f32 %v2345_v38, %v2906_v23 }
 0x5f5   :  { %v2935_v31 = vmul.f32 1.442695, %v2926_v21 }
 0x5f7   :  { %8250 = vpow2.f32 %v2935_v31 }
 0x5fa   :  { %v2918_v8 = vpop.xlane.xlu1 %2917 }
 0x5fb   :  { %v2930_v40 = vsub.f32 %v9508_v39, %v2918_v8 }
 0x5fd   :  { %v2943_v23 = vmul.f32 1.442695, %v2930_v40 }
 0x5fe   :  { %v2924_v44 = vpop.xlane.xlu1 %2923 }
 0x5ff   :  { %v2932_v21 = vsub.f32 %v9512_v7, %v2924_v44 }
 0x601   :  { %v9566_v46 = vpop.eup %8250 }
 0x602   :  { %v3081_v10 = vpop.permute.xlu1 %3080  ;;  %v2952_v14 = vsel %vm1474_vm3, %v9566_v46, 0.0 }
 0x603   :  { %2953 = vadd.xlane.f32.xlu1 %v2952_v14  ;;  %7699 = vmatpush3.msk.msra.mxu0 %vm1567_vm2, %v3081_v10 }
 0x604   :  { %7708 = vmatprep.subr.mxu0 %v8436_v0 }
 0x610   :  { %v2903_v25 = vpop.xlane.xlu0 %2902 }
 0x611   :  { %v2925_v16 = vsub.f32 %v2253_v51, %v2903_v25  ;;  %v2947_v51 = vmul.f32 1.442695, %v2932_v21  ;;  %v9607_v21 = vrot.slane %v9435_v52, %v9068_v12 }
 0x613   :  { %v2933_v35 = vmul.f32 1.442695, %v2925_v16 }
 0x614   :  { %v2909_v61 = vpop.xlane.xlu0 %2908 }
 0x615   :  { %8252 = vpow2.f32 %v2933_v35  ;;  %v2927_v38 = vsub.f32 %v2437_v48, %v2909_v61 }
 0x617   :  { %v2937_v36 = vmul.f32 1.442695, %v2927_v38 }
 0x618   :  { %v2912_v26 = vpop.xlane.xlu0 %2911 }
 0x619   :  { %8254 = vpow2.f32 %v2937_v36  ;;  %v2928_v43 = vsub.f32 %v9506_v5, %v2912_v26 }
 0x61b   :  { %v2939_v31 = vmul.f32 1.442695, %v2928_v43 }
 0x61c   :  { %v2915_v10 = vpop.xlane.xlu0 %2914 }
 0x61d   :  { %8256 = vpow2.f32 %v2939_v31  ;;  %v2929_v14 = vsub.f32 %v2621_v24, %v2915_v10  ;;  %v9613_v31 = vrot.slane %v9413_v62, %v9068_v12  ;;  %v3165_v62 = vpop.permute.xlu1 %3164 }
 0x61e   :  { %8258 = vpow2.f32 %v2943_v23 }
 0x61f   :  { %v9575_v37 = vpop.eup %8252  ;;  %v2941_v25 = vmul.f32 1.442695, %v2929_v14 }
 0x620   :  { %v2921_v48 = vpop.xlane.xlu0 %2920  ;;  %v2949_v39 = vsel %vm1474_vm3, %v9575_v37, 0.0 }
 0x621   :  { %8260 = vpow2.f32 %v2941_v25  ;;  %v2931_v8 = vsub.f32 %v2805_v29, %v2921_v48  ;;  %2950 = vadd.xlane.f32.xlu0 %v2949_v39  ;;  %v3249_v52 = vpop.permute.xlu1 %3248 }
 0x622   :  { %8262 = vpow2.f32 %v2947_v51 }
 0x623   :  { %v9579_v5 = vpop.eup %8254  ;;  %v2945_v7 = vmul.f32 1.442695, %v2931_v8 }
 0x624   :  { %v2997_v44 = vpop.permute.xlu0 %2996  ;;  %v2955_v24 = vsel %vm1474_vm3, %v9579_v5, 0.0 }
 0x625   :  { %8264 = vpow2.f32 %v2945_v7  ;;  %2956 = vadd.xlane.f32.xlu0 %v2955_v24  ;;  %7694 = vmatpush3.msk.msra.mxu1 %vm1567_vm2, %v2997_v44  ;;  %v3417_v10 = vpop.permute.xlu1 %3416 }
 0x626   :  { %7703 = vmatprep.subr.mxu1 %v8436_v0 }
 0x627   :  { %v9585_v16 = vpop.eup %8256 }
 0x628   :  { %v2958_v29 = vsel %vm1474_vm3, %v9585_v16, 0.0  ;;  %v9589_v35 = vpop.eup %8258  ;;  %v3333_v48 = vpop.permute.xlu0 %3332 }
 0x629   :  { %2959 = vadd.xlane.f32.xlu1 %v2958_v29  ;;  %v2964_v40 = vsel %vm1474_vm3, %v9589_v35, 0.0 }
 0x62b   :  { %v9591_v61 = vpop.eup %8260 }
 0x62c   :  { %v2961_v38 = vsel %vm1474_vm3, %v9591_v61, 0.0  ;;  %v9597_v36 = vpop.eup %8262 }
 0x62d   :  { %2962 = vadd.xlane.f32.xlu0 %v2961_v38  ;;  %2965 = vadd.xlane.f32.xlu1 %v2964_v40  ;;  %v2970_v23 = vsel %vm1474_vm3, %v9597_v36, 0.0 }
 0x62f   :  { %v9599_v26 = vpop.eup %8264 }
 0x630   :  { %v2967_v43 = vsel %vm1474_vm3, %v9599_v26, 0.0 }
 0x631   :  { %2968 = vadd.xlane.f32.xlu0 %v2967_v43  ;;  %2971 = vadd.xlane.f32.xlu1 %v2970_v23 }
 0x642   :  { %3584 = vrot.lane.b32.xlu1 %v9607_v21, %s8439_s4 }
 0x646   :  { %3903 = vrot.lane.b32.xlu1 %v9245_v59, %s8440_s30 }
 0x647   :  { %3500 = vrot.lane.b32.xlu0 %v9613_v31, %s8439_s4 }
 0x64a   :  { %3981 = vrot.lane.b32.xlu1 %v9251_v45, %s8440_s30 }
 0x64b   :  { %3905 = vrot.lane.b32.xlu0 %v9233_v53, %s8440_s30 }
 0x64e   :  { %4059 = vrot.lane.b32.xlu1 %v9300_v63, %s8440_s30 }
 0x64f   :  { %3983 = vrot.lane.b32.xlu0 %v9239_v54, %s8440_s30 }
 0x652   :  { %4137 = vrot.lane.b32.xlu1 %v9306_v4, %s8440_s30 }
 0x653   :  { %4061 = vrot.lane.b32.xlu0 %v9265_v60, %s8440_s30 }
 0x656   :  { %4295 = vrot.lane.b32.xlu1 %v9314_v11, %s8440_s30 }
 0x657   :  { %4139 = vrot.lane.b32.xlu0 %v9257_v2, %s8440_s30 }
 0x65a   :  { %4293 = vrot.lane.b32.xlu1 %v9321_v17, %s8440_s30 }
 0x65b   :  { %4217 = vrot.lane.b32.xlu0 %v9343_v9, %s8440_s30 }
 0x65e   :  { %4451 = vrot.lane.b32.xlu1 %v9327_v20, %s8440_s30 }
 0x65f   :  { %4215 = vrot.lane.b32.xlu0 %v9349_v15, %s8440_s30 }
 0x662   :  { %4449 = vrot.lane.b32.xlu1 %v9333_v22, %s8440_s30 }
 0x663   :  { %4373 = vrot.lane.b32.xlu0 %v9355_v27, %s8440_s30 }
 0x667   :  { %4371 = vrot.lane.b32.xlu0 %v9361_v19, %s8440_s30 }
 0x690   :  { %v2954_v14 = vpop.xlane.xlu1 %2953 }
 0x691   :  { %8266 = vrcp.f32 %v2954_v14 }
 0x69b   :  { %v8267_v51 = vpop.eup %8266 }
 0x69c   :  { %v2982_v25 = vmul.f32 %v8267_v51, %v9566_v46 }
 0x69e   :  { %7701 = vmatmul.mubr.msk.f32.vlgmr.msra.gmra.mrb[24].mxu0 %vm1563_vm4, %v2982_v25 }
 0x69f   :  { %7709 = vmatpush3.msk.msra.mxu0 %vm1567_vm2, %v3249_v52  ;;  %7710 = vmatprep.mubr.msk.f32.mxu0 %vm8438_vm0, %v8436_v0 }
 0x6a0   :  { %7718 = vmatprep.subr.mxu0 %v8436_v0 }
 0x6ae   :  { %v2951_v39 = vpop.xlane.xlu0 %2950 }
 0x6af   :  { %8268 = vrcp.f32 %v2951_v39 }
 0x6b2   :  { %v2957_v8 = vpop.xlane.xlu0 %2956 }
 0x6b3   :  { %8270 = vrcp.f32 %v2957_v8 }
 0x6b6   :  { %v2960_v7 = vpop.xlane.xlu1 %2959 }
 0x6b7   :  { %8272 = vrcp.f32 %v2960_v7 }
 0x6b9   :  { %v8269_v44 = vpop.eup %8268 }
 0x6ba   :  { %v2981_v24 = vmul.f32 %v8269_v44, %v9575_v37  ;;  %v2963_v46 = vpop.xlane.xlu0 %2962  ;;  %v2966_v29 = vpop.xlane.xlu1 %2965 }
 0x6bb   :  { %8274 = vrcp.f32 %v2963_v46 }
 0x6bc   :  { %8276 = vrcp.f32 %v2966_v29  ;;  %7696 = vmatmul.mubr.msk.f32.vlgmr.msra.gmra.mrb[36].mxu1 %vm1563_vm4, %v2981_v24 }
 0x6bd   :  { %v8271_v38 = vpop.eup %8270  ;;  %7704 = vmatpush3.msk.msra.mxu1 %vm1567_vm2, %v3165_v62  ;;  %7705 = vmatprep.mubr.msk.f32.mxu1 %vm8438_vm0, %v8436_v0 }
 0x6be   :  { %v2983_v40 = vmul.f32 %v8271_v38, %v9579_v5  ;;  %v2969_v43 = vpop.xlane.xlu0 %2968  ;;  %v2972_v23 = vpop.xlane.xlu1 %2971  ;;  %7713 = vmatprep.subr.mxu1 %v8436_v0 }
 0x6bf   :  { %8278 = vrcp.f32 %v2969_v43 }
 0x6c0   :  { %8280 = vrcp.f32 %v2972_v23  ;;  %7706 = vmatmul.mubr.msk.f32.vlgmr.msra.gmra.mrb[38].mxu1 %vm1563_vm4, %v2983_v40  ;;  %v736_v23 = vld [vmem:[#allocation2 + $0x20] sm:$0xff] }
 0x6c1   :  { %v8273_v37 = vpop.eup %8272  ;;  %7714 = vmatpush3.msk.msra.mxu1 %vm1567_vm2, %v3333_v48  ;;  %7715 = vmatprep.mubr.msk.f32.mxu1 %vm8438_vm0, %v8436_v0 }
 0x6c2   :  { %v2984_v62 = vmul.f32 %v8273_v37, %v9585_v16  ;;  %v3585_v52 = vpop.permute.xlu1 %3584  ;;  %7723 = vmatprep.subr.mxu1 %v8436_v0  ;;  %v3501_v5 = vpop.permute.xlu0 %3500  ;;  %v737_v37 = vld [vmem:[#allocation2 + $0x28] sm:$0xff] }
 0x6c4   :  { %7711 = vmatmul.mubr.msk.f32.vlgmr.msra.gmra.mrb[26].mxu0 %vm1563_vm4, %v2984_v62  ;;  %v8097_v62 = vpack.c.bf16 %v737_v37, %v736_v23 }
 0x6c5   :  { %v8275_v14 = vpop.eup %8274  ;;  %7719 = vmatpush3.msk.msra.mxu0 %vm1567_vm2, %v3417_v10  ;;  %7720 = vmatprep.mubr.msk.f32.mxu0 %vm8438_vm0, %v8436_v0 }
 0x6c6   :  { %v8277_v51 = vpop.eup %8276  ;;  %v2985_v25 = vmul.f32 %v8275_v14, %v9591_v61  ;;  %v3904_v48 = vpop.permute.xlu1 %3903  ;;  %7728 = vmatprep.subr.mxu0 %v8436_v0  ;;  %v732_v14 = vld [vmem:[#allocation2] sm:$0xff] }
 0x6c7   :  { %v2986_v16 = vmul.f32 %v8277_v51, %v9589_v35  ;;  %v3906_v7 = vpop.permute.xlu0 %3905 }
 0x6c8   :  { %7716 = vmatmul.mubr.msk.f32.vlgmr.msra.gmra.mrb[40].mxu1 %vm1563_vm4, %v2985_v25  ;;  %v733_v25 = vld [vmem:[#allocation2 + $0x8] sm:$0xff] }
 0x6c9   :  { %v8279_v39 = vpop.eup %8278  ;;  %7721 = vmatmul.mubr.msk.f32.vlgmr.msra.gmra.mrb[28].mxu0 %vm1563_vm4, %v2986_v16  ;;  %7724 = vmatpush3.msk.msra.mxu1 %vm1567_vm2, %v3501_v5  ;;  %v739_v5 = vld [vmem:[#allocation2 + $0x38] sm:$0xff] }
 0x6ca   :  { %v8281_v8 = vpop.eup %8280  ;;  %v2987_v10 = vmul.f32 %v8279_v39, %v9599_v26  ;;  %7729 = vmatpush3.msk.msra.mxu0 %vm1567_vm2, %v3585_v52  ;;  %v3982_v44 = vpop.permute.xlu1 %3981  ;;  %7725 = vmatprep.mubr.msk.f32.mxu1 %vm8438_vm0, %v8436_v0  ;;  %v738_v52 = vld [vmem:[#allocation2 + $0x30] sm:$0xff] }
 0x6cb   :  { %v2988_v61 = vmul.f32 %v8281_v8, %v9597_v36  ;;  %7730 = vmatprep.mubr.msk.f32.mxu0 %vm8438_vm0, %v8436_v0  ;;  %7755 = vmatprep.subr.mxu0 %v8436_v0  ;;  %v3984_v26 = vpop.permute.xlu0 %3983  ;;  %v8101_v51 = vpack.c.bf16 %v739_v5, %v738_v52 }
 0x6cc   :  { %7726 = vmatmul.mubr.msk.f32.vlgmr.msra.gmra.mrb[42].mxu1 %vm1563_vm4, %v2987_v10  ;;  %8098 = vmatprep.subr.bf16.mxu1 %v8097_v62 }
 0x6cd   :  { %7731 = vmatmul.mubr.msk.f32.vlgmr.msra.gmra.mrb[30].mxu0 %vm1563_vm4, %v2988_v61  ;;  %8100 = vmatpush3.bf16.msra.mxu1 %v8097_v62 }
 0x6ce   :  { %v4060_v35 = vpop.permute.xlu1 %4059  ;;  %7757 = vmatprep.mubr.msk.f32.mxu0 %vm8438_vm0, %v8436_v0  ;;  %8102 = vmatprep.subr.bf16.mxu1 %v8101_v51 }
 0x6cf   :  { %v4062_v36 = vpop.permute.xlu0 %4061 }
 0x6d1   :  { %7756 = vmatpush3.xpose.msk.msra.mxu0 %vm873_vm1, %v3906_v7  ;;  %8104 = vmatpush3.bf16.msra.mxu1 %v8101_v51 }
 0x6d2   :  { %7760 = vmatprep.subr.mxu0 %v8436_v0  ;;  %v4138_v24 = vpop.permute.xlu1 %4137 }
 0x6d3   :  { %v4140_v38 = vpop.permute.xlu0 %4139 }
 0x6d4   :  { %7758 = vmatmul.mubr.msk.f32.vlgmr.msra.gmra.mrb[32].mxu0 %vm873_vm1, %v3904_v48  ;;  %v8105_v48 = vpack.c.bf16 %v733_v25, %v732_v14  ;;  %v734_v25 = vld [vmem:[#allocation2 + $0x10] sm:$0xff] }
 0x6d5   :  { %7761 = vmatpush3.xpose.msk.msra.mxu0 %vm873_vm1, %v3984_v26  ;;  %7762 = vmatprep.mubr.msk.f32.mxu0 %vm8438_vm0, %v8436_v0 }
 0x6d6   :  { %7765 = vmatprep.subr.mxu0 %v8436_v0  ;;  %v4296_v46 = vpop.permute.xlu1 %4295  ;;  %8106 = vmatprep.subr.bf16.mxu1 %v8105_v48 }
 0x6d8   :  { %7763 = vmatmul.mubr.msk.f32.vlgmr.msra.gmra.mrb[34].mxu0 %vm873_vm1, %v3982_v44 }
 0x6d9   :  { %7766 = vmatpush3.xpose.msk.msra.mxu0 %vm873_vm1, %v4062_v36  ;;  %7767 = vmatprep.mubr.msk.f32.mxu0 %vm8438_vm0, %v8436_v0 }
 0x6da   :  { %7770 = vmatprep.subr.mxu0 %v8436_v0  ;;  %v4294_v29 = vpop.permute.xlu1 %4293 }
 0x6dc   :  { %7768 = vmatmul.mubr.msk.f32.vlgmr.msra.gmra.mrb[36].mxu0 %vm873_vm1, %v4060_v35 }
 0x6dd   :  { %7771 = vmatpush3.xpose.msk.msra.mxu0 %vm873_vm1, %v4140_v38  ;;  %7772 = vmatprep.mubr.msk.f32.mxu0 %vm8438_vm0, %v8436_v0 }
 0x6de   :  { %7780 = vmatprep.subr.mxu0 %v8436_v0  ;;  %v4452_v40 = vpop.permute.xlu1 %4451 }
 0x6e0   :  { %7773 = vmatmul.mubr.msk.f32.vlgmr.msra.gmra.mrb[38].mxu0 %vm873_vm1, %v4138_v24 }
 0x6e1   :  { %7781 = vmatpush3.xpose.msk.msra.mxu0 %vm873_vm1, %v4296_v46  ;;  %7782 = vmatprep.mubr.msk.f32.mxu0 %vm8438_vm0, %v8436_v0 }
 0x6e2   :  { %7790 = vmatprep.subr.mxu0 %v8436_v0  ;;  %v4450_v43 = vpop.permute.xlu1 %4449 }
 0x6e4   :  { %7783 = vmatmul.mubr.msk.f32.vlgmr.msra.gmra.mrb[40].mxu0 %vm873_vm1, %v4294_v29 }
 0x6e5   :  { %7791 = vmatpush3.xpose.msk.msra.mxu0 %vm873_vm1, %v4452_v40  ;;  %7792 = vmatprep.mubr.msk.f32.mxu0 %vm8438_vm0, %v8436_v0 }
 0x6e6   :  { %7800 = vmatprep.subr.mxu0 %v8436_v0 }
 0x6e8   :  { %7793 = vmatmul.mubr.msk.f32.vlgmr.msra.gmra.mrb[42].mxu0 %vm873_vm1, %v4450_v43 }
 0x6e9   :  { %7802 = vmatprep.mubr.msk.f32.mxu0 %vm8438_vm0, %v8436_v0 }
 0x771   :  { %v3153_v16 = vpop.f32.mrb[24].mxu0 }
 0x772   :  { %v7702_v39 = vpop.f32.mrb[25].mxu0 }
 0x78f   :  { %v3069_v8 = vpop.f32.mrb[36].mxu1 }
 0x790   :  { %v3669_v10 = vcombine.low %v3069_v8, %v3153_v16  ;;  %v7697_v7 = vpop.f32.mrb[37].mxu1  ;;  %v735_v16 = vld [vmem:[#allocation2 + $0x18] sm:$0xff] }
 0x791   :  { %v8109_v7 = vpack.c.bf16 %v735_v16, %v734_v25 }
 0x792   :  { %v3677_v36 = vrot.slane %v3669_v10, %v9068_v12 }
 0x793   :  { %v3237_v44 = vpop.f32.mrb[38].mxu1 }
 0x794   :  { %v7707_v61 = vpop.f32.mrb[39].mxu1 }
 0x797   :  { %v3321_v35 = vpop.f32.mrb[26].mxu0 }
 0x798   :  { %v3670_v26 = vcombine.low %v3237_v44, %v3321_v35  ;;  %v7712_v24 = vpop.f32.mrb[27].mxu0 }
 0x79a   :  { %v3684_v46 = vrot.slane %v3670_v26, %v9068_v12  ;;  %v4218_v26 = vpop.permute.xlu0 %4217 }
 0x79b   :  { %v3405_v29 = vpop.f32.mrb[40].mxu1 }
 0x79c   :  { %v3685_v38 = vcombine.low %v3677_v36, %v3684_v46  ;;  %v3489_v40 = vpop.f32.mrb[28].mxu0  ;;  %v7717_v43 = vpop.f32.mrb[41].mxu1 }
 0x79d   :  { %v3686_v23 = vcombine.low %v3405_v29, %v3489_v40  ;;  %v7722_v37 = vpop.f32.mrb[29].mxu0 }
 0x79e   :  { %7741 = vmatprep.mubr.msk.f32.mxu1 %vm873_vm1, %v3685_v38 }
 0x79f   :  { %v3573_v62 = vpop.f32.mrb[42].mxu1  ;;  %v3694_v39 = vrot.slane %v3686_v23, %v9068_v12 }
 0x7a0   :  { %v3657_v52 = vpop.f32.mrb[30].mxu0  ;;  %v7727_v5 = vpop.f32.mrb[43].mxu1 }
 0x7a1   :  { %v3687_v14 = vcombine.low %v3573_v62, %v3657_v52  ;;  %v7732_v51 = vpop.f32.mrb[31].mxu0 }
 0x7a3   :  { %v3701_v8 = vrot.slane %v3687_v14, %v9068_v12 }
 0x7a5   :  { %v3702_v10 = vcombine.low %v3694_v39, %v3701_v8 }
 0x7a7   :  { %v9725_v44 = vpop.f32.mrb[32].mxu0  ;;  %7742 = vmatmul.mubr.msk.f32.vlgmr.msra.gmra.mrb[44].mxu1 %vm873_vm1, %v3702_v10 }
 0x7a8   :  { %8108 = vmatpush3.bf16.msra.mxu1 %v8105_v48  ;;  %v7759_v61 = vpop.f32.mrb[33].mxu0  ;;  %7752 = vmatprep.mubr.msk.f32.mxu1 %vm873_vm1, %v3806_v56  ;;  %v4527_v35 = vsel %vm1474_vm3, %v9725_v44, -inf  ;;  %v4216_v48 = vpop.permute.xlu0 %4215 }
 0x7a9   :  { %4528 = vmax.xlane.f32.xlu0 %v4527_v35  ;;  %8110 = vmatprep.subr.bf16.mxu1 %v8109_v7 }
 0x7ab   :  { %v4055_v24 = vpop.f32.mrb[34].mxu0 }
 0x7ac   :  { %8112 = vmatpush3.bf16.msra.mxu1 %v8109_v7  ;;  %v7764_v36 = vpop.f32.mrb[35].mxu0  ;;  %v4530_v46 = vsel %vm1474_vm3, %v4055_v24, -inf  ;;  %v4374_v43 = vpop.permute.xlu0 %4373 }
 0x7ad   :  { %4531 = vmax.xlane.f32.xlu1 %v4530_v46  ;;  %7775 = vmatprep.subr.mxu1 %v8436_v0 }
 0x7af   :  { %v9736_v29 = vpop.f32.mrb[36].mxu0  ;;  %7753 = vmatmul.mubr.msk.f32.vlgmr.msra.gmra.mrb[44].mxu1 %vm873_vm1, %v3823_v41 }
 0x7b0   :  { %v7769_v47 = vpop.f32.mrb[37].mxu0  ;;  %v4533_v18 = vsel %vm1474_vm3, %v9736_v29, -inf  ;;  %7777 = vmatprep.mubr.msk.f32.mxu1 %vm8438_vm0, %v8436_v0  ;;  %v4372_v23 = vpop.permute.xlu0 %4371 }
 0x7b1   :  { %4534 = vmax.xlane.f32.xlu0 %v4533_v18 }
 0x7b3   :  { %v4211_v56 = vpop.f32.mrb[38].mxu0 }
 0x7b4   :  { %v7774_v38 = vpop.f32.mrb[39].mxu0  ;;  %v4536_v40 = vsel %vm1474_vm3, %v4211_v56, -inf }
 0x7b5   :  { %7776 = vmatpush3.xpose.msk.msra.mxu1 %vm873_vm1, %v4218_v26  ;;  %4537 = vmax.xlane.f32.xlu0 %v4536_v40 }
 0x7b6   :  { %7785 = vmatprep.subr.mxu1 %v8436_v0 }
 0x7b7   :  { %v4367_v30 = vpop.f32.mrb[40].mxu0 }
 0x7b8   :  { %7778 = vmatmul.mubr.msk.f32.vlgmr.msra.gmra.mrb[46].mxu1 %vm873_vm1, %v4216_v48  ;;  %v7784_v49 = vpop.f32.mrb[41].mxu0  ;;  %v4542_v41 = vsel %vm1474_vm3, %v4367_v30, -inf }
 0x7b9   :  { %7786 = vmatpush3.xpose.msk.msra.mxu1 %vm873_vm1, %v4374_v43  ;;  %4543 = vmax.xlane.f32.xlu1 %v4542_v41 }
 0x7ba   :  { %7787 = vmatprep.mubr.msk.f32.mxu1 %vm8438_vm0, %v8436_v0  ;;  %7795 = vmatprep.subr.mxu1 %v8436_v0 }
 0x7bb   :  { %v4523_v37 = vpop.f32.mrb[42].mxu0 }
 0x7bc   :  { %7788 = vmatmul.mubr.msk.f32.vlgmr.msra.gmra.mrb[48].mxu1 %vm873_vm1, %v4372_v23  ;;  %v7794_v62 = vpop.f32.mrb[43].mxu0  ;;  %v4548_v52 = vsel %vm1474_vm3, %v4523_v37, -inf }
 0x7bd   :  { %4549 = vmax.xlane.f32.xlu1 %v4548_v52  ;;  %7797 = vmatprep.mubr.msk.f32.mxu1 %vm8438_vm0, %v8436_v0 }
 0x836   :  { %v4529_v5 = vpop.xlane.xlu0 %4528 }
 0x837   :  { %v4551_v14 = vsub.f32 %v9725_v44, %v4529_v5 }
 0x83a   :  { %v4532_v51 = vpop.xlane.xlu1 %4531 }
 0x83b   :  { %v4552_v25 = vsub.f32 %v4055_v24, %v4532_v51 }
 0x83d   :  { %v4561_v16 = vmul.f32 1.442695, %v4552_v25 }
 0x83e   :  { %v4535_v39 = vpop.xlane.xlu0 %4534 }
 0x83f   :  { %8282 = vpow2.f32 %v4561_v16  ;;  %v4553_v8 = vsub.f32 %v9736_v29, %v4535_v39 }
 0x841   :  { %v4563_v49 = vmul.f32 1.442695, %v4553_v8 }
 0x842   :  { %v4538_v10 = vpop.xlane.xlu0 %4537 }
 0x843   :  { %v4554_v7 = vsub.f32 %v4211_v56, %v4538_v10 }
 0x845   :  { %v4565_v61 = vmul.f32 1.442695, %v4554_v7 }
 0x846   :  { %v4544_v35 = vpop.xlane.xlu1 %4543 }
 0x847   :  { %8284 = vpow2.f32 %v4565_v61  ;;  %v4556_v26 = vsub.f32 %v4367_v30, %v4544_v35  ;;  %v4559_v30 = vmul.f32 1.442695, %v4551_v14 }
 0x849   :  { %v8283_v36 = vpop.eup %8282  ;;  %v4569_v46 = vmul.f32 1.442695, %v4556_v26 }
 0x84a   :  { %v4550_v48 = vpop.xlane.xlu1 %4549  ;;  %v4578_v47 = vsel %vm1474_vm3, %v8283_v36, 0.0 }
 0x84b   :  { %8286 = vpow2.f32 %v4569_v46  ;;  %v4558_v44 = vsub.f32 %v4523_v37, %v4550_v48  ;;  %4579 = vadd.xlane.f32.xlu1 %v4578_v47 }
 0x84d   :  { %v4573_v24 = vmul.f32 1.442695, %v4558_v44 }
 0x84f   :  { %8288 = vpow2.f32 %v4573_v24 }
 0x850   :  { %8290 = vpow2.f32 %v4559_v30 }
 0x851   :  { %v8285_v18 = vpop.eup %8284  ;;  %8292 = vpow2.f32 %v4563_v49 }
 0x852   :  { %v4584_v38 = vsel %vm1474_vm3, %v8285_v18, 0.0 }
 0x853   :  { %4585 = vadd.xlane.f32.xlu1 %v4584_v38 }
 0x855   :  { %v9763_v29 = vpop.eup %8286 }
 0x856   :  { %v4590_v56 = vsel %vm1474_vm3, %v9763_v29, 0.0 }
 0x857   :  { %4591 = vadd.xlane.f32.xlu1 %v4590_v56 }
 0x859   :  { %v9767_v40 = vpop.eup %8288 }
 0x85a   :  { %v4596_v43 = vsel %vm1474_vm3, %v9767_v40, 0.0  ;;  %v9793_v52 = vpop.eup %8290 }
 0x85b   :  { %4597 = vadd.xlane.f32.xlu1 %v4596_v43 }
 0x86c   :  { %4692 = vrot.lane.b32.xlu1 %v9524_v32, %s8440_s30 }
 0x870   :  { %4769 = vrot.lane.b32.xlu1 %v9533_v50, %s8440_s30 }
 0x874   :  { %4846 = vrot.lane.b32.xlu1 %v9540_v28, %s8440_s30 }
 0x878   :  { %5000 = vrot.lane.b32.xlu1 %v9548_v6, %s8440_s30 }
 0x87c   :  { %5154 = vrot.lane.b32.xlu1 %v9607_v21, %s8440_s30 }
 0x880   :  { %5354 = vrot.lane.b32.xlu1 %v9245_v59, %s8441_s18 }
 0x884   :  { %5432 = vrot.lane.b32.xlu1 %v9251_v45, %s8441_s18 }
 0x888   :  { %5590 = vrot.lane.b32.xlu1 %v9257_v2, %s8441_s18  ;;  %v4575_v2 = vsel %vm1474_vm3, %v9793_v52, 0.0 }
 0x88b   :  { %v4289_v41 = vpop.f32.mrb[46].mxu1 }
 0x88c   :  { %v7779_v23 = vpop.f32.mrb[47].mxu1  ;;  %5588 = vrot.lane.b32.xlu1 %v9306_v4, %s8441_s18  ;;  %v4539_v37 = vsel %vm1474_vm3, %v4289_v41, -inf  ;;  %v9799_v4 = vpop.eup %8292 }
 0x88d   :  { %4540 = vmax.xlane.f32.xlu0 %v4539_v37 }
 0x88f   :  { %v4445_v62 = vpop.f32.mrb[48].mxu1 }
 0x890   :  { %v7789_v59 = vpop.f32.mrb[49].mxu1  ;;  %5746 = vrot.lane.b32.xlu1 %v9314_v11, %s8441_s18  ;;  %v4545_v45 = vsel %vm1474_vm3, %v4445_v62, -inf  ;;  %v4581_v11 = vsel %vm1474_vm3, %v9799_v4, 0.0 }
 0x891   :  { %4546 = vmax.xlane.f32.xlu0 %v4545_v45 }
 0x894   :  { %5744 = vrot.lane.b32.xlu1 %v9321_v17, %s8441_s18 }
 0x895   :  { %4576 = vadd.xlane.f32.xlu0 %v4575_v2 }
 0x898   :  { %5902 = vrot.lane.b32.xlu1 %v9327_v20, %s8441_s18 }
 0x899   :  { %4582 = vadd.xlane.f32.xlu0 %v4581_v11 }
 0x89c   :  { %5900 = vrot.lane.b32.xlu1 %v9333_v22, %s8441_s18 }
 0x8af   :  { %4615 = vrot.lane.b32.xlu0 %v9556_v42, %s8440_s30 }
 0x8b3   :  { %4923 = vrot.lane.b32.xlu0 %v9562_v13, %s8440_s30 }
 0x8d8   :  { %v4580_v17 = vpop.xlane.xlu1 %4579 }
 0x8d9   :  { %8294 = vrcp.f32 %v4580_v17  ;;  %v741_v17 = vld [vmem:[#allocation2 + $0x48] sm:$0xff] }
 0x8e0   :  { %v4586_v5 = vpop.xlane.xlu1 %4585 }
 0x8e1   :  { %8296 = vrcp.f32 %v4586_v5 }
 0x8e3   :  { %v8295_v20 = vpop.eup %8294 }
 0x8e4   :  { %v4592_v14 = vpop.xlane.xlu1 %4591  ;;  %v4608_v25 = vmul.f32 %v8295_v20, %v8283_v36 }
 0x8e5   :  { %8298 = vrcp.f32 %v4592_v14 }
 0x8e8   :  { %v4598_v51 = vpop.xlane.xlu1 %4597 }
 0x8e9   :  { %8300 = vrcp.f32 %v4598_v51 }
 0x8eb   :  { %v8297_v39 = vpop.eup %8296 }
 0x8ec   :  { %v4693_v16 = vpop.permute.xlu1 %4692  ;;  %v4610_v8 = vmul.f32 %v8297_v39, %v8285_v18 }
 0x8ed   :  { %7801 = vmatpush3.msk.msra.mxu0 %vm1567_vm2, %v4693_v16 }
 0x8ee   :  { %7803 = vmatmul.mubr.msk.f32.vlgmr.msra.gmra.mrb[44].mxu0 %vm1563_vm4, %v4608_v25  ;;  %7810 = vmatprep.subr.mxu0 %v8436_v0 }
 0x8ef   :  { %7812 = vmatprep.mubr.msk.f32.mxu0 %vm8438_vm0, %v8436_v0  ;;  %v8299_v7 = vpop.eup %8298 }
 0x8f0   :  { %v4770_v22 = vpop.permute.xlu1 %4769  ;;  %v4612_v61 = vmul.f32 %v8299_v7, %v9763_v29 }
 0x8f3   :  { %v8301_v26 = vpop.eup %8300 }
 0x8f4   :  { %v4847_v10 = vpop.permute.xlu1 %4846  ;;  %v4614_v36 = vmul.f32 %v8301_v26, %v9767_v40 }
 0x8f5   :  { %7811 = vmatpush3.msk.msra.mxu0 %vm1567_vm2, %v4847_v10 }
 0x8f6   :  { %7813 = vmatmul.mubr.msk.f32.vlgmr.msra.gmra.mrb[46].mxu0 %vm1563_vm4, %v4610_v8  ;;  %7820 = vmatprep.subr.mxu0 %v8436_v0 }
 0x8f7   :  { %7822 = vmatprep.mubr.msk.f32.mxu0 %vm8438_vm0, %v8436_v0 }
 0x8f8   :  { %v5001_v35 = vpop.permute.xlu1 %5000 }
 0x8f9   :  { %7821 = vmatpush3.msk.msra.mxu0 %vm1567_vm2, %v5001_v35 }
 0x8fa   :  { %7823 = vmatmul.mubr.msk.f32.vlgmr.msra.gmra.mrb[48].mxu0 %vm1563_vm4, %v4612_v61  ;;  %7830 = vmatprep.subr.mxu0 %v8436_v0 }
 0x8fb   :  { %7832 = vmatprep.mubr.msk.f32.mxu0 %vm8438_vm0, %v8436_v0 }
 0x8fc   :  { %v5155_v46 = vpop.permute.xlu1 %5154 }
 0x8fd   :  { %7831 = vmatpush3.msk.msra.mxu0 %vm1567_vm2, %v5155_v46 }
 0x8fe   :  { %7833 = vmatmul.mubr.msk.f32.vlgmr.msra.gmra.mrb[50].mxu0 %vm1563_vm4, %v4614_v36  ;;  %7846 = vmatprep.subr.mxu0 %v8436_v0 }
 0x8ff   :  { %7848 = vmatprep.mubr.msk.f32.mxu0 %vm8438_vm0, %v8436_v0 }
 0x91a   :  { %v4541_v48 = vpop.xlane.xlu0 %4540 }
 0x91b   :  { %v4555_v47 = vsub.f32 %v4289_v41, %v4541_v48 }
 0x91d   :  { %v4567_v44 = vmul.f32 1.442695, %v4555_v47 }
 0x91e   :  { %v4547_v24 = vpop.xlane.xlu0 %4546 }
 0x91f   :  { %8302 = vpow2.f32 %v4567_v44  ;;  %v4557_v18 = vsub.f32 %v4445_v62, %v4547_v24 }
 0x921   :  { %v4571_v38 = vmul.f32 1.442695, %v4557_v18 }
 0x922   :  { %v4577_v29 = vpop.xlane.xlu0 %4576 }
 0x923   :  { %8304 = vpow2.f32 %v4571_v38 }
 0x924   :  { %8306 = vrcp.f32 %v4577_v29 }
 0x926   :  { %v4583_v56 = vpop.xlane.xlu0 %4582 }
 0x927   :  { %8308 = vrcp.f32 %v4583_v56 }
 0x929   :  { %v8303_v40 = vpop.eup %8302 }
 0x92a   :  { %v4616_v43 = vpop.permute.xlu0 %4615  ;;  %v4587_v30 = vsel %vm1474_vm3, %v8303_v40, 0.0 }
 0x92b   :  { %4588 = vadd.xlane.f32.xlu0 %v4587_v30  ;;  %7796 = vmatpush3.msk.msra.mxu1 %vm1567_vm2, %v4616_v43  ;;  %v743_v43 = vld [vmem:[#allocation2 + $0x58] sm:$0xff] }
 0x92c   :  { %7805 = vmatprep.subr.mxu1 %v8436_v0 }
 0x92d   :  { %v8305_v49 = vpop.eup %8304 }
 0x92e   :  { %v8307_v41 = vpop.eup %8306  ;;  %v4593_v23 = vsel %vm1474_vm3, %v8305_v49, 0.0  ;;  %v4924_v45 = vpop.permute.xlu0 %4923 }
 0x92f   :  { %v4607_v37 = vmul.f32 %v8307_v41, %v9793_v52  ;;  %4594 = vadd.xlane.f32.xlu0 %v4593_v23 }
 0x931   :  { %v8309_v62 = vpop.eup %8308  ;;  %7798 = vmatmul.mubr.msk.f32.vlgmr.msra.gmra.mrb[50].mxu1 %vm1563_vm4, %v4607_v37 }
 0x932   :  { %v4609_v59 = vmul.f32 %v8309_v62, %v9799_v4  ;;  %7806 = vmatpush3.msk.msra.mxu1 %vm1567_vm2, %v4770_v22  ;;  %7807 = vmatprep.mubr.msk.f32.mxu1 %vm8438_vm0, %v8436_v0 }
 0x933   :  { %7815 = vmatprep.subr.mxu1 %v8436_v0 }
 0x935   :  { %7808 = vmatmul.mubr.msk.f32.vlgmr.msra.gmra.mrb[52].mxu1 %vm1563_vm4, %v4609_v59 }
 0x936   :  { %7816 = vmatpush3.msk.msra.mxu1 %vm1567_vm2, %v4924_v45  ;;  %7817 = vmatprep.mubr.msk.f32.mxu1 %vm8438_vm0, %v8436_v0 }
 0x937   :  { %7825 = vmatprep.subr.mxu1 %v8436_v0 }
 0x945   :  { %5077 = vrot.lane.b32.xlu0 %v9613_v31, %s8440_s30 }
 0x949   :  { %5356 = vrot.lane.b32.xlu0 %v9233_v53, %s8441_s18  ;;  %v5355_v53 = vpop.permute.xlu1 %5354 }
 0x94d   :  { %5434 = vrot.lane.b32.xlu0 %v9239_v54, %s8441_s18  ;;  %v5433_v54 = vpop.permute.xlu1 %5432 }
 0x951   :  { %5512 = vrot.lane.b32.xlu0 %v9265_v60, %s8441_s18  ;;  %v5591_v2 = vpop.permute.xlu1 %5590 }
 0x955   :  { %5510 = vrot.lane.b32.xlu0 %v9300_v63, %s8441_s18  ;;  %v5589_v63 = vpop.permute.xlu1 %5588 }
 0x959   :  { %5668 = vrot.lane.b32.xlu0 %v9343_v9, %s8441_s18  ;;  %v740_v9 = vld [vmem:[#allocation2 + $0x40] sm:$0xff]  ;;  %v5747_v20 = vpop.permute.xlu1 %5746 }
 0x95d   :  { %5666 = vrot.lane.b32.xlu0 %v9349_v15, %s8441_s18  ;;  %v5745_v8 = vpop.permute.xlu1 %5744 }
 0x961   :  { %5824 = vrot.lane.b32.xlu0 %v9355_v27, %s8441_s18  ;;  %v8113_v27 = vpack.c.bf16 %v741_v17, %v740_v9  ;;  %v5903_v61 = vpop.permute.xlu1 %5902 }
 0x965   :  { %5822 = vrot.lane.b32.xlu0 %v9361_v19, %s8441_s18  ;;  %v5901_v36 = vpop.permute.xlu1 %5900 }
 0x9b8   :  { %v4589_v52 = vpop.xlane.xlu0 %4588 }
 0x9b9   :  { %8310 = vrcp.f32 %v4589_v52 }
 0x9bc   :  { %v4595_v60 = vpop.xlane.xlu0 %4594 }
 0x9bd   :  { %8312 = vrcp.f32 %v4595_v60 }
 0x9c0   :  { %v5078_v4 = vpop.permute.xlu0 %5077 }
 0x9c1   :  { %v4765_v11 = vpop.f32.mrb[44].mxu0 }
 0x9c2   :  { %v7804_v5 = vpop.f32.mrb[45].mxu0 }
 0x9c3   :  { %v8311_v15 = vpop.eup %8310 }
 0x9c4   :  { %v4611_v14 = vmul.f32 %v8311_v15, %v8303_v40  ;;  %v5357_v51 = vpop.permute.xlu0 %5356  ;;  %v742_v40 = vld [vmem:[#allocation2 + $0x50] sm:$0xff] }
 0x9c5   :  { %7847 = vmatpush3.xpose.msk.msra.mxu0 %vm873_vm1, %v5357_v51  ;;  %v8117_v30 = vpack.c.bf16 %v743_v43, %v742_v40 }
 0x9c6   :  { %7818 = vmatmul.mubr.msk.f32.vlgmr.msra.gmra.mrb[54].mxu1 %vm1563_vm4, %v4611_v14  ;;  %7851 = vmatprep.subr.mxu0 %v8436_v0 }
 0x9c7   :  { %v8313_v19 = vpop.eup %8312  ;;  %7826 = vmatpush3.msk.msra.mxu1 %vm1567_vm2, %v5078_v4  ;;  %7827 = vmatprep.mubr.msk.f32.mxu1 %vm8438_vm0, %v8436_v0 }
 0x9c8   :  { %v4613_v25 = vmul.f32 %v8313_v19, %v8305_v49  ;;  %v5435_v16 = vpop.permute.xlu0 %5434  ;;  %7849 = vmatmul.mubr.msk.f32.vlgmr.msra.gmra.mrb[52].mxu0 %vm873_vm1, %v5355_v53  ;;  %8114 = vmatprep.subr.bf16.mxu1 %v8113_v27 }
 0x9c9   :  { %v4919_v22 = vpop.f32.mrb[46].mxu0  ;;  %7852 = vmatpush3.xpose.msk.msra.mxu0 %vm873_vm1, %v5435_v16  ;;  %7853 = vmatprep.mubr.msk.f32.mxu0 %vm8438_vm0, %v8436_v0 }
 0x9ca   :  { %v7814_v39 = vpop.f32.mrb[47].mxu0  ;;  %7828 = vmatmul.mubr.msk.f32.vlgmr.msra.gmra.mrb[56].mxu1 %vm1563_vm4, %v4613_v25  ;;  %7861 = vmatprep.subr.mxu0 %v8436_v0 }
 0x9cb   :  { %8116 = vmatpush3.bf16.msra.mxu1 %v8113_v27 }
 0x9cc   :  { %7854 = vmatmul.mubr.msk.f32.vlgmr.msra.gmra.mrb[54].mxu0 %vm873_vm1, %v5433_v54  ;;  %8118 = vmatprep.subr.bf16.mxu1 %v8117_v30  ;;  %v5513_v49 = vpop.permute.xlu0 %5512 }
 0x9cd   :  { %v5073_v10 = vpop.f32.mrb[48].mxu0  ;;  %7862 = vmatpush3.xpose.msk.msra.mxu0 %vm873_vm1, %v5591_v2  ;;  %7863 = vmatprep.mubr.msk.f32.mxu0 %vm8438_vm0, %v8436_v0 }
 0x9ce   :  { %v7824_v7 = vpop.f32.mrb[49].mxu0  ;;  %7871 = vmatprep.subr.mxu0 %v8436_v0 }
 0x9cf   :  { %8120 = vmatpush3.bf16.msra.mxu1 %v8117_v30 }
 0x9d0   :  { %7864 = vmatmul.mubr.msk.f32.vlgmr.msra.gmra.mrb[56].mxu0 %vm873_vm1, %v5589_v63  ;;  %7856 = vmatprep.subr.mxu1 %v8436_v0  ;;  %v5511_v41 = vpop.permute.xlu0 %5510 }
 0x9d1   :  { %v5227_v35 = vpop.f32.mrb[50].mxu0  ;;  %7872 = vmatpush3.xpose.msk.msra.mxu0 %vm873_vm1, %v5747_v20  ;;  %7873 = vmatprep.mubr.msk.f32.mxu0 %vm8438_vm0, %v8436_v0 }
 0x9d2   :  { %v7834_v26 = vpop.f32.mrb[51].mxu0  ;;  %7881 = vmatprep.subr.mxu0 %v8436_v0 }
 0x9d4   :  { %7874 = vmatmul.mubr.msk.f32.vlgmr.msra.gmra.mrb[58].mxu0 %vm873_vm1, %v5745_v8  ;;  %v5669_v54 = vpop.permute.xlu0 %5668 }
 0x9d5   :  { %7882 = vmatpush3.xpose.msk.msra.mxu0 %vm873_vm1, %v5903_v61  ;;  %7883 = vmatprep.mubr.msk.f32.mxu0 %vm8438_vm0, %v8436_v0 }
 0x9d6   :  { %7891 = vmatprep.subr.mxu0 %v8436_v0 }
 0x9d8   :  { %7884 = vmatmul.mubr.msk.f32.vlgmr.msra.gmra.mrb[60].mxu0 %vm873_vm1, %v5901_v36  ;;  %v5667_v15 = vpop.permute.xlu0 %5666 }
 0x9d9   :  { %7893 = vmatprep.mubr.msk.f32.mxu0 %vm8438_vm0, %v8436_v0 }
 0x9dc   :  { %v5825_v16 = vpop.permute.xlu0 %5824 }
 0xa04   :  { %v4688_v46 = vpop.f32.mrb[50].mxu1 }
 0xa05   :  { %v5239_v48 = vcombine.low %v4688_v46, %v4765_v11  ;;  %v7799_v47 = vpop.f32.mrb[51].mxu1 }
 0xa07   :  { %v5247_v38 = vrot.slane %v5239_v48, %v9068_v12 }
 0xa08   :  { %v4842_v44 = vpop.f32.mrb[52].mxu1 }
 0xa09   :  { %v5240_v24 = vcombine.low %v4842_v44, %v4919_v22  ;;  %v7809_v18 = vpop.f32.mrb[53].mxu1 }
 0xa0b   :  { %v5254_v29 = vrot.slane %v5240_v24, %v9068_v12 }
 0xa0d   :  { %v5255_v56 = vcombine.low %v5247_v38, %v5254_v29 }
 0xa0f   :  { %7843 = vmatprep.mubr.msk.f32.mxu1 %vm873_vm1, %v5255_v56 }
 0xa99   :  { %v4996_v23 = vpop.f32.mrb[54].mxu1 }
 0xa9a   :  { %v5256_v37 = vcombine.low %v4996_v23, %v5073_v10  ;;  %v7819_v62 = vpop.f32.mrb[55].mxu1  ;;  %v5823_v10 = vpop.permute.xlu0 %5822 }
 0xa9b   :  { %v9901_v59 = vpop.f32.mrb[52].mxu0 }
 0xa9c   :  { %v7850_v45 = vpop.f32.mrb[53].mxu0  ;;  %v5978_v53 = vsel %vm1474_vm3, %v9901_v59, -inf  ;;  %v5264_v4 = vrot.slane %v5256_v37, %v9068_v12 }
 0xa9d   :  { %v5150_v52 = vpop.f32.mrb[56].mxu1  ;;  %5979 = vmax.xlane.f32.xlu0 %v5978_v53 }
 0xa9e   :  { %v5257_v2 = vcombine.low %v5150_v52, %v5227_v35  ;;  %v7829_v60 = vpop.f32.mrb[57].mxu1 }
 0xa9f   :  { %v5506_v63 = vpop.f32.mrb[54].mxu0 }
 0xaa0   :  { %v5271_v11 = vrot.slane %v5257_v2, %v9068_v12  ;;  %v7855_v9 = vpop.f32.mrb[55].mxu0  ;;  %v5981_v17 = vsel %vm1474_vm3, %v5506_v63, -inf }
 0xaa1   :  { %5982 = vmax.xlane.f32.xlu1 %v5981_v17 }
 0xaa2   :  { %v5272_v5 = vcombine.low %v5264_v4, %v5271_v11 }
 0xaa3   :  { %v5662_v14 = vpop.f32.mrb[56].mxu0 }
 0xaa4   :  { %7844 = vmatmul.mubr.msk.f32.vlgmr.msra.gmra.mrb[44].mxu1 %vm873_vm1, %v5272_v5  ;;  %v7865_v51 = vpop.f32.mrb[57].mxu0  ;;  %v5987_v27 = vsel %vm1474_vm3, %v5662_v14, -inf }
 0xaa5   :  { %7857 = vmatpush3.xpose.msk.msra.mxu1 %vm873_vm1, %v5513_v49  ;;  %5988 = vmax.xlane.f32.xlu0 %v5987_v27 }
 0xaa6   :  { %7858 = vmatprep.mubr.msk.f32.mxu1 %vm8438_vm0, %v8436_v0  ;;  %7866 = vmatprep.subr.mxu1 %v8436_v0 }
 0xaa7   :  { %v5818_v20 = vpop.f32.mrb[58].mxu0 }
 0xaa8   :  { %7859 = vmatmul.mubr.msk.f32.vlgmr.msra.gmra.mrb[58].mxu1 %vm873_vm1, %v5511_v41  ;;  %v7875_v19 = vpop.f32.mrb[59].mxu0  ;;  %v5993_v25 = vsel %vm1474_vm3, %v5818_v20, -inf }
 0xaa9   :  { %7867 = vmatpush3.xpose.msk.msra.mxu1 %vm873_vm1, %v5669_v54  ;;  %5994 = vmax.xlane.f32.xlu1 %v5993_v25 }
 0xaaa   :  { %7868 = vmatprep.mubr.msk.f32.mxu1 %vm8438_vm0, %v8436_v0  ;;  %7876 = vmatprep.subr.mxu1 %v8436_v0 }
 0xaab   :  { %v5974_v22 = vpop.f32.mrb[60].mxu0 }
 0xaac   :  { %7869 = vmatmul.mubr.msk.f32.vlgmr.msra.gmra.mrb[60].mxu1 %vm873_vm1, %v5667_v15  ;;  %v7885_v39 = vpop.f32.mrb[61].mxu0  ;;  %v5999_v8 = vsel %vm1474_vm3, %v5974_v22, -inf }
 0xaad   :  { %7877 = vmatpush3.xpose.msk.msra.mxu1 %vm873_vm1, %v5825_v16  ;;  %6000 = vmax.xlane.f32.xlu1 %v5999_v8 }
 0xaae   :  { %7878 = vmatprep.mubr.msk.f32.mxu1 %vm8438_vm0, %v8436_v0  ;;  %7886 = vmatprep.subr.mxu1 %v8436_v0 }
 0xab0   :  { %7879 = vmatmul.mubr.msk.f32.vlgmr.msra.gmra.mrb[62].mxu1 %vm873_vm1, %v5823_v10 }
 0xab1   :  { %7888 = vmatprep.mubr.msk.f32.mxu1 %vm8438_vm0, %v8436_v0 }
 0xb2a   :  { %v5980_v7 = vpop.xlane.xlu0 %5979 }
 0xb2b   :  { %v6002_v61 = vsub.f32 %v9901_v59, %v5980_v7 }
 0xb2d   :  { %v6010_v59 = vmul.f32 1.442695, %v6002_v61 }
 0xb2e   :  { %v5983_v35 = vpop.xlane.xlu1 %5982 }
 0xb2f   :  { %v6003_v26 = vsub.f32 %v5506_v63, %v5983_v35 }
 0xb31   :  { %v6012_v36 = vmul.f32 1.442695, %v6003_v26 }
 0xb32   :  { %v5989_v46 = vpop.xlane.xlu0 %5988 }
 0xb33   :  { %8314 = vpow2.f32 %v6012_v36  ;;  %v6005_v48 = vsub.f32 %v5662_v14, %v5989_v46 }
 0xb35   :  { %v6016_v47 = vmul.f32 1.442695, %v6005_v48 }
 0xb36   :  { %v5995_v44 = vpop.xlane.xlu1 %5994 }
 0xb37   :  { %8316 = vpow2.f32 %v6016_v47  ;;  %v6007_v24 = vsub.f32 %v5818_v20, %v5995_v44 }
 0xb39   :  { %v6020_v18 = vmul.f32 1.442695, %v6007_v24 }
 0xb3a   :  { %v6001_v38 = vpop.xlane.xlu1 %6000 }
 0xb3b   :  { %8318 = vpow2.f32 %v6020_v18  ;;  %v6009_v29 = vsub.f32 %v5974_v22, %v6001_v38 }
 0xb3d   :  { %v8315_v56 = vpop.eup %8314  ;;  %v6024_v40 = vmul.f32 1.442695, %v6009_v29 }
 0xb3e   :  { %v6029_v43 = vsel %vm1474_vm3, %v8315_v56, 0.0 }
 0xb3f   :  { %8320 = vpow2.f32 %v6024_v40  ;;  %6030 = vadd.xlane.f32.xlu1 %v6029_v43 }
 0xb40   :  { %8322 = vpow2.f32 %v6010_v59 }
 0xb41   :  { %v8317_v30 = vpop.eup %8316 }
 0xb42   :  { %v6035_v49 = vsel %vm1474_vm3, %v8317_v30, 0.0 }
 0xb43   :  { %6036 = vadd.xlane.f32.xlu1 %v6035_v49 }
 0xb45   :  { %v8319_v41 = vpop.eup %8318 }
 0xb46   :  { %v6041_v23 = vsel %vm1474_vm3, %v8319_v41, 0.0 }
 0xb47   :  { %6042 = vadd.xlane.f32.xlu1 %v6041_v23 }
 0xb49   :  { %v8321_v37 = vpop.eup %8320 }
 0xb4a   :  { %v6047_v62 = vsel %vm1474_vm3, %v8321_v37, 0.0 }
 0xb4b   :  { %6048 = vadd.xlane.f32.xlu1 %v6047_v62 }
 0xb5c   :  { %6143 = vrot.lane.b32.xlu1 %v9524_v32, %s8441_s18 }
 0xb60   :  { %6220 = vrot.lane.b32.xlu1 %v9533_v50, %s8441_s18 }
 0xb64   :  { %6297 = vrot.lane.b32.xlu1 %v9540_v28, %s8441_s18 }
 0xb68   :  { %6451 = vrot.lane.b32.xlu1 %v9548_v6, %s8441_s18  ;;  %v9947_v6 = vpop.eup %8322 }
 0xb6c   :  { %6605 = vrot.lane.b32.xlu1 %v9607_v21, %s8441_s18  ;;  %v6026_v21 = vsel %vm1474_vm3, %v9947_v6, 0.0 }
 0xb7b   :  { %v5584_v45 = vpop.f32.mrb[58].mxu1 }
 0xb7c   :  { %v7860_v53 = vpop.f32.mrb[59].mxu1  ;;  %v5984_v54 = vsel %vm1474_vm3, %v5584_v45, -inf }
 0xb7d   :  { %5985 = vmax.xlane.f32.xlu0 %v5984_v54 }
 0xb7f   :  { %v5740_v32 = vpop.f32.mrb[60].mxu1 }
 0xb80   :  { %v7870_v52 = vpop.f32.mrb[61].mxu1  ;;  %v5990_v50 = vsel %vm1474_vm3, %v5740_v32, -inf }
 0xb81   :  { %5991 = vmax.xlane.f32.xlu0 %v5990_v50 }
 0xb83   :  { %v5896_v2 = vpop.f32.mrb[62].mxu1 }
 0xb84   :  { %v7880_v28 = vpop.f32.mrb[63].mxu1  ;;  %v5996_v60 = vsel %vm1474_vm3, %v5896_v2, -inf }
 0xb85   :  { %5997 = vmax.xlane.f32.xlu0 %v5996_v60 }
 0xb89   :  { %6027 = vadd.xlane.f32.xlu0 %v6026_v21 }
 0xb9f   :  { %6066 = vrot.lane.b32.xlu0 %v9556_v42, %s8441_s18 }
 0xba3   :  { %6374 = vrot.lane.b32.xlu0 %v9562_v13, %s8441_s18 }
 0xbcc   :  { %v6031_v63 = vpop.xlane.xlu1 %6030 }
 0xbcd   :  { %8324 = vrcp.f32 %v6031_v63 }
 0xbd0   :  { %v6037_v4 = vpop.xlane.xlu1 %6036 }
 0xbd1   :  { %8326 = vrcp.f32 %v6037_v4 }
 0xbd4   :  { %v6043_v11 = vpop.xlane.xlu1 %6042 }
 0xbd5   :  { %8328 = vrcp.f32 %v6043_v11 }
 0xbd7   :  { %v8325_v17 = vpop.eup %8324 }
 0xbd8   :  { %v6049_v9 = vpop.xlane.xlu1 %6048  ;;  %v6059_v5 = vmul.f32 %v8325_v17, %v8315_v56  ;;  %v745_v17 = vld [vmem:[#allocation2 + $0x68] sm:$0xff] }
 0xbd9   :  { %8330 = vrcp.f32 %v6049_v9  ;;  %v744_v9 = vld [vmem:[#allocation2 + $0x60] sm:$0xff] }
 0xbdb   :  { %v8327_v13 = vpop.eup %8326 }
 0xbdc   :  { %v6144_v15 = vpop.permute.xlu1 %6143  ;;  %v6061_v14 = vmul.f32 %v8327_v13, %v8317_v30 }
 0xbdd   :  { %7892 = vmatpush3.msk.msra.mxu0 %vm1567_vm2, %v6144_v15  ;;  %v746_v15 = vld [vmem:[#allocation2 + $0x70] sm:$0xff] }
 0xbde   :  { %7894 = vmatmul.mubr.msk.f32.vlgmr.msra.gmra.mrb[62].mxu0 %vm1563_vm4, %v6059_v5  ;;  %7901 = vmatprep.subr.mxu0 %v8436_v0  ;;  %v8121_v5 = vpack.c.bf16 %v745_v17, %v744_v9 }
 0xbdf   :  { %7903 = vmatprep.mubr.msk.f32.mxu0 %vm8438_vm0, %v8436_v0  ;;  %v8329_v27 = vpop.eup %8328 }
 0xbe0   :  { %v6221_v42 = vpop.permute.xlu1 %6220  ;;  %v6063_v20 = vmul.f32 %v8329_v27, %v8319_v41 }
 0xbe3   :  { %v8331_v25 = vpop.eup %8330 }
 0xbe4   :  { %v6298_v51 = vpop.permute.xlu1 %6297  ;;  %v6065_v16 = vmul.f32 %v8331_v25, %v8321_v37 }
 0xbe5   :  { %7902 = vmatpush3.msk.msra.mxu0 %vm1567_vm2, %v6298_v51 }
 0xbe6   :  { %7904 = vmatmul.mubr.msk.f32.vlgmr.msra.gmra.mrb[64].mxu0 %vm1563_vm4, %v6061_v14  ;;  %7911 = vmatprep.subr.mxu0 %v8436_v0 }
 0xbe7   :  { %7913 = vmatprep.mubr.msk.f32.mxu0 %vm8438_vm0, %v8436_v0 }
 0xbe8   :  { %v6452_v19 = vpop.permute.xlu1 %6451 }
 0xbe9   :  { %7912 = vmatpush3.msk.msra.mxu0 %vm1567_vm2, %v6452_v19 }
 0xbea   :  { %7914 = vmatmul.mubr.msk.f32.vlgmr.msra.gmra.mrb[66].mxu0 %vm1563_vm4, %v6063_v20  ;;  %7921 = vmatprep.subr.mxu0 %v8436_v0 }
 0xbeb   :  { %7923 = vmatprep.mubr.msk.f32.mxu0 %vm8438_vm0, %v8436_v0 }
 0xbec   :  { %v6606_v22 = vpop.permute.xlu1 %6605 }
 0xbed   :  { %7922 = vmatpush3.msk.msra.mxu0 %vm1567_vm2, %v6606_v22 }
 0xbee   :  { %7924 = vmatmul.mubr.msk.f32.vlgmr.msra.gmra.mrb[68].mxu0 %vm1563_vm4, %v6065_v16 }
 0xbef   :  { %7002 = vmatprep.mubr.f32.mxu0 %v8436_v0 }
 0xc0a   :  { %v5986_v39 = vpop.xlane.xlu0 %5985 }
 0xc0b   :  { %v6004_v8 = vsub.f32 %v5584_v45, %v5986_v39 }
 0xc0d   :  { %v6014_v10 = vmul.f32 1.442695, %v6004_v8 }
 0xc0e   :  { %v5992_v7 = vpop.xlane.xlu0 %5991 }
 0xc0f   :  { %8332 = vpow2.f32 %v6014_v10  ;;  %v6006_v61 = vsub.f32 %v5740_v32, %v5992_v7 }
 0xc11   :  { %v6018_v35 = vmul.f32 1.442695, %v6006_v61 }
 0xc12   :  { %v5998_v26 = vpop.xlane.xlu0 %5997 }
 0xc13   :  { %8334 = vpow2.f32 %v6018_v35  ;;  %v6008_v36 = vsub.f32 %v5896_v2, %v5998_v26 }
 0xc15   :  { %v6022_v46 = vmul.f32 1.442695, %v6008_v36  ;;  %v10005_v36 = vld [vmem:[%s10179_s12] sm:$0x3f] }
 0xc16   :  { %v6028_v48 = vpop.xlane.xlu0 %6027 }
 0xc17   :  { %8336 = vpow2.f32 %v6022_v46  ;;  %v10191_v46 = vsub.s32 2, %v9054_v1 }
 0xc18   :  { %8338 = vrcp.f32 %v6028_v48 }
 0xc19   :  { %v8333_v47 = vpop.eup %8332  ;;  %v216_v48 = vrot.slane %v10005_v36, %v10191_v46  ;;  %v6915_v46 = vld [vmem:[%s10180_s13 + $0xa8] sm:$0xff] }
 0xc1a   :  { %v6067_v44 = vpop.permute.xlu0 %6066  ;;  %v6032_v24 = vsel %vm1474_vm3, %v8333_v47, 0.0 }
 0xc1b   :  { %6033 = vadd.xlane.f32.xlu0 %v6032_v24  ;;  %7887 = vmatpush3.msk.msra.mxu1 %vm1567_vm2, %v6067_v44 }
 0xc1c   :  { %7896 = vmatprep.subr.mxu1 %v8436_v0 }
 0xc1d   :  { %v8335_v18 = vpop.eup %8334 }
 0xc1e   :  { %v6038_v38 = vsel %vm1474_vm3, %v8335_v18, 0.0  ;;  %v6375_v30 = vpop.permute.xlu0 %6374 }
 0xc1f   :  { %6039 = vadd.xlane.f32.xlu0 %v6038_v38 }
 0xc21   :  { %v8337_v29 = vpop.eup %8336 }
 0xc22   :  { %v8339_v56 = vpop.eup %8338  ;;  %v6044_v40 = vsel %vm1474_vm3, %v8337_v29, 0.0 }
 0xc23   :  { %v6058_v43 = vmul.f32 %v8339_v56, %v9947_v6  ;;  %6045 = vadd.xlane.f32.xlu0 %v6044_v40 }
 0xc25   :  { %7889 = vmatmul.mubr.msk.f32.vlgmr.msra.gmra.mrb[64].mxu1 %vm1563_vm4, %v6058_v43 }
 0xc26   :  { %7897 = vmatpush3.msk.msra.mxu1 %vm1567_vm2, %v6221_v42  ;;  %7898 = vmatprep.mubr.msk.f32.mxu1 %vm8438_vm0, %v8436_v0  ;;  %v747_v42 = vld [vmem:[#allocation2 + $0x78] sm:$0xff] }
 0xc27   :  { %7906 = vmatprep.subr.mxu1 %v8436_v0  ;;  %v8125_v13 = vpack.c.bf16 %v747_v42, %v746_v15  ;;  %v6903_v15 = vld [vmem:[%s10180_s13 + $0x48] sm:$0xff]  ;;  %v6905_v42 = vld [vmem:[%s10180_s13 + $0x58] sm:$0xff] }
 0xc39   :  { %6528 = vrot.lane.b32.xlu0 %v9613_v31, %s8441_s18 }
 0xca8   :  { %v6034_v49 = vpop.xlane.xlu0 %6033 }
 0xca9   :  { %8340 = vrcp.f32 %v6034_v49 }
 0xcac   :  { %v6040_v41 = vpop.xlane.xlu0 %6039 }
 0xcad   :  { %8342 = vrcp.f32 %v6040_v41  ;;  %v8359_v41 = vld [vmem:[%s10189_s15 + $0x8] sm:$0xff] }
 0xcb0   :  { %v6046_v23 = vpop.xlane.xlu0 %6045 }
 0xcb1   :  { %8344 = vrcp.f32 %v6046_v23  ;;  %v6216_v37 = vpop.f32.mrb[62].mxu0 }
 0xcb2   :  { %v7895_v62 = vpop.f32.mrb[63].mxu0 }
 0xcb3   :  { %v8341_v59 = vpop.eup %8340  ;;  %v6895_v62 = vld [vmem:[%s10180_s13 + $0x8] sm:$0xff] }
 0xcb4   :  { %v6060_v45 = vmul.f32 %v8341_v59, %v8333_v47  ;;  %v6529_v32 = vpop.permute.xlu0 %6528  ;;  %v373_v47 = vadd.f32 %v9050_v55, %v216_v48  ;;  %v8360_v55 = vld [vmem:[%s10189_s15] sm:$0xff]  ;;  %v6897_v59 = vld [vmem:[%s10180_s13 + $0x18] sm:$0xff] }
 0xcb5   :  { %v6917_v48 = vld [vmem:[%s10180_s13 + $0xb8] sm:$0xff] }
 0xcb6   :  { %7899 = vmatmul.mubr.msk.f32.vlgmr.msra.gmra.mrb[66].mxu1 %vm1563_vm4, %v6060_v45  ;;  %v6814_v44 = vcombine.low %v373_v47, %v373_v47  ;;  %v6894_v45 = vld [vmem:[%s10180_s13] sm:$0xff] }
 0xcb7   :  { %v8343_v53 = vpop.eup %8342  ;;  %7907 = vmatpush3.msk.msra.mxu1 %vm1567_vm2, %v6375_v30  ;;  %7908 = vmatprep.mubr.msk.f32.mxu1 %vm8438_vm0, %v8436_v0  ;;  %v6914_v47 = vld [vmem:[%s10180_s13 + $0xa0] sm:$0xff] }
 0xcb8   :  { %v6062_v31 = vmul.f32 %v8343_v53, %v8335_v18  ;;  %7916 = vmatprep.subr.mxu1 %v8436_v0  ;;  %v6821_v24 = vrot.slane %v6814_v44, %v9068_v12  ;;  %v7326_v18 = vld [vmem:[%s10173_s6] ss:$0 sm:$0xff]  ;;  %v8129_v53 = vpack.c.bf16 %v6897_v59, %v6895_v62  ;;  %v8149_v44 = vpack.c.bf16 %v6917_v48, %v6915_v46  ;;  %v6924_v59 = vld [vmem:[%s10180_s13 + $0xf0] sm:$0xff] }
 0xcb9   :  { %v6370_v54 = vpop.f32.mrb[64].mxu0  ;;  %v6922_v62 = vld [vmem:[%s10180_s13 + $0xe0] sm:$0xff] }
 0xcba   :  { %v7905_v52 = vpop.f32.mrb[65].mxu0  ;;  %7909 = vmatmul.mubr.msk.f32.vlgmr.msra.gmra.mrb[68].mxu1 %vm1563_vm4, %v6062_v31  ;;  %v6896_v31 = vld [vmem:[%s10180_s13 + $0x10] sm:$0xff]  ;;  %8130 = vmatprep.subr.bf16.mxu0 %v8129_v53  ;;  %v7067_v53 = vld [vmem:[#allocation4 + $0x80] sm:$0xff] }
 0xcbb   :  { %v8345_v50 = vpop.eup %8344  ;;  %7917 = vmatpush3.msk.msra.mxu1 %vm1567_vm2, %v6529_v32  ;;  %7918 = vmatprep.mubr.msk.f32.mxu1 %vm8438_vm0, %v8436_v0  ;;  %v6901_v32 = vld [vmem:[%s10180_s13 + $0x38] sm:$0xff]  ;;  %v8131_v52 = vpack.c.bf16 %v6896_v31, %v6894_v45  ;;  %v8159_v45 = vpack.c.bf16 %v6924_v59, %v6922_v62  ;;  %v7068_v31 = vld [vmem:[#allocation4 + $0x88] sm:$0xff]  ;;  %v7057_v62 = vld [vmem:[#allocation4 + $0x30] sm:$0xff] }
 0xcbc   :  { %v6064_v2 = vmul.f32 %v8345_v50, %v8337_v29  ;;  %8122 = vmatprep.subr.bf16.mxu1 %v8121_v5  ;;  %v6822_v29 = vcombine.low %v6821_v24, %v6821_v24  ;;  %v6916_v24 = vld [vmem:[%s10180_s13 + $0xb0] sm:$0xff]  ;;  %v7058_v59 = vld [vmem:[#allocation4 + $0x38] sm:$0xff] }
 0xcbd   :  { %v6524_v28 = vpop.f32.mrb[66].mxu0  ;;  %8132 = vmatpush1.bf16.msra.mxu0 %v8131_v52  ;;  %v7052_v52 = vld [vmem:[#allocation4 + $0x8] sm:$0xff] }
 0xcbe   :  { %v7915_v60 = vpop.f32.mrb[67].mxu0  ;;  %7919 = vmatmul.mubr.msk.f32.vlgmr.msra.gmra.mrb[70].mxu1 %vm1563_vm4, %v6064_v2  ;;  %v6898_v2 = vld [vmem:[%s10180_s13 + $0x20] sm:$0xff] }
 0xcbf   :  { %8124 = vmatpush3.bf16.msra.mxu1 %v8121_v5 }
 0xcc0   :  { %8126 = vmatprep.subr.bf16.mxu1 %v8125_v13 }
 0xcc1   :  { %v6678_v6 = vpop.f32.mrb[68].mxu0 }
 0xcc2   :  { %v7925_v21 = vpop.f32.mrb[69].mxu0 }
 0xcc3   :  { %8128 = vmatpush3.bf16.msra.mxu1 %v8125_v13  ;;  %v8137_v13 = vpack.c.bf16 %v6905_v42, %v6903_v15 }
 0xcf8   :  { %v6139_v63 = vpop.f32.mrb[64].mxu1 }
 0xcf9   :  { %v6690_v4 = vcombine.low %v6139_v63, %v6216_v37  ;;  %v7890_v11 = vpop.f32.mrb[65].mxu1 }
 0xcfb   :  { %v6698_v20 = vrot.slane %v6690_v4, %v9068_v12 }
 0xd89   :  { %v6293_v14 = vpop.f32.mrb[66].mxu1 }
 0xd8a   :  { %v6691_v51 = vcombine.low %v6293_v14, %v6370_v54  ;;  %v7900_v27 = vpop.f32.mrb[67].mxu1  ;;  %v6899_v54 = vld [vmem:[%s10180_s13 + $0x28] sm:$0xff]  ;;  %v6902_v14 = vld [vmem:[%s10180_s13 + $0x40] sm:$0xff] }
 0xd8b   :  { %v8133_v50 = vpack.c.bf16 %v6901_v32, %v6899_v54  ;;  %v7051_v54 = vld [vmem:[#allocation4] sm:$0xff]  ;;  %v8161_v32 = vpack.c.bf16 %v7068_v31, %v7067_v53  ;;  %v7076_v53 = vld [vmem:[#allocation4 + $0xc8] sm:$0xff]  ;;  %v8175_v31 = vpack.c.bf16 %v7058_v59, %v7057_v62 }
 0xd8c   :  { %v6705_v19 = vrot.slane %v6691_v51, %v9068_v12  ;;  %v6904_v51 = vld [vmem:[%s10180_s13 + $0x50] sm:$0xff] }
 0xd8d   :  { %v6447_v25 = vpop.f32.mrb[68].mxu1  ;;  %8134 = vmatprep.subr.bf16.mxu0 %v8133_v50  ;;  %v8139_v27 = vpack.c.bf16 %v6904_v51, %v6902_v14  ;;  %v8163_v50 = vpack.c.bf16 %v7052_v52, %v7051_v54  ;;  %8162 = vmatprep.subr.bf16.mxu1 %v8161_v32  ;;  %v7059_v32 = vld [vmem:[#allocation4 + $0x40] sm:$0xff]  ;;  %v7060_v52 = vld [vmem:[#allocation4 + $0x48] sm:$0xff] }
 0xd8e   :  { %v6706_v16 = vcombine.low %v6698_v20, %v6705_v19  ;;  %v6707_v22 = vcombine.low %v6447_v25, %v6524_v28  ;;  %v7910_v39 = vpop.f32.mrb[69].mxu1  ;;  %v6900_v28 = vld [vmem:[%s10180_s13 + $0x30] sm:$0xff]  ;;  %v6907_v20 = vld [vmem:[%s10180_s13 + $0x68] sm:$0xff]  ;;  %v6909_v19 = vld [vmem:[%s10180_s13 + $0x78] sm:$0xff] }
 0xd8f   :  { %v8135_v60 = vpack.c.bf16 %v6900_v28, %v6898_v2  ;;  %v8141_v25 = vpack.c.bf16 %v6909_v19, %v6907_v20  ;;  %v219_v2 = vsub.s32 3, %v9054_v1  ;;  %v7327_v20 = vld [vmem:[%s10176_s9] ss:$0 sm:$0xff] }
 0xd90   :  { %7934 = vmatprep.mubr.msk.f32.mxu1 %vm873_vm1, %v6706_v16  ;;  %v6715_v61 = vrot.slane %v6707_v22, %v9068_v12  ;;  %v6906_v16 = vld [vmem:[%s10180_s13 + $0x60] sm:$0xff]  ;;  %v6908_v22 = vld [vmem:[%s10180_s13 + $0x70] sm:$0xff] }
 0xd91   :  { %v6601_v8 = vpop.f32.mrb[70].mxu1  ;;  %8136 = vmatpush1.bf16.msra.mxu0 %v8135_v60  ;;  %v8143_v39 = vpack.c.bf16 %v6908_v22, %v6906_v16  ;;  %v7328_v16 = vld [vmem:[%s10177_s10] ss:$0 sm:$0xff] }
 0xd92   :  { %v6708_v10 = vcombine.low %v6601_v8, %v6678_v6  ;;  %v7920_v7 = vpop.f32.mrb[71].mxu1  ;;  %8138 = vmatprep.subr.bf16.mxu0 %v8137_v13  ;;  %v6911_v8 = vld [vmem:[%s10180_s13 + $0x88] sm:$0xff] }
 0xd94   :  { %v6722_v35 = vrot.slane %v6708_v10, %v9068_v12  ;;  %v6913_v10 = vld [vmem:[%s10180_s13 + $0x98] sm:$0xff] }
 0xd95   :  { %8140 = vmatpush1.bf16.msra.mxu0 %v8139_v27  ;;  %v8145_v7 = vpack.c.bf16 %v6913_v10, %v6911_v8 }
 0xd96   :  { %v6723_v26 = vcombine.low %v6715_v61, %v6722_v35  ;;  %8142 = vmatprep.subr.bf16.mxu0 %v8141_v25  ;;  %v6910_v61 = vld [vmem:[%s10180_s13 + $0x80] sm:$0xff]  ;;  %v6912_v35 = vld [vmem:[%s10180_s13 + $0x90] sm:$0xff] }
 0xd98   :  { %7935 = vmatmul.mubr.msk.f32.vlgmr.msra.gmra.mrb[44].mxu1 %vm873_vm1, %v6723_v26  ;;  %v8147_v26 = vpack.c.bf16 %v6912_v35, %v6910_v61 }
 0xd99   :  { %8144 = vmatpush1.bf16.msra.mxu0 %v8143_v39  ;;  %8164 = vmatpush3.bf16.msra.mxu1 %v8163_v50  ;;  %v7077_v50 = vld [vmem:[#allocation4 + $0xd0] sm:$0xff] }
 0xd9a   :  { %8146 = vmatprep.subr.bf16.mxu0 %v8145_v7 }
 0xd9d   :  { %8148 = vmatpush1.bf16.msra.mxu0 %v8147_v26 }
 0xd9e   :  { %8150 = vmatprep.subr.bf16.mxu0 %v8149_v44  ;;  %v7070_v44 = vld [vmem:[#allocation4 + $0x98] sm:$0xff] }
 0xe6b   :  { %v7936_v38 = vpop.f32.mrb[44].mxu1 }
 0xe6c   :  { %v6812_v56 = vadd.f32 %v7936_v38, %v7326_v18  ;;  %v6794_v40 = vpop.f32.mrb[45].mxu1  ;;  %v6921_v38 = vld [vmem:[%s10180_s13 + $0xd8] sm:$0xff] }
 0xe6d   :  { %v6811_v43 = vadd.f32 %v7326_v18, %v6794_v40  ;;  %v6919_v18 = vld [vmem:[%s10180_s13 + $0xc8] sm:$0xff]  ;;  %v6918_v40 = vld [vmem:[%s10180_s13 + $0xc0] sm:$0xff] }
 0xe6e   :  { %v6825_v30 = vmul.f32 %v6822_v29, %v6812_v56  ;;  %v8153_v56 = vpack.c.bf16 %v6921_v38, %v6919_v18  ;;  %v7054_v38 = vld [vmem:[#allocation4 + $0x18] sm:$0xff] }
 0xe6f   :  { %v6824_v49 = vmul.f32 %v6822_v29, %v6811_v43  ;;  %v8151_v29 = vpack.c.bf16 %v6916_v24, %v6914_v47  ;;  %v6920_v43 = vld [vmem:[%s10180_s13 + $0xd0] sm:$0xff] }
 0xe70   :  { %v10018_v23 = vadd.f32 %v8359_v41, %v6825_v30  ;;  %v6923_v30 = vld [vmem:[%s10180_s13 + $0xe8] sm:$0xff]  ;;  %v8155_v41 = vpack.c.bf16 %v6920_v43, %v6918_v40  ;;  %v7069_v47 = vld [vmem:[#allocation4 + $0x90] sm:$0xff]  ;;  %v7055_v43 = vld [vmem:[#allocation4 + $0x20] sm:$0xff] }
 0xe71   :  { %v10023_v37 = vadd.f32 %v8360_v55, %v6824_v49  ;;  %v6925_v49 = vld [vmem:[%s10180_s13 + $0xf8] sm:$0xff]  ;;  %8152 = vmatpush1.bf16.msra.mxu0 %v8151_v29  ;;  %v7053_v24 = vld [vmem:[#allocation4 + $0x10] sm:$0xff]  ;;  %v8165_v18 = vpack.c.bf16 %v7070_v44, %v7069_v47  ;;  %v7071_v29 = vld [vmem:[#allocation4 + $0xa0] sm:$0xff] }
 0xe72   :  { %6832 = vadd.xlane.f32.xlu1 %v10018_v23  ;;  %8154 = vmatprep.subr.bf16.mxu0 %v8153_v56  ;;  %v8157_v55 = vpack.c.bf16 %v6925_v49, %v6923_v30  ;;  %v7072_v56 = vld [vmem:[#allocation4 + $0xa8] sm:$0xff]  ;;  %v7073_v49 = vld [vmem:[#allocation4 + $0xb0] sm:$0xff] }
 0xe73   :  { %6830 = vadd.xlane.f32.xlu0 %v10023_v37  ;;  %v8169_v40 = vpack.c.bf16 %v7072_v56, %v7071_v29  ;;  %v7056_v30 = vld [vmem:[#allocation4 + $0x28] sm:$0xff]  ;;  %8166 = vmatprep.subr.bf16.mxu1 %v8165_v18 }
 0xe75   :  { %8156 = vmatpush1.bf16.msra.mxu0 %v8155_v41  ;;  %v7074_v41 = vld [vmem:[#allocation4 + $0xb8] sm:$0xff] }
 0xe76   :  { %8158 = vmatprep.subr.bf16.mxu0 %v8157_v55  ;;  %v8171_v55 = vpack.c.bf16 %v7056_v30, %v7055_v43 }
 0xe79   :  { %8160 = vmatpush1.bf16.msra.mxu0 %v8159_v45  ;;  %v7075_v45 = vld [vmem:[#allocation4 + $0xc0] sm:$0xff] }
 0xe7a   :  { %v8177_v54 = vpack.c.bf16 %v7076_v53, %v7075_v45 }
 0xeff   :  { %v6833_v6 = vpop.xlane.xlu1 %6832 }
 0xf00   :  { %v6831_v21 = vpop.xlane.xlu0 %6830  ;;  %v6835_v63 = vmul.f32 0.0078125, %v6833_v6  ;;  %v223_v6 = vsub.s32 4, %v9054_v1 }
 0xf01   :  { %v6834_v4 = vmul.f32 0.0078125, %v6831_v21 }
 0xf02   :  { %v10055_v9 = vsub.f32 %v10018_v23, %v6835_v63  ;;  %v220_v63 = vrot.slane %v10005_v36, %v219_v2  ;;  %v7078_v2 = vld [vmem:[#allocation4 + $0xd8] sm:$0xff] }
 0xf03   :  { %v10052_v11 = vsub.f32 %v10023_v37, %v6834_v4 }
 0xf04   :  { %v6839_v5 = vmul.f32 %v10055_v9, %v10055_v9  ;;  %v375_v42 = vadd.f32 %v9052_v57, %v220_v63  ;;  %v7079_v63 = vld [vmem:[#allocation4 + $0xe0] sm:$0xff] }
 0xf05   :  { %v6838_v17 = vmul.f32 %v10052_v11, %v10052_v11 }
 0xf06   :  { %v6869_v14 = vcombine.low %v375_v42, %v375_v42  ;;  %v7064_v42 = vld [vmem:[#allocation4 + $0x68] sm:$0xff] }
 0xf07   :  { %6840 = vadd.xlane.f32.xlu0 %v6838_v17 }
 0xf08   :  { %v6876_v19 = vrot.slane %v6869_v14, %v9068_v12  ;;  %v7082_v14 = vld [vmem:[#allocation4 + $0xf8] sm:$0xff] }
 0xf0b   :  { %6842 = vadd.xlane.f32.xlu0 %v6839_v5  ;;  %v224_v5 = vrot.slane %v10005_v36, %v223_v6  ;;  %v7061_v6 = vld [vmem:[#allocation4 + $0x50] sm:$0xff] }
 0xf0d   :  { %v444_v13 = vadd.f32 %v9081_v33, %v224_v5  ;;  %v6877_v33 = vcombine.low %v6876_v19, %v6876_v19  ;;  %v7066_v19 = vld [vmem:[#allocation4 + $0x78] sm:$0xff] }
 0xf0f   :  { %v6882_v51 = vcombine.low %v444_v13, %v444_v13  ;;  %v7081_v13 = vld [vmem:[#allocation4 + $0xf0] sm:$0xff] }
 0xf11   :  { %v6889_v57 = vrot.slane %v6882_v51, %v9068_v12 }
 0xf13   :  { %v6890_v7 = vcombine.low %v6889_v57, %v6889_v57 }
 0xf94   :  { %v6841_v28 = vpop.xlane.xlu0 %6840 }
 0xf95   :  { %v6844_v60 = vmul.f32 0.0078125, %v6841_v28  ;;  %v8179_v28 = vpack.c.bf16 %v7060_v52, %v7059_v32 }
 0xf97   :  { %v6846_v21 = vadd.f32 1e-05, %v6844_v60  ;;  %v8181_v60 = vpack.c.bf16 %v7078_v2, %v7077_v50 }
 0xf98   :  { %v6843_v4 = vpop.xlane.xlu0 %6842 }
 0xf99   :  { %8346 = vrsqrt.f32 %v6846_v21  ;;  %v6845_v17 = vmul.f32 0.0078125, %v6843_v4  ;;  %v7062_v21 = vld [vmem:[#allocation4 + $0x58] sm:$0xff]  ;;  %v7080_v4 = vld [vmem:[#allocation4 + $0xe8] sm:$0xff] }
 0xf9a   :  { %v8185_v5 = vpack.c.bf16 %v7080_v4, %v7079_v63 }
 0xf9b   :  { %v6847_v15 = vadd.f32 1e-05, %v6845_v17  ;;  %v8183_v17 = vpack.c.bf16 %v7062_v21, %v7061_v6 }
 0xf9d   :  { %8348 = vrsqrt.f32 %v6847_v15  ;;  %v7063_v15 = vld [vmem:[#allocation4 + $0x60] sm:$0xff] }
 0xf9e   :  { %v8187_v51 = vpack.c.bf16 %v7064_v42, %v7063_v15 }
 0xfa3   :  { %v8347_v27 = vpop.eup %8346 }
 0xfa4   :  { %v6850_v25 = vmul.f32 %v8347_v27, %v10052_v11  ;;  %v8189_v27 = vpack.c.bf16 %v7082_v14, %v7081_v13 }
 0xfa6   :  { %v6858_v22 = vmul.f32 %v7327_v20, %v6850_v25 }
 0xfa7   :  { %v8349_v39 = vpop.eup %8348 }
 0xfa8   :  { %v6851_v8 = vmul.f32 %v8349_v39, %v10055_v9  ;;  %v6866_v10 = vadd.f32 %v7328_v16, %v6858_v22  ;;  %v8167_v9 = vpack.c.bf16 %v7054_v38, %v7053_v24 }
 0xfaa   :  { %v6879_v61 = vmul.f32 %v6877_v33, %v6866_v10  ;;  %v6859_v35 = vmul.f32 %v7327_v20, %v6851_v8  ;;  %8168 = vmatpush3.bf16.msra.mxu1 %v8167_v9  ;;  %v7065_v20 = vld [vmem:[#allocation4 + $0x70] sm:$0xff] }
 0xfab   :  { %8170 = vmatprep.subr.bf16.mxu1 %v8169_v40  ;;  %v8191_v25 = vpack.c.bf16 %v7066_v19, %v7065_v20 }
 0xfac   :  { %v6892_v26 = vadd.f32 %v6890_v7, %v6879_v61  ;;  %v6867_v46 = vadd.f32 %v7328_v16, %v6859_v35  ;;  %v6926_v16 = vld [vmem:[%s10181_s14] sm:$0x3] }
 0xfad   :  { %v6931_v57 = vrot.slane %v6926_v16, %v9057_v58  ;;  %v6935_v22 = vrot.slane %v6926_v16, %v9064_v3 }
 0xfae   :  { %7003 = vmatmul.mubr.f32.vlgmr.msra.gmra.mrb[70].mxu0 %v6892_v26  ;;  %v6880_v48 = vmul.f32 %v6877_v33, %v6867_v46  ;;  %8172 = vmatpush3.bf16.msra.mxu1 %v8171_v55 }
 0xfaf   :  { %7008 = vmatprep.mubr.f32.mxu0 %v8436_v0  ;;  %v8173_v0 = vpack.c.bf16 %v7074_v41, %v7073_v49 }
 0xfb0   :  { %v6893_v11 = vadd.f32 %v6890_v7, %v6880_v48 }
 0xfb1   :  { %8174 = vmatprep.subr.bf16.mxu1 %v8173_v0 }
 0xfb2   :  { %7009 = vmatmul.mubr.f32.gmra.mrb[72].mxu0 %v6893_v11  ;;  %8176 = vmatpush3.bf16.msra.mxu1 %v8175_v31 }
 0xfb3   :  { %8178 = vmatprep.subr.bf16.mxu1 %v8177_v54 }
 0xfb6   :  { %8180 = vmatpush3.bf16.msra.mxu1 %v8179_v28 }
 0xfb7   :  { %8182 = vmatprep.subr.bf16.mxu1 %v8181_v60 }
 0xfba   :  { %8184 = vmatpush3.bf16.msra.mxu1 %v8183_v17  ;;  %v227_v17 = vsub.s32 5, %v9054_v1 }
 0xfbb   :  { %8186 = vmatprep.subr.bf16.mxu1 %v8185_v5 }
 0xfbc   :  { %v228_v5 = vrot.slane %v10005_v36, %v227_v17 }
 0xfbe   :  { %8188 = vmatpush3.bf16.msra.mxu1 %v8187_v51  ;;  %v446_v15 = vadd.f32 %v9083_v34, %v228_v5  ;;  %v7329_v51 = vld [vmem:[#allocation6] ss:$0 sm:$0xff] }
 0xfbf   :  { %8190 = vmatprep.subr.bf16.mxu1 %v8189_v27 }
 0xfc0   :  { %v7166_v42 = vcombine.low %v446_v15, %v446_v15 }
 0xfc2   :  { %8192 = vmatpush3.bf16.msra.mxu1 %v8191_v25  ;;  %v7173_v13 = vrot.slane %v7166_v42, %v9068_v12 }
 0xfc4   :  { %v7174_v19 = vcombine.low %v7173_v13, %v7173_v13 }
0x1081   :  { %v7004_v39 = vpop.f32.mrb[70].mxu0 }
0x1082   :  { %v7005_v33 = vadd.f32 %v7004_v39, %v6931_v57  ;;  %v7006_v8 = vpop.f32.mrb[71].mxu0 }
0x1083   :  { %v7007_v10 = vadd.f32 %v7006_v8, %v6935_v22 }
0x1084   :  { %v7019_v7 = vmul.f32 0.044715, %v7005_v33  ;;  %v7015_v54 = vmul.f32 0.5, %v7005_v33 }
0x1085   :  { %v7020_v61 = vmul.f32 0.044715, %v7007_v10  ;;  %v7010_v35 = vpop.f32.mrb[72].mxu0  ;;  %v7016_v53 = vmul.f32 0.5, %v7007_v10 }
0x1086   :  { %v7023_v26 = vmul.f32 %v7019_v7, %v7005_v33  ;;  %v7011_v46 = vadd.f32 %v7010_v35, %v6931_v57  ;;  %v7012_v48 = vpop.f32.mrb[73].mxu0 }
0x1087   :  { %v7024_v11 = vmul.f32 %v7020_v61, %v7007_v10  ;;  %v7013_v47 = vadd.f32 %v7012_v48, %v6935_v22 }
0x1088   :  { %v7027_v44 = vmul.f32 %v7023_v26, %v7005_v33  ;;  %v7021_v24 = vmul.f32 0.044715, %v7011_v46  ;;  %v7017_v21 = vmul.f32 0.5, %v7011_v46 }
0x1089   :  { %v7022_v18 = vmul.f32 0.044715, %v7013_v47  ;;  %v7028_v38 = vmul.f32 %v7024_v11, %v7007_v10  ;;  %v7018_v60 = vmul.f32 0.5, %v7013_v47 }
0x108a   :  { %v7031_v29 = vadd.f32 %v7027_v44, %v7005_v33  ;;  %v7025_v58 = vmul.f32 %v7021_v24, %v7011_v46 }
0x108b   :  { %v7026_v56 = vmul.f32 %v7022_v18, %v7013_v47  ;;  %v7032_v3 = vadd.f32 %v7028_v38, %v7007_v10 }
0x108c   :  { %v7035_v9 = vmul.f32 0.7978846, %v7031_v29  ;;  %v7029_v40 = vmul.f32 %v7025_v58, %v7011_v46 }
0x108d   :  { %v7036_v43 = vmul.f32 0.7978846, %v7032_v3  ;;  %v7030_v30 = vmul.f32 %v7026_v56, %v7013_v47 }
0x108e   :  { %8350 = vtanh.f32 %v7035_v9  ;;  %v7033_v49 = vadd.f32 %v7029_v40, %v7011_v46 }
0x108f   :  { %8352 = vtanh.f32 %v7036_v43  ;;  %v7034_v41 = vadd.f32 %v7030_v30, %v7013_v47 }
0x1090   :  { %v7037_v55 = vmul.f32 0.7978846, %v7033_v49 }
0x1091   :  { %v7038_v0 = vmul.f32 0.7978846, %v7034_v41 }
0x1092   :  { %8354 = vtanh.f32 %v7037_v55 }
0x1093   :  { %8356 = vtanh.f32 %v7038_v0 }
0x1098   :  { %v8351_v62 = vpop.eup %8350 }
0x1099   :  { %v8353_v59 = vpop.eup %8352  ;;  %v7043_v45 = vadd.f32 1.0, %v8351_v62 }
0x109a   :  { %v7044_v31 = vadd.f32 1.0, %v8353_v59 }
0x109b   :  { %v7047_v2 = vmul.f32 %v7043_v45, %v7015_v54 }
0x109c   :  { %v8355_v32 = vpop.eup %8354  ;;  %v7048_v52 = vmul.f32 %v7044_v31, %v7016_v53 }
0x109d   :  { %v8357_v50 = vpop.eup %8356  ;;  %v7045_v28 = vadd.f32 1.0, %v8355_v32 }
0x109e   :  { %7154 = vmatprep.mubr.f32.mxu1 %v7048_v52  ;;  %v7046_v6 = vadd.f32 1.0, %v8357_v50 }
0x109f   :  { %7155 = vmatmul.mubr.f32.vlgmr.msra.gmra.mrb[72].mxu1 %v7047_v2  ;;  %v7049_v4 = vmul.f32 %v7045_v28, %v7017_v21 }
0x10a0   :  { %v7050_v63 = vmul.f32 %v7046_v6, %v7018_v60 }
0x10a2   :  { %7159 = vmatprep.mubr.f32.mxu1 %v7050_v63 }
0x10a3   :  { %7160 = vmatmul.mubr.f32.gmra.mrb[74].mxu1 %v7049_v4 }
0x1172   :  { %v7532_v14 = vpop.f32.mrb[72].mxu1 }
0x1173   :  { %v7533_v27 = vpop.f32.mrb[73].mxu1 }
0x1174   :  { %v7534_v20 = vadd.f32 %v7533_v27, %v7532_v14 }
0x1176   :  { %v7157_v25 = vadd.f32 %v7534_v20, %v7329_v51  ;;  %v7535_v16 = vpop.f32.mrb[74].mxu1 }
0x1177   :  { %v7536_v57 = vpop.f32.mrb[75].mxu1 }
0x1178   :  { %v7176_v22 = vmul.f32 %v7174_v19, %v7157_v25  ;;  %v7537_v39 = vadd.f32 %v7536_v57, %v7535_v16 }
0x117a   :  { %v7178_v33 = vadd.f32 %v7176_v22, %v10023_v37  ;;  %v7162_v1 = vadd.f32 %v7537_v39, %v7329_v51 }
0x117c   :  { %7180 = vst [vmem:[%s10184_s17] sm:$0xff] %v7178_v33  ;;  %v7177_v34 = vmul.f32 %v7174_v19, %v7162_v1 }
0x117e   :  { %v7179_v12 = vadd.f32 %v7177_v34, %v10018_v23 }
0x1180   :  { %7181 = vst [vmem:[%s10184_s17 + $0x8] sm:$0xff] %v7179_v12 }
0x1181   :  { %7186 = vsyncpa [#allocation3], 1 }
0x1182   :  { %7187 = vsyncpa [#allocation5], 1 }

// kernel: dit_forward.10
= control target key start
LH: loop header
LB: loop body
LE: loop exit
PB: predicated region body
PF: predicated region fallthrough
CT: control target
= control target key end

     0   :  { %v8315_v3 = vmov 0.0   ;;  %vm8317_vm0 = vmmov 0   ;;  %vm834_vm1 = vcmask 261120   ;;  %vm1528_vm2 = vcmask 1041408   ;;  %s8319_s25 = smov 64   ;;  %s10150_s0 = inlined_call_operand.vmem [shape: f32[16,128], index: 0, kind: input, shape index: {}]   ;;  %s10151_s11 = inlined_call_operand.vmem [shape: f32[128,768], index: 11, kind: input, shape index: {}]   ;;  %s10152_s1 = inlined_call_operand.vmem [shape: f32[2,128], index: 1, kind: input, shape index: {}]   ;;  %s10153_s2 = inlined_call_operand.vmem [shape: f32[2,128], index: 2, kind: input, shape index: {}]   ;;  %s10154_s3 = inlined_call_operand.vmem [shape: f32[128,384], index: 3, kind: input, shape index: {}]   ;;  %s10155_s12 = inlined_call_operand.vmem [shape: f32[1,768], index: 12, kind: input, shape index: {}]   ;;  %s10156_s7 = inlined_call_operand.vmem [shape: f32[1,128], index: 7, kind: input, shape index: {}]   ;;  %s10157_s8 = inlined_call_operand.vmem [shape: f32[1,128], index: 8, kind: input, shape index: {}]   ;;  %s10158_s4 = inlined_call_operand.vmem [shape: f32[1,384], index: 4, kind: input, shape index: {}]   ;;  %s10159_s5 = inlined_call_operand.vmem [shape: f32[128,128], index: 5, kind: input, shape index: {}]   ;;  %s10160_s6 = inlined_call_operand.vmem [shape: f32[1,128], index: 6, kind: input, shape index: {}]   ;;  %s10161_s13 = inlined_call_operand.vmem [shape: f32[128,256], index: 13, kind: input, shape index: {}]   ;;  %s10162_s15 = inlined_call_operand.vmem [shape: f32[256,128], index: 15, kind: input, shape index: {}]   ;;  %s10163_s9 = inlined_call_operand.vmem [shape: f32[1,128], index: 9, kind: input, shape index: {}]   ;;  %s10164_s10 = inlined_call_operand.vmem [shape: f32[1,128], index: 10, kind: input, shape index: {}]   ;;  %s10165_s14 = inlined_call_operand.vmem [shape: f32[1,256], index: 14, kind: input, shape index: {}]   ;;  %s10166_s16 = inlined_call_operand.vmem [shape: f32[1,128], index: 16, kind: input, shape index: {}]   ;;  %s10167_s17 = inlined_call_operand.vmem [shape: f32[16,128], index: 17, kind: output, shape index: {}]  }
   0x1   :  { %10171 = sst [smem:[#allocation2_spill]] %s10150_s0  ;;  %260 = vmatprep.mubr.f32.mxu0 %v8315_v3  ;;  %331 = vmatprep.mubr.f32.mxu1 %v8315_v3  ;;  %v58_v28 = vld [vmem:[%s10153_s2] sm:$0x3]  ;;  %vm1435_vm3 = vcmask 9216   ;;  %vm1524_vm4 = vcmask 15360  }
   0x2   :  { %10172 = sst [smem:[#allocation3_spill]] %s10151_s11  ;;  %s10173_s26 = sld [smem:[#allocation2_spill]]  ;;  %v59_v29 = vld [vmem:[%s10152_s1] sm:$0x3] }
   0x3   :  { %s10174_s30 = sld [smem:[#allocation3_spill]]  ;;  %v8485_v30 = vadd.f32 %v59_v29, %v58_v28 }
   0x5   :  { %v61_v35 = vsub.f32 0.0, %v8485_v30 }
   0x7   :  { %v62_v38 = vmul.f32 1.442695, %v61_v35 }
   0x8   :  { %v8414_v0 = vld [vmem:[%s10173_s26] sm:$0xff]  ;;  %v8419_v1 = vld [vmem:[%s10173_s26 + $0x8] sm:$0xff] }
   0x9   :  { %v69_v2 = vld [vmem:[%s10174_s30 + $0x8] sm:$0xff]  ;;  %411 = vadd.xlane.f32.xlu0 %v8414_v0  ;;  %v75_v4 = vld [vmem:[%s10174_s30 + $0x38] sm:$0xff]  ;;  %v68_v5 = vld [vmem:[%s10174_s30] sm:$0xff]  ;;  %8164 = vpow2.f32 %v62_v38 }
   0xa   :  { %v74_v6 = vld [vmem:[%s10174_s30 + $0x30] sm:$0xff]  ;;  %v7896_v7 = vpack.c.bf16 %v75_v4, %v69_v2  ;;  %v81_v9 = vld [vmem:[%s10174_s30 + $0x68] sm:$0xff]  ;;  %v87_v10 = vld [vmem:[%s10174_s30 + $0x98] sm:$0xff] }
   0xb   :  { %v7898_v8 = vpack.c.bf16 %v74_v6, %v68_v5  ;;  %v80_v11 = vld [vmem:[%s10174_s30 + $0x60] sm:$0xff]  ;;  %v7900_v12 = vpack.c.bf16 %v87_v10, %v81_v9  ;;  %v86_v13 = vld [vmem:[%s10174_s30 + $0x90] sm:$0xff]  ;;  %v93_v14 = vld [vmem:[%s10174_s30 + $0xc8] sm:$0xff] }
   0xc   :  { %v99_v15 = vld [vmem:[%s10174_s30 + $0xf8] sm:$0xff]  ;;  %7897 = vmatprep.subr.bf16.mxu0 %v7896_v7  ;;  %v7902_v16 = vpack.c.bf16 %v86_v13, %v80_v11  ;;  %v92_v18 = vld [vmem:[%s10174_s30 + $0xc0] sm:$0xff]  ;;  %v98_v19 = vld [vmem:[%s10174_s30 + $0xf0] sm:$0xff] }
   0xd   :  { %413 = vadd.xlane.f32.xlu0 %v8419_v1  ;;  %7899 = vmatpush1.bf16.msra.mxu0 %v7898_v8  ;;  %v7904_v17 = vpack.c.bf16 %v99_v15, %v93_v14  ;;  %v105_v20 = vld [vmem:[%s10174_s30 + $0x128] sm:$0xff]  ;;  %v111_v21 = vld [vmem:[%s10174_s30 + $0x158] sm:$0xff]  ;;  %v7906_v22 = vpack.c.bf16 %v98_v19, %v92_v18  ;;  %v104_v24 = vld [vmem:[%s10174_s30 + $0x120] sm:$0xff] }
   0xe   :  { %7901 = vmatprep.subr.bf16.mxu0 %v7900_v12  ;;  %v7908_v23 = vpack.c.bf16 %v111_v21, %v105_v20  ;;  %v110_v25 = vld [vmem:[%s10174_s30 + $0x150] sm:$0xff]  ;;  %v117_v26 = vld [vmem:[%s10174_s30 + $0x188] sm:$0xff]  ;;  %v123_v27 = vld [vmem:[%s10174_s30 + $0x1b8] sm:$0xff] }
   0xf   :  { %v7910_v31 = vpack.c.bf16 %v110_v25, %v104_v24  ;;  %v7912_v32 = vpack.c.bf16 %v123_v27, %v117_v26  ;;  %v116_v33 = vld [vmem:[%s10174_s30 + $0x180] sm:$0xff]  ;;  %v122_v34 = vld [vmem:[%s10174_s30 + $0x1b0] sm:$0xff]  ;;  %v129_v36 = vld [vmem:[%s10174_s30 + $0x1e8] sm:$0xff] }
  0x10   :  { %v135_v37 = vld [vmem:[%s10174_s30 + $0x218] sm:$0xff]  ;;  %v7914_v39 = vpack.c.bf16 %v122_v34, %v116_v33  ;;  %v128_v41 = vld [vmem:[%s10174_s30 + $0x1e0] sm:$0xff]  ;;  %v134_v42 = vld [vmem:[%s10174_s30 + $0x210] sm:$0xff] }
  0x11   :  { %7903 = vmatpush1.bf16.msra.mxu0 %v7902_v16  ;;  %v7916_v40 = vpack.c.bf16 %v135_v37, %v129_v36  ;;  %v141_v43 = vld [vmem:[%s10174_s30 + $0x248] sm:$0xff]  ;;  %v147_v44 = vld [vmem:[%s10174_s30 + $0x278] sm:$0xff]  ;;  %v7918_v45 = vpack.c.bf16 %v134_v42, %v128_v41  ;;  %v140_v47 = vld [vmem:[%s10174_s30 + $0x240] sm:$0xff] }
  0x12   :  { %7905 = vmatprep.subr.bf16.mxu0 %v7904_v17  ;;  %v7920_v46 = vpack.c.bf16 %v147_v44, %v141_v43  ;;  %v146_v48 = vld [vmem:[%s10174_s30 + $0x270] sm:$0xff]  ;;  %v153_v49 = vld [vmem:[%s10174_s30 + $0x2a8] sm:$0xff]  ;;  %v159_v50 = vld [vmem:[%s10174_s30 + $0x2d8] sm:$0xff] }
  0x13   :  { %v152_v51 = vld [vmem:[%s10174_s30 + $0x2a0] sm:$0xff]  ;;  %v158_v52 = vld [vmem:[%s10174_s30 + $0x2d0] sm:$0xff]  ;;  %v7922_v53 = vpack.c.bf16 %v146_v48, %v140_v47  ;;  %v71_v54 = vld [vmem:[%s10174_s30 + $0x18] sm:$0xff]  ;;  %v7924_v57 = vpack.c.bf16 %v159_v50, %v153_v49  ;;  %v8165_v6 = vpop.eup %8164 }
  0x14   :  { %v77_v55 = vld [vmem:[%s10174_s30 + $0x48] sm:$0xff]  ;;  %v70_v56 = vld [vmem:[%s10174_s30 + $0x10] sm:$0xff]  ;;  %v76_v59 = vld [vmem:[%s10174_s30 + $0x40] sm:$0xff]  ;;  %v7926_v8 = vpack.c.bf16 %v158_v52, %v152_v51  ;;  %v64_v9 = vadd.f32 1.0, %v8165_v6 }
  0x15   :  { %7907 = vmatpush1.bf16.msra.mxu0 %v7906_v22  ;;  %v7928_v58 = vpack.c.bf16 %v77_v55, %v71_v54  ;;  %v83_v60 = vld [vmem:[%s10174_s30 + $0x78] sm:$0xff]  ;;  %v89_v61 = vld [vmem:[%s10174_s30 + $0xa8] sm:$0xff]  ;;  %v7930_v62 = vpack.c.bf16 %v76_v59, %v70_v56  ;;  %v82_v5 = vld [vmem:[%s10174_s30 + $0x70] sm:$0xff] }
  0x16   :  { %7909 = vmatprep.subr.bf16.mxu0 %v7908_v23  ;;  %v7932_v63 = vpack.c.bf16 %v89_v61, %v83_v60  ;;  %v73_v2 = vld [vmem:[%s10174_s30 + $0x28] sm:$0xff]  ;;  %v79_v4 = vld [vmem:[%s10174_s30 + $0x58] sm:$0xff]  ;;  %v88_v7 = vld [vmem:[%s10174_s30 + $0xa0] sm:$0xff]  ;;  %8166 = vrcp.f32 %v64_v9 }
  0x17   :  { %7929 = vmatprep.subr.bf16.mxu1 %v7928_v58  ;;  %v7934_v10 = vpack.c.bf16 %v88_v7, %v82_v5  ;;  %v95_v11 = vld [vmem:[%s10174_s30 + $0xd8] sm:$0xff]  ;;  %v101_v12 = vld [vmem:[%s10174_s30 + $0x108] sm:$0xff]  ;;  %v7960_v13 = vpack.c.bf16 %v79_v4, %v73_v2  ;;  %v94_v15 = vld [vmem:[%s10174_s30 + $0xd0] sm:$0xff] }
  0x18   :  { %7931 = vmatpush1.bf16.msra.mxu1 %v7930_v62  ;;  %v7936_v14 = vpack.c.bf16 %v101_v12, %v95_v11  ;;  %v100_v16 = vld [vmem:[%s10174_s30 + $0x100] sm:$0xff]  ;;  %v107_v17 = vld [vmem:[%s10174_s30 + $0x138] sm:$0xff]  ;;  %v113_v18 = vld [vmem:[%s10174_s30 + $0x168] sm:$0xff] }
  0x19   :  { %7911 = vmatpush1.bf16.msra.mxu0 %v7910_v31  ;;  %7933 = vmatprep.subr.bf16.mxu1 %v7932_v63  ;;  %v7938_v19 = vpack.c.bf16 %v100_v16, %v94_v15  ;;  %v7940_v20 = vpack.c.bf16 %v113_v18, %v107_v17  ;;  %v106_v21 = vld [vmem:[%s10174_s30 + $0x130] sm:$0xff]  ;;  %v112_v22 = vld [vmem:[%s10174_s30 + $0x160] sm:$0xff]  ;;  %v119_v23 = vld [vmem:[%s10174_s30 + $0x198] sm:$0xff] }
  0x1a   :  { %7913 = vmatprep.subr.bf16.mxu0 %v7912_v32  ;;  %v125_v24 = vld [vmem:[%s10174_s30 + $0x1c8] sm:$0xff]  ;;  %v72_v25 = vld [vmem:[%s10174_s30 + $0x20] sm:$0xff]  ;;  %v78_v26 = vld [vmem:[%s10174_s30 + $0x50] sm:$0xff]  ;;  %v7942_v27 = vpack.c.bf16 %v112_v22, %v106_v21 }
  0x1b   :  { %v85_v28 = vld [vmem:[%s10174_s30 + $0x88] sm:$0xff]  ;;  %v7944_v29 = vpack.c.bf16 %v125_v24, %v119_v23  ;;  %v118_v31 = vld [vmem:[%s10174_s30 + $0x190] sm:$0xff]  ;;  %v124_v32 = vld [vmem:[%s10174_s30 + $0x1c0] sm:$0xff]  ;;  %v7962_v37 = vpack.c.bf16 %v78_v26, %v72_v25 }
  0x1c   :  { %7935 = vmatpush1.bf16.msra.mxu1 %v7934_v10  ;;  %v91_v33 = vld [vmem:[%s10174_s30 + $0xb8] sm:$0xff]  ;;  %v137_v35 = vld [vmem:[%s10174_s30 + $0x228] sm:$0xff]  ;;  %v84_v38 = vld [vmem:[%s10174_s30 + $0x80] sm:$0xff] }
  0x1d   :  { %7915 = vmatpush1.bf16.msra.mxu0 %v7914_v39  ;;  %7937 = vmatprep.subr.bf16.mxu1 %v7936_v14  ;;  %v131_v34 = vld [vmem:[%s10174_s30 + $0x1f8] sm:$0xff]  ;;  %v90_v39 = vld [vmem:[%s10174_s30 + $0xb0] sm:$0xff]  ;;  %v7964_v42 = vpack.c.bf16 %v91_v33, %v85_v28  ;;  %v97_v43 = vld [vmem:[%s10174_s30 + $0xe8] sm:$0xff] }
  0x1e   :  { %7917 = vmatprep.subr.bf16.mxu0 %v7916_v40  ;;  %v7946_v40 = vpack.c.bf16 %v124_v32, %v118_v31  ;;  %v7948_v44 = vpack.c.bf16 %v137_v35, %v131_v34  ;;  %v143_v47 = vld [vmem:[%s10174_s30 + $0x258] sm:$0xff]  ;;  %v149_v48 = vld [vmem:[%s10174_s30 + $0x288] sm:$0xff]  ;;  %v7966_v49 = vpack.c.bf16 %v90_v39, %v84_v38  ;;  %v96_v50 = vld [vmem:[%s10174_s30 + $0xe0] sm:$0xff] }
  0x1f   :  { %v102_v51 = vld [vmem:[%s10174_s30 + $0x110] sm:$0xff]  ;;  %v109_v54 = vld [vmem:[%s10174_s30 + $0x148] sm:$0xff]  ;;  %v7952_v55 = vpack.c.bf16 %v149_v48, %v143_v47  ;;  %v115_v58 = vld [vmem:[%s10174_s30 + $0x178] sm:$0xff] }
  0x20   :  { %7939 = vmatpush1.bf16.msra.mxu1 %v7938_v19  ;;  %v8167_v36 = vpop.eup %8166  ;;  %v142_v56 = vld [vmem:[%s10174_s30 + $0x250] sm:$0xff]  ;;  %v155_v59 = vld [vmem:[%s10174_s30 + $0x2b8] sm:$0xff]  ;;  %v161_v60 = vld [vmem:[%s10174_s30 + $0x2e8] sm:$0xff]  ;;  %v7970_v61 = vpack.c.bf16 %v102_v51, %v96_v50  ;;  %v7972_v4 = vpack.c.bf16 %v115_v58, %v109_v54 }
  0x21   :  { %7919 = vmatpush1.bf16.msra.mxu0 %v7918_v45  ;;  %7941 = vmatprep.subr.bf16.mxu1 %v7940_v20  ;;  %v8621_v41 = vmul.f32 %v8167_v36, %v8485_v30  ;;  %v130_v45 = vld [vmem:[%s10174_s30 + $0x1f0] sm:$0xff]  ;;  %v103_v30 = vld [vmem:[%s10174_s30 + $0x118] sm:$0xff]  ;;  %v108_v62 = vld [vmem:[%s10174_s30 + $0x140] sm:$0xff]  ;;  %v7956_v6 = vpack.c.bf16 %v161_v60, %v155_v59 }
  0x22   :  { %7921 = vmatprep.subr.bf16.mxu0 %v7920_v46  ;;  %v136_v46 = vld [vmem:[%s10174_s30 + $0x220] sm:$0xff]  ;;  %v114_v63 = vld [vmem:[%s10174_s30 + $0x170] sm:$0xff]  ;;  %v121_v5 = vld [vmem:[%s10174_s30 + $0x1a8] sm:$0xff] }
  0x23   :  { %v7950_v52 = vpack.c.bf16 %v136_v46, %v130_v45  ;;  %v154_v7 = vld [vmem:[%s10174_s30 + $0x2b0] sm:$0xff]  ;;  %v127_v9 = vld [vmem:[%s10174_s30 + $0x1d8] sm:$0xff]  ;;  %v477_v10 = vld [vmem:[%s10154_s3 + $0x8] sm:$0xff]  ;;  %v7974_v12 = vpack.c.bf16 %v114_v63, %v108_v62 }
  0x24   :  { %7943 = vmatpush1.bf16.msra.mxu1 %v7942_v27  ;;  %v480_v11 = vld [vmem:[%s10154_s3 + $0x20] sm:$0xff]  ;;  %v126_v14 = vld [vmem:[%s10174_s30 + $0x1d0] sm:$0xff]  ;;  %v7976_v16 = vpack.c.bf16 %v127_v9, %v121_v5  ;;  %v133_v17 = vld [vmem:[%s10174_s30 + $0x208] sm:$0xff] }
  0x25   :  { %7923 = vmatpush1.bf16.msra.mxu0 %v7922_v53  ;;  %7945 = vmatprep.subr.bf16.mxu1 %v7944_v29  ;;  %v7968_v53 = vpack.c.bf16 %v103_v30, %v97_v43  ;;  %v7992_v18 = vpack.c.bf16 %v480_v11, %v477_v10  ;;  %v476_v19 = vld [vmem:[%s10154_s3] sm:$0xff]  ;;  %v479_v20 = vld [vmem:[%s10154_s3 + $0x18] sm:$0xff]  ;;  %v486_v23 = vld [vmem:[%s10154_s3 + $0x50] sm:$0xff] }
  0x26   :  { %7925 = vmatprep.subr.bf16.mxu0 %v7924_v57  ;;  %v148_v57 = vld [vmem:[%s10174_s30 + $0x280] sm:$0xff]  ;;  %v139_v21 = vld [vmem:[%s10174_s30 + $0x238] sm:$0xff]  ;;  %v7994_v26 = vpack.c.bf16 %v479_v20, %v476_v19  ;;  %v138_v28 = vld [vmem:[%s10174_s30 + $0x230] sm:$0xff] }
  0x27   :  { %v7954_v2 = vpack.c.bf16 %v148_v57, %v142_v56  ;;  %v483_v22 = vld [vmem:[%s10154_s3 + $0x38] sm:$0xff]  ;;  %v132_v25 = vld [vmem:[%s10174_s30 + $0x200] sm:$0xff]  ;;  %v7980_v27 = vpack.c.bf16 %v139_v21, %v133_v17  ;;  %v482_v31 = vld [vmem:[%s10154_s3 + $0x30] sm:$0xff] }
  0x28   :  { %7947 = vmatpush1.bf16.msra.mxu1 %v7946_v40  ;;  %v7996_v29 = vpack.c.bf16 %v486_v23, %v483_v22  ;;  %v485_v32 = vld [vmem:[%s10154_s3 + $0x48] sm:$0xff]  ;;  %v151_v34 = vld [vmem:[%s10174_s30 + $0x298] sm:$0xff]  ;;  %v7982_v35 = vpack.c.bf16 %v138_v28, %v132_v25  ;;  %v144_v38 = vld [vmem:[%s10174_s30 + $0x260] sm:$0xff] }
  0x29   :  { %7927 = vmatpush1.bf16.msra.mxu0 %v7926_v8  ;;  %7949 = vmatprep.subr.bf16.mxu1 %v7948_v44  ;;  %v160_v8 = vld [vmem:[%s10174_s30 + $0x2e0] sm:$0xff]  ;;  %v145_v33 = vld [vmem:[%s10174_s30 + $0x268] sm:$0xff]  ;;  %v7998_v36 = vpack.c.bf16 %v485_v32, %v482_v31  ;;  %v150_v39 = vld [vmem:[%s10174_s30 + $0x290] sm:$0xff] }
  0x2a   :  { %7961 = vmatprep.subr.bf16.mxu0 %v7960_v13  ;;  %v120_v13 = vld [vmem:[%s10174_s30 + $0x1a0] sm:$0xff]  ;;  %v7958_v15 = vpack.c.bf16 %v160_v8, %v154_v7  ;;  %v157_v40 = vld [vmem:[%s10174_s30 + $0x2c8] sm:$0xff]  ;;  %v7986_v43 = vpack.c.bf16 %v150_v39, %v144_v38  ;;  %v162_v46 = vld [vmem:[%s10174_s30 + $0x2f0] sm:$0xff] }
  0x2b   :  { %v7978_v24 = vpack.c.bf16 %v126_v14, %v120_v13  ;;  %v156_v45 = vld [vmem:[%s10174_s30 + $0x2c0] sm:$0xff]  ;;  %v478_v30 = vld [vmem:[%s10154_s3 + $0x10] sm:$0xff]  ;;  %v481_v47 = vld [vmem:[%s10154_s3 + $0x28] sm:$0xff] }
  0x2c   :  { %261 = vmatmul.mubr.f32.vlgmr.msra.gmra.mrb[0].mxu0 %v8621_v41  ;;  %7951 = vmatpush1.bf16.msra.mxu1 %v7950_v52  ;;  %v7990_v48 = vpack.c.bf16 %v162_v46, %v156_v45  ;;  %v484_v58 = vld [vmem:[%s10154_s3 + $0x40] sm:$0xff]  ;;  %v490_v5 = vld [vmem:[%s10154_s3 + $0x70] sm:$0xff]  ;;  %v493_v7 = vld [vmem:[%s10154_s3 + $0x88] sm:$0xff] }
  0x2d   :  { %7963 = vmatpush1.bf16.msra.mxu0 %v7962_v37  ;;  %402 = vmatprep.mubr.f32.mxu0 %v8315_v3  ;;  %v7984_v37 = vpack.c.bf16 %v151_v34, %v145_v33  ;;  %v488_v60 = vld [vmem:[%s10154_s3 + $0x60] sm:$0xff]  ;;  %v494_v8 = vld [vmem:[%s10154_s3 + $0x90] sm:$0xff]  ;;  %v497_v9 = vld [vmem:[%s10154_s3 + $0xa8] sm:$0xff]  ;;  %v8032_v10 = vpack.c.bf16 %v493_v7, %v490_v5 }
  0x2e   :  { %7965 = vmatprep.subr.bf16.mxu0 %v7964_v42  ;;  %7953 = vmatprep.subr.bf16.mxu1 %v7952_v55  ;;  %v163_v42 = vld [vmem:[%s10174_s30 + $0x2f8] sm:$0xff]  ;;  %v8006_v11 = vpack.c.bf16 %v497_v9, %v494_v8  ;;  %v504_v13 = vld [vmem:[%s10154_s3 + $0xe0] sm:$0xff]  ;;  %v510_v22 = vld [vmem:[%s10154_s3 + $0x110] sm:$0xff] }
  0x2f   :  { %v7988_v44 = vpack.c.bf16 %v163_v42, %v157_v40  ;;  %v496_v14 = vld [vmem:[%s10154_s3 + $0xa0] sm:$0xff]  ;;  %v507_v21 = vld [vmem:[%s10154_s3 + $0xf8] sm:$0xff]  ;;  %v505_v25 = vld [vmem:[%s10154_s3 + $0xe8] sm:$0xff] }
  0x30   :  { %7955 = vmatpush1.bf16.msra.mxu1 %v7954_v2  ;;  %v495_v2 = vld [vmem:[%s10154_s3 + $0x98] sm:$0xff]  ;;  %v500_v17 = vld [vmem:[%s10154_s3 + $0xc0] sm:$0xff]  ;;  %v8012_v23 = vpack.c.bf16 %v510_v22, %v507_v21  ;;  %v509_v28 = vld [vmem:[%s10154_s3 + $0x108] sm:$0xff] }
  0x31   :  { %7967 = vmatpush1.bf16.msra.mxu0 %v7966_v49  ;;  %7957 = vmatprep.subr.bf16.mxu1 %v7956_v6  ;;  %v8024_v49 = vpack.c.bf16 %v481_v47, %v478_v30  ;;  %v513_v31 = vld [vmem:[%s10154_s3 + $0x128] sm:$0xff]  ;;  %v516_v32 = vld [vmem:[%s10154_s3 + $0x140] sm:$0xff]  ;;  %v519_v40 = vld [vmem:[%s10154_s3 + $0x158] sm:$0xff] }
  0x32   :  { %7969 = vmatprep.subr.bf16.mxu0 %v7968_v53  ;;  %v508_v33 = vld [vmem:[%s10154_s3 + $0x100] sm:$0xff]  ;;  %v8016_v34 = vpack.c.bf16 %v516_v32, %v513_v31  ;;  %v522_v42 = vld [vmem:[%s10154_s3 + $0x170] sm:$0xff]  ;;  %v517_v45 = vld [vmem:[%s10154_s3 + $0x148] sm:$0xff] }
  0x33   :  { %v518_v46 = vld [vmem:[%s10154_s3 + $0x150] sm:$0xff]  ;;  %v521_v30 = vld [vmem:[%s10154_s3 + $0x168] sm:$0xff] }
  0x34   :  { %7959 = vmatpush1.bf16.msra.mxu1 %v7958_v15 }
  0x35   :  { %7971 = vmatpush1.bf16.msra.mxu0 %v7970_v61  ;;  %7993 = vmatprep.subr.bf16.mxu1 %v7992_v18  ;;  %v491_v61 = vld [vmem:[%s10154_s3 + $0x78] sm:$0xff] }
  0x36   :  { %7973 = vmatprep.subr.bf16.mxu0 %v7972_v4  ;;  %v8002_v63 = vpack.c.bf16 %v491_v61, %v488_v60  ;;  %v498_v4 = vld [vmem:[%s10154_s3 + $0xb0] sm:$0xff]  ;;  %v503_v18 = vld [vmem:[%s10154_s3 + $0xd8] sm:$0xff] }
  0x37   :  { %332 = vmatmul.mubr.f32.vlgmr.msra.gmra.mrb[0].mxu1 %v8621_v41  ;;  %v8004_v6 = vpack.c.bf16 %v498_v4, %v495_v2  ;;  %v8010_v20 = vpack.c.bf16 %v503_v18, %v500_v17  ;;  %v7147_v17 = vld [vmem:[%s10156_s7] ss:$0 sm:$0xff]  ;;  %s8320_s7 = smov 32  }
  0x38   :  { %7995 = vmatpush1.bf16.msra.mxu1 %v7994_v26  ;;  %605 = vmatprep.mubr.f32.mxu1 %v8315_v3  ;;  %v506_v26 = vld [vmem:[%s10154_s3 + $0xf0] sm:$0xff] }
  0x39   :  { %7975 = vmatpush1.bf16.msra.mxu0 %v7974_v12  ;;  %7997 = vmatprep.subr.bf16.mxu1 %v7996_v29  ;;  %v501_v12 = vld [vmem:[%s10154_s3 + $0xc8] sm:$0xff]  ;;  %v8014_v29 = vpack.c.bf16 %v509_v28, %v506_v26 }
  0x3a   :  { %7977 = vmatprep.subr.bf16.mxu0 %v7976_v16  ;;  %v8008_v15 = vpack.c.bf16 %v504_v13, %v501_v12  ;;  %v499_v16 = vld [vmem:[%s10154_s3 + $0xb8] sm:$0xff] }
  0x3b   :  { %v8036_v19 = vpack.c.bf16 %v499_v16, %v496_v14 }
  0x3c   :  { %7999 = vmatpush1.bf16.msra.mxu1 %v7998_v36  ;;  %v512_v36 = vld [vmem:[%s10154_s3 + $0x120] sm:$0xff] }
  0x3d   :  { %7979 = vmatpush1.bf16.msra.mxu0 %v7978_v24  ;;  %v502_v24 = vld [vmem:[%s10154_s3 + $0xd0] sm:$0xff] }
  0x3e   :  { %7981 = vmatprep.subr.bf16.mxu0 %v7980_v27  ;;  %v8040_v27 = vpack.c.bf16 %v505_v25, %v502_v24 }
  0x41   :  { %7983 = vmatpush1.bf16.msra.mxu0 %v7982_v35  ;;  %v511_v35 = vld [vmem:[%s10154_s3 + $0x118] sm:$0xff] }
  0x42   :  { %7985 = vmatprep.subr.bf16.mxu0 %v7984_v37  ;;  %v515_v37 = vld [vmem:[%s10154_s3 + $0x138] sm:$0xff]  ;;  %v8044_v38 = vpack.c.bf16 %v511_v35, %v508_v33 }
  0x43   :  { %v8018_v39 = vpack.c.bf16 %v515_v37, %v512_v36 }
  0x45   :  { %7987 = vmatpush1.bf16.msra.mxu0 %v7986_v43  ;;  %v514_v43 = vld [vmem:[%s10154_s3 + $0x130] sm:$0xff] }
  0x46   :  { %7989 = vmatprep.subr.bf16.mxu0 %v7988_v44  ;;  %v8020_v44 = vpack.c.bf16 %v522_v42, %v519_v40  ;;  %v8048_v47 = vpack.c.bf16 %v517_v45, %v514_v43 }
  0x49   :  { %7991 = vmatpush1.bf16.msra.mxu0 %v7990_v48  ;;  %v8022_v48 = vpack.c.bf16 %v521_v30, %v518_v46 }
  0x4a   :  { %8025 = vmatprep.subr.bf16.mxu0 %v8024_v49 }
  0x4c   :  { %403 = vmatmul.mubr.f32.vlgmr.msra.gmra.mrb[2].mxu0 %v8621_v41  ;;  %v489_v41 = vld [vmem:[%s10154_s3 + $0x68] sm:$0xff] }
  0x4d   :  { %8027 = vmatpush3.bf16.msra.mxu0 %v8024_v49  ;;  %v520_v49 = vld [vmem:[%s10154_s3 + $0x160] sm:$0xff] }
  0x96   :  { %v412_v50 = vpop.xlane.xlu0 %411 }
  0x97   :  { %v416_v51 = vmul.f32 0.0078125, %v412_v50  ;;  %v523_v50 = vld [vmem:[%s10154_s3 + $0x178] sm:$0xff] }
  0x99   :  { %v8761_v52 = vsub.f32 %v8414_v0, %v416_v51  ;;  %v492_v0 = vld [vmem:[%s10154_s3 + $0x80] sm:$0xff]  ;;  %v8052_v51 = vpack.c.bf16 %v523_v50, %v520_v49 }
  0x9a   :  { %v414_v53 = vpop.xlane.xlu0 %413  ;;  %v8000_v59 = vpack.c.bf16 %v492_v0, %v489_v41  ;;  %v166_v41 = vlaneseq }
  0x9b   :  { %v417_v54 = vmul.f32 0.0078125, %v414_v53  ;;  %v420_v55 = vmul.f32 %v8761_v52, %v8761_v52 }
  0x9c   :  { %8001 = vmatprep.subr.bf16.mxu1 %v8000_v59  ;;  %v8890_v0 = vshrl.u32 %v166_v41, 7  ;;  %v164_v59 = vld [vmem:[%s10155_s12] sm:$0x3f] }
  0x9d   :  { %422 = vadd.xlane.f32.xlu1 %v420_v55  ;;  %v8766_v56 = vsub.f32 %v8419_v1, %v417_v54  ;;  %v487_v1 = vld [vmem:[%s10154_s3 + $0x58] sm:$0xff]  ;;  %8003 = vmatpush1.bf16.msra.mxu1 %v8002_v63 }
  0x9e   :  { %v8028_v62 = vpack.c.bf16 %v487_v1, %v484_v58  ;;  %8005 = vmatprep.subr.bf16.mxu1 %v8004_v6  ;;  %v8893_v58 = vsub.s32 0, %v8890_v0  ;;  %v8900_v2 = vsub.s32 1, %v8890_v0  ;;  %v10170_v37 = vsub.s32 2, %v8890_v0 }
  0x9f   :  { %v421_v57 = vmul.f32 %v8766_v56, %v8766_v56 }
  0xa0   :  { %8029 = vmatprep.subr.bf16.mxu0 %v8028_v62  ;;  %v169_v61 = vrot.slane %v164_v59, %v8893_v58  ;;  %v173_v9 = vrot.slane %v164_v59, %v8900_v2 }
  0xa1   :  { %424 = vadd.xlane.f32.xlu1 %v421_v57  ;;  %8031 = vmatpush3.bf16.msra.mxu0 %v8028_v62  ;;  %v8316_v62 = vmov 1983009808  }
  0xa2   :  { %8033 = vmatprep.subr.bf16.mxu0 %v8032_v10  ;;  %8007 = vmatpush1.bf16.msra.mxu1 %v8006_v11  ;;  %v453_v63 = vunpack.c.l.s4 %v8316_v62 }
  0xa3   :  { %8009 = vmatprep.subr.bf16.mxu1 %v8008_v15 }
  0xa4   :  { %v454_v8 = vunpack.c.0.s8 %v453_v63 }
  0xa5   :  { %8035 = vmatpush3.bf16.msra.mxu0 %v8032_v10 }
  0xa6   :  { %8037 = vmatprep.subr.bf16.mxu0 %v8036_v19  ;;  %8011 = vmatpush1.bf16.msra.mxu1 %v8010_v20  ;;  %v8904_v12 = vsub.s32 %v454_v8, %v8890_v0 }
  0xa7   :  { %8013 = vmatprep.subr.bf16.mxu1 %v8012_v23 }
  0xa9   :  { %8039 = vmatpush3.bf16.msra.mxu0 %v8036_v19  ;;  %v7148_v19 = vld [vmem:[%s10157_s8] ss:$0 sm:$0xff] }
  0xaa   :  { %8041 = vmatprep.subr.bf16.mxu0 %v8040_v27  ;;  %8015 = vmatpush1.bf16.msra.mxu1 %v8014_v29 }
  0xab   :  { %8017 = vmatprep.subr.bf16.mxu1 %v8016_v34 }
  0xad   :  { %8043 = vmatpush3.bf16.msra.mxu0 %v8040_v27 }
  0xae   :  { %8045 = vmatprep.subr.bf16.mxu0 %v8044_v38  ;;  %8019 = vmatpush1.bf16.msra.mxu1 %v8018_v39 }
  0xaf   :  { %8021 = vmatprep.subr.bf16.mxu1 %v8020_v44 }
  0xb1   :  { %8047 = vmatpush3.bf16.msra.mxu0 %v8044_v38 }
  0xb2   :  { %8049 = vmatprep.subr.bf16.mxu0 %v8048_v47  ;;  %8023 = vmatpush1.bf16.msra.mxu1 %v8022_v48 }
  0xb3   :  { %7532 = vmatprep.subr.mxu1 %v8315_v3 }
  0xb5   :  { %8051 = vmatpush3.bf16.msra.mxu0 %v8048_v47 }
  0xb6   :  { %8053 = vmatprep.subr.bf16.mxu0 %v8052_v51 }
  0xb9   :  { %8055 = vmatpush3.bf16.msra.mxu0 %v8052_v51 }
  0xba   :  { %7567 = vmatprep.subr.mxu0 %v8315_v3 }
  0xff   :  { %v262_v53 = vpop.f32.mrb[0].mxu0 }
 0x100   :  { %v264_v54 = vpop.f32.mrb[1].mxu0  ;;  %v263_v7 = vadd.f32 %v262_v53, %v169_v61 }
 0x101   :  { %v265_v13 = vadd.f32 %v264_v54, %v173_v9 }
 0x102   :  { %v451_v11 = vcombine.low %v263_v7, %v263_v7 }
 0x103   :  { %v464_v15 = vcombine.low %v265_v13, %v265_v13 }
 0x104   :  { %v458_v14 = vrot.slane %v451_v11, %v8904_v12 }
 0x105   :  { %v471_v22 = vrot.slane %v464_v15, %v8904_v12 }
 0x106   :  { %v459_v21 = vcombine.low %v458_v14, %v458_v14 }
 0x107   :  { %v472_v28 = vcombine.low %v471_v22, %v471_v22 }
 0x10a   :  { %v8886_v55 = vpop.f32.mrb[0].mxu1 }
 0x10b   :  { %v8888_v57 = vpop.f32.mrb[1].mxu1 }
 0x11f   :  { %v8917_v33 = vpop.f32.mrb[2].mxu0 }
 0x120   :  { %v8919_v34 = vpop.f32.mrb[3].mxu0 }
 0x12a   :  { %v423_v1 = vpop.xlane.xlu1 %422 }
 0x12b   :  { %v426_v60 = vmul.f32 0.0078125, %v423_v1 }
 0x12d   :  { %v428_v4 = vadd.f32 1e-05, %v426_v60 }
 0x12e   :  { %v425_v5 = vpop.xlane.xlu1 %424 }
 0x12f   :  { %8168 = vrsqrt.f32 %v428_v4  ;;  %v427_v6 = vmul.f32 0.0078125, %v425_v5 }
 0x131   :  { %v429_v10 = vadd.f32 1e-05, %v427_v6 }
 0x133   :  { %8170 = vrsqrt.f32 %v429_v10 }
 0x139   :  { %v8169_v16 = vpop.eup %8168 }
 0x13a   :  { %v432_v18 = vmul.f32 %v8169_v16, %v8761_v52 }
 0x13c   :  { %v440_v20 = vmul.f32 %v7147_v17, %v432_v18 }
 0x13d   :  { %v8171_v23 = vpop.eup %8170 }
 0x13e   :  { %v433_v24 = vmul.f32 %v8171_v23, %v8766_v56  ;;  %v448_v25 = vadd.f32 %v7148_v19, %v440_v20  ;;  %v524_v56 = vld [vmem:[%s10158_s4] sm:$0x7]  ;;  %s8318_s4 = smov 96  }
 0x13f   :  { %v529_v35 = vrot.slane %v524_v56, %v8893_v58  ;;  %v533_v36 = vrot.slane %v524_v56, %v8900_v2  ;;  %v537_v43 = vrot.slane %v524_v56, %v10170_v37 }
 0x140   :  { %v441_v26 = vmul.f32 %v7147_v17, %v433_v24  ;;  %v461_v27 = vmul.f32 %v459_v21, %v448_v25 }
 0x142   :  { %v449_v29 = vadd.f32 %v7148_v19, %v441_v26  ;;  %v474_v31 = vadd.f32 %v472_v28, %v461_v27 }
 0x144   :  { %v462_v32 = vmul.f32 %v459_v21, %v449_v29  ;;  %606 = vmatmul.mubr.f32.vlgmr.msra.gmra.mrb[2].mxu1 %v474_v31  ;;  %7529 = vmatprep.mubr.f32.mxu0 %v474_v31 }
 0x145   :  { %611 = vmatprep.mubr.f32.mxu1 %v8315_v3 }
 0x146   :  { %v475_v52 = vadd.f32 %v472_v28, %v462_v32 }
 0x148   :  { %612 = vmatmul.mubr.f32.gmra.mrb[4].mxu1 %v475_v52  ;;  %7530 = vmatmul.mubr.f32.vlgmr.msra.gmra.mrb[4].mxu0 %v475_v52 }
 0x149   :  { %7534 = vmatprep.mubr.msk.f32.mxu1 %vm8317_vm0, %v8315_v3  ;;  %7569 = vmatprep.mubr.msk.f32.mxu0 %vm8317_vm0, %v8315_v3 }
 0x217   :  { %v607_v38 = vpop.f32.mrb[2].mxu1 }
 0x218   :  { %v608_v39 = vadd.f32 %v607_v38, %v529_v35  ;;  %v609_v40 = vpop.f32.mrb[3].mxu1 }
 0x219   :  { %v610_v42 = vadd.f32 %v609_v40, %v533_v36 }
 0x21a   :  { %v719_v44 = vrot.slane %v608_v39, %v8904_v12  ;;  %v712_v53 = vcombine.high %v608_v39, %v608_v39 }
 0x21b   :  { %v8935_v45 = vrot.slane %v610_v42, %v8904_v12  ;;  %v613_v46 = vpop.f32.mrb[4].mxu1  ;;  %v7531_v30 = vpop.f32.mrb[4].mxu0  ;;  %v764_v1 = vcombine.high %v610_v42, %v610_v42 }
 0x21c   :  { %v614_v47 = vadd.f32 %v613_v46, %v529_v35  ;;  %v615_v48 = vpop.f32.mrb[5].mxu1  ;;  %v684_v49 = vpop.f32.mrb[5].mxu0  ;;  %v8937_v50 = vadd.f32 %v7531_v30, %v537_v43  ;;  %v727_v54 = vcombine.high %v719_v44, %v719_v44  ;;  %v8941_v41 = vmul.f32 0.17677669, %v719_v44 }
 0x21d   :  { %v616_v51 = vadd.f32 %v615_v48, %v533_v36  ;;  %7533 = vmatpush3.xpose.msk.msra.mxu1 %vm834_vm1, %v8935_v45  ;;  %v8946_v60 = vcombine.high %v8935_v45, %v8935_v45  ;;  %v726_v63 = vrot.slane %v712_v53, %v8904_v12  ;;  %v8963_v6 = vrot.slane %v764_v1, %v8904_v12 }
 0x21e   :  { %v729_v59 = vcombine.high %v614_v47, %v614_v47  ;;  %7537 = vmatprep.subr.mxu1 %v8315_v3  ;;  %v8956_v4 = vmul.f32 0.17677669, %v727_v54  ;;  %v8965_v8 = vadd.f32 %v684_v49, %v537_v43  ;;  %v736_v18 = vrot.slane %v614_v47, %v8904_v12 }
 0x21f   :  { %v781_v62 = vcombine.high %v616_v51, %v616_v51  ;;  %v728_v11 = vcombine.high %v726_v63, %v726_v63  ;;  %v8981_v13 = vmul.f32 0.17677669, %v726_v63  ;;  %v8988_v14 = vcombine.high %v8963_v6, %v8963_v6 }
 0x220   :  { %v743_v61 = vrot.slane %v729_v59, %v8904_v12  ;;  %7535 = vmatmul.mubr.msk.f32.vlgmr.msra.gmra.mrb[6].mxu1 %vm834_vm1, %v8941_v41  ;;  %v8975_v10 = vrot.slane %v8965_v8, %v8904_v12  ;;  %v9011_v19 = vrot.slane %v616_v51, %v8904_v12  ;;  %v744_v20 = vcombine.high %v736_v18, %v736_v18 }
 0x221   :  { %7538 = vmatpush3.xpose.msk.msra.mxu1 %vm834_vm1, %v8946_v60  ;;  %7539 = vmatprep.mubr.msk.f32.mxu1 %vm8317_vm0, %v8315_v3  ;;  %v8959_v5 = vrot.slane %v781_v62, %v8904_v12  ;;  %v9003_v17 = vmul.f32 0.17677669, %v728_v11  ;;  %v9023_v21 = vmul.f32 0.17677669, %v736_v18  ;;  %v9069_v53 = vrot.slane %v8935_v45, %v8904_v12 }
 0x222   :  { %7542 = vmatprep.subr.mxu1 %v8315_v3  ;;  %v745_v7 = vcombine.high %v743_v61, %v743_v61  ;;  %v8995_v16 = vcombine.high %v8975_v10, %v8975_v10  ;;  %v9028_v22 = vcombine.high %v9011_v19, %v9011_v19  ;;  %v9036_v23 = vmul.f32 0.17677669, %v744_v20 }
 0x223   :  { %v8969_v9 = vcombine.high %v8959_v5, %v8959_v5  ;;  %v9045_v24 = vmul.f32 0.17677669, %v743_v61  ;;  %v9075_v54 = vrot.slane %v8946_v60, %v8904_v12  ;;  %v9081_v59 = vrot.slane %v8941_v41, %v8904_v12 }
 0x224   :  { %7540 = vmatmul.mubr.msk.f32.vlgmr.msra.gmra.mrb[8].mxu1 %vm834_vm1, %v8956_v4  ;;  %v8990_v15 = vmul.f32 0.17677669, %v745_v7  ;;  %v9087_v45 = vrot.slane %v8956_v4, %v8904_v12  ;;  %v9093_v1 = vrot.slane %v8988_v14, %v8904_v12  ;;  %v9101_v60 = vrot.slane %v8963_v6, %v8904_v12 }
 0x225   :  { %7543 = vmatpush3.xpose.msk.msra.mxu1 %vm834_vm1, %v8963_v6  ;;  %7544 = vmatprep.mubr.msk.f32.mxu1 %vm8317_vm0, %v8315_v3 }
 0x226   :  { %7568 = vmatpush3.xpose.msk.msra.mxu0 %vm834_vm1, %v8969_v9  ;;  %7547 = vmatprep.subr.mxu1 %v8315_v3 }
 0x227   :  { %7577 = vmatprep.subr.mxu0 %v8315_v3 }
 0x228   :  { %7545 = vmatmul.mubr.msk.f32.vlgmr.msra.gmra.mrb[10].mxu1 %vm834_vm1, %v8981_v13 }
 0x229   :  { %7570 = vmatmul.mubr.msk.f32.vlgmr.msra.gmra.mrb[6].mxu0 %vm834_vm1, %v8990_v15  ;;  %7548 = vmatpush3.xpose.msk.msra.mxu1 %vm834_vm1, %v8988_v14 }
 0x22a   :  { %7578 = vmatpush3.msk.msra.mxu0 %vm1528_vm2, %v8995_v16  ;;  %7549 = vmatprep.mubr.msk.f32.mxu1 %vm8317_vm0, %v8315_v3 }
 0x22b   :  { %7552 = vmatprep.subr.mxu1 %v8315_v3  ;;  %7579 = vmatprep.mubr.msk.f32.mxu0 %vm8317_vm0, %v8315_v3 }
 0x22c   :  { %7550 = vmatmul.mubr.msk.f32.vlgmr.msra.gmra.mrb[12].mxu1 %vm834_vm1, %v9003_v17  ;;  %7587 = vmatprep.subr.mxu0 %v8315_v3 }
 0x22d   :  { %7553 = vmatpush3.xpose.msk.msra.mxu1 %vm834_vm1, %v9011_v19  ;;  %7554 = vmatprep.mubr.msk.f32.mxu1 %vm8317_vm0, %v8315_v3 }
 0x22e   :  { %7557 = vmatprep.subr.mxu1 %v8315_v3 }
 0x230   :  { %7555 = vmatmul.mubr.msk.f32.vlgmr.msra.gmra.mrb[14].mxu1 %vm834_vm1, %v9023_v21 }
 0x231   :  { %7558 = vmatpush3.xpose.msk.msra.mxu1 %vm834_vm1, %v9028_v22  ;;  %7559 = vmatprep.mubr.msk.f32.mxu1 %vm8317_vm0, %v8315_v3 }
 0x232   :  { %7562 = vmatprep.subr.mxu1 %v8315_v3 }
 0x234   :  { %7560 = vmatmul.mubr.msk.f32.vlgmr.msra.gmra.mrb[16].mxu1 %vm834_vm1, %v9036_v23 }
 0x235   :  { %7563 = vmatpush3.xpose.msk.msra.mxu1 %vm834_vm1, %v8959_v5  ;;  %7564 = vmatprep.mubr.msk.f32.mxu1 %vm8317_vm0, %v8315_v3 }
 0x236   :  { %7572 = vmatprep.subr.mxu1 %v8315_v3 }
 0x238   :  { %7565 = vmatmul.mubr.msk.f32.vlgmr.msra.gmra.mrb[18].mxu1 %vm834_vm1, %v9045_v24 }
 0x239   :  { %7573 = vmatpush3.msk.msra.mxu1 %vm1528_vm2, %v8975_v10  ;;  %7574 = vmatprep.mubr.msk.f32.mxu1 %vm8317_vm0, %v8315_v3 }
 0x23a   :  { %7582 = vmatprep.subr.mxu1 %v8315_v3 }
 0x2f3   :  { %v906_v25 = vpop.f32.mrb[6].mxu1 }
 0x2f4   :  { %v7536_v26 = vpop.f32.mrb[7].mxu1  ;;  %v1436_v27 = vsel %vm1435_vm3, %v906_v25, -inf }
 0x2f5   :  { %1437 = vmax.xlane.f32.xlu0 %v1436_v27 }
 0x2f7   :  { %v981_v28 = vpop.f32.mrb[8].mxu1 }
 0x2f8   :  { %v7541_v29 = vpop.f32.mrb[9].mxu1  ;;  %v1439_v31 = vsel %vm1435_vm3, %v981_v28, -inf }
 0x2f9   :  { %1440 = vmax.xlane.f32.xlu1 %v1439_v31 }
 0x2fb   :  { %v1056_v32 = vpop.f32.mrb[10].mxu1 }
 0x2fc   :  { %v9057_v52 = vpop.f32.mrb[6].mxu0  ;;  %v7546_v56 = vpop.f32.mrb[11].mxu1  ;;  %v1442_v35 = vsel %vm1435_vm3, %v1056_v32, -inf }
 0x2fd   :  { %v7571_v36 = vpop.f32.mrb[7].mxu0  ;;  %1443 = vmax.xlane.f32.xlu0 %v1442_v35  ;;  %v1457_v51 = vsel %vm1435_vm3, %v9057_v52, -inf }
 0x2ff   :  { %v1131_v38 = vpop.f32.mrb[12].mxu1 }
 0x300   :  { %v7551_v39 = vpop.f32.mrb[13].mxu1  ;;  %v1445_v40 = vsel %vm1435_vm3, %v1131_v38, -inf }
 0x301   :  { %1446 = vmax.xlane.f32.xlu1 %v1445_v40 }
 0x303   :  { %v1206_v42 = vpop.f32.mrb[14].mxu1 }
 0x304   :  { %v7556_v43 = vpop.f32.mrb[15].mxu1  ;;  %v1448_v44 = vsel %vm1435_vm3, %v1206_v42, -inf }
 0x305   :  { %1449 = vmax.xlane.f32.xlu0 %v1448_v44 }
 0x307   :  { %v1281_v46 = vpop.f32.mrb[16].mxu1 }
 0x308   :  { %v7561_v30 = vpop.f32.mrb[17].mxu1  ;;  %v1451_v47 = vsel %vm1435_vm3, %v1281_v46, -inf }
 0x309   :  { %1452 = vmax.xlane.f32.xlu1 %v1451_v47 }
 0x30b   :  { %v9063_v48 = vpop.f32.mrb[18].mxu1 }
 0x30c   :  { %v7566_v49 = vpop.f32.mrb[19].mxu1  ;;  %v1454_v41 = vsel %vm1435_vm3, %v9063_v48, -inf }
 0x30d   :  { %1458 = vmax.xlane.f32.xlu1 %v1457_v51 }
 0x31b   :  { %2142 = vrot.lane.b32.xlu0 %v9069_v53, %s8318_s4 }
 0x31e   :  { %2234 = vrot.lane.b32.xlu1 %v9075_v54, %s8318_s4 }
 0x322   :  { %2133 = vrot.lane.b32.xlu1 %v9081_v59, %s8318_s4 }
 0x326   :  { %2225 = vrot.lane.b32.xlu1 %v9087_v45, %s8318_s4 }
 0x32a   :  { %2418 = vrot.lane.b32.xlu1 %v9093_v1, %s8318_s4 }
 0x33a   :  { %1455 = vmax.xlane.f32.xlu0 %v1454_v41 }
 0x350   :  { %2326 = vrot.lane.b32.xlu0 %v9101_v60, %s8318_s4 }
 0x382   :  { %v1438_v61 = vpop.xlane.xlu0 %1437 }
 0x383   :  { %v1460_v62 = vsub.f32 %v906_v25, %v1438_v61 }
 0x385   :  { %v1468_v63 = vmul.f32 1.442695, %v1460_v62 }
 0x386   :  { %v1441_v4 = vpop.xlane.xlu1 %1440 }
 0x387   :  { %8172 = vpow2.f32 %v1468_v63  ;;  %v1461_v7 = vsub.f32 %v981_v28, %v1441_v4  ;;  %v9136_v63 = vrot.slane %v8981_v13, %v8904_v12  ;;  %v9142_v4 = vrot.slane %v9003_v17, %v8904_v12 }
 0x388   :  { %v9157_v17 = vrot.slane %v9036_v23, %v8904_v12 }
 0x389   :  { %v1470_v11 = vmul.f32 1.442695, %v1461_v7 }
 0x38a   :  { %v1444_v14 = vpop.xlane.xlu0 %1443 }
 0x38b   :  { %8174 = vpow2.f32 %v1470_v11  ;;  %v1462_v18 = vsub.f32 %v1056_v32, %v1444_v14  ;;  %v9150_v11 = vrot.slane %v9028_v22, %v8904_v12  ;;  %v9169_v22 = vrot.slane %v8990_v15, %v8904_v12 }
 0x38c   :  { %v9185_v15 = vrot.slane %v9023_v21, %v8904_v12 }
 0x38d   :  { %v1472_v20 = vmul.f32 1.442695, %v1462_v18 }
 0x38e   :  { %v1447_v27 = vpop.xlane.xlu1 %1446 }
 0x38f   :  { %8176 = vpow2.f32 %v1472_v20  ;;  %v1463_v36 = vsub.f32 %v1131_v38, %v1447_v27  ;;  %v9163_v20 = vrot.slane %v8969_v9, %v8904_v12  ;;  %v9179_v9 = vrot.slane %v9011_v19, %v8904_v12 }
 0x390   :  { %v9191_v27 = vrot.slane %v8959_v5, %v8904_v12  ;;  %v9197_v19 = vrot.slane %v9045_v24, %v8904_v12  ;;  %v800_v24 = vcombine.high %v8965_v8, %v8965_v8 }
 0x391   :  { %v9105_v26 = vpop.eup %8172 }
 0x392   :  { %v1450_v6 = vpop.xlane.xlu0 %1449  ;;  %v1484_v29 = vsel %vm1435_vm3, %v9105_v26, 0.0 }
 0x393   :  { %v1464_v31 = vsub.f32 %v1206_v42, %v1450_v6  ;;  %1485 = vadd.xlane.f32.xlu0 %v1484_v29  ;;  %v1474_v42 = vmul.f32 1.442695, %v1463_v36 }
 0x395   :  { %v9109_v25 = vpop.eup %8174  ;;  %v1476_v56 = vmul.f32 1.442695, %v1464_v31 }
 0x396   :  { %v1453_v35 = vpop.xlane.xlu1 %1452  ;;  %v1487_v28 = vsel %vm1435_vm3, %v9109_v25, 0.0  ;;  %v9144_v7 = vpop.permute.xlu0 %2142 }
 0x397   :  { %8178 = vpow2.f32 %v1476_v56  ;;  %1488 = vadd.xlane.f32.xlu1 %v1487_v28  ;;  %v1465_v44 = vsub.f32 %v1281_v46, %v1453_v35 }
 0x399   :  { %v9113_v32 = vpop.eup %8176  ;;  %v1478_v49 = vmul.f32 1.442695, %v1465_v44 }
 0x39a   :  { %v1459_v39 = vpop.xlane.xlu1 %1458  ;;  %v1490_v40 = vsel %vm1435_vm3, %v9113_v32, 0.0 }
 0x39b   :  { %v1467_v43 = vsub.f32 %v9057_v52, %v1459_v39  ;;  %1491 = vadd.xlane.f32.xlu0 %v1490_v40  ;;  %v9215_v40 = vrot.slane %v800_v24, %v8904_v12 }
 0x39d   :  { %v1482_v30 = vmul.f32 1.442695, %v1467_v43 }
 0x39e   :  { %v9201_v6 = vpop.permute.xlu1 %2234 }
 0x39f   :  { %8180 = vpow2.f32 %v1482_v30 }
 0x3a0   :  { %8182 = vpow2.f32 %v1474_v42 }
 0x3a1   :  { %v9118_v47 = vpop.eup %8178  ;;  %8184 = vpow2.f32 %v1478_v49 }
 0x3a2   :  { %v1496_v51 = vsel %vm1435_vm3, %v9118_v47, 0.0  ;;  %v9203_v21 = vpop.permute.xlu1 %2133 }
 0x3a3   :  { %1497 = vadd.xlane.f32.xlu0 %v1496_v51 }
 0x3a6   :  { %v9205_v29 = vpop.permute.xlu1 %2225 }
 0x3a9   :  { %v9122_v38 = vpop.eup %8180 }
 0x3aa   :  { %v1505_v41 = vsel %vm1435_vm3, %v9122_v38, 0.0  ;;  %v9126_v52 = vpop.eup %8182  ;;  %v9209_v5 = vpop.permute.xlu1 %2418 }
 0x3ab   :  { %1506 = vadd.xlane.f32.xlu1 %v1505_v41  ;;  %v1493_v46 = vsel %vm1435_vm3, %v9126_v52, 0.0  ;;  %v9130_v61 = vpop.eup %8184 }
 0x3ac   :  { %v1499_v62 = vsel %vm1435_vm3, %v9130_v61, 0.0 }
 0x3af   :  { %1494 = vadd.xlane.f32.xlu1 %v1493_v46 }
 0x3b3   :  { %1500 = vadd.xlane.f32.xlu1 %v1499_v62 }
 0x3b9   :  { %2317 = vrot.lane.b32.xlu0 %v9136_v63, %s8318_s4 }
 0x3c4   :  { %2409 = vrot.lane.b32.xlu1 %v9142_v4, %s8318_s4 }
 0x3c7   :  { %v1456_v14 = vpop.xlane.xlu0 %1455 }
 0x3c8   :  { %v1466_v13 = vsub.f32 %v9063_v48, %v1456_v14  ;;  %2602 = vrot.lane.b32.xlu1 %v9150_v11, %s8318_s4 }
 0x3ca   :  { %v1480_v18 = vmul.f32 1.442695, %v1466_v13 }
 0x3cb   :  { %v9207_v31 = vpop.permute.xlu0 %2326 }
 0x3cc   :  { %8186 = vpow2.f32 %v1480_v18  ;;  %2593 = vrot.lane.b32.xlu1 %v9157_v17, %s8318_s4 }
 0x3d0   :  { %2786 = vrot.lane.b32.xlu1 %v9163_v20, %s8318_s4 }
 0x3d4   :  { %2777 = vrot.lane.b32.xlu1 %v9169_v22, %s8318_s4 }
 0x3d6   :  { %v9173_v23 = vpop.eup %8186 }
 0x3d7   :  { %v1502_v48 = vsel %vm1435_vm3, %v9173_v23, 0.0 }
 0x3d8   :  { %1503 = vadd.xlane.f32.xlu0 %v1502_v48 }
 0x3ee   :  { %2510 = vrot.lane.b32.xlu0 %v9179_v9, %s8318_s4 }
 0x3f2   :  { %2501 = vrot.lane.b32.xlu0 %v9185_v15, %s8318_s4 }
 0x3f6   :  { %2694 = vrot.lane.b32.xlu0 %v9191_v27, %s8318_s4 }
 0x3fa   :  { %2685 = vrot.lane.b32.xlu0 %v9197_v19, %s8318_s4 }
 0x420   :  { %v1486_v56 = vpop.xlane.xlu0 %1485 }
 0x421   :  { %8188 = vrcp.f32 %v1486_v56 }
 0x424   :  { %v1489_v35 = vpop.xlane.xlu1 %1488 }
 0x425   :  { %8190 = vrcp.f32 %v1489_v35 }
 0x428   :  { %v1492_v28 = vpop.xlane.xlu0 %1491 }
 0x429   :  { %8192 = vrcp.f32 %v1492_v28 }
 0x42b   :  { %v8189_v36 = vpop.eup %8188 }
 0x42c   :  { %v1516_v39 = vmul.f32 %v8189_v36, %v9105_v26  ;;  %v9226_v26 = vcombine.high %v9215_v40, %v9215_v40 }
 0x42e   :  { %7575 = vmatmul.mubr.msk.f32.vlgmr.msra.gmra.mrb[20].mxu1 %vm1524_vm4, %v1516_v39 }
 0x42f   :  { %v8191_v43 = vpop.eup %8190  ;;  %7583 = vmatpush3.msk.msra.mxu1 %vm1528_vm2, %v9215_v40  ;;  %7584 = vmatprep.mubr.msk.f32.mxu1 %vm8317_vm0, %v8315_v3 }
 0x430   :  { %v1498_v42 = vpop.xlane.xlu0 %1497  ;;  %v1517_v8 = vmul.f32 %v8191_v43, %v9109_v25  ;;  %7592 = vmatprep.subr.mxu1 %v8315_v3  ;;  %v9237_v25 = vrot.slane %v8937_v50, %v8904_v12 }
 0x431   :  { %8194 = vrcp.f32 %v1498_v42 }
 0x432   :  { %7580 = vmatmul.mubr.msk.f32.vlgmr.msra.gmra.mrb[8].mxu0 %vm1524_vm4, %v1517_v8  ;;  %v9260_v13 = vcombine.high %v9237_v25, %v9237_v25 }
 0x433   :  { %v8193_v44 = vpop.eup %8192  ;;  %7588 = vmatpush3.msk.msra.mxu0 %vm1528_vm2, %v9226_v26  ;;  %7589 = vmatprep.mubr.msk.f32.mxu0 %vm8317_vm0, %v8315_v3 }
 0x434   :  { %v1518_v30 = vmul.f32 %v8193_v44, %v9113_v32  ;;  %7597 = vmatprep.subr.mxu0 %v8315_v3  ;;  %v817_v32 = vcombine.high %v8937_v50, %v8937_v50 }
 0x436   :  { %7585 = vmatmul.mubr.msk.f32.vlgmr.msra.gmra.mrb[22].mxu1 %vm1524_vm4, %v1518_v30  ;;  %v9249_v62 = vrot.slane %v817_v32, %v8904_v12 }
 0x437   :  { %7593 = vmatpush3.msk.msra.mxu1 %vm1528_vm2, %v9237_v25  ;;  %7594 = vmatprep.mubr.msk.f32.mxu1 %vm8317_vm0, %v8315_v3 }
 0x438   :  { %v1507_v49 = vpop.xlane.xlu1 %1506  ;;  %7602 = vmatprep.subr.mxu1 %v8315_v3 }
 0x43b   :  { %v8195_v51 = vpop.eup %8194 }
 0x43c   :  { %v1495_v41 = vpop.xlane.xlu1 %1494  ;;  %v1520_v46 = vmul.f32 %v8195_v51, %v9118_v47 }
 0x43d   :  { %8196 = vrcp.f32 %v1495_v41 }
 0x43e   :  { %7595 = vmatmul.mubr.msk.f32.vlgmr.msra.gmra.mrb[24].mxu1 %vm1524_vm4, %v1520_v46 }
 0x43f   :  { %7603 = vmatpush3.msk.msra.mxu1 %vm1528_vm2, %v9249_v62  ;;  %7604 = vmatprep.mubr.msk.f32.mxu1 %vm8317_vm0, %v8315_v3 }
 0x440   :  { %v1501_v14 = vpop.xlane.xlu1 %1500  ;;  %7612 = vmatprep.subr.mxu1 %v8315_v3 }
 0x441   :  { %8198 = vrcp.f32 %v1501_v14 }
 0x442   :  { %8200 = vrcp.f32 %v1507_v49 }
 0x444   :  { %v2410_v48 = vpop.permute.xlu1 %2409 }
 0x447   :  { %v8197_v50 = vpop.eup %8196 }
 0x448   :  { %v1519_v47 = vmul.f32 %v8197_v50, %v9126_v52  ;;  %v9271_v52 = vcombine.high %v9249_v62, %v9249_v62  ;;  %v2603_v24 = vpop.permute.xlu1 %2602 }
 0x44a   :  { %7590 = vmatmul.mubr.msk.f32.vlgmr.msra.gmra.mrb[10].mxu0 %vm1524_vm4, %v1519_v47 }
 0x44b   :  { %v8199_v18 = vpop.eup %8198  ;;  %7598 = vmatpush3.msk.msra.mxu0 %vm1528_vm2, %v9260_v13  ;;  %7599 = vmatprep.mubr.msk.f32.mxu0 %vm8317_vm0, %v8315_v3 }
 0x44c   :  { %7607 = vmatprep.subr.mxu0 %v8315_v3  ;;  %v1521_v56 = vmul.f32 %v8199_v18, %v9130_v61  ;;  %v8201_v35 = vpop.eup %8200  ;;  %v2594_v61 = vpop.permute.xlu1 %2593 }
 0x44d   :  { %v1523_v28 = vmul.f32 %v8201_v35, %v9122_v38 }
 0x44e   :  { %7600 = vmatmul.mubr.msk.f32.vlgmr.msra.gmra.mrb[12].mxu0 %vm1524_vm4, %v1521_v56 }
 0x44f   :  { %7608 = vmatpush3.msk.msra.mxu0 %vm1528_vm2, %v9271_v52  ;;  %7609 = vmatprep.mubr.msk.f32.mxu0 %vm8317_vm0, %v8315_v3 }
 0x450   :  { %7617 = vmatprep.subr.mxu0 %v8315_v3  ;;  %v2787_v38 = vpop.permute.xlu1 %2786 }
 0x452   :  { %7610 = vmatmul.mubr.msk.f32.vlgmr.msra.gmra.mrb[14].mxu0 %vm1524_vm4, %v1523_v28 }
 0x453   :  { %7619 = vmatprep.mubr.msk.f32.mxu0 %vm8317_vm0, %v8315_v3 }
 0x456   :  { %7618 = vmatpush3.xpose.msk.msra.mxu0 %vm834_vm1, %v9201_v6  ;;  %v2318_v6 = vpop.permute.xlu0 %2317 }
 0x457   :  { %7627 = vmatprep.subr.mxu0 %v8315_v3 }
 0x459   :  { %7620 = vmatmul.mubr.msk.f32.vlgmr.msra.gmra.mrb[16].mxu0 %vm834_vm1, %v9205_v29  ;;  %v2778_v29 = vpop.permute.xlu1 %2777 }
 0x45a   :  { %7628 = vmatpush3.xpose.msk.msra.mxu0 %vm834_vm1, %v9209_v5  ;;  %7629 = vmatprep.mubr.msk.f32.mxu0 %vm8317_vm0, %v8315_v3 }
 0x45b   :  { %7637 = vmatprep.subr.mxu0 %v8315_v3 }
 0x45d   :  { %7630 = vmatmul.mubr.msk.f32.vlgmr.msra.gmra.mrb[18].mxu0 %vm834_vm1, %v2410_v48 }
 0x45e   :  { %7638 = vmatpush3.xpose.msk.msra.mxu0 %vm834_vm1, %v2603_v24  ;;  %7639 = vmatprep.mubr.msk.f32.mxu0 %vm8317_vm0, %v8315_v3 }
 0x45f   :  { %7647 = vmatprep.subr.mxu0 %v8315_v3 }
 0x461   :  { %7640 = vmatmul.mubr.msk.f32.vlgmr.msra.gmra.mrb[20].mxu0 %vm834_vm1, %v2594_v61 }
 0x462   :  { %7648 = vmatpush3.xpose.msk.msra.mxu0 %vm834_vm1, %v2787_v38  ;;  %7649 = vmatprep.mubr.msk.f32.mxu0 %vm8317_vm0, %v8315_v3 }
 0x463   :  { %7657 = vmatprep.subr.mxu0 %v8315_v3 }
 0x465   :  { %7650 = vmatmul.mubr.msk.f32.vlgmr.msra.gmra.mrb[22].mxu0 %vm834_vm1, %v2778_v29  ;;  %v1504_v5 = vpop.xlane.xlu0 %1503 }
 0x466   :  { %8202 = vrcp.f32 %v1504_v5  ;;  %7659 = vmatprep.mubr.msk.f32.mxu0 %vm8317_vm0, %v8315_v3 }
 0x469   :  { %v2511_v39 = vpop.permute.xlu0 %2510 }
 0x46d   :  { %v2502_v42 = vpop.permute.xlu0 %2501 }
 0x470   :  { %v8203_v36 = vpop.eup %8202 }
 0x471   :  { %v1522_v43 = vmul.f32 %v8203_v36, %v9173_v23 }
 0x473   :  { %7605 = vmatmul.mubr.msk.f32.vlgmr.msra.gmra.mrb[26].mxu1 %vm1524_vm4, %v1522_v43 }
 0x474   :  { %7613 = vmatpush3.xpose.msk.msra.mxu1 %vm834_vm1, %v9144_v7  ;;  %7614 = vmatprep.mubr.msk.f32.mxu1 %vm8317_vm0, %v8315_v3  ;;  %v2695_v7 = vpop.permute.xlu0 %2694 }
 0x475   :  { %7622 = vmatprep.subr.mxu1 %v8315_v3 }
 0x477   :  { %7615 = vmatmul.mubr.msk.f32.vlgmr.msra.gmra.mrb[28].mxu1 %vm834_vm1, %v9203_v21 }
 0x478   :  { %7623 = vmatpush3.xpose.msk.msra.mxu1 %vm834_vm1, %v9207_v31  ;;  %7624 = vmatprep.mubr.msk.f32.mxu1 %vm8317_vm0, %v8315_v3  ;;  %v2686_v23 = vpop.permute.xlu0 %2685 }
 0x479   :  { %7632 = vmatprep.subr.mxu1 %v8315_v3 }
 0x47b   :  { %7625 = vmatmul.mubr.msk.f32.vlgmr.msra.gmra.mrb[30].mxu1 %vm834_vm1, %v2318_v6 }
 0x47c   :  { %7633 = vmatpush3.xpose.msk.msra.mxu1 %vm834_vm1, %v2511_v39  ;;  %7634 = vmatprep.mubr.msk.f32.mxu1 %vm8317_vm0, %v8315_v3 }
 0x47d   :  { %7642 = vmatprep.subr.mxu1 %v8315_v3 }
 0x47f   :  { %7635 = vmatmul.mubr.msk.f32.vlgmr.msra.gmra.mrb[32].mxu1 %vm834_vm1, %v2502_v42 }
 0x480   :  { %7643 = vmatpush3.xpose.msk.msra.mxu1 %vm834_vm1, %v2695_v7  ;;  %7644 = vmatprep.mubr.msk.f32.mxu1 %vm8317_vm0, %v8315_v3 }
 0x481   :  { %7652 = vmatprep.subr.mxu1 %v8315_v3 }
 0x483   :  { %7645 = vmatmul.mubr.msk.f32.vlgmr.msra.gmra.mrb[34].mxu1 %vm834_vm1, %v2686_v23 }
 0x484   :  { %7654 = vmatprep.mubr.msk.f32.mxu1 %vm8317_vm0, %v8315_v3 }
 0x501   :  { %v1597_v21 = vpop.f32.mrb[20].mxu1 }
 0x502   :  { %v7576_v31 = vpop.f32.mrb[21].mxu1 }
 0x505   :  { %v1672_v8 = vpop.f32.mrb[8].mxu0 }
 0x506   :  { %v3751_v44 = vcombine.low %v1597_v21, %v1672_v8  ;;  %v7581_v30 = vpop.f32.mrb[9].mxu0 }
 0x508   :  { %v9334_v47 = vrot.slane %v3751_v44, %v8904_v12 }
 0x509   :  { %v1747_v49 = vpop.f32.mrb[22].mxu1 }
 0x50a   :  { %v7586_v32 = vpop.f32.mrb[23].mxu1 }
 0x50b   :  { %v9360_v32 = vrot.slane %v8995_v16, %v8904_v12 }
 0x511   :  { %v1897_v51 = vpop.f32.mrb[24].mxu1 }
 0x512   :  { %v7596_v41 = vpop.f32.mrb[25].mxu1 }
 0x51d   :  { %v1822_v46 = vpop.f32.mrb[10].mxu0 }
 0x51e   :  { %v3752_v14 = vcombine.low %v1747_v49, %v1822_v46  ;;  %v7591_v50 = vpop.f32.mrb[11].mxu0 }
 0x51f   :  { %v9369_v50 = vrot.slane %v9215_v40, %v8904_v12 }
 0x520   :  { %v9337_v18 = vrot.slane %v3752_v14, %v8904_v12 }
 0x521   :  { %v1972_v48 = vpop.f32.mrb[12].mxu0 }
 0x522   :  { %v3767_v56 = vcombine.low %v9334_v47, %v9337_v18  ;;  %v3768_v35 = vcombine.low %v1897_v51, %v1972_v48  ;;  %v7601_v28 = vpop.f32.mrb[13].mxu0 }
 0x523   :  { %v9376_v28 = vrot.slane %v9226_v26, %v8904_v12 }
 0x524   :  { %v9353_v30 = vrot.slane %v3768_v35, %v8904_v12 }
 0x525   :  { %v2122_v24 = vpop.f32.mrb[14].mxu0 }
 0x526   :  { %v7611_v61 = vpop.f32.mrb[15].mxu0 }
 0x52c   :  { %v2306_v38 = vpop.f32.mrb[16].mxu0 }
 0x52d   :  { %v7621_v6 = vpop.f32.mrb[17].mxu0  ;;  %v2865_v29 = vsel %vm1435_vm3, %v2306_v38, -inf }
 0x52e   :  { %2866 = vmax.xlane.f32.xlu1 %v2865_v29  ;;  %v9384_v6 = vrot.slane %v9260_v13, %v8904_v12  ;;  %v9398_v13 = vrot.slane %v9237_v25, %v8904_v12 }
 0x530   :  { %v9342_v5 = vpop.f32.mrb[18].mxu0 }
 0x531   :  { %v7631_v36 = vpop.f32.mrb[19].mxu0  ;;  %v2871_v40 = vsel %vm1435_vm3, %v9342_v5, -inf }
 0x534   :  { %v9344_v39 = vpop.f32.mrb[20].mxu0 }
 0x535   :  { %v7641_v43 = vpop.f32.mrb[21].mxu0  ;;  %v2877_v42 = vsel %vm1435_vm3, %v9344_v39, -inf }
 0x536   :  { %2878 = vmax.xlane.f32.xlu1 %v2877_v42  ;;  %v9392_v42 = vrot.slane %v8975_v10, %v8904_v12 }
 0x538   :  { %v9348_v7 = vpop.f32.mrb[22].mxu0 }
 0x539   :  { %v7651_v23 = vpop.f32.mrb[23].mxu0  ;;  %v2883_v21 = vsel %vm1435_vm3, %v9348_v7, -inf }
 0x53a   :  { %2884 = vmax.xlane.f32.xlu1 %v2883_v21 }
 0x546   :  { %v2047_v31 = vpop.f32.mrb[26].mxu1 }
 0x547   :  { %v3769_v8 = vcombine.low %v2047_v31, %v2122_v24  ;;  %v7606_v44 = vpop.f32.mrb[27].mxu1 }
 0x549   :  { %v9356_v49 = vrot.slane %v3769_v8, %v8904_v12 }
 0x54a   :  { %v2214_v51 = vpop.f32.mrb[28].mxu1 }
 0x54b   :  { %v3784_v41 = vcombine.low %v9353_v30, %v9356_v49  ;;  %3041 = vrot.lane.b32.xlu1 %v9360_v32, %s8318_s4  ;;  %v7616_v46 = vpop.f32.mrb[29].mxu1  ;;  %v2862_v14 = vsel %vm1435_vm3, %v2214_v51, -inf }
 0x54c   :  { %2863 = vmax.xlane.f32.xlu0 %v2862_v14 }
 0x54e   :  { %v2398_v48 = vpop.f32.mrb[30].mxu1 }
 0x54f   :  { %3125 = vrot.lane.b32.xlu1 %v9369_v50, %s8318_s4  ;;  %v7626_v16 = vpop.f32.mrb[31].mxu1  ;;  %v2868_v35 = vsel %vm1435_vm3, %v2398_v48, -inf }
 0x550   :  { %2869 = vmax.xlane.f32.xlu0 %v2868_v35 }
 0x552   :  { %v2582_v24 = vpop.f32.mrb[32].mxu1 }
 0x553   :  { %3209 = vrot.lane.b32.xlu1 %v9376_v28, %s8318_s4  ;;  %v7636_v61 = vpop.f32.mrb[33].mxu1  ;;  %v2874_v26 = vsel %vm1435_vm3, %v2582_v24, -inf }
 0x554   :  { %2872 = vmax.xlane.f32.xlu0 %v2871_v40 }
 0x556   :  { %v2766_v29 = vpop.f32.mrb[34].mxu1 }
 0x557   :  { %3377 = vrot.lane.b32.xlu1 %v9384_v6, %s8318_s4  ;;  %v7646_v36 = vpop.f32.mrb[35].mxu1  ;;  %v2880_v43 = vsel %vm1435_vm3, %v2766_v29, -inf }
 0x558   :  { %2875 = vmax.xlane.f32.xlu0 %v2874_v26 }
 0x55c   :  { %2881 = vmax.xlane.f32.xlu0 %v2880_v43 }
 0x572   :  { %2957 = vrot.lane.b32.xlu0 %v9392_v42, %s8318_s4 }
 0x576   :  { %3293 = vrot.lane.b32.xlu0 %v9398_v13, %s8318_s4 }
 0x5bb   :  { %v2867_v23 = vpop.xlane.xlu1 %2866 }
 0x5bc   :  { %v2887_v21 = vsub.f32 %v2306_v38, %v2867_v23 }
 0x5be   :  { %v2896_v31 = vmul.f32 1.442695, %v2887_v21 }
 0x5c0   :  { %8204 = vpow2.f32 %v2896_v31 }
 0x5c3   :  { %v2879_v8 = vpop.xlane.xlu1 %2878 }
 0x5c4   :  { %v2891_v40 = vsub.f32 %v9344_v39, %v2879_v8 }
 0x5c6   :  { %v2904_v23 = vmul.f32 1.442695, %v2891_v40 }
 0x5c7   :  { %v2885_v44 = vpop.xlane.xlu1 %2884 }
 0x5c8   :  { %v2893_v21 = vsub.f32 %v9348_v7, %v2885_v44 }
 0x5ca   :  { %v9402_v46 = vpop.eup %8204 }
 0x5cb   :  { %v3042_v10 = vpop.permute.xlu1 %3041  ;;  %v2913_v14 = vsel %vm1435_vm3, %v9402_v46, 0.0 }
 0x5cc   :  { %2914 = vadd.xlane.f32.xlu1 %v2913_v14  ;;  %7658 = vmatpush3.msk.msra.mxu0 %vm1528_vm2, %v3042_v10 }
 0x5cd   :  { %7667 = vmatprep.subr.mxu0 %v8315_v3 }
 0x5d9   :  { %v2864_v25 = vpop.xlane.xlu0 %2863 }
 0x5da   :  { %v2886_v16 = vsub.f32 %v2214_v51, %v2864_v25  ;;  %v2908_v51 = vmul.f32 1.442695, %v2893_v21  ;;  %v9443_v21 = vrot.slane %v9271_v52, %v8904_v12 }
 0x5dc   :  { %v2894_v35 = vmul.f32 1.442695, %v2886_v16 }
 0x5dd   :  { %v2870_v61 = vpop.xlane.xlu0 %2869 }
 0x5de   :  { %8206 = vpow2.f32 %v2894_v35  ;;  %v2888_v38 = vsub.f32 %v2398_v48, %v2870_v61 }
 0x5e0   :  { %v2898_v36 = vmul.f32 1.442695, %v2888_v38 }
 0x5e1   :  { %v2873_v26 = vpop.xlane.xlu0 %2872 }
 0x5e2   :  { %8208 = vpow2.f32 %v2898_v36  ;;  %v2889_v43 = vsub.f32 %v9342_v5, %v2873_v26 }
 0x5e4   :  { %v2900_v31 = vmul.f32 1.442695, %v2889_v43 }
 0x5e5   :  { %v2876_v10 = vpop.xlane.xlu0 %2875 }
 0x5e6   :  { %8210 = vpow2.f32 %v2900_v31  ;;  %v2890_v14 = vsub.f32 %v2582_v24, %v2876_v10  ;;  %v9449_v31 = vrot.slane %v9249_v62, %v8904_v12  ;;  %v3126_v62 = vpop.permute.xlu1 %3125 }
 0x5e7   :  { %8212 = vpow2.f32 %v2904_v23 }
 0x5e8   :  { %v9411_v37 = vpop.eup %8206  ;;  %v2902_v25 = vmul.f32 1.442695, %v2890_v14 }
 0x5e9   :  { %v2882_v48 = vpop.xlane.xlu0 %2881  ;;  %v2910_v39 = vsel %vm1435_vm3, %v9411_v37, 0.0 }
 0x5ea   :  { %8214 = vpow2.f32 %v2902_v25  ;;  %v2892_v8 = vsub.f32 %v2766_v29, %v2882_v48  ;;  %2911 = vadd.xlane.f32.xlu0 %v2910_v39  ;;  %v3210_v52 = vpop.permute.xlu1 %3209 }
 0x5eb   :  { %8216 = vpow2.f32 %v2908_v51 }
 0x5ec   :  { %v9415_v5 = vpop.eup %8208  ;;  %v2906_v7 = vmul.f32 1.442695, %v2892_v8 }
 0x5ed   :  { %v2958_v44 = vpop.permute.xlu0 %2957  ;;  %v2916_v24 = vsel %vm1435_vm3, %v9415_v5, 0.0 }
 0x5ee   :  { %8218 = vpow2.f32 %v2906_v7  ;;  %2917 = vadd.xlane.f32.xlu0 %v2916_v24  ;;  %7653 = vmatpush3.msk.msra.mxu1 %vm1528_vm2, %v2958_v44  ;;  %v3378_v10 = vpop.permute.xlu1 %3377 }
 0x5ef   :  { %7662 = vmatprep.subr.mxu1 %v8315_v3 }
 0x5f0   :  { %v9421_v16 = vpop.eup %8210 }
 0x5f1   :  { %v2919_v29 = vsel %vm1435_vm3, %v9421_v16, 0.0  ;;  %v9425_v35 = vpop.eup %8212  ;;  %v3294_v48 = vpop.permute.xlu0 %3293 }
 0x5f2   :  { %2920 = vadd.xlane.f32.xlu1 %v2919_v29  ;;  %v2925_v40 = vsel %vm1435_vm3, %v9425_v35, 0.0 }
 0x5f4   :  { %v9427_v61 = vpop.eup %8214 }
 0x5f5   :  { %v2922_v38 = vsel %vm1435_vm3, %v9427_v61, 0.0  ;;  %v9433_v36 = vpop.eup %8216 }
 0x5f6   :  { %2923 = vadd.xlane.f32.xlu0 %v2922_v38  ;;  %2926 = vadd.xlane.f32.xlu1 %v2925_v40  ;;  %v2931_v23 = vsel %vm1435_vm3, %v9433_v36, 0.0 }
 0x5f8   :  { %v9435_v26 = vpop.eup %8218 }
 0x5f9   :  { %v2928_v43 = vsel %vm1435_vm3, %v9435_v26, 0.0 }
 0x5fa   :  { %2929 = vadd.xlane.f32.xlu0 %v2928_v43  ;;  %2932 = vadd.xlane.f32.xlu1 %v2931_v23 }
 0x60b   :  { %3545 = vrot.lane.b32.xlu1 %v9443_v21, %s8318_s4 }
 0x60f   :  { %3864 = vrot.lane.b32.xlu1 %v9081_v59, %s8319_s25 }
 0x610   :  { %3461 = vrot.lane.b32.xlu0 %v9449_v31, %s8318_s4 }
 0x613   :  { %3942 = vrot.lane.b32.xlu1 %v9087_v45, %s8319_s25 }
 0x614   :  { %3866 = vrot.lane.b32.xlu0 %v9069_v53, %s8319_s25 }
 0x617   :  { %4020 = vrot.lane.b32.xlu1 %v9136_v63, %s8319_s25 }
 0x618   :  { %3944 = vrot.lane.b32.xlu0 %v9075_v54, %s8319_s25 }
 0x61b   :  { %4098 = vrot.lane.b32.xlu1 %v9142_v4, %s8319_s25 }
 0x61c   :  { %4022 = vrot.lane.b32.xlu0 %v9101_v60, %s8319_s25 }
 0x61f   :  { %4256 = vrot.lane.b32.xlu1 %v9150_v11, %s8319_s25 }
 0x620   :  { %4100 = vrot.lane.b32.xlu0 %v9093_v1, %s8319_s25 }
 0x623   :  { %4254 = vrot.lane.b32.xlu1 %v9157_v17, %s8319_s25 }
 0x624   :  { %4178 = vrot.lane.b32.xlu0 %v9179_v9, %s8319_s25 }
 0x627   :  { %4412 = vrot.lane.b32.xlu1 %v9163_v20, %s8319_s25 }
 0x628   :  { %4176 = vrot.lane.b32.xlu0 %v9185_v15, %s8319_s25 }
 0x62b   :  { %4410 = vrot.lane.b32.xlu1 %v9169_v22, %s8319_s25 }
 0x62c   :  { %4334 = vrot.lane.b32.xlu0 %v9191_v27, %s8319_s25 }
 0x630   :  { %4332 = vrot.lane.b32.xlu0 %v9197_v19, %s8319_s25 }
 0x659   :  { %v2915_v14 = vpop.xlane.xlu1 %2914 }
 0x65a   :  { %8220 = vrcp.f32 %v2915_v14 }
 0x664   :  { %v8221_v51 = vpop.eup %8220 }
 0x665   :  { %v2943_v25 = vmul.f32 %v8221_v51, %v9402_v46 }
 0x667   :  { %7660 = vmatmul.mubr.msk.f32.vlgmr.msra.gmra.mrb[24].mxu0 %vm1524_vm4, %v2943_v25 }
 0x668   :  { %7668 = vmatpush3.msk.msra.mxu0 %vm1528_vm2, %v3210_v52  ;;  %7669 = vmatprep.mubr.msk.f32.mxu0 %vm8317_vm0, %v8315_v3 }
 0x669   :  { %7677 = vmatprep.subr.mxu0 %v8315_v3 }
 0x677   :  { %v2912_v39 = vpop.xlane.xlu0 %2911 }
 0x678   :  { %8222 = vrcp.f32 %v2912_v39 }
 0x67b   :  { %v2918_v8 = vpop.xlane.xlu0 %2917 }
 0x67c   :  { %8224 = vrcp.f32 %v2918_v8 }
 0x67f   :  { %v2921_v7 = vpop.xlane.xlu1 %2920 }
 0x680   :  { %8226 = vrcp.f32 %v2921_v7 }
 0x682   :  { %v8223_v44 = vpop.eup %8222 }
 0x683   :  { %v2942_v24 = vmul.f32 %v8223_v44, %v9411_v37  ;;  %v2924_v46 = vpop.xlane.xlu0 %2923  ;;  %v2927_v29 = vpop.xlane.xlu1 %2926 }
 0x684   :  { %8228 = vrcp.f32 %v2924_v46 }
 0x685   :  { %8230 = vrcp.f32 %v2927_v29  ;;  %7655 = vmatmul.mubr.msk.f32.vlgmr.msra.gmra.mrb[36].mxu1 %vm1524_vm4, %v2942_v24 }
 0x686   :  { %v8225_v38 = vpop.eup %8224  ;;  %7663 = vmatpush3.msk.msra.mxu1 %vm1528_vm2, %v3126_v62  ;;  %7664 = vmatprep.mubr.msk.f32.mxu1 %vm8317_vm0, %v8315_v3 }
 0x687   :  { %v2944_v40 = vmul.f32 %v8225_v38, %v9415_v5  ;;  %v2930_v43 = vpop.xlane.xlu0 %2929  ;;  %v2933_v23 = vpop.xlane.xlu1 %2932  ;;  %7672 = vmatprep.subr.mxu1 %v8315_v3 }
 0x688   :  { %8232 = vrcp.f32 %v2930_v43 }
 0x689   :  { %8234 = vrcp.f32 %v2933_v23  ;;  %7665 = vmatmul.mubr.msk.f32.vlgmr.msra.gmra.mrb[38].mxu1 %vm1524_vm4, %v2944_v40  ;;  %v697_v23 = vld [vmem:[%s10159_s5 + $0x20] sm:$0xff] }
 0x68a   :  { %v8227_v37 = vpop.eup %8226  ;;  %7673 = vmatpush3.msk.msra.mxu1 %vm1528_vm2, %v3294_v48  ;;  %7674 = vmatprep.mubr.msk.f32.mxu1 %vm8317_vm0, %v8315_v3 }
 0x68b   :  { %v2945_v62 = vmul.f32 %v8227_v37, %v9421_v16  ;;  %v3546_v52 = vpop.permute.xlu1 %3545  ;;  %7682 = vmatprep.subr.mxu1 %v8315_v3  ;;  %v3462_v5 = vpop.permute.xlu0 %3461  ;;  %v698_v37 = vld [vmem:[%s10159_s5 + $0x28] sm:$0xff] }
 0x68d   :  { %7670 = vmatmul.mubr.msk.f32.vlgmr.msra.gmra.mrb[26].mxu0 %vm1524_vm4, %v2945_v62  ;;  %v8056_v62 = vpack.c.bf16 %v698_v37, %v697_v23 }
 0x68e   :  { %v8229_v14 = vpop.eup %8228  ;;  %7678 = vmatpush3.msk.msra.mxu0 %vm1528_vm2, %v3378_v10  ;;  %7679 = vmatprep.mubr.msk.f32.mxu0 %vm8317_vm0, %v8315_v3 }
 0x68f   :  { %v8231_v51 = vpop.eup %8230  ;;  %v2946_v25 = vmul.f32 %v8229_v14, %v9427_v61  ;;  %v3865_v48 = vpop.permute.xlu1 %3864  ;;  %7687 = vmatprep.subr.mxu0 %v8315_v3  ;;  %v693_v14 = vld [vmem:[%s10159_s5] sm:$0xff] }
 0x690   :  { %v2947_v16 = vmul.f32 %v8231_v51, %v9425_v35  ;;  %v3867_v7 = vpop.permute.xlu0 %3866 }
 0x691   :  { %7675 = vmatmul.mubr.msk.f32.vlgmr.msra.gmra.mrb[40].mxu1 %vm1524_vm4, %v2946_v25  ;;  %v694_v25 = vld [vmem:[%s10159_s5 + $0x8] sm:$0xff] }
 0x692   :  { %v8233_v39 = vpop.eup %8232  ;;  %7680 = vmatmul.mubr.msk.f32.vlgmr.msra.gmra.mrb[28].mxu0 %vm1524_vm4, %v2947_v16  ;;  %7683 = vmatpush3.msk.msra.mxu1 %vm1528_vm2, %v3462_v5  ;;  %v700_v5 = vld [vmem:[%s10159_s5 + $0x38] sm:$0xff] }
 0x693   :  { %v8235_v8 = vpop.eup %8234  ;;  %v2948_v10 = vmul.f32 %v8233_v39, %v9435_v26  ;;  %7688 = vmatpush3.msk.msra.mxu0 %vm1528_vm2, %v3546_v52  ;;  %v3943_v44 = vpop.permute.xlu1 %3942  ;;  %7684 = vmatprep.mubr.msk.f32.mxu1 %vm8317_vm0, %v8315_v3  ;;  %v699_v52 = vld [vmem:[%s10159_s5 + $0x30] sm:$0xff] }
 0x694   :  { %v2949_v61 = vmul.f32 %v8235_v8, %v9433_v36  ;;  %7689 = vmatprep.mubr.msk.f32.mxu0 %vm8317_vm0, %v8315_v3  ;;  %7714 = vmatprep.subr.mxu0 %v8315_v3  ;;  %v3945_v26 = vpop.permute.xlu0 %3944  ;;  %v8060_v51 = vpack.c.bf16 %v700_v5, %v699_v52 }
 0x695   :  { %7685 = vmatmul.mubr.msk.f32.vlgmr.msra.gmra.mrb[42].mxu1 %vm1524_vm4, %v2948_v10  ;;  %8057 = vmatprep.subr.bf16.mxu1 %v8056_v62 }
 0x696   :  { %7690 = vmatmul.mubr.msk.f32.vlgmr.msra.gmra.mrb[30].mxu0 %vm1524_vm4, %v2949_v61  ;;  %8059 = vmatpush3.bf16.msra.mxu1 %v8056_v62 }
 0x697   :  { %v4021_v35 = vpop.permute.xlu1 %4020  ;;  %7716 = vmatprep.mubr.msk.f32.mxu0 %vm8317_vm0, %v8315_v3  ;;  %8061 = vmatprep.subr.bf16.mxu1 %v8060_v51 }
 0x698   :  { %v4023_v36 = vpop.permute.xlu0 %4022 }
 0x69a   :  { %7715 = vmatpush3.xpose.msk.msra.mxu0 %vm834_vm1, %v3867_v7  ;;  %8063 = vmatpush3.bf16.msra.mxu1 %v8060_v51 }
 0x69b   :  { %7719 = vmatprep.subr.mxu0 %v8315_v3  ;;  %v4099_v24 = vpop.permute.xlu1 %4098 }
 0x69c   :  { %v4101_v38 = vpop.permute.xlu0 %4100 }
 0x69d   :  { %7717 = vmatmul.mubr.msk.f32.vlgmr.msra.gmra.mrb[32].mxu0 %vm834_vm1, %v3865_v48  ;;  %v8064_v48 = vpack.c.bf16 %v694_v25, %v693_v14  ;;  %v695_v25 = vld [vmem:[%s10159_s5 + $0x10] sm:$0xff] }
 0x69e   :  { %7720 = vmatpush3.xpose.msk.msra.mxu0 %vm834_vm1, %v3945_v26  ;;  %7721 = vmatprep.mubr.msk.f32.mxu0 %vm8317_vm0, %v8315_v3 }
 0x69f   :  { %7724 = vmatprep.subr.mxu0 %v8315_v3  ;;  %v4257_v46 = vpop.permute.xlu1 %4256  ;;  %8065 = vmatprep.subr.bf16.mxu1 %v8064_v48 }
 0x6a1   :  { %7722 = vmatmul.mubr.msk.f32.vlgmr.msra.gmra.mrb[34].mxu0 %vm834_vm1, %v3943_v44 }
 0x6a2   :  { %7725 = vmatpush3.xpose.msk.msra.mxu0 %vm834_vm1, %v4023_v36  ;;  %7726 = vmatprep.mubr.msk.f32.mxu0 %vm8317_vm0, %v8315_v3 }
 0x6a3   :  { %7729 = vmatprep.subr.mxu0 %v8315_v3  ;;  %v4255_v29 = vpop.permute.xlu1 %4254 }
 0x6a5   :  { %7727 = vmatmul.mubr.msk.f32.vlgmr.msra.gmra.mrb[36].mxu0 %vm834_vm1, %v4021_v35 }
 0x6a6   :  { %7730 = vmatpush3.xpose.msk.msra.mxu0 %vm834_vm1, %v4101_v38  ;;  %7731 = vmatprep.mubr.msk.f32.mxu0 %vm8317_vm0, %v8315_v3 }
 0x6a7   :  { %7739 = vmatprep.subr.mxu0 %v8315_v3  ;;  %v4413_v40 = vpop.permute.xlu1 %4412 }
 0x6a9   :  { %7732 = vmatmul.mubr.msk.f32.vlgmr.msra.gmra.mrb[38].mxu0 %vm834_vm1, %v4099_v24 }
 0x6aa   :  { %7740 = vmatpush3.xpose.msk.msra.mxu0 %vm834_vm1, %v4257_v46  ;;  %7741 = vmatprep.mubr.msk.f32.mxu0 %vm8317_vm0, %v8315_v3 }
 0x6ab   :  { %7749 = vmatprep.subr.mxu0 %v8315_v3  ;;  %v4411_v43 = vpop.permute.xlu1 %4410 }
 0x6ad   :  { %7742 = vmatmul.mubr.msk.f32.vlgmr.msra.gmra.mrb[40].mxu0 %vm834_vm1, %v4255_v29 }
 0x6ae   :  { %7750 = vmatpush3.xpose.msk.msra.mxu0 %vm834_vm1, %v4413_v40  ;;  %7751 = vmatprep.mubr.msk.f32.mxu0 %vm8317_vm0, %v8315_v3 }
 0x6af   :  { %7759 = vmatprep.subr.mxu0 %v8315_v3 }
 0x6b1   :  { %7752 = vmatmul.mubr.msk.f32.vlgmr.msra.gmra.mrb[42].mxu0 %vm834_vm1, %v4411_v43 }
 0x6b2   :  { %7761 = vmatprep.mubr.msk.f32.mxu0 %vm8317_vm0, %v8315_v3 }
 0x73a   :  { %v3114_v16 = vpop.f32.mrb[24].mxu0 }
 0x73b   :  { %v7661_v39 = vpop.f32.mrb[25].mxu0 }
 0x758   :  { %v3030_v8 = vpop.f32.mrb[36].mxu1 }
 0x759   :  { %v3630_v10 = vcombine.low %v3030_v8, %v3114_v16  ;;  %v7656_v7 = vpop.f32.mrb[37].mxu1  ;;  %v696_v16 = vld [vmem:[%s10159_s5 + $0x18] sm:$0xff] }
 0x75a   :  { %v8068_v7 = vpack.c.bf16 %v696_v16, %v695_v25 }
 0x75b   :  { %v3638_v36 = vrot.slane %v3630_v10, %v8904_v12 }
 0x75c   :  { %v3198_v44 = vpop.f32.mrb[38].mxu1 }
 0x75d   :  { %v7666_v61 = vpop.f32.mrb[39].mxu1 }
 0x760   :  { %v3282_v35 = vpop.f32.mrb[26].mxu0 }
 0x761   :  { %v3631_v26 = vcombine.low %v3198_v44, %v3282_v35  ;;  %v7671_v24 = vpop.f32.mrb[27].mxu0 }
 0x763   :  { %v3645_v46 = vrot.slane %v3631_v26, %v8904_v12  ;;  %v4179_v26 = vpop.permute.xlu0 %4178 }
 0x764   :  { %v3366_v29 = vpop.f32.mrb[40].mxu1 }
 0x765   :  { %v3646_v38 = vcombine.low %v3638_v36, %v3645_v46  ;;  %v3450_v40 = vpop.f32.mrb[28].mxu0  ;;  %v7676_v43 = vpop.f32.mrb[41].mxu1 }
 0x766   :  { %v3647_v23 = vcombine.low %v3366_v29, %v3450_v40  ;;  %v7681_v37 = vpop.f32.mrb[29].mxu0 }
 0x767   :  { %7700 = vmatprep.mubr.msk.f32.mxu1 %vm834_vm1, %v3646_v38 }
 0x768   :  { %v3534_v62 = vpop.f32.mrb[42].mxu1  ;;  %v3655_v39 = vrot.slane %v3647_v23, %v8904_v12 }
 0x769   :  { %v3618_v52 = vpop.f32.mrb[30].mxu0  ;;  %v7686_v5 = vpop.f32.mrb[43].mxu1 }
 0x76a   :  { %v3648_v14 = vcombine.low %v3534_v62, %v3618_v52  ;;  %v7691_v51 = vpop.f32.mrb[31].mxu0 }
 0x76c   :  { %v3662_v8 = vrot.slane %v3648_v14, %v8904_v12 }
 0x76e   :  { %v3663_v10 = vcombine.low %v3655_v39, %v3662_v8 }
 0x770   :  { %v9585_v44 = vpop.f32.mrb[32].mxu0  ;;  %7701 = vmatmul.mubr.msk.f32.vlgmr.msra.gmra.mrb[44].mxu1 %vm834_vm1, %v3663_v10 }
 0x771   :  { %8067 = vmatpush3.bf16.msra.mxu1 %v8064_v48  ;;  %v7718_v61 = vpop.f32.mrb[33].mxu0  ;;  %7711 = vmatprep.mubr.msk.f32.mxu1 %vm834_vm1, %v3767_v56  ;;  %v4488_v35 = vsel %vm1435_vm3, %v9585_v44, -inf  ;;  %v4177_v48 = vpop.permute.xlu0 %4176 }
 0x772   :  { %4489 = vmax.xlane.f32.xlu0 %v4488_v35  ;;  %8069 = vmatprep.subr.bf16.mxu1 %v8068_v7 }
 0x774   :  { %v4016_v24 = vpop.f32.mrb[34].mxu0 }
 0x775   :  { %8071 = vmatpush3.bf16.msra.mxu1 %v8068_v7  ;;  %v7723_v36 = vpop.f32.mrb[35].mxu0  ;;  %v4491_v46 = vsel %vm1435_vm3, %v4016_v24, -inf  ;;  %v4335_v43 = vpop.permute.xlu0 %4334 }
 0x776   :  { %4492 = vmax.xlane.f32.xlu1 %v4491_v46  ;;  %7734 = vmatprep.subr.mxu1 %v8315_v3 }
 0x778   :  { %v9596_v29 = vpop.f32.mrb[36].mxu0  ;;  %7712 = vmatmul.mubr.msk.f32.vlgmr.msra.gmra.mrb[44].mxu1 %vm834_vm1, %v3784_v41 }
 0x779   :  { %v7728_v47 = vpop.f32.mrb[37].mxu0  ;;  %v4494_v18 = vsel %vm1435_vm3, %v9596_v29, -inf  ;;  %7736 = vmatprep.mubr.msk.f32.mxu1 %vm8317_vm0, %v8315_v3  ;;  %v4333_v23 = vpop.permute.xlu0 %4332 }
 0x77a   :  { %4495 = vmax.xlane.f32.xlu0 %v4494_v18 }
 0x77c   :  { %v4172_v56 = vpop.f32.mrb[38].mxu0 }
 0x77d   :  { %v7733_v38 = vpop.f32.mrb[39].mxu0  ;;  %v4497_v40 = vsel %vm1435_vm3, %v4172_v56, -inf }
 0x77e   :  { %7735 = vmatpush3.xpose.msk.msra.mxu1 %vm834_vm1, %v4179_v26  ;;  %4498 = vmax.xlane.f32.xlu0 %v4497_v40 }
 0x77f   :  { %7744 = vmatprep.subr.mxu1 %v8315_v3 }
 0x780   :  { %v4328_v30 = vpop.f32.mrb[40].mxu0 }
 0x781   :  { %7737 = vmatmul.mubr.msk.f32.vlgmr.msra.gmra.mrb[46].mxu1 %vm834_vm1, %v4177_v48  ;;  %v7743_v49 = vpop.f32.mrb[41].mxu0  ;;  %v4503_v41 = vsel %vm1435_vm3, %v4328_v30, -inf }
 0x782   :  { %7745 = vmatpush3.xpose.msk.msra.mxu1 %vm834_vm1, %v4335_v43  ;;  %4504 = vmax.xlane.f32.xlu1 %v4503_v41 }
 0x783   :  { %7746 = vmatprep.mubr.msk.f32.mxu1 %vm8317_vm0, %v8315_v3  ;;  %7754 = vmatprep.subr.mxu1 %v8315_v3 }
 0x784   :  { %v4484_v37 = vpop.f32.mrb[42].mxu0 }
 0x785   :  { %7747 = vmatmul.mubr.msk.f32.vlgmr.msra.gmra.mrb[48].mxu1 %vm834_vm1, %v4333_v23  ;;  %v7753_v62 = vpop.f32.mrb[43].mxu0  ;;  %v4509_v52 = vsel %vm1435_vm3, %v4484_v37, -inf }
 0x786   :  { %4510 = vmax.xlane.f32.xlu1 %v4509_v52  ;;  %7756 = vmatprep.mubr.msk.f32.mxu1 %vm8317_vm0, %v8315_v3 }
 0x7ff   :  { %v4490_v5 = vpop.xlane.xlu0 %4489 }
 0x800   :  { %v4512_v14 = vsub.f32 %v9585_v44, %v4490_v5 }
 0x803   :  { %v4493_v51 = vpop.xlane.xlu1 %4492 }
 0x804   :  { %v4513_v25 = vsub.f32 %v4016_v24, %v4493_v51 }
 0x806   :  { %v4522_v16 = vmul.f32 1.442695, %v4513_v25 }
 0x807   :  { %v4496_v39 = vpop.xlane.xlu0 %4495 }
 0x808   :  { %8236 = vpow2.f32 %v4522_v16  ;;  %v4514_v8 = vsub.f32 %v9596_v29, %v4496_v39 }
 0x80a   :  { %v4524_v49 = vmul.f32 1.442695, %v4514_v8 }
 0x80b   :  { %v4499_v10 = vpop.xlane.xlu0 %4498 }
 0x80c   :  { %v4515_v7 = vsub.f32 %v4172_v56, %v4499_v10 }
 0x80e   :  { %v4526_v61 = vmul.f32 1.442695, %v4515_v7 }
 0x80f   :  { %v4505_v35 = vpop.xlane.xlu1 %4504 }
 0x810   :  { %8238 = vpow2.f32 %v4526_v61  ;;  %v4517_v26 = vsub.f32 %v4328_v30, %v4505_v35  ;;  %v4520_v30 = vmul.f32 1.442695, %v4512_v14 }
 0x812   :  { %v8237_v36 = vpop.eup %8236  ;;  %v4530_v46 = vmul.f32 1.442695, %v4517_v26 }
 0x813   :  { %v4511_v48 = vpop.xlane.xlu1 %4510  ;;  %v4539_v47 = vsel %vm1435_vm3, %v8237_v36, 0.0 }
 0x814   :  { %8240 = vpow2.f32 %v4530_v46  ;;  %v4519_v44 = vsub.f32 %v4484_v37, %v4511_v48  ;;  %4540 = vadd.xlane.f32.xlu1 %v4539_v47 }
 0x816   :  { %v4534_v24 = vmul.f32 1.442695, %v4519_v44 }
 0x818   :  { %8242 = vpow2.f32 %v4534_v24 }
 0x819   :  { %8244 = vpow2.f32 %v4520_v30 }
 0x81a   :  { %v8239_v18 = vpop.eup %8238  ;;  %8246 = vpow2.f32 %v4524_v49 }
 0x81b   :  { %v4545_v38 = vsel %vm1435_vm3, %v8239_v18, 0.0 }
 0x81c   :  { %4546 = vadd.xlane.f32.xlu1 %v4545_v38 }
 0x81e   :  { %v9623_v29 = vpop.eup %8240 }
 0x81f   :  { %v4551_v56 = vsel %vm1435_vm3, %v9623_v29, 0.0 }
 0x820   :  { %4552 = vadd.xlane.f32.xlu1 %v4551_v56 }
 0x822   :  { %v9627_v40 = vpop.eup %8242 }
 0x823   :  { %v4557_v43 = vsel %vm1435_vm3, %v9627_v40, 0.0  ;;  %v9653_v52 = vpop.eup %8244 }
 0x824   :  { %4558 = vadd.xlane.f32.xlu1 %v4557_v43 }
 0x835   :  { %4653 = vrot.lane.b32.xlu1 %v9360_v32, %s8319_s25 }
 0x839   :  { %4730 = vrot.lane.b32.xlu1 %v9369_v50, %s8319_s25 }
 0x83d   :  { %4807 = vrot.lane.b32.xlu1 %v9376_v28, %s8319_s25 }
 0x841   :  { %4961 = vrot.lane.b32.xlu1 %v9384_v6, %s8319_s25 }
 0x845   :  { %5115 = vrot.lane.b32.xlu1 %v9443_v21, %s8319_s25 }
 0x849   :  { %5315 = vrot.lane.b32.xlu1 %v9081_v59, %s8320_s7 }
 0x84d   :  { %5393 = vrot.lane.b32.xlu1 %v9087_v45, %s8320_s7 }
 0x851   :  { %5551 = vrot.lane.b32.xlu1 %v9093_v1, %s8320_s7  ;;  %v4536_v1 = vsel %vm1435_vm3, %v9653_v52, 0.0 }
 0x854   :  { %v4250_v41 = vpop.f32.mrb[46].mxu1 }
 0x855   :  { %v7738_v23 = vpop.f32.mrb[47].mxu1  ;;  %5549 = vrot.lane.b32.xlu1 %v9142_v4, %s8320_s7  ;;  %v4500_v37 = vsel %vm1435_vm3, %v4250_v41, -inf  ;;  %v9659_v4 = vpop.eup %8246 }
 0x856   :  { %4501 = vmax.xlane.f32.xlu0 %v4500_v37 }
 0x858   :  { %v4406_v62 = vpop.f32.mrb[48].mxu1 }
 0x859   :  { %v7748_v59 = vpop.f32.mrb[49].mxu1  ;;  %5707 = vrot.lane.b32.xlu1 %v9150_v11, %s8320_s7  ;;  %v4506_v45 = vsel %vm1435_vm3, %v4406_v62, -inf  ;;  %v4542_v11 = vsel %vm1435_vm3, %v9659_v4, 0.0 }
 0x85a   :  { %4507 = vmax.xlane.f32.xlu0 %v4506_v45 }
 0x85d   :  { %5705 = vrot.lane.b32.xlu1 %v9157_v17, %s8320_s7 }
 0x85e   :  { %4537 = vadd.xlane.f32.xlu0 %v4536_v1 }
 0x861   :  { %5863 = vrot.lane.b32.xlu1 %v9163_v20, %s8320_s7 }
 0x862   :  { %4543 = vadd.xlane.f32.xlu0 %v4542_v11 }
 0x865   :  { %5861 = vrot.lane.b32.xlu1 %v9169_v22, %s8320_s7 }
 0x878   :  { %4576 = vrot.lane.b32.xlu0 %v9392_v42, %s8319_s25 }
 0x87c   :  { %4884 = vrot.lane.b32.xlu0 %v9398_v13, %s8319_s25 }
 0x8a1   :  { %v4541_v17 = vpop.xlane.xlu1 %4540 }
 0x8a2   :  { %8248 = vrcp.f32 %v4541_v17 }
 0x8a9   :  { %v4547_v5 = vpop.xlane.xlu1 %4546 }
 0x8aa   :  { %8250 = vrcp.f32 %v4547_v5 }
 0x8ac   :  { %v8249_v20 = vpop.eup %8248 }
 0x8ad   :  { %v4553_v14 = vpop.xlane.xlu1 %4552  ;;  %v4569_v25 = vmul.f32 %v8249_v20, %v8237_v36 }
 0x8ae   :  { %8252 = vrcp.f32 %v4553_v14 }
 0x8b1   :  { %v4559_v51 = vpop.xlane.xlu1 %4558 }
 0x8b2   :  { %8254 = vrcp.f32 %v4559_v51 }
 0x8b4   :  { %v8251_v39 = vpop.eup %8250 }
 0x8b5   :  { %v4654_v16 = vpop.permute.xlu1 %4653  ;;  %v4571_v8 = vmul.f32 %v8251_v39, %v8239_v18 }
 0x8b6   :  { %7760 = vmatpush3.msk.msra.mxu0 %vm1528_vm2, %v4654_v16 }
 0x8b7   :  { %7762 = vmatmul.mubr.msk.f32.vlgmr.msra.gmra.mrb[44].mxu0 %vm1524_vm4, %v4569_v25  ;;  %7769 = vmatprep.subr.mxu0 %v8315_v3 }
 0x8b8   :  { %7771 = vmatprep.mubr.msk.f32.mxu0 %vm8317_vm0, %v8315_v3  ;;  %v8253_v7 = vpop.eup %8252 }
 0x8b9   :  { %v4731_v22 = vpop.permute.xlu1 %4730  ;;  %v4573_v61 = vmul.f32 %v8253_v7, %v9623_v29 }
 0x8bc   :  { %v8255_v26 = vpop.eup %8254 }
 0x8bd   :  { %v4808_v10 = vpop.permute.xlu1 %4807  ;;  %v4575_v36 = vmul.f32 %v8255_v26, %v9627_v40 }
 0x8be   :  { %7770 = vmatpush3.msk.msra.mxu0 %vm1528_vm2, %v4808_v10 }
 0x8bf   :  { %7772 = vmatmul.mubr.msk.f32.vlgmr.msra.gmra.mrb[46].mxu0 %vm1524_vm4, %v4571_v8  ;;  %7779 = vmatprep.subr.mxu0 %v8315_v3 }
 0x8c0   :  { %7781 = vmatprep.mubr.msk.f32.mxu0 %vm8317_vm0, %v8315_v3 }
 0x8c1   :  { %v4962_v35 = vpop.permute.xlu1 %4961 }
 0x8c2   :  { %7780 = vmatpush3.msk.msra.mxu0 %vm1528_vm2, %v4962_v35 }
 0x8c3   :  { %7782 = vmatmul.mubr.msk.f32.vlgmr.msra.gmra.mrb[48].mxu0 %vm1524_vm4, %v4573_v61  ;;  %7789 = vmatprep.subr.mxu0 %v8315_v3 }
 0x8c4   :  { %7791 = vmatprep.mubr.msk.f32.mxu0 %vm8317_vm0, %v8315_v3 }
 0x8c5   :  { %v5116_v46 = vpop.permute.xlu1 %5115 }
 0x8c6   :  { %7790 = vmatpush3.msk.msra.mxu0 %vm1528_vm2, %v5116_v46 }
 0x8c7   :  { %7792 = vmatmul.mubr.msk.f32.vlgmr.msra.gmra.mrb[50].mxu0 %vm1524_vm4, %v4575_v36  ;;  %7805 = vmatprep.subr.mxu0 %v8315_v3 }
 0x8c8   :  { %7807 = vmatprep.mubr.msk.f32.mxu0 %vm8317_vm0, %v8315_v3 }
 0x8e3   :  { %v4502_v48 = vpop.xlane.xlu0 %4501 }
 0x8e4   :  { %v4516_v47 = vsub.f32 %v4250_v41, %v4502_v48 }
 0x8e6   :  { %v4528_v44 = vmul.f32 1.442695, %v4516_v47 }
 0x8e7   :  { %v4508_v24 = vpop.xlane.xlu0 %4507 }
 0x8e8   :  { %8256 = vpow2.f32 %v4528_v44  ;;  %v4518_v18 = vsub.f32 %v4406_v62, %v4508_v24 }
 0x8ea   :  { %v4532_v38 = vmul.f32 1.442695, %v4518_v18 }
 0x8eb   :  { %v4538_v29 = vpop.xlane.xlu0 %4537 }
 0x8ec   :  { %8258 = vpow2.f32 %v4532_v38 }
 0x8ed   :  { %8260 = vrcp.f32 %v4538_v29 }
 0x8ef   :  { %v4544_v56 = vpop.xlane.xlu0 %4543 }
 0x8f0   :  { %8262 = vrcp.f32 %v4544_v56 }
 0x8f2   :  { %v8257_v40 = vpop.eup %8256 }
 0x8f3   :  { %v4577_v43 = vpop.permute.xlu0 %4576  ;;  %v4548_v30 = vsel %vm1435_vm3, %v8257_v40, 0.0 }
 0x8f4   :  { %4549 = vadd.xlane.f32.xlu0 %v4548_v30  ;;  %7755 = vmatpush3.msk.msra.mxu1 %vm1528_vm2, %v4577_v43  ;;  %v704_v43 = vld [vmem:[%s10159_s5 + $0x58] sm:$0xff] }
 0x8f5   :  { %7764 = vmatprep.subr.mxu1 %v8315_v3 }
 0x8f6   :  { %v8259_v49 = vpop.eup %8258 }
 0x8f7   :  { %v8261_v41 = vpop.eup %8260  ;;  %v4554_v23 = vsel %vm1435_vm3, %v8259_v49, 0.0  ;;  %v4885_v45 = vpop.permute.xlu0 %4884 }
 0x8f8   :  { %v4568_v37 = vmul.f32 %v8261_v41, %v9653_v52  ;;  %4555 = vadd.xlane.f32.xlu0 %v4554_v23 }
 0x8fa   :  { %v8263_v62 = vpop.eup %8262  ;;  %7757 = vmatmul.mubr.msk.f32.vlgmr.msra.gmra.mrb[50].mxu1 %vm1524_vm4, %v4568_v37 }
 0x8fb   :  { %v4570_v59 = vmul.f32 %v8263_v62, %v9659_v4  ;;  %7765 = vmatpush3.msk.msra.mxu1 %vm1528_vm2, %v4731_v22  ;;  %7766 = vmatprep.mubr.msk.f32.mxu1 %vm8317_vm0, %v8315_v3 }
 0x8fc   :  { %7774 = vmatprep.subr.mxu1 %v8315_v3 }
 0x8fe   :  { %7767 = vmatmul.mubr.msk.f32.vlgmr.msra.gmra.mrb[52].mxu1 %vm1524_vm4, %v4570_v59 }
 0x8ff   :  { %7775 = vmatpush3.msk.msra.mxu1 %vm1528_vm2, %v4885_v45  ;;  %7776 = vmatprep.mubr.msk.f32.mxu1 %vm8317_vm0, %v8315_v3 }
 0x900   :  { %7784 = vmatprep.subr.mxu1 %v8315_v3 }
 0x90e   :  { %5038 = vrot.lane.b32.xlu0 %v9449_v31, %s8319_s25 }
 0x912   :  { %5317 = vrot.lane.b32.xlu0 %v9069_v53, %s8320_s7  ;;  %v5316_v53 = vpop.permute.xlu1 %5315 }
 0x916   :  { %5395 = vrot.lane.b32.xlu0 %v9075_v54, %s8320_s7  ;;  %v5394_v54 = vpop.permute.xlu1 %5393 }
 0x91a   :  { %5473 = vrot.lane.b32.xlu0 %v9101_v60, %s8320_s7  ;;  %v5552_v1 = vpop.permute.xlu1 %5551 }
 0x91e   :  { %5471 = vrot.lane.b32.xlu0 %v9136_v63, %s8320_s7  ;;  %v5550_v63 = vpop.permute.xlu1 %5549 }
 0x922   :  { %5629 = vrot.lane.b32.xlu0 %v9179_v9, %s8320_s7  ;;  %v701_v9 = vld [vmem:[%s10159_s5 + $0x40] sm:$0xff]  ;;  %v5708_v51 = vpop.permute.xlu1 %5707 }
 0x926   :  { %5627 = vrot.lane.b32.xlu0 %v9185_v15, %s8320_s7  ;;  %v702_v15 = vld [vmem:[%s10159_s5 + $0x48] sm:$0xff]  ;;  %v5706_v8 = vpop.permute.xlu1 %5705 }
 0x927   :  { %v8072_v14 = vpack.c.bf16 %v702_v15, %v701_v9 }
 0x92a   :  { %5785 = vrot.lane.b32.xlu0 %v9191_v27, %s8320_s7  ;;  %v5864_v61 = vpop.permute.xlu1 %5863 }
 0x92e   :  { %5783 = vrot.lane.b32.xlu0 %v9197_v19, %s8320_s7  ;;  %v5862_v36 = vpop.permute.xlu1 %5861 }
 0x981   :  { %v4550_v52 = vpop.xlane.xlu0 %4549 }
 0x982   :  { %8264 = vrcp.f32 %v4550_v52 }
 0x985   :  { %v4556_v60 = vpop.xlane.xlu0 %4555 }
 0x986   :  { %8266 = vrcp.f32 %v4556_v60 }
 0x989   :  { %v5039_v4 = vpop.permute.xlu0 %5038 }
 0x98a   :  { %v4726_v11 = vpop.f32.mrb[44].mxu0 }
 0x98b   :  { %v7763_v27 = vpop.f32.mrb[45].mxu0 }
 0x98c   :  { %v8265_v19 = vpop.eup %8264 }
 0x98d   :  { %v4572_v17 = vmul.f32 %v8265_v19, %v8257_v40  ;;  %v5318_v5 = vpop.permute.xlu0 %5317  ;;  %v703_v40 = vld [vmem:[%s10159_s5 + $0x50] sm:$0xff] }
 0x98e   :  { %7806 = vmatpush3.xpose.msk.msra.mxu0 %vm834_vm1, %v5318_v5  ;;  %v8076_v30 = vpack.c.bf16 %v704_v43, %v703_v40 }
 0x98f   :  { %7777 = vmatmul.mubr.msk.f32.vlgmr.msra.gmra.mrb[54].mxu1 %vm1524_vm4, %v4572_v17  ;;  %7810 = vmatprep.subr.mxu0 %v8315_v3 }
 0x990   :  { %v8267_v20 = vpop.eup %8266  ;;  %7785 = vmatpush3.msk.msra.mxu1 %vm1528_vm2, %v5039_v4  ;;  %7786 = vmatprep.mubr.msk.f32.mxu1 %vm8317_vm0, %v8315_v3 }
 0x991   :  { %v4574_v25 = vmul.f32 %v8267_v20, %v8259_v49  ;;  %v5396_v16 = vpop.permute.xlu0 %5395  ;;  %7808 = vmatmul.mubr.msk.f32.vlgmr.msra.gmra.mrb[52].mxu0 %vm834_vm1, %v5316_v53  ;;  %8073 = vmatprep.subr.bf16.mxu1 %v8072_v14 }
 0x992   :  { %v4880_v22 = vpop.f32.mrb[46].mxu0  ;;  %7811 = vmatpush3.xpose.msk.msra.mxu0 %vm834_vm1, %v5396_v16  ;;  %7812 = vmatprep.mubr.msk.f32.mxu0 %vm8317_vm0, %v8315_v3 }
 0x993   :  { %v7773_v39 = vpop.f32.mrb[47].mxu0  ;;  %7787 = vmatmul.mubr.msk.f32.vlgmr.msra.gmra.mrb[56].mxu1 %vm1524_vm4, %v4574_v25  ;;  %7820 = vmatprep.subr.mxu0 %v8315_v3 }
 0x994   :  { %8075 = vmatpush3.bf16.msra.mxu1 %v8072_v14 }
 0x995   :  { %7813 = vmatmul.mubr.msk.f32.vlgmr.msra.gmra.mrb[54].mxu0 %vm834_vm1, %v5394_v54  ;;  %8077 = vmatprep.subr.bf16.mxu1 %v8076_v30  ;;  %v5474_v49 = vpop.permute.xlu0 %5473 }
 0x996   :  { %v5034_v10 = vpop.f32.mrb[48].mxu0  ;;  %7821 = vmatpush3.xpose.msk.msra.mxu0 %vm834_vm1, %v5552_v1  ;;  %7822 = vmatprep.mubr.msk.f32.mxu0 %vm8317_vm0, %v8315_v3 }
 0x997   :  { %v7783_v7 = vpop.f32.mrb[49].mxu0  ;;  %7830 = vmatprep.subr.mxu0 %v8315_v3 }
 0x998   :  { %8079 = vmatpush3.bf16.msra.mxu1 %v8076_v30 }
 0x999   :  { %7823 = vmatmul.mubr.msk.f32.vlgmr.msra.gmra.mrb[56].mxu0 %vm834_vm1, %v5550_v63  ;;  %7815 = vmatprep.subr.mxu1 %v8315_v3  ;;  %v5472_v41 = vpop.permute.xlu0 %5471 }
 0x99a   :  { %v5188_v35 = vpop.f32.mrb[50].mxu0  ;;  %7831 = vmatpush3.xpose.msk.msra.mxu0 %vm834_vm1, %v5708_v51  ;;  %7832 = vmatprep.mubr.msk.f32.mxu0 %vm8317_vm0, %v8315_v3 }
 0x99b   :  { %v7793_v26 = vpop.f32.mrb[51].mxu0  ;;  %7840 = vmatprep.subr.mxu0 %v8315_v3 }
 0x99d   :  { %7833 = vmatmul.mubr.msk.f32.vlgmr.msra.gmra.mrb[58].mxu0 %vm834_vm1, %v5706_v8  ;;  %v5630_v54 = vpop.permute.xlu0 %5629 }
 0x99e   :  { %7841 = vmatpush3.xpose.msk.msra.mxu0 %vm834_vm1, %v5864_v61  ;;  %7842 = vmatprep.mubr.msk.f32.mxu0 %vm8317_vm0, %v8315_v3 }
 0x99f   :  { %7850 = vmatprep.subr.mxu0 %v8315_v3 }
 0x9a1   :  { %7843 = vmatmul.mubr.msk.f32.vlgmr.msra.gmra.mrb[60].mxu0 %vm834_vm1, %v5862_v36  ;;  %v5628_v19 = vpop.permute.xlu0 %5627 }
 0x9a2   :  { %7852 = vmatprep.mubr.msk.f32.mxu0 %vm8317_vm0, %v8315_v3 }
 0x9a5   :  { %v5786_v16 = vpop.permute.xlu0 %5785 }
 0x9cd   :  { %v4649_v46 = vpop.f32.mrb[50].mxu1 }
 0x9ce   :  { %v5200_v48 = vcombine.low %v4649_v46, %v4726_v11  ;;  %v7758_v47 = vpop.f32.mrb[51].mxu1 }
 0x9d0   :  { %v5208_v38 = vrot.slane %v5200_v48, %v8904_v12 }
 0x9d1   :  { %v4803_v44 = vpop.f32.mrb[52].mxu1 }
 0x9d2   :  { %v5201_v24 = vcombine.low %v4803_v44, %v4880_v22  ;;  %v7768_v18 = vpop.f32.mrb[53].mxu1 }
 0x9d4   :  { %v5215_v29 = vrot.slane %v5201_v24, %v8904_v12 }
 0x9d6   :  { %v5216_v56 = vcombine.low %v5208_v38, %v5215_v29 }
 0x9d8   :  { %7802 = vmatprep.mubr.msk.f32.mxu1 %vm834_vm1, %v5216_v56 }
 0xa62   :  { %v4957_v23 = vpop.f32.mrb[54].mxu1 }
 0xa63   :  { %v5217_v37 = vcombine.low %v4957_v23, %v5034_v10  ;;  %v7778_v62 = vpop.f32.mrb[55].mxu1  ;;  %v5784_v10 = vpop.permute.xlu0 %5783 }
 0xa64   :  { %v9773_v59 = vpop.f32.mrb[52].mxu0 }
 0xa65   :  { %v7809_v45 = vpop.f32.mrb[53].mxu0  ;;  %v5939_v53 = vsel %vm1435_vm3, %v9773_v59, -inf  ;;  %v5225_v4 = vrot.slane %v5217_v37, %v8904_v12 }
 0xa66   :  { %v5111_v52 = vpop.f32.mrb[56].mxu1  ;;  %5940 = vmax.xlane.f32.xlu0 %v5939_v53 }
 0xa67   :  { %v5218_v1 = vcombine.low %v5111_v52, %v5188_v35  ;;  %v7788_v60 = vpop.f32.mrb[57].mxu1 }
 0xa68   :  { %v5467_v63 = vpop.f32.mrb[54].mxu0 }
 0xa69   :  { %v5232_v11 = vrot.slane %v5218_v1, %v8904_v12  ;;  %v7814_v9 = vpop.f32.mrb[55].mxu0  ;;  %v5942_v15 = vsel %vm1435_vm3, %v5467_v63, -inf }
 0xa6a   :  { %5943 = vmax.xlane.f32.xlu1 %v5942_v15 }
 0xa6b   :  { %v5233_v27 = vcombine.low %v5225_v4, %v5232_v11 }
 0xa6c   :  { %v5623_v17 = vpop.f32.mrb[56].mxu0 }
 0xa6d   :  { %7803 = vmatmul.mubr.msk.f32.vlgmr.msra.gmra.mrb[44].mxu1 %vm834_vm1, %v5233_v27  ;;  %v7824_v5 = vpop.f32.mrb[57].mxu0  ;;  %v5948_v14 = vsel %vm1435_vm3, %v5623_v17, -inf }
 0xa6e   :  { %7816 = vmatpush3.xpose.msk.msra.mxu1 %vm834_vm1, %v5474_v49  ;;  %5949 = vmax.xlane.f32.xlu0 %v5948_v14 }
 0xa6f   :  { %7817 = vmatprep.mubr.msk.f32.mxu1 %vm8317_vm0, %v8315_v3  ;;  %7825 = vmatprep.subr.mxu1 %v8315_v3 }
 0xa70   :  { %v5779_v51 = vpop.f32.mrb[58].mxu0 }
 0xa71   :  { %7818 = vmatmul.mubr.msk.f32.vlgmr.msra.gmra.mrb[58].mxu1 %vm834_vm1, %v5472_v41  ;;  %v7834_v20 = vpop.f32.mrb[59].mxu0  ;;  %v5954_v25 = vsel %vm1435_vm3, %v5779_v51, -inf }
 0xa72   :  { %7826 = vmatpush3.xpose.msk.msra.mxu1 %vm834_vm1, %v5630_v54  ;;  %5955 = vmax.xlane.f32.xlu1 %v5954_v25 }
 0xa73   :  { %7827 = vmatprep.mubr.msk.f32.mxu1 %vm8317_vm0, %v8315_v3  ;;  %7835 = vmatprep.subr.mxu1 %v8315_v3 }
 0xa74   :  { %v5935_v22 = vpop.f32.mrb[60].mxu0 }
 0xa75   :  { %7828 = vmatmul.mubr.msk.f32.vlgmr.msra.gmra.mrb[60].mxu1 %vm834_vm1, %v5628_v19  ;;  %v7844_v39 = vpop.f32.mrb[61].mxu0  ;;  %v5960_v8 = vsel %vm1435_vm3, %v5935_v22, -inf }
 0xa76   :  { %7836 = vmatpush3.xpose.msk.msra.mxu1 %vm834_vm1, %v5786_v16  ;;  %5961 = vmax.xlane.f32.xlu1 %v5960_v8 }
 0xa77   :  { %7837 = vmatprep.mubr.msk.f32.mxu1 %vm8317_vm0, %v8315_v3  ;;  %7845 = vmatprep.subr.mxu1 %v8315_v3 }
 0xa79   :  { %7838 = vmatmul.mubr.msk.f32.vlgmr.msra.gmra.mrb[62].mxu1 %vm834_vm1, %v5784_v10 }
 0xa7a   :  { %7847 = vmatprep.mubr.msk.f32.mxu1 %vm8317_vm0, %v8315_v3 }
 0xaf3   :  { %v5941_v7 = vpop.xlane.xlu0 %5940 }
 0xaf4   :  { %v5963_v61 = vsub.f32 %v9773_v59, %v5941_v7 }
 0xaf6   :  { %v5971_v59 = vmul.f32 1.442695, %v5963_v61 }
 0xaf7   :  { %v5944_v35 = vpop.xlane.xlu1 %5943 }
 0xaf8   :  { %v5964_v26 = vsub.f32 %v5467_v63, %v5944_v35 }
 0xafa   :  { %v5973_v36 = vmul.f32 1.442695, %v5964_v26 }
 0xafb   :  { %v5950_v46 = vpop.xlane.xlu0 %5949 }
 0xafc   :  { %8268 = vpow2.f32 %v5973_v36  ;;  %v5966_v48 = vsub.f32 %v5623_v17, %v5950_v46 }
 0xafe   :  { %v5977_v47 = vmul.f32 1.442695, %v5966_v48 }
 0xaff   :  { %v5956_v44 = vpop.xlane.xlu1 %5955 }
 0xb00   :  { %8270 = vpow2.f32 %v5977_v47  ;;  %v5968_v24 = vsub.f32 %v5779_v51, %v5956_v44 }
 0xb02   :  { %v5981_v18 = vmul.f32 1.442695, %v5968_v24 }
 0xb03   :  { %v5962_v38 = vpop.xlane.xlu1 %5961 }
 0xb04   :  { %8272 = vpow2.f32 %v5981_v18  ;;  %v5970_v29 = vsub.f32 %v5935_v22, %v5962_v38 }
 0xb06   :  { %v8269_v56 = vpop.eup %8268  ;;  %v5985_v40 = vmul.f32 1.442695, %v5970_v29 }
 0xb07   :  { %v5990_v43 = vsel %vm1435_vm3, %v8269_v56, 0.0 }
 0xb08   :  { %8274 = vpow2.f32 %v5985_v40  ;;  %5991 = vadd.xlane.f32.xlu1 %v5990_v43 }
 0xb09   :  { %8276 = vpow2.f32 %v5971_v59 }
 0xb0a   :  { %v8271_v30 = vpop.eup %8270 }
 0xb0b   :  { %v5996_v49 = vsel %vm1435_vm3, %v8271_v30, 0.0 }
 0xb0c   :  { %5997 = vadd.xlane.f32.xlu1 %v5996_v49 }
 0xb0e   :  { %v8273_v41 = vpop.eup %8272 }
 0xb0f   :  { %v6002_v23 = vsel %vm1435_vm3, %v8273_v41, 0.0 }
 0xb10   :  { %6003 = vadd.xlane.f32.xlu1 %v6002_v23 }
 0xb12   :  { %v8275_v37 = vpop.eup %8274 }
 0xb13   :  { %v6008_v62 = vsel %vm1435_vm3, %v8275_v37, 0.0 }
 0xb14   :  { %6009 = vadd.xlane.f32.xlu1 %v6008_v62 }
 0xb25   :  { %6104 = vrot.lane.b32.xlu1 %v9360_v32, %s8320_s7 }
 0xb29   :  { %6181 = vrot.lane.b32.xlu1 %v9369_v50, %s8320_s7 }
 0xb2d   :  { %6258 = vrot.lane.b32.xlu1 %v9376_v28, %s8320_s7 }
 0xb31   :  { %6412 = vrot.lane.b32.xlu1 %v9384_v6, %s8320_s7  ;;  %v9819_v6 = vpop.eup %8276 }
 0xb35   :  { %6566 = vrot.lane.b32.xlu1 %v9443_v21, %s8320_s7  ;;  %v5987_v21 = vsel %vm1435_vm3, %v9819_v6, 0.0 }
 0xb44   :  { %v5545_v45 = vpop.f32.mrb[58].mxu1 }
 0xb45   :  { %v7819_v53 = vpop.f32.mrb[59].mxu1  ;;  %v5945_v54 = vsel %vm1435_vm3, %v5545_v45, -inf }
 0xb46   :  { %5946 = vmax.xlane.f32.xlu0 %v5945_v54 }
 0xb48   :  { %v5701_v32 = vpop.f32.mrb[60].mxu1 }
 0xb49   :  { %v7829_v52 = vpop.f32.mrb[61].mxu1  ;;  %v5951_v50 = vsel %vm1435_vm3, %v5701_v32, -inf }
 0xb4a   :  { %5952 = vmax.xlane.f32.xlu0 %v5951_v50 }
 0xb4c   :  { %v5857_v1 = vpop.f32.mrb[62].mxu1 }
 0xb4d   :  { %v7839_v28 = vpop.f32.mrb[63].mxu1  ;;  %v5957_v60 = vsel %vm1435_vm3, %v5857_v1, -inf }
 0xb4e   :  { %5958 = vmax.xlane.f32.xlu0 %v5957_v60 }
 0xb52   :  { %5988 = vadd.xlane.f32.xlu0 %v5987_v21 }
 0xb68   :  { %6027 = vrot.lane.b32.xlu0 %v9392_v42, %s8320_s7 }
 0xb6c   :  { %6335 = vrot.lane.b32.xlu0 %v9398_v13, %s8320_s7 }
 0xb95   :  { %v5992_v63 = vpop.xlane.xlu1 %5991 }
 0xb96   :  { %8278 = vrcp.f32 %v5992_v63 }
 0xb99   :  { %v5998_v4 = vpop.xlane.xlu1 %5997 }
 0xb9a   :  { %8280 = vrcp.f32 %v5998_v4 }
 0xb9d   :  { %v6004_v11 = vpop.xlane.xlu1 %6003 }
 0xb9e   :  { %8282 = vrcp.f32 %v6004_v11 }
 0xba0   :  { %v8279_v15 = vpop.eup %8278 }
 0xba1   :  { %v6010_v9 = vpop.xlane.xlu1 %6009  ;;  %v6020_v27 = vmul.f32 %v8279_v15, %v8269_v56  ;;  %v706_v15 = vld [vmem:[%s10159_s5 + $0x68] sm:$0xff] }
 0xba2   :  { %8284 = vrcp.f32 %v6010_v9  ;;  %v705_v9 = vld [vmem:[%s10159_s5 + $0x60] sm:$0xff] }
 0xba4   :  { %v8281_v13 = vpop.eup %8280 }
 0xba5   :  { %v6105_v19 = vpop.permute.xlu1 %6104  ;;  %v6022_v17 = vmul.f32 %v8281_v13, %v8271_v30 }
 0xba6   :  { %7851 = vmatpush3.msk.msra.mxu0 %vm1528_vm2, %v6105_v19  ;;  %v707_v19 = vld [vmem:[%s10159_s5 + $0x70] sm:$0xff] }
 0xba7   :  { %7853 = vmatmul.mubr.msk.f32.vlgmr.msra.gmra.mrb[62].mxu0 %vm1524_vm4, %v6020_v27  ;;  %7860 = vmatprep.subr.mxu0 %v8315_v3  ;;  %v8080_v27 = vpack.c.bf16 %v706_v15, %v705_v9 }
 0xba8   :  { %7862 = vmatprep.mubr.msk.f32.mxu0 %vm8317_vm0, %v8315_v3  ;;  %v8283_v14 = vpop.eup %8282 }
 0xba9   :  { %v6182_v42 = vpop.permute.xlu1 %6181  ;;  %v6024_v51 = vmul.f32 %v8283_v14, %v8273_v41 }
 0xbac   :  { %v8285_v25 = vpop.eup %8284 }
 0xbad   :  { %v6259_v5 = vpop.permute.xlu1 %6258  ;;  %v6026_v16 = vmul.f32 %v8285_v25, %v8275_v37 }
 0xbae   :  { %7861 = vmatpush3.msk.msra.mxu0 %vm1528_vm2, %v6259_v5 }
 0xbaf   :  { %7863 = vmatmul.mubr.msk.f32.vlgmr.msra.gmra.mrb[64].mxu0 %vm1524_vm4, %v6022_v17  ;;  %7870 = vmatprep.subr.mxu0 %v8315_v3 }
 0xbb0   :  { %7872 = vmatprep.mubr.msk.f32.mxu0 %vm8317_vm0, %v8315_v3 }
 0xbb1   :  { %v6413_v20 = vpop.permute.xlu1 %6412 }
 0xbb2   :  { %7871 = vmatpush3.msk.msra.mxu0 %vm1528_vm2, %v6413_v20 }
 0xbb3   :  { %7873 = vmatmul.mubr.msk.f32.vlgmr.msra.gmra.mrb[66].mxu0 %vm1524_vm4, %v6024_v51  ;;  %7880 = vmatprep.subr.mxu0 %v8315_v3 }
 0xbb4   :  { %7882 = vmatprep.mubr.msk.f32.mxu0 %vm8317_vm0, %v8315_v3 }
 0xbb5   :  { %v6567_v22 = vpop.permute.xlu1 %6566 }
 0xbb6   :  { %7881 = vmatpush3.msk.msra.mxu0 %vm1528_vm2, %v6567_v22 }
 0xbb7   :  { %7883 = vmatmul.mubr.msk.f32.vlgmr.msra.gmra.mrb[68].mxu0 %vm1524_vm4, %v6026_v16 }
 0xbb8   :  { %6963 = vmatprep.mubr.f32.mxu0 %v8315_v3 }
 0xbd3   :  { %v5947_v39 = vpop.xlane.xlu0 %5946 }
 0xbd4   :  { %v5965_v8 = vsub.f32 %v5545_v45, %v5947_v39 }
 0xbd6   :  { %v5975_v10 = vmul.f32 1.442695, %v5965_v8 }
 0xbd7   :  { %v5953_v7 = vpop.xlane.xlu0 %5952 }
 0xbd8   :  { %8286 = vpow2.f32 %v5975_v10  ;;  %v5967_v61 = vsub.f32 %v5701_v32, %v5953_v7 }
 0xbda   :  { %v5979_v35 = vmul.f32 1.442695, %v5967_v61 }
 0xbdb   :  { %v5959_v26 = vpop.xlane.xlu0 %5958 }
 0xbdc   :  { %8288 = vpow2.f32 %v5979_v35  ;;  %v5969_v36 = vsub.f32 %v5857_v1, %v5959_v26 }
 0xbde   :  { %v5983_v46 = vmul.f32 1.442695, %v5969_v36  ;;  %v9889_v36 = vld [vmem:[%s10155_s12] sm:$0x3f] }
 0xbdf   :  { %v5989_v48 = vpop.xlane.xlu0 %5988 }
 0xbe0   :  { %8290 = vpow2.f32 %v5983_v46  ;;  %v10175_v46 = vsub.s32 2, %v8890_v0 }
 0xbe1   :  { %8292 = vrcp.f32 %v5989_v48 }
 0xbe2   :  { %v8287_v47 = vpop.eup %8286  ;;  %v177_v48 = vrot.slane %v9889_v36, %v10175_v46  ;;  %v6876_v46 = vld [vmem:[%s10161_s13 + $0xa8] sm:$0xff] }
 0xbe3   :  { %v6028_v44 = vpop.permute.xlu0 %6027  ;;  %v5993_v24 = vsel %vm1435_vm3, %v8287_v47, 0.0 }
 0xbe4   :  { %5994 = vadd.xlane.f32.xlu0 %v5993_v24  ;;  %7846 = vmatpush3.msk.msra.mxu1 %vm1528_vm2, %v6028_v44 }
 0xbe5   :  { %7855 = vmatprep.subr.mxu1 %v8315_v3 }
 0xbe6   :  { %v8289_v18 = vpop.eup %8288 }
 0xbe7   :  { %v5999_v38 = vsel %vm1435_vm3, %v8289_v18, 0.0  ;;  %v6336_v30 = vpop.permute.xlu0 %6335 }
 0xbe8   :  { %6000 = vadd.xlane.f32.xlu0 %v5999_v38 }
 0xbea   :  { %v8291_v29 = vpop.eup %8290 }
 0xbeb   :  { %v8293_v56 = vpop.eup %8292  ;;  %v6005_v40 = vsel %vm1435_vm3, %v8291_v29, 0.0 }
 0xbec   :  { %v6019_v43 = vmul.f32 %v8293_v56, %v9819_v6  ;;  %6006 = vadd.xlane.f32.xlu0 %v6005_v40 }
 0xbee   :  { %7848 = vmatmul.mubr.msk.f32.vlgmr.msra.gmra.mrb[64].mxu1 %vm1524_vm4, %v6019_v43 }
 0xbef   :  { %7856 = vmatpush3.msk.msra.mxu1 %vm1528_vm2, %v6182_v42  ;;  %7857 = vmatprep.mubr.msk.f32.mxu1 %vm8317_vm0, %v8315_v3  ;;  %v708_v42 = vld [vmem:[%s10159_s5 + $0x78] sm:$0xff] }
 0xbf0   :  { %7865 = vmatprep.subr.mxu1 %v8315_v3  ;;  %v8084_v13 = vpack.c.bf16 %v708_v42, %v707_v19  ;;  %v6864_v19 = vld [vmem:[%s10161_s13 + $0x48] sm:$0xff]  ;;  %v6866_v42 = vld [vmem:[%s10161_s13 + $0x58] sm:$0xff] }
 0xc02   :  { %6489 = vrot.lane.b32.xlu0 %v9449_v31, %s8320_s7 }
 0xc71   :  { %v5995_v49 = vpop.xlane.xlu0 %5994 }
 0xc72   :  { %8294 = vrcp.f32 %v5995_v49 }
 0xc75   :  { %v6001_v41 = vpop.xlane.xlu0 %6000 }
 0xc76   :  { %8296 = vrcp.f32 %v6001_v41  ;;  %v8313_v41 = vld [vmem:[%s10173_s26 + $0x8] sm:$0xff] }
 0xc79   :  { %v6007_v23 = vpop.xlane.xlu0 %6006 }
 0xc7a   :  { %8298 = vrcp.f32 %v6007_v23  ;;  %v6177_v37 = vpop.f32.mrb[62].mxu0 }
 0xc7b   :  { %v7854_v62 = vpop.f32.mrb[63].mxu0 }
 0xc7c   :  { %v8295_v59 = vpop.eup %8294  ;;  %v6856_v62 = vld [vmem:[%s10161_s13 + $0x8] sm:$0xff] }
 0xc7d   :  { %v6021_v45 = vmul.f32 %v8295_v59, %v8287_v47  ;;  %v6490_v32 = vpop.permute.xlu0 %6489  ;;  %v334_v47 = vadd.f32 %v8886_v55, %v177_v48  ;;  %v8314_v55 = vld [vmem:[%s10173_s26] sm:$0xff]  ;;  %v6858_v59 = vld [vmem:[%s10161_s13 + $0x18] sm:$0xff] }
 0xc7e   :  { %v6878_v48 = vld [vmem:[%s10161_s13 + $0xb8] sm:$0xff] }
 0xc7f   :  { %7858 = vmatmul.mubr.msk.f32.vlgmr.msra.gmra.mrb[66].mxu1 %vm1524_vm4, %v6021_v45  ;;  %v6775_v44 = vcombine.low %v334_v47, %v334_v47  ;;  %v6855_v45 = vld [vmem:[%s10161_s13] sm:$0xff] }
 0xc80   :  { %v8297_v53 = vpop.eup %8296  ;;  %7866 = vmatpush3.msk.msra.mxu1 %vm1528_vm2, %v6336_v30  ;;  %7867 = vmatprep.mubr.msk.f32.mxu1 %vm8317_vm0, %v8315_v3  ;;  %v6875_v47 = vld [vmem:[%s10161_s13 + $0xa0] sm:$0xff] }
 0xc81   :  { %v6023_v31 = vmul.f32 %v8297_v53, %v8289_v18  ;;  %7875 = vmatprep.subr.mxu1 %v8315_v3  ;;  %v6782_v24 = vrot.slane %v6775_v44, %v8904_v12  ;;  %v7285_v18 = vld [vmem:[%s10160_s6] ss:$0 sm:$0xff]  ;;  %v8088_v53 = vpack.c.bf16 %v6858_v59, %v6856_v62  ;;  %v8108_v44 = vpack.c.bf16 %v6878_v48, %v6876_v46  ;;  %v6885_v59 = vld [vmem:[%s10161_s13 + $0xf0] sm:$0xff] }
 0xc82   :  { %v6331_v54 = vpop.f32.mrb[64].mxu0  ;;  %v6883_v62 = vld [vmem:[%s10161_s13 + $0xe0] sm:$0xff] }
 0xc83   :  { %v7864_v52 = vpop.f32.mrb[65].mxu0  ;;  %7868 = vmatmul.mubr.msk.f32.vlgmr.msra.gmra.mrb[68].mxu1 %vm1524_vm4, %v6023_v31  ;;  %v6857_v31 = vld [vmem:[%s10161_s13 + $0x10] sm:$0xff]  ;;  %8089 = vmatprep.subr.bf16.mxu0 %v8088_v53  ;;  %v7028_v53 = vld [vmem:[%s10162_s15 + $0x80] sm:$0xff] }
 0xc84   :  { %v8299_v50 = vpop.eup %8298  ;;  %7876 = vmatpush3.msk.msra.mxu1 %vm1528_vm2, %v6490_v32  ;;  %7877 = vmatprep.mubr.msk.f32.mxu1 %vm8317_vm0, %v8315_v3  ;;  %v6862_v32 = vld [vmem:[%s10161_s13 + $0x38] sm:$0xff]  ;;  %v8090_v52 = vpack.c.bf16 %v6857_v31, %v6855_v45  ;;  %v8118_v45 = vpack.c.bf16 %v6885_v59, %v6883_v62  ;;  %v7029_v31 = vld [vmem:[%s10162_s15 + $0x88] sm:$0xff]  ;;  %v7018_v62 = vld [vmem:[%s10162_s15 + $0x30] sm:$0xff] }
 0xc85   :  { %v6025_v1 = vmul.f32 %v8299_v50, %v8291_v29  ;;  %8081 = vmatprep.subr.bf16.mxu1 %v8080_v27  ;;  %v6783_v29 = vcombine.low %v6782_v24, %v6782_v24  ;;  %v6877_v24 = vld [vmem:[%s10161_s13 + $0xb0] sm:$0xff]  ;;  %v7019_v59 = vld [vmem:[%s10162_s15 + $0x38] sm:$0xff] }
 0xc86   :  { %v6485_v28 = vpop.f32.mrb[66].mxu0  ;;  %8091 = vmatpush1.bf16.msra.mxu0 %v8090_v52  ;;  %v7013_v52 = vld [vmem:[%s10162_s15 + $0x8] sm:$0xff] }
 0xc87   :  { %v7874_v60 = vpop.f32.mrb[67].mxu0  ;;  %7878 = vmatmul.mubr.msk.f32.vlgmr.msra.gmra.mrb[70].mxu1 %vm1524_vm4, %v6025_v1  ;;  %v6859_v1 = vld [vmem:[%s10161_s13 + $0x20] sm:$0xff] }
 0xc88   :  { %8083 = vmatpush3.bf16.msra.mxu1 %v8080_v27 }
 0xc89   :  { %8085 = vmatprep.subr.bf16.mxu1 %v8084_v13 }
 0xc8a   :  { %v6639_v6 = vpop.f32.mrb[68].mxu0 }
 0xc8b   :  { %v7884_v21 = vpop.f32.mrb[69].mxu0 }
 0xc8c   :  { %8087 = vmatpush3.bf16.msra.mxu1 %v8084_v13  ;;  %v8096_v13 = vpack.c.bf16 %v6866_v42, %v6864_v19 }
 0xcc1   :  { %v6100_v63 = vpop.f32.mrb[64].mxu1 }
 0xcc2   :  { %v6651_v4 = vcombine.low %v6100_v63, %v6177_v37  ;;  %v7849_v11 = vpop.f32.mrb[65].mxu1 }
 0xcc4   :  { %v6659_v51 = vrot.slane %v6651_v4, %v8904_v12 }
 0xd52   :  { %v6254_v17 = vpop.f32.mrb[66].mxu1 }
 0xd53   :  { %v6652_v5 = vcombine.low %v6254_v17, %v6331_v54  ;;  %v7859_v14 = vpop.f32.mrb[67].mxu1  ;;  %v6860_v54 = vld [vmem:[%s10161_s13 + $0x28] sm:$0xff]  ;;  %v6863_v17 = vld [vmem:[%s10161_s13 + $0x40] sm:$0xff] }
 0xd54   :  { %v8092_v50 = vpack.c.bf16 %v6862_v32, %v6860_v54  ;;  %v7012_v54 = vld [vmem:[%s10162_s15] sm:$0xff]  ;;  %v8120_v32 = vpack.c.bf16 %v7029_v31, %v7028_v53  ;;  %v7037_v53 = vld [vmem:[%s10162_s15 + $0xc8] sm:$0xff]  ;;  %v8134_v31 = vpack.c.bf16 %v7019_v59, %v7018_v62 }
 0xd55   :  { %v6666_v20 = vrot.slane %v6652_v5, %v8904_v12  ;;  %v6865_v5 = vld [vmem:[%s10161_s13 + $0x50] sm:$0xff] }
 0xd56   :  { %v6408_v25 = vpop.f32.mrb[68].mxu1  ;;  %8093 = vmatprep.subr.bf16.mxu0 %v8092_v50  ;;  %v8098_v14 = vpack.c.bf16 %v6865_v5, %v6863_v17  ;;  %v8122_v50 = vpack.c.bf16 %v7013_v52, %v7012_v54  ;;  %8121 = vmatprep.subr.bf16.mxu1 %v8120_v32  ;;  %v7020_v32 = vld [vmem:[%s10162_s15 + $0x40] sm:$0xff]  ;;  %v7021_v52 = vld [vmem:[%s10162_s15 + $0x48] sm:$0xff] }
 0xd57   :  { %v6667_v16 = vcombine.low %v6659_v51, %v6666_v20  ;;  %v6668_v22 = vcombine.low %v6408_v25, %v6485_v28  ;;  %v7869_v39 = vpop.f32.mrb[69].mxu1  ;;  %v6861_v28 = vld [vmem:[%s10161_s13 + $0x30] sm:$0xff]  ;;  %v6868_v51 = vld [vmem:[%s10161_s13 + $0x68] sm:$0xff]  ;;  %v6870_v20 = vld [vmem:[%s10161_s13 + $0x78] sm:$0xff] }
 0xd58   :  { %v8094_v60 = vpack.c.bf16 %v6861_v28, %v6859_v1  ;;  %v8100_v25 = vpack.c.bf16 %v6870_v20, %v6868_v51  ;;  %v180_v1 = vsub.s32 3, %v8890_v0  ;;  %v7286_v51 = vld [vmem:[%s10163_s9] ss:$0 sm:$0xff] }
 0xd59   :  { %7893 = vmatprep.mubr.msk.f32.mxu1 %vm834_vm1, %v6667_v16  ;;  %v6676_v61 = vrot.slane %v6668_v22, %v8904_v12  ;;  %v6867_v16 = vld [vmem:[%s10161_s13 + $0x60] sm:$0xff]  ;;  %v6869_v22 = vld [vmem:[%s10161_s13 + $0x70] sm:$0xff] }
 0xd5a   :  { %v6562_v8 = vpop.f32.mrb[70].mxu1  ;;  %8095 = vmatpush1.bf16.msra.mxu0 %v8094_v60  ;;  %v8102_v39 = vpack.c.bf16 %v6869_v22, %v6867_v16  ;;  %v7287_v16 = vld [vmem:[%s10164_s10] ss:$0 sm:$0xff] }
 0xd5b   :  { %v6669_v10 = vcombine.low %v6562_v8, %v6639_v6  ;;  %v7879_v7 = vpop.f32.mrb[71].mxu1  ;;  %8097 = vmatprep.subr.bf16.mxu0 %v8096_v13  ;;  %v6872_v8 = vld [vmem:[%s10161_s13 + $0x88] sm:$0xff] }
 0xd5d   :  { %v6683_v35 = vrot.slane %v6669_v10, %v8904_v12  ;;  %v6874_v10 = vld [vmem:[%s10161_s13 + $0x98] sm:$0xff] }
 0xd5e   :  { %8099 = vmatpush1.bf16.msra.mxu0 %v8098_v14  ;;  %v8104_v7 = vpack.c.bf16 %v6874_v10, %v6872_v8 }
 0xd5f   :  { %v6684_v26 = vcombine.low %v6676_v61, %v6683_v35  ;;  %8101 = vmatprep.subr.bf16.mxu0 %v8100_v25  ;;  %v6871_v61 = vld [vmem:[%s10161_s13 + $0x80] sm:$0xff]  ;;  %v6873_v35 = vld [vmem:[%s10161_s13 + $0x90] sm:$0xff] }
 0xd61   :  { %7894 = vmatmul.mubr.msk.f32.vlgmr.msra.gmra.mrb[44].mxu1 %vm834_vm1, %v6684_v26  ;;  %v8106_v26 = vpack.c.bf16 %v6873_v35, %v6871_v61 }
 0xd62   :  { %8103 = vmatpush1.bf16.msra.mxu0 %v8102_v39  ;;  %8123 = vmatpush3.bf16.msra.mxu1 %v8122_v50  ;;  %v7038_v50 = vld [vmem:[%s10162_s15 + $0xd0] sm:$0xff] }
 0xd63   :  { %8105 = vmatprep.subr.bf16.mxu0 %v8104_v7 }
 0xd66   :  { %8107 = vmatpush1.bf16.msra.mxu0 %v8106_v26 }
 0xd67   :  { %8109 = vmatprep.subr.bf16.mxu0 %v8108_v44  ;;  %v7014_v44 = vld [vmem:[%s10162_s15 + $0x10] sm:$0xff] }
 0xe34   :  { %v7895_v38 = vpop.f32.mrb[44].mxu1 }
 0xe35   :  { %v6773_v56 = vadd.f32 %v7895_v38, %v7285_v18  ;;  %v6755_v40 = vpop.f32.mrb[45].mxu1  ;;  %v6882_v38 = vld [vmem:[%s10161_s13 + $0xd8] sm:$0xff] }
 0xe36   :  { %v6772_v43 = vadd.f32 %v7285_v18, %v6755_v40  ;;  %v6880_v18 = vld [vmem:[%s10161_s13 + $0xc8] sm:$0xff]  ;;  %v6879_v40 = vld [vmem:[%s10161_s13 + $0xc0] sm:$0xff] }
 0xe37   :  { %v6786_v30 = vmul.f32 %v6783_v29, %v6773_v56  ;;  %v8112_v56 = vpack.c.bf16 %v6882_v38, %v6880_v18  ;;  %v7015_v18 = vld [vmem:[%s10162_s15 + $0x18] sm:$0xff]  ;;  %v7033_v38 = vld [vmem:[%s10162_s15 + $0xa8] sm:$0xff] }
 0xe38   :  { %v6785_v49 = vmul.f32 %v6783_v29, %v6772_v43  ;;  %v8110_v29 = vpack.c.bf16 %v6877_v24, %v6875_v47  ;;  %v6881_v43 = vld [vmem:[%s10161_s13 + $0xd0] sm:$0xff] }
 0xe39   :  { %v9902_v23 = vadd.f32 %v8313_v41, %v6786_v30  ;;  %v6884_v30 = vld [vmem:[%s10161_s13 + $0xe8] sm:$0xff]  ;;  %v8114_v41 = vpack.c.bf16 %v6881_v43, %v6879_v40  ;;  %v7030_v47 = vld [vmem:[%s10162_s15 + $0x90] sm:$0xff]  ;;  %v7016_v40 = vld [vmem:[%s10162_s15 + $0x20] sm:$0xff] }
 0xe3a   :  { %v9907_v37 = vadd.f32 %v8314_v55, %v6785_v49  ;;  %v6886_v49 = vld [vmem:[%s10161_s13 + $0xf8] sm:$0xff]  ;;  %8111 = vmatpush1.bf16.msra.mxu0 %v8110_v29  ;;  %v8126_v29 = vpack.c.bf16 %v7015_v18, %v7014_v44  ;;  %v7017_v43 = vld [vmem:[%s10162_s15 + $0x28] sm:$0xff] }
 0xe3b   :  { %6793 = vadd.xlane.f32.xlu1 %v9902_v23  ;;  %8113 = vmatprep.subr.bf16.mxu0 %v8112_v56  ;;  %v8116_v55 = vpack.c.bf16 %v6886_v49, %v6884_v30  ;;  %v7034_v30 = vld [vmem:[%s10162_s15 + $0xb0] sm:$0xff]  ;;  %v7035_v49 = vld [vmem:[%s10162_s15 + $0xb8] sm:$0xff] }
 0xe3c   :  { %6791 = vadd.xlane.f32.xlu0 %v9907_v37 }
 0xe3e   :  { %8115 = vmatpush1.bf16.msra.mxu0 %v8114_v41  ;;  %v8130_v41 = vpack.c.bf16 %v7017_v43, %v7016_v40 }
 0xe3f   :  { %8117 = vmatprep.subr.bf16.mxu0 %v8116_v55  ;;  %v8132_v55 = vpack.c.bf16 %v7035_v49, %v7034_v30 }
 0xe42   :  { %8119 = vmatpush1.bf16.msra.mxu0 %v8118_v45  ;;  %v7036_v45 = vld [vmem:[%s10162_s15 + $0xc0] sm:$0xff] }
 0xe43   :  { %v8136_v54 = vpack.c.bf16 %v7037_v53, %v7036_v45 }
 0xec8   :  { %v6794_v6 = vpop.xlane.xlu1 %6793 }
 0xec9   :  { %v6792_v21 = vpop.xlane.xlu0 %6791  ;;  %v6796_v63 = vmul.f32 0.0078125, %v6794_v6  ;;  %v184_v6 = vsub.s32 4, %v8890_v0 }
 0xeca   :  { %v6795_v4 = vmul.f32 0.0078125, %v6792_v21 }
 0xecb   :  { %v9939_v9 = vsub.f32 %v9902_v23, %v6796_v63  ;;  %v181_v63 = vrot.slane %v9889_v36, %v180_v1  ;;  %v7039_v1 = vld [vmem:[%s10162_s15 + $0xd8] sm:$0xff] }
 0xecc   :  { %v9936_v11 = vsub.f32 %v9907_v37, %v6795_v4 }
 0xecd   :  { %v6800_v27 = vmul.f32 %v9939_v9, %v9939_v9  ;;  %v336_v42 = vadd.f32 %v8888_v57, %v181_v63  ;;  %v7040_v63 = vld [vmem:[%s10162_s15 + $0xe0] sm:$0xff] }
 0xece   :  { %v6799_v15 = vmul.f32 %v9936_v11, %v9936_v11 }
 0xecf   :  { %v6830_v17 = vcombine.low %v336_v42, %v336_v42  ;;  %v7025_v42 = vld [vmem:[%s10162_s15 + $0x68] sm:$0xff] }
 0xed0   :  { %6801 = vadd.xlane.f32.xlu0 %v6799_v15 }
 0xed1   :  { %v6837_v20 = vrot.slane %v6830_v17, %v8904_v12  ;;  %v7043_v17 = vld [vmem:[%s10162_s15 + $0xf8] sm:$0xff] }
 0xed4   :  { %6803 = vadd.xlane.f32.xlu0 %v6800_v27  ;;  %v185_v27 = vrot.slane %v9889_v36, %v184_v6  ;;  %v7022_v6 = vld [vmem:[%s10162_s15 + $0x50] sm:$0xff] }
 0xed6   :  { %v405_v13 = vadd.f32 %v8917_v33, %v185_v27  ;;  %v6838_v33 = vcombine.low %v6837_v20, %v6837_v20  ;;  %v7027_v20 = vld [vmem:[%s10162_s15 + $0x78] sm:$0xff] }
 0xed8   :  { %v6843_v5 = vcombine.low %v405_v13, %v405_v13  ;;  %v7042_v13 = vld [vmem:[%s10162_s15 + $0xf0] sm:$0xff] }
 0xeda   :  { %v6850_v57 = vrot.slane %v6843_v5, %v8904_v12 }
 0xedc   :  { %v6851_v7 = vcombine.low %v6850_v57, %v6850_v57 }
 0xf5d   :  { %v6802_v28 = vpop.xlane.xlu0 %6801 }
 0xf5e   :  { %v6805_v60 = vmul.f32 0.0078125, %v6802_v28  ;;  %v8138_v28 = vpack.c.bf16 %v7021_v52, %v7020_v32 }
 0xf60   :  { %v6807_v21 = vadd.f32 1e-05, %v6805_v60  ;;  %v8140_v60 = vpack.c.bf16 %v7039_v1, %v7038_v50 }
 0xf61   :  { %v6804_v4 = vpop.xlane.xlu0 %6803 }
 0xf62   :  { %8300 = vrsqrt.f32 %v6807_v21  ;;  %v6806_v15 = vmul.f32 0.0078125, %v6804_v4  ;;  %v7023_v21 = vld [vmem:[%s10162_s15 + $0x58] sm:$0xff]  ;;  %v7041_v4 = vld [vmem:[%s10162_s15 + $0xe8] sm:$0xff] }
 0xf63   :  { %v8144_v27 = vpack.c.bf16 %v7041_v4, %v7040_v63 }
 0xf64   :  { %v6808_v19 = vadd.f32 1e-05, %v6806_v15  ;;  %v8142_v15 = vpack.c.bf16 %v7023_v21, %v7022_v6 }
 0xf66   :  { %8302 = vrsqrt.f32 %v6808_v19  ;;  %v7024_v19 = vld [vmem:[%s10162_s15 + $0x60] sm:$0xff] }
 0xf67   :  { %v8146_v5 = vpack.c.bf16 %v7025_v42, %v7024_v19 }
 0xf6c   :  { %v8301_v14 = vpop.eup %8300 }
 0xf6d   :  { %v6811_v25 = vmul.f32 %v8301_v14, %v9936_v11  ;;  %v8148_v14 = vpack.c.bf16 %v7043_v17, %v7042_v13 }
 0xf6f   :  { %v6819_v22 = vmul.f32 %v7286_v51, %v6811_v25 }
 0xf70   :  { %v8303_v39 = vpop.eup %8302 }
 0xf71   :  { %v6812_v8 = vmul.f32 %v8303_v39, %v9939_v9  ;;  %v6827_v10 = vadd.f32 %v7287_v16, %v6819_v22  ;;  %v7031_v9 = vld [vmem:[%s10162_s15 + $0x98] sm:$0xff] }
 0xf72   :  { %v8124_v24 = vpack.c.bf16 %v7031_v9, %v7030_v47 }
 0xf73   :  { %v6840_v61 = vmul.f32 %v6838_v33, %v6827_v10  ;;  %v6820_v35 = vmul.f32 %v7286_v51, %v6812_v8  ;;  %v7026_v51 = vld [vmem:[%s10162_s15 + $0x70] sm:$0xff] }
 0xf74   :  { %8125 = vmatprep.subr.bf16.mxu1 %v8124_v24  ;;  %v8150_v25 = vpack.c.bf16 %v7027_v20, %v7026_v51 }
 0xf75   :  { %v6853_v26 = vadd.f32 %v6851_v7, %v6840_v61  ;;  %v6828_v46 = vadd.f32 %v7287_v16, %v6820_v35  ;;  %8127 = vmatpush3.bf16.msra.mxu1 %v8126_v29  ;;  %v6887_v16 = vld [vmem:[%s10165_s14] sm:$0x3] }
 0xf76   :  { %v6892_v57 = vrot.slane %v6887_v16, %v8893_v58  ;;  %v6896_v22 = vrot.slane %v6887_v16, %v8900_v2 }
 0xf77   :  { %6964 = vmatmul.mubr.f32.vlgmr.msra.gmra.mrb[70].mxu0 %v6853_v26  ;;  %v6841_v48 = vmul.f32 %v6838_v33, %v6828_v46 }
 0xf78   :  { %6969 = vmatprep.mubr.f32.mxu0 %v8315_v3  ;;  %v7032_v3 = vld [vmem:[%s10162_s15 + $0xa0] sm:$0xff] }
 0xf79   :  { %v6854_v11 = vadd.f32 %v6851_v7, %v6841_v48  ;;  %v8128_v56 = vpack.c.bf16 %v7033_v38, %v7032_v3 }
 0xf7b   :  { %6970 = vmatmul.mubr.f32.gmra.mrb[72].mxu0 %v6854_v11  ;;  %8129 = vmatprep.subr.bf16.mxu1 %v8128_v56 }
 0xf7c   :  { %8131 = vmatpush3.bf16.msra.mxu1 %v8130_v41 }
 0xf7d   :  { %8133 = vmatprep.subr.bf16.mxu1 %v8132_v55 }
 0xf80   :  { %8135 = vmatpush3.bf16.msra.mxu1 %v8134_v31 }
 0xf81   :  { %8137 = vmatprep.subr.bf16.mxu1 %v8136_v54 }
 0xf84   :  { %8139 = vmatpush3.bf16.msra.mxu1 %v8138_v28 }
 0xf85   :  { %8141 = vmatprep.subr.bf16.mxu1 %v8140_v60 }
 0xf88   :  { %8143 = vmatpush3.bf16.msra.mxu1 %v8142_v15  ;;  %v188_v15 = vsub.s32 5, %v8890_v0 }
 0xf89   :  { %8145 = vmatprep.subr.bf16.mxu1 %v8144_v27 }
 0xf8a   :  { %v189_v27 = vrot.slane %v9889_v36, %v188_v15 }
 0xf8c   :  { %8147 = vmatpush3.bf16.msra.mxu1 %v8146_v5  ;;  %v407_v19 = vadd.f32 %v8919_v34, %v189_v27  ;;  %v7288_v5 = vld [vmem:[%s10166_s16] ss:$0 sm:$0xff] }
 0xf8d   :  { %8149 = vmatprep.subr.bf16.mxu1 %v8148_v14 }
 0xf8e   :  { %v7127_v42 = vcombine.low %v407_v19, %v407_v19 }
 0xf90   :  { %8151 = vmatpush3.bf16.msra.mxu1 %v8150_v25  ;;  %v7134_v13 = vrot.slane %v7127_v42, %v8904_v12 }
 0xf92   :  { %v7135_v20 = vcombine.low %v7134_v13, %v7134_v13 }
0x104a   :  { %v6965_v39 = vpop.f32.mrb[70].mxu0 }
0x104b   :  { %v6966_v33 = vadd.f32 %v6965_v39, %v6892_v57  ;;  %v6967_v8 = vpop.f32.mrb[71].mxu0 }
0x104c   :  { %v6968_v10 = vadd.f32 %v6967_v8, %v6896_v22 }
0x104d   :  { %v6980_v7 = vmul.f32 0.044715, %v6966_v33  ;;  %v6976_v54 = vmul.f32 0.5, %v6966_v33 }
0x104e   :  { %v6981_v61 = vmul.f32 0.044715, %v6968_v10  ;;  %v6971_v35 = vpop.f32.mrb[72].mxu0  ;;  %v6977_v53 = vmul.f32 0.5, %v6968_v10 }
0x104f   :  { %v6984_v26 = vmul.f32 %v6980_v7, %v6966_v33  ;;  %v6972_v46 = vadd.f32 %v6971_v35, %v6892_v57  ;;  %v6973_v48 = vpop.f32.mrb[73].mxu0 }
0x1050   :  { %v6985_v11 = vmul.f32 %v6981_v61, %v6968_v10  ;;  %v6974_v47 = vadd.f32 %v6973_v48, %v6896_v22 }
0x1051   :  { %v6988_v9 = vmul.f32 %v6984_v26, %v6966_v33  ;;  %v6982_v44 = vmul.f32 0.044715, %v6972_v46  ;;  %v6978_v21 = vmul.f32 0.5, %v6972_v46 }
0x1052   :  { %v6983_v24 = vmul.f32 0.044715, %v6974_v47  ;;  %v6989_v18 = vmul.f32 %v6985_v11, %v6968_v10  ;;  %v6979_v60 = vmul.f32 0.5, %v6974_v47 }
0x1053   :  { %v6992_v3 = vadd.f32 %v6988_v9, %v6966_v33  ;;  %v6986_v58 = vmul.f32 %v6982_v44, %v6972_v46 }
0x1054   :  { %v6987_v38 = vmul.f32 %v6983_v24, %v6974_v47  ;;  %v6993_v2 = vadd.f32 %v6989_v18, %v6968_v10 }
0x1055   :  { %v6996_v29 = vmul.f32 0.7978846, %v6992_v3  ;;  %v6990_v56 = vmul.f32 %v6986_v58, %v6972_v46 }
0x1056   :  { %v6997_v40 = vmul.f32 0.7978846, %v6993_v2  ;;  %v6991_v43 = vmul.f32 %v6987_v38, %v6974_v47 }
0x1057   :  { %8304 = vtanh.f32 %v6996_v29  ;;  %v6994_v30 = vadd.f32 %v6990_v56, %v6972_v46 }
0x1058   :  { %8306 = vtanh.f32 %v6997_v40  ;;  %v6995_v49 = vadd.f32 %v6991_v43, %v6974_v47 }
0x1059   :  { %v6998_v41 = vmul.f32 0.7978846, %v6994_v30 }
0x105a   :  { %v6999_v55 = vmul.f32 0.7978846, %v6995_v49 }
0x105b   :  { %8308 = vtanh.f32 %v6998_v41 }
0x105c   :  { %8310 = vtanh.f32 %v6999_v55 }
0x1061   :  { %v8305_v62 = vpop.eup %8304 }
0x1062   :  { %v8307_v59 = vpop.eup %8306  ;;  %v7004_v45 = vadd.f32 1.0, %v8305_v62 }
0x1063   :  { %v7005_v31 = vadd.f32 1.0, %v8307_v59 }
0x1064   :  { %v7008_v1 = vmul.f32 %v7004_v45, %v6976_v54 }
0x1065   :  { %v8309_v32 = vpop.eup %8308  ;;  %v7009_v52 = vmul.f32 %v7005_v31, %v6977_v53 }
0x1066   :  { %v8311_v50 = vpop.eup %8310  ;;  %v7006_v28 = vadd.f32 1.0, %v8309_v32 }
0x1067   :  { %7115 = vmatprep.mubr.f32.mxu1 %v7009_v52  ;;  %v7007_v6 = vadd.f32 1.0, %v8311_v50 }
0x1068   :  { %7116 = vmatmul.mubr.f32.vlgmr.msra.gmra.mrb[72].mxu1 %v7008_v1  ;;  %v7010_v4 = vmul.f32 %v7006_v28, %v6978_v21 }
0x1069   :  { %v7011_v63 = vmul.f32 %v7007_v6, %v6979_v60 }
0x106b   :  { %7120 = vmatprep.mubr.f32.mxu1 %v7011_v63 }
0x106c   :  { %7121 = vmatmul.mubr.f32.gmra.mrb[74].mxu1 %v7010_v4 }
0x113b   :  { %v7491_v17 = vpop.f32.mrb[72].mxu1 }
0x113c   :  { %v7492_v14 = vpop.f32.mrb[73].mxu1 }
0x113d   :  { %v7493_v51 = vadd.f32 %v7492_v14, %v7491_v17 }
0x113f   :  { %v7118_v25 = vadd.f32 %v7493_v51, %v7288_v5  ;;  %v7494_v16 = vpop.f32.mrb[74].mxu1 }
0x1140   :  { %v7495_v57 = vpop.f32.mrb[75].mxu1 }
0x1141   :  { %v7137_v22 = vmul.f32 %v7135_v20, %v7118_v25  ;;  %v7496_v0 = vadd.f32 %v7495_v57, %v7494_v16 }
0x1143   :  { %v7139_v36 = vadd.f32 %v7137_v22, %v9907_v37  ;;  %v7123_v39 = vadd.f32 %v7496_v0, %v7288_v5 }
0x1145   :  { %7141 = vst [vmem:[%s10167_s17] sm:$0xff] %v7139_v36  ;;  %v7138_v12 = vmul.f32 %v7135_v20, %v7123_v39 }
0x1147   :  { %v7140_v34 = vadd.f32 %v7138_v12, %v9902_v23 }
0x1149   :  { %7142 = vst [vmem:[%s10167_s17 + $0x8] sm:$0xff] %v7140_v34 }

</bundles_post_ra>
